<compile_context>
chip_gen: v7x
topology: tpu7x:2x2x1
jax: 0.10.0
libtpu: 0.0.40
codegen_flags: <defaults>
</compile_context>

<pallas_src>
import functools

import jax
import jax.numpy as jnp
from jax.experimental import pallas as pl
from jax.experimental.pallas import tpu as pltpu


def _phase(v, r, c):
    """Row-parity r / col-parity c sub-lattice of an even-sized (2U,2V,C) value,
    using only lane-preserving reshapes + static indexing (no strided access)."""
    U2, V2, C = v.shape
    v = v.reshape(U2 // 2, 2, V2, C)[:, r]            # rows 2u+r -> (U, 2V, C)
    v = v.reshape(U2 // 2, V2 // 2, 2, C)[:, :, c]    # cols 2v+c -> (U, V, C)
    return v


def _leaky(x):
    # LeakyReLU(0.2): max(x, 0.2*x) is exact for both signs.
    return jnp.maximum(x, 0.2 * x)


def _disc_kernel(p1_ref, w1_ref, w2_ref, b2_ref, w3_ref, b3_ref, w4_ref,
                 o_ref, q2_ref, y2e_ref, q3_ref, *, H1, H2, H3, K2, K3):
    C1 = w1_ref.shape[-1]          # 64
    C2 = w2_ref.shape[-1]          # 128
    P2 = q2_ref.shape[-2]          # H1//2 + 1
    E2 = y2e_ref.shape[0]          # H2 + 1 (even)

    # ---- layer 1: Conv2d(2,64,4,2,1,bias=False) + LeakyReLU
    # wrapper-provided im2col patches -> one matmul (contraction depth 32).
    y1 = jnp.dot(p1_ref[0], w1_ref[...], preferred_element_type=jnp.float32)
    y1 = _leaky(y1).reshape(H1, H1, C1)                       # (14,14,64) f32

    # scatter pad(y1, 1) into its 4 stride-2 phase planes (VMEM resident).
    q2_ref[...] = jnp.zeros_like(q2_ref)
    for e in range(2):
        for f in range(2):
            q2_ref[2 * e + f, 1 - e:P2 - e, 1 - f:P2 - f, :] = (
                _phase(y1, 1 - e, 1 - f))

    # ---- layer 2: Conv2d(64,128,4,2,1,bias=False) + BN(folded) + LeakyReLU
    acc2 = None
    for kh in range(K2):
        for kw in range(K2):
            patch = q2_ref[2 * (kh % 2) + (kw % 2),
                           kh // 2:kh // 2 + H2, kw // 2:kw // 2 + H2, :]
            patch = patch.reshape(H2 * H2, C1).astype(jnp.bfloat16)
            t = jnp.dot(patch, w2_ref[kh * K2 + kw],
                        preferred_element_type=jnp.float32)
            acc2 = t if acc2 is None else acc2 + t
    h2 = _leaky(acc2 + b2_ref[...])                            # (49,128) f32

    # zero-extend to even spatial size, then build layer-3 phase planes.
    y2e_ref[...] = jnp.zeros_like(y2e_ref)
    y2e_ref[0:H2, 0:H2, :] = h2.reshape(H2, H2, C2)
    v2 = y2e_ref[...]
    q3_ref[...] = jnp.zeros_like(q3_ref)
    for e in range(2):
        for f in range(2):
            q3_ref[2 * e + f, 1 - e:1 - e + E2 // 2, 1 - f:1 - f + E2 // 2, :] = (
                _phase(v2, 1 - e, 1 - f))

    # ---- layer 3: Conv2d(128,256,3,2,1,bias=False) + BN(folded) + LeakyReLU
    acc3 = None
    for kh in range(K3):
        for kw in range(K3):
            patch = q3_ref[2 * (kh % 2) + (kw % 2),
                           kh // 2:kh // 2 + H3, kw // 2:kw // 2 + H3, :]
            patch = patch.reshape(H3 * H3, C2).astype(jnp.bfloat16)
            t = jnp.dot(patch, w3_ref[kh * K3 + kw],
                        preferred_element_type=jnp.float32)
            acc3 = t if acc3 is None else acc3 + t
    h3 = _leaky(acc3 + b3_ref[...])                            # (16,256) f32

    # ---- layer 4: Conv2d(256,1,4,1,0,bias=False) + Sigmoid  (1x1 output)
    s = jnp.sum(h3 * w4_ref[...], axis=1, keepdims=True)       # (16,1)
    s = jnp.sum(s, axis=0, keepdims=True)                      # (1,1)
    o_ref[0] = 1.0 / (1.0 + jnp.exp(-s))


def conditional_cnn_discriminator_forward(x, labels, params):
    """x: (N,1,H,W) f32 NCHW, labels: (N,) int32 -> (N,1,1,1) f32 (sigmoid)."""
    N, Cx, H, W = x.shape
    assert Cx == 1 and H == W, "expects single-channel square images"
    assert params['embed'].shape[1] == H * W, "embedding_size must equal H*W"
    # layer geometry (PyTorch conv output-size formulas for the default config)
    H1 = (H + 2 - 4) // 2 + 1          # 14
    H2 = (H1 + 2 - 4) // 2 + 1         # 7
    H3 = (H2 + 2 - 3) // 2 + 1         # 4
    assert H1 % 2 == 0 and H2 % 2 == 1 and H3 == 4, "unsupported spatial size"
    P2 = H2 + 1                        # layer-2 phase-plane size (8)
    E2 = H2 + 1                        # even-extended layer-2 output (8)
    P3 = H3 + 1                        # layer-3 phase-plane size (5)
    C1 = params['w1'].shape[-1]        # 64
    C2 = params['w2'].shape[-1]        # 128

    # ---- tiny XLA prologue (single fused op before the one pallas_call):
    # embedding lookup, channel concat, NCHW->NHWC, pad, im2col of the
    # 2-channel input for the first stride-2 conv.
    emb = params['embed'][labels].reshape(N, 1, H, W)
    x2 = jnp.concatenate([x, emb], axis=1)                     # (N,2,H,W)
    x2 = jnp.transpose(x2, (0, 2, 3, 1))                       # (N,H,W,2)
    xp = jnp.pad(x2, ((0, 0), (1, 1), (1, 1), (0, 0)))         # (N,H+2,W+2,2)
    taps = [xp[:, kh:kh + 2 * H1:2, kw:kw + 2 * H1:2, :]
            for kh in range(4) for kw in range(4)]             # 16 x (N,H1,H1,2)
    p1 = jnp.concatenate(taps, axis=-1).reshape(N, H1 * H1, 32)
    p1 = p1.astype(jnp.bfloat16)

    kernel = functools.partial(_disc_kernel, H1=H1, H2=H2, H3=H3, K2=4, K3=3)
    out = pl.pallas_call(
        kernel,
        out_shape=jax.ShapeDtypeStruct((N, 1, 1), jnp.float32),
        grid=(N,),
        in_specs=[
            pl.BlockSpec((1,) + p1.shape[1:], lambda n: (n, 0, 0)),
            pl.BlockSpec(params['w1'].shape, lambda n: (0, 0)),
            pl.BlockSpec(params['w2'].shape, lambda n: (0, 0, 0)),
            pl.BlockSpec(params['b2'].shape, lambda n: (0, 0)),
            pl.BlockSpec(params['w3'].shape, lambda n: (0, 0, 0)),
            pl.BlockSpec(params['b3'].shape, lambda n: (0, 0)),
            pl.BlockSpec(params['w4'].shape, lambda n: (0, 0)),
        ],
        out_specs=pl.BlockSpec((1, 1, 1), lambda n: (n, 0, 0)),
        scratch_shapes=[
            pltpu.VMEM((4, P2, P2, C1), jnp.float32),   # layer-2 input phases
            pltpu.VMEM((E2, E2, C2), jnp.float32),      # even-extended layer-2 out
            pltpu.VMEM((4, P3, P3, C2), jnp.float32),   # layer-3 input phases
        ],
        compiler_params=pltpu.CompilerParams(
            dimension_semantics=("parallel",)),
    )(p1, params['w1'], params['w2'], params['b2'],
      params['w3'], params['b3'], params['w4'])
    return out.reshape(N, 1, 1, 1)


def init_params(key, n_classes=10, embedding_size=28 * 28):
    """Synthetic parameters matching the PyTorch init (weights_init: conv ~
    N(0,0.02); BN gamma ~ N(1,0.02), beta=0, fresh running stats; Embedding ~
    N(0,1)), pre-packed for the fused kernel (BN folded, bf16 MXU weights)."""
    ks = jax.random.split(key, 7)
    std = 0.02

    w1_t = std * jax.random.normal(ks[0], (64, 2, 4, 4), jnp.float32)
    w2_t = std * jax.random.normal(ks[1], (128, 64, 4, 4), jnp.float32)
    w3_t = std * jax.random.normal(ks[2], (256, 128, 3, 3), jnp.float32)
    w4_t = std * jax.random.normal(ks[3], (1, 256, 4, 4), jnp.float32)

    g2 = 1.0 + std * jax.random.normal(ks[4], (128,), jnp.float32)
    beta2 = jnp.zeros((128,), jnp.float32)
    m2 = jnp.zeros((128,), jnp.float32)
    v2 = jnp.ones((128,), jnp.float32)
    g3 = 1.0 + std * jax.random.normal(ks[5], (256,), jnp.float32)
    beta3 = jnp.zeros((256,), jnp.float32)
    m3 = jnp.zeros((256,), jnp.float32)
    v3 = jnp.ones((256,), jnp.float32)

    embed = jax.random.normal(ks[6], (n_classes, embedding_size), jnp.float32)

    eps = 1e-5
    s2 = g2 / jnp.sqrt(v2 + eps)
    s3 = g3 / jnp.sqrt(v3 + eps)

    p = {}
    # Conv1: (Cout,Cin,kh,kw) -> rows ordered (kh,kw,ci) to match im2col packing
    p['w1'] = jnp.transpose(w1_t, (2, 3, 1, 0)).reshape(32, 64).astype(jnp.bfloat16)
    # Conv2/Conv3: per-tap (Cin,Cout) weights with eval-mode BN scale folded in
    p['w2'] = (jnp.transpose(w2_t, (2, 3, 1, 0)) * s2).reshape(16, 64, 128).astype(jnp.bfloat16)
    p['b2'] = (beta2 - m2 * s2).reshape(1, 128)
    p['w3'] = (jnp.transpose(w3_t, (2, 3, 1, 0)) * s3).reshape(9, 128, 256).astype(jnp.bfloat16)
    p['b3'] = (beta3 - m3 * s3).reshape(1, 256)
    # Conv4 (4x4 valid on a 4x4 input): flatten to (spatial=16, Cin=256)
    p['w4'] = jnp.transpose(w4_t[0], (1, 2, 0)).reshape(16, 256)
    p['embed'] = embed
    return p


if __name__ == "__main__":
    key = jax.random.PRNGKey(0)
    pkey, xkey, lkey = jax.random.split(key, 3)
    params = init_params(pkey)

    # MNIST-like shapes implied by the module: batch=2, 1 channel, 28x28
    # (default embedding_size = 28*28), labels in [0, 10).
    x = jax.random.normal(xkey, (2, 1, 28, 28), jnp.float32)
    labels = jax.random.randint(lkey, (2,), 0, 10, jnp.int32)

    out = jax.jit(conditional_cnn_discriminator_forward)(x, labels, params)
    out = jax.block_until_ready(out)

    assert out.shape == (2, 1, 1, 1), out.shape
    assert out.dtype == jnp.float32
    assert bool(jnp.all(jnp.isfinite(out)))
    assert bool(jnp.all((out >= 0.0) & (out <= 1.0)))   # sigmoid range
    print("KERNEL_OK")
</pallas_src>

<mosaic_0001>
module attributes {stable_mosaic.version = 11 : i64} {
  func.func @_disc_kernel(%arg0: i32, %arg1: memref<1x196x32xbf16, #tpu.memory_space<vmem>>, %arg2: memref<32x64xbf16, #tpu.memory_space<vmem>>, %arg3: memref<16x64x128xbf16, #tpu.memory_space<vmem>>, %arg4: memref<1x128xf32, #tpu.memory_space<vmem>>, %arg5: memref<9x128x256xbf16, #tpu.memory_space<vmem>>, %arg6: memref<1x256xf32, #tpu.memory_space<vmem>>, %arg7: memref<16x256xf32, #tpu.memory_space<vmem>>, %arg8: memref<1x1x1xf32, #tpu.memory_space<vmem>>, %arg9: memref<4x8x8x64xf32, #tpu.memory_space<vmem>>, %arg10: memref<8x8x128xf32, #tpu.memory_space<vmem>>, %arg11: memref<4x5x5x128xf32, #tpu.memory_space<vmem>>) attributes {dimension_semantics = [#tpu.dimension_semantics<parallel>], iteration_bounds = array<i64: 2>, scalar_prefetch = 0 : i64, scratch_operands = 3 : i64, tpu.core_type = #tpu.core_type<tc>, window_params = [{transform_indices = @transform_0, window_bounds = array<i64: 1, 196, 32>}, {pipeline_mode = #tpu.pipeline_mode<synchronous>, transform_indices = @transform_1, window_bounds = array<i64: 32, 64>}, {pipeline_mode = #tpu.pipeline_mode<synchronous>, transform_indices = @transform_2, window_bounds = array<i64: 16, 64, 128>}, {pipeline_mode = #tpu.pipeline_mode<synchronous>, transform_indices = @transform_3, window_bounds = array<i64: 1, 128>}, {pipeline_mode = #tpu.pipeline_mode<synchronous>, transform_indices = @transform_4, window_bounds = array<i64: 9, 128, 256>}, {pipeline_mode = #tpu.pipeline_mode<synchronous>, transform_indices = @transform_5, window_bounds = array<i64: 1, 256>}, {pipeline_mode = #tpu.pipeline_mode<synchronous>, transform_indices = @transform_6, window_bounds = array<i64: 16, 256>}, {transform_indices = @transform_7, window_bounds = array<i64: 1, 1, 1>}]} {
    %c0 = arith.constant 0 : index
    %c0_0 = arith.constant 0 : index
    %c0_1 = arith.constant 0 : index
    %0 = vector.load %arg1[%c0, %c0_0, %c0_1] : memref<1x196x32xbf16, #tpu.memory_space<vmem>>, vector<1x196x32xbf16>
    %1 = vector.shape_cast %0 : vector<1x196x32xbf16> to vector<196x32xbf16>
    %c0_2 = arith.constant 0 : index
    %c0_3 = arith.constant 0 : index
    %2 = vector.load %arg2[%c0_2, %c0_3] : memref<32x64xbf16, #tpu.memory_space<vmem>>, vector<32x64xbf16>
    %cst = arith.constant dense<0.000000e+00> : vector<196x64xf32>
    %3 = tpu.matmul %1, %2, %cst {dimension_numbers = #tpu.dot_dimension_numbers<[1], [0], [0], [1], [0, 0, 1, 1], [], []>} : vector<196x32xbf16>, vector<32x64xbf16>, vector<196x64xf32> -> vector<196x64xf32>
    %cst_4 = arith.constant 2.000000e-01 : f32
    %4 = vector.broadcast %cst_4 : f32 to vector<196x64xf32>
    %5 = arith.mulf %4, %3 : vector<196x64xf32>
    %6 = arith.maximumf %3, %5 : vector<196x64xf32>
    %7 = vector.shape_cast %6 : vector<196x64xf32> to vector<14x14x64xf32>
    %cst_5 = arith.constant 0.000000e+00 : f32
    %8 = vector.broadcast %cst_5 : f32 to vector<4x8x8x64xf32>
    %c0_6 = arith.constant 0 : index
    %c0_7 = arith.constant 0 : index
    %c0_8 = arith.constant 0 : index
    %c0_9 = arith.constant 0 : index
    %9 = vector.load %arg9[%c0_6, %c0_7, %c0_8, %c0_9] : memref<4x8x8x64xf32, #tpu.memory_space<vmem>>, vector<4x8x8x64xf32>
    tpu.vector_store %arg9[%c0_6, %c0_7, %c0_8, %c0_9], %8 {strides = array<i32>} : memref<4x8x8x64xf32, #tpu.memory_space<vmem>>, vector<4x8x8x64xf32>,
    %10 = vector.shape_cast %7 : vector<14x14x64xf32> to vector<7x2x14x64xf32>
    %11 = vector.extract_strided_slice %10 {offsets = [0, 1, 0, 0], sizes = [7, 1, 14, 64], strides = [1, 1, 1, 1]} : vector<7x2x14x64xf32> to vector<7x1x14x64xf32>
    %12 = vector.shape_cast %11 : vector<7x1x14x64xf32> to vector<7x14x64xf32>
    %13 = vector.shape_cast %12 : vector<7x14x64xf32> to vector<7x7x2x64xf32>
    %14 = vector.extract_strided_slice %13 {offsets = [0, 0, 1, 0], sizes = [7, 7, 1, 64], strides = [1, 1, 1, 1]} : vector<7x7x2x64xf32> to vector<7x7x1x64xf32>
    %15 = vector.shape_cast %14 : vector<7x7x1x64xf32> to vector<7x7x64xf32>
    %c0_10 = arith.constant 0 : index
    %c1 = arith.constant 1 : index
    %c1_11 = arith.constant 1 : index
    %c0_12 = arith.constant 0 : index
    %16 = vector.load %arg9[%c0_10, %c1, %c1_11, %c0_12] : memref<4x8x8x64xf32, #tpu.memory_space<vmem>>, vector<1x7x7x64xf32>
    %17 = vector.shape_cast %16 : vector<1x7x7x64xf32> to vector<7x7x64xf32>
    %18 = vector.shape_cast %15 : vector<7x7x64xf32> to vector<1x7x7x64xf32>
    tpu.vector_store %arg9[%c0_10, %c1, %c1_11, %c0_12], %18 {strides = array<i32>} : memref<4x8x8x64xf32, #tpu.memory_space<vmem>>, vector<1x7x7x64xf32>,
    %19 = vector.shape_cast %7 : vector<14x14x64xf32> to vector<7x2x14x64xf32>
    %20 = vector.extract_strided_slice %19 {offsets = [0, 1, 0, 0], sizes = [7, 1, 14, 64], strides = [1, 1, 1, 1]} : vector<7x2x14x64xf32> to vector<7x1x14x64xf32>
    %21 = vector.shape_cast %20 : vector<7x1x14x64xf32> to vector<7x14x64xf32>
    %22 = vector.shape_cast %21 : vector<7x14x64xf32> to vector<7x7x2x64xf32>
    %23 = vector.extract_strided_slice %22 {offsets = [0, 0, 0, 0], sizes = [7, 7, 1, 64], strides = [1, 1, 1, 1]} : vector<7x7x2x64xf32> to vector<7x7x1x64xf32>
    %24 = vector.shape_cast %23 : vector<7x7x1x64xf32> to vector<7x7x64xf32>
    %c1_13 = arith.constant 1 : index
    %c1_14 = arith.constant 1 : index
    %c0_15 = arith.constant 0 : index
    %c0_16 = arith.constant 0 : index
    %25 = vector.load %arg9[%c1_13, %c1_14, %c0_15, %c0_16] : memref<4x8x8x64xf32, #tpu.memory_space<vmem>>, vector<1x7x7x64xf32>
    %26 = vector.shape_cast %25 : vector<1x7x7x64xf32> to vector<7x7x64xf32>
    %27 = vector.shape_cast %24 : vector<7x7x64xf32> to vector<1x7x7x64xf32>
    tpu.vector_store %arg9[%c1_13, %c1_14, %c0_15, %c0_16], %27 {strides = array<i32>} : memref<4x8x8x64xf32, #tpu.memory_space<vmem>>, vector<1x7x7x64xf32>,
    %28 = vector.shape_cast %7 : vector<14x14x64xf32> to vector<7x2x14x64xf32>
    %29 = vector.extract_strided_slice %28 {offsets = [0, 0, 0, 0], sizes = [7, 1, 14, 64], strides = [1, 1, 1, 1]} : vector<7x2x14x64xf32> to vector<7x1x14x64xf32>
    %30 = vector.shape_cast %29 : vector<7x1x14x64xf32> to vector<7x14x64xf32>
    %31 = vector.shape_cast %30 : vector<7x14x64xf32> to vector<7x7x2x64xf32>
    %32 = vector.extract_strided_slice %31 {offsets = [0, 0, 1, 0], sizes = [7, 7, 1, 64], strides = [1, 1, 1, 1]} : vector<7x7x2x64xf32> to vector<7x7x1x64xf32>
    %33 = vector.shape_cast %32 : vector<7x7x1x64xf32> to vector<7x7x64xf32>
    %c2 = arith.constant 2 : index
    %c0_17 = arith.constant 0 : index
    %c1_18 = arith.constant 1 : index
    %c0_19 = arith.constant 0 : index
    %34 = vector.load %arg9[%c2, %c0_17, %c1_18, %c0_19] : memref<4x8x8x64xf32, #tpu.memory_space<vmem>>, vector<1x7x7x64xf32>
    %35 = vector.shape_cast %34 : vector<1x7x7x64xf32> to vector<7x7x64xf32>
    %36 = vector.shape_cast %33 : vector<7x7x64xf32> to vector<1x7x7x64xf32>
    tpu.vector_store %arg9[%c2, %c0_17, %c1_18, %c0_19], %36 {strides = array<i32>} : memref<4x8x8x64xf32, #tpu.memory_space<vmem>>, vector<1x7x7x64xf32>,
    %37 = vector.shape_cast %7 : vector<14x14x64xf32> to vector<7x2x14x64xf32>
    %38 = vector.extract_strided_slice %37 {offsets = [0, 0, 0, 0], sizes = [7, 1, 14, 64], strides = [1, 1, 1, 1]} : vector<7x2x14x64xf32> to vector<7x1x14x64xf32>
    %39 = vector.shape_cast %38 : vector<7x1x14x64xf32> to vector<7x14x64xf32>
    %40 = vector.shape_cast %39 : vector<7x14x64xf32> to vector<7x7x2x64xf32>
    %41 = vector.extract_strided_slice %40 {offsets = [0, 0, 0, 0], sizes = [7, 7, 1, 64], strides = [1, 1, 1, 1]} : vector<7x7x2x64xf32> to vector<7x7x1x64xf32>
    %42 = vector.shape_cast %41 : vector<7x7x1x64xf32> to vector<7x7x64xf32>
    %c3 = arith.constant 3 : index
    %c0_20 = arith.constant 0 : index
    %c0_21 = arith.constant 0 : index
    %c0_22 = arith.constant 0 : index
    %43 = vector.load %arg9[%c3, %c0_20, %c0_21, %c0_22] : memref<4x8x8x64xf32, #tpu.memory_space<vmem>>, vector<1x7x7x64xf32>
    %44 = vector.shape_cast %43 : vector<1x7x7x64xf32> to vector<7x7x64xf32>
    %45 = vector.shape_cast %42 : vector<7x7x64xf32> to vector<1x7x7x64xf32>
    tpu.vector_store %arg9[%c3, %c0_20, %c0_21, %c0_22], %45 {strides = array<i32>} : memref<4x8x8x64xf32, #tpu.memory_space<vmem>>, vector<1x7x7x64xf32>,
    %c0_23 = arith.constant 0 : index
    %c0_24 = arith.constant 0 : index
    %c0_25 = arith.constant 0 : index
    %c0_26 = arith.constant 0 : index
    %46 = vector.load %arg9[%c0_23, %c0_24, %c0_25, %c0_26] : memref<4x8x8x64xf32, #tpu.memory_space<vmem>>, vector<1x7x7x64xf32>
    %47 = vector.shape_cast %46 : vector<1x7x7x64xf32> to vector<7x7x64xf32>
    %48 = vector.shape_cast %47 : vector<7x7x64xf32> to vector<49x64xf32>
    %49 = arith.truncf %48 : vector<49x64xf32> to vector<49x64xbf16>
    %c0_27 = arith.constant 0 : index
    %c0_28 = arith.constant 0 : index
    %c0_29 = arith.constant 0 : index
    %50 = vector.load %arg3[%c0_27, %c0_28, %c0_29] : memref<16x64x128xbf16, #tpu.memory_space<vmem>>, vector<1x64x128xbf16>
    %51 = vector.shape_cast %50 : vector<1x64x128xbf16> to vector<64x128xbf16>
    %cst_30 = arith.constant dense<0.000000e+00> : vector<49x128xf32>
    %52 = tpu.matmul %49, %51, %cst_30 {dimension_numbers = #tpu.dot_dimension_numbers<[1], [0], [0], [1], [0, 0, 1, 1], [], []>} : vector<49x64xbf16>, vector<64x128xbf16>, vector<49x128xf32> -> vector<49x128xf32>
    %c1_31 = arith.constant 1 : index
    %c0_32 = arith.constant 0 : index
    %c0_33 = arith.constant 0 : index
    %c0_34 = arith.constant 0 : index
    %53 = vector.load %arg9[%c1_31, %c0_32, %c0_33, %c0_34] : memref<4x8x8x64xf32, #tpu.memory_space<vmem>>, vector<1x7x7x64xf32>
    %54 = vector.shape_cast %53 : vector<1x7x7x64xf32> to vector<7x7x64xf32>
    %55 = vector.shape_cast %54 : vector<7x7x64xf32> to vector<49x64xf32>
    %56 = arith.truncf %55 : vector<49x64xf32> to vector<49x64xbf16>
    %c1_35 = arith.constant 1 : index
    %c0_36 = arith.constant 0 : index
    %c0_37 = arith.constant 0 : index
    %57 = vector.load %arg3[%c1_35, %c0_36, %c0_37] : memref<16x64x128xbf16, #tpu.memory_space<vmem>>, vector<1x64x128xbf16>
    %58 = vector.shape_cast %57 : vector<1x64x128xbf16> to vector<64x128xbf16>
    %cst_38 = arith.constant dense<0.000000e+00> : vector<49x128xf32>
    %59 = tpu.matmul %56, %58, %cst_38 {dimension_numbers = #tpu.dot_dimension_numbers<[1], [0], [0], [1], [0, 0, 1, 1], [], []>} : vector<49x64xbf16>, vector<64x128xbf16>, vector<49x128xf32> -> vector<49x128xf32>
    %60 = arith.addf %52, %59 : vector<49x128xf32>
    %c0_39 = arith.constant 0 : index
    %c0_40 = arith.constant 0 : index
    %c1_41 = arith.constant 1 : index
    %c0_42 = arith.constant 0 : index
    %61 = vector.load %arg9[%c0_39, %c0_40, %c1_41, %c0_42] : memref<4x8x8x64xf32, #tpu.memory_space<vmem>>, vector<1x7x7x64xf32>
    %62 = vector.shape_cast %61 : vector<1x7x7x64xf32> to vector<7x7x64xf32>
    %63 = vector.shape_cast %62 : vector<7x7x64xf32> to vector<49x64xf32>
    %64 = arith.truncf %63 : vector<49x64xf32> to vector<49x64xbf16>
    %c2_43 = arith.constant 2 : index
    %c0_44 = arith.constant 0 : index
    %c0_45 = arith.constant 0 : index
    %65 = vector.load %arg3[%c2_43, %c0_44, %c0_45] : memref<16x64x128xbf16, #tpu.memory_space<vmem>>, vector<1x64x128xbf16>
    %66 = vector.shape_cast %65 : vector<1x64x128xbf16> to vector<64x128xbf16>
    %cst_46 = arith.constant dense<0.000000e+00> : vector<49x128xf32>
    %67 = tpu.matmul %64, %66, %cst_46 {dimension_numbers = #tpu.dot_dimension_numbers<[1], [0], [0], [1], [0, 0, 1, 1], [], []>} : vector<49x64xbf16>, vector<64x128xbf16>, vector<49x128xf32> -> vector<49x128xf32>
    %68 = arith.addf %60, %67 : vector<49x128xf32>
    %c1_47 = arith.constant 1 : index
    %c0_48 = arith.constant 0 : index
    %c1_49 = arith.constant 1 : index
    %c0_50 = arith.constant 0 : index
    %69 = vector.load %arg9[%c1_47, %c0_48, %c1_49, %c0_50] : memref<4x8x8x64xf32, #tpu.memory_space<vmem>>, vector<1x7x7x64xf32>
    %70 = vector.shape_cast %69 : vector<1x7x7x64xf32> to vector<7x7x64xf32>
    %71 = vector.shape_cast %70 : vector<7x7x64xf32> to vector<49x64xf32>
    %72 = arith.truncf %71 : vector<49x64xf32> to vector<49x64xbf16>
    %c3_51 = arith.constant 3 : index
    %c0_52 = arith.constant 0 : index
    %c0_53 = arith.constant 0 : index
    %73 = vector.load %arg3[%c3_51, %c0_52, %c0_53] : memref<16x64x128xbf16, #tpu.memory_space<vmem>>, vector<1x64x128xbf16>
    %74 = vector.shape_cast %73 : vector<1x64x128xbf16> to vector<64x128xbf16>
    %cst_54 = arith.constant dense<0.000000e+00> : vector<49x128xf32>
    %75 = tpu.matmul %72, %74, %cst_54 {dimension_numbers = #tpu.dot_dimension_numbers<[1], [0], [0], [1], [0, 0, 1, 1], [], []>} : vector<49x64xbf16>, vector<64x128xbf16>, vector<49x128xf32> -> vector<49x128xf32>
    %76 = arith.addf %68, %75 : vector<49x128xf32>
    %c2_55 = arith.constant 2 : index
    %c0_56 = arith.constant 0 : index
    %c0_57 = arith.constant 0 : index
    %c0_58 = arith.constant 0 : index
    %77 = vector.load %arg9[%c2_55, %c0_56, %c0_57, %c0_58] : memref<4x8x8x64xf32, #tpu.memory_space<vmem>>, vector<1x7x7x64xf32>
    %78 = vector.shape_cast %77 : vector<1x7x7x64xf32> to vector<7x7x64xf32>
    %79 = vector.shape_cast %78 : vector<7x7x64xf32> to vector<49x64xf32>
    %80 = arith.truncf %79 : vector<49x64xf32> to vector<49x64xbf16>
    %c4 = arith.constant 4 : index
    %c0_59 = arith.constant 0 : index
    %c0_60 = arith.constant 0 : index
    %81 = vector.load %arg3[%c4, %c0_59, %c0_60] : memref<16x64x128xbf16, #tpu.memory_space<vmem>>, vector<1x64x128xbf16>
    %82 = vector.shape_cast %81 : vector<1x64x128xbf16> to vector<64x128xbf16>
    %cst_61 = arith.constant dense<0.000000e+00> : vector<49x128xf32>
    %83 = tpu.matmul %80, %82, %cst_61 {dimension_numbers = #tpu.dot_dimension_numbers<[1], [0], [0], [1], [0, 0, 1, 1], [], []>} : vector<49x64xbf16>, vector<64x128xbf16>, vector<49x128xf32> -> vector<49x128xf32>
    %84 = arith.addf %76, %83 : vector<49x128xf32>
    %c3_62 = arith.constant 3 : index
    %c0_63 = arith.constant 0 : index
    %c0_64 = arith.constant 0 : index
    %c0_65 = arith.constant 0 : index
    %85 = vector.load %arg9[%c3_62, %c0_63, %c0_64, %c0_65] : memref<4x8x8x64xf32, #tpu.memory_space<vmem>>, vector<1x7x7x64xf32>
    %86 = vector.shape_cast %85 : vector<1x7x7x64xf32> to vector<7x7x64xf32>
    %87 = vector.shape_cast %86 : vector<7x7x64xf32> to vector<49x64xf32>
    %88 = arith.truncf %87 : vector<49x64xf32> to vector<49x64xbf16>
    %c5 = arith.constant 5 : index
    %c0_66 = arith.constant 0 : index
    %c0_67 = arith.constant 0 : index
    %89 = vector.load %arg3[%c5, %c0_66, %c0_67] : memref<16x64x128xbf16, #tpu.memory_space<vmem>>, vector<1x64x128xbf16>
    %90 = vector.shape_cast %89 : vector<1x64x128xbf16> to vector<64x128xbf16>
    %cst_68 = arith.constant dense<0.000000e+00> : vector<49x128xf32>
    %91 = tpu.matmul %88, %90, %cst_68 {dimension_numbers = #tpu.dot_dimension_numbers<[1], [0], [0], [1], [0, 0, 1, 1], [], []>} : vector<49x64xbf16>, vector<64x128xbf16>, vector<49x128xf32> -> vector<49x128xf32>
    %92 = arith.addf %84, %91 : vector<49x128xf32>
    %c2_69 = arith.constant 2 : index
    %c0_70 = arith.constant 0 : index
    %c1_71 = arith.constant 1 : index
    %c0_72 = arith.constant 0 : index
    %93 = vector.load %arg9[%c2_69, %c0_70, %c1_71, %c0_72] : memref<4x8x8x64xf32, #tpu.memory_space<vmem>>, vector<1x7x7x64xf32>
    %94 = vector.shape_cast %93 : vector<1x7x7x64xf32> to vector<7x7x64xf32>
    %95 = vector.shape_cast %94 : vector<7x7x64xf32> to vector<49x64xf32>
    %96 = arith.truncf %95 : vector<49x64xf32> to vector<49x64xbf16>
    %c6 = arith.constant 6 : index
    %c0_73 = arith.constant 0 : index
    %c0_74 = arith.constant 0 : index
    %97 = vector.load %arg3[%c6, %c0_73, %c0_74] : memref<16x64x128xbf16, #tpu.memory_space<vmem>>, vector<1x64x128xbf16>
    %98 = vector.shape_cast %97 : vector<1x64x128xbf16> to vector<64x128xbf16>
    %cst_75 = arith.constant dense<0.000000e+00> : vector<49x128xf32>
    %99 = tpu.matmul %96, %98, %cst_75 {dimension_numbers = #tpu.dot_dimension_numbers<[1], [0], [0], [1], [0, 0, 1, 1], [], []>} : vector<49x64xbf16>, vector<64x128xbf16>, vector<49x128xf32> -> vector<49x128xf32>
    %100 = arith.addf %92, %99 : vector<49x128xf32>
    %c3_76 = arith.constant 3 : index
    %c0_77 = arith.constant 0 : index
    %c1_78 = arith.constant 1 : index
    %c0_79 = arith.constant 0 : index
    %101 = vector.load %arg9[%c3_76, %c0_77, %c1_78, %c0_79] : memref<4x8x8x64xf32, #tpu.memory_space<vmem>>, vector<1x7x7x64xf32>
    %102 = vector.shape_cast %101 : vector<1x7x7x64xf32> to vector<7x7x64xf32>
    %103 = vector.shape_cast %102 : vector<7x7x64xf32> to vector<49x64xf32>
    %104 = arith.truncf %103 : vector<49x64xf32> to vector<49x64xbf16>
    %c7 = arith.constant 7 : index
    %c0_80 = arith.constant 0 : index
    %c0_81 = arith.constant 0 : index
    %105 = vector.load %arg3[%c7, %c0_80, %c0_81] : memref<16x64x128xbf16, #tpu.memory_space<vmem>>, vector<1x64x128xbf16>
    %106 = vector.shape_cast %105 : vector<1x64x128xbf16> to vector<64x128xbf16>
    %cst_82 = arith.constant dense<0.000000e+00> : vector<49x128xf32>
    %107 = tpu.matmul %104, %106, %cst_82 {dimension_numbers = #tpu.dot_dimension_numbers<[1], [0], [0], [1], [0, 0, 1, 1], [], []>} : vector<49x64xbf16>, vector<64x128xbf16>, vector<49x128xf32> -> vector<49x128xf32>
    %108 = arith.addf %100, %107 : vector<49x128xf32>
    %c0_83 = arith.constant 0 : index
    %c1_84 = arith.constant 1 : index
    %c0_85 = arith.constant 0 : index
    %c0_86 = arith.constant 0 : index
    %109 = vector.load %arg9[%c0_83, %c1_84, %c0_85, %c0_86] : memref<4x8x8x64xf32, #tpu.memory_space<vmem>>, vector<1x7x7x64xf32>
    %110 = vector.shape_cast %109 : vector<1x7x7x64xf32> to vector<7x7x64xf32>
    %111 = vector.shape_cast %110 : vector<7x7x64xf32> to vector<49x64xf32>
    %112 = arith.truncf %111 : vector<49x64xf32> to vector<49x64xbf16>
    %c8 = arith.constant 8 : index
    %c0_87 = arith.constant 0 : index
    %c0_88 = arith.constant 0 : index
    %113 = vector.load %arg3[%c8, %c0_87, %c0_88] : memref<16x64x128xbf16, #tpu.memory_space<vmem>>, vector<1x64x128xbf16>
    %114 = vector.shape_cast %113 : vector<1x64x128xbf16> to vector<64x128xbf16>
    %cst_89 = arith.constant dense<0.000000e+00> : vector<49x128xf32>
    %115 = tpu.matmul %112, %114, %cst_89 {dimension_numbers = #tpu.dot_dimension_numbers<[1], [0], [0], [1], [0, 0, 1, 1], [], []>} : vector<49x64xbf16>, vector<64x128xbf16>, vector<49x128xf32> -> vector<49x128xf32>
    %116 = arith.addf %108, %115 : vector<49x128xf32>
    %c1_90 = arith.constant 1 : index
    %c1_91 = arith.constant 1 : index
    %c0_92 = arith.constant 0 : index
    %c0_93 = arith.constant 0 : index
    %117 = vector.load %arg9[%c1_90, %c1_91, %c0_92, %c0_93] : memref<4x8x8x64xf32, #tpu.memory_space<vmem>>, vector<1x7x7x64xf32>
    %118 = vector.shape_cast %117 : vector<1x7x7x64xf32> to vector<7x7x64xf32>
    %119 = vector.shape_cast %118 : vector<7x7x64xf32> to vector<49x64xf32>
    %120 = arith.truncf %119 : vector<49x64xf32> to vector<49x64xbf16>
    %c9 = arith.constant 9 : index
    %c0_94 = arith.constant 0 : index
    %c0_95 = arith.constant 0 : index
    %121 = vector.load %arg3[%c9, %c0_94, %c0_95] : memref<16x64x128xbf16, #tpu.memory_space<vmem>>, vector<1x64x128xbf16>
    %122 = vector.shape_cast %121 : vector<1x64x128xbf16> to vector<64x128xbf16>
    %cst_96 = arith.constant dense<0.000000e+00> : vector<49x128xf32>
    %123 = tpu.matmul %120, %122, %cst_96 {dimension_numbers = #tpu.dot_dimension_numbers<[1], [0], [0], [1], [0, 0, 1, 1], [], []>} : vector<49x64xbf16>, vector<64x128xbf16>, vector<49x128xf32> -> vector<49x128xf32>
    %124 = arith.addf %116, %123 : vector<49x128xf32>
    %c0_97 = arith.constant 0 : index
    %c1_98 = arith.constant 1 : index
    %c1_99 = arith.constant 1 : index
    %c0_100 = arith.constant 0 : index
    %125 = vector.load %arg9[%c0_97, %c1_98, %c1_99, %c0_100] : memref<4x8x8x64xf32, #tpu.memory_space<vmem>>, vector<1x7x7x64xf32>
    %126 = vector.shape_cast %125 : vector<1x7x7x64xf32> to vector<7x7x64xf32>
    %127 = vector.shape_cast %126 : vector<7x7x64xf32> to vector<49x64xf32>
    %128 = arith.truncf %127 : vector<49x64xf32> to vector<49x64xbf16>
    %c10 = arith.constant 10 : index
    %c0_101 = arith.constant 0 : index
    %c0_102 = arith.constant 0 : index
    %129 = vector.load %arg3[%c10, %c0_101, %c0_102] : memref<16x64x128xbf16, #tpu.memory_space<vmem>>, vector<1x64x128xbf16>
    %130 = vector.shape_cast %129 : vector<1x64x128xbf16> to vector<64x128xbf16>
    %cst_103 = arith.constant dense<0.000000e+00> : vector<49x128xf32>
    %131 = tpu.matmul %128, %130, %cst_103 {dimension_numbers = #tpu.dot_dimension_numbers<[1], [0], [0], [1], [0, 0, 1, 1], [], []>} : vector<49x64xbf16>, vector<64x128xbf16>, vector<49x128xf32> -> vector<49x128xf32>
    %132 = arith.addf %124, %131 : vector<49x128xf32>
    %c1_104 = arith.constant 1 : index
    %c1_105 = arith.constant 1 : index
    %c1_106 = arith.constant 1 : index
    %c0_107 = arith.constant 0 : index
    %133 = vector.load %arg9[%c1_104, %c1_105, %c1_106, %c0_107] : memref<4x8x8x64xf32, #tpu.memory_space<vmem>>, vector<1x7x7x64xf32>
    %134 = vector.shape_cast %133 : vector<1x7x7x64xf32> to vector<7x7x64xf32>
    %135 = vector.shape_cast %134 : vector<7x7x64xf32> to vector<49x64xf32>
    %136 = arith.truncf %135 : vector<49x64xf32> to vector<49x64xbf16>
    %c11 = arith.constant 11 : index
    %c0_108 = arith.constant 0 : index
    %c0_109 = arith.constant 0 : index
    %137 = vector.load %arg3[%c11, %c0_108, %c0_109] : memref<16x64x128xbf16, #tpu.memory_space<vmem>>, vector<1x64x128xbf16>
    %138 = vector.shape_cast %137 : vector<1x64x128xbf16> to vector<64x128xbf16>
    %cst_110 = arith.constant dense<0.000000e+00> : vector<49x128xf32>
    %139 = tpu.matmul %136, %138, %cst_110 {dimension_numbers = #tpu.dot_dimension_numbers<[1], [0], [0], [1], [0, 0, 1, 1], [], []>} : vector<49x64xbf16>, vector<64x128xbf16>, vector<49x128xf32> -> vector<49x128xf32>
    %140 = arith.addf %132, %139 : vector<49x128xf32>
    %c2_111 = arith.constant 2 : index
    %c1_112 = arith.constant 1 : index
    %c0_113 = arith.constant 0 : index
    %c0_114 = arith.constant 0 : index
    %141 = vector.load %arg9[%c2_111, %c1_112, %c0_113, %c0_114] : memref<4x8x8x64xf32, #tpu.memory_space<vmem>>, vector<1x7x7x64xf32>
    %142 = vector.shape_cast %141 : vector<1x7x7x64xf32> to vector<7x7x64xf32>
    %143 = vector.shape_cast %142 : vector<7x7x64xf32> to vector<49x64xf32>
    %144 = arith.truncf %143 : vector<49x64xf32> to vector<49x64xbf16>
    %c12 = arith.constant 12 : index
    %c0_115 = arith.constant 0 : index
    %c0_116 = arith.constant 0 : index
    %145 = vector.load %arg3[%c12, %c0_115, %c0_116] : memref<16x64x128xbf16, #tpu.memory_space<vmem>>, vector<1x64x128xbf16>
    %146 = vector.shape_cast %145 : vector<1x64x128xbf16> to vector<64x128xbf16>
    %cst_117 = arith.constant dense<0.000000e+00> : vector<49x128xf32>
    %147 = tpu.matmul %144, %146, %cst_117 {dimension_numbers = #tpu.dot_dimension_numbers<[1], [0], [0], [1], [0, 0, 1, 1], [], []>} : vector<49x64xbf16>, vector<64x128xbf16>, vector<49x128xf32> -> vector<49x128xf32>
    %148 = arith.addf %140, %147 : vector<49x128xf32>
    %c3_118 = arith.constant 3 : index
    %c1_119 = arith.constant 1 : index
    %c0_120 = arith.constant 0 : index
    %c0_121 = arith.constant 0 : index
    %149 = vector.load %arg9[%c3_118, %c1_119, %c0_120, %c0_121] : memref<4x8x8x64xf32, #tpu.memory_space<vmem>>, vector<1x7x7x64xf32>
    %150 = vector.shape_cast %149 : vector<1x7x7x64xf32> to vector<7x7x64xf32>
    %151 = vector.shape_cast %150 : vector<7x7x64xf32> to vector<49x64xf32>
    %152 = arith.truncf %151 : vector<49x64xf32> to vector<49x64xbf16>
    %c13 = arith.constant 13 : index
    %c0_122 = arith.constant 0 : index
    %c0_123 = arith.constant 0 : index
    %153 = vector.load %arg3[%c13, %c0_122, %c0_123] : memref<16x64x128xbf16, #tpu.memory_space<vmem>>, vector<1x64x128xbf16>
    %154 = vector.shape_cast %153 : vector<1x64x128xbf16> to vector<64x128xbf16>
    %cst_124 = arith.constant dense<0.000000e+00> : vector<49x128xf32>
    %155 = tpu.matmul %152, %154, %cst_124 {dimension_numbers = #tpu.dot_dimension_numbers<[1], [0], [0], [1], [0, 0, 1, 1], [], []>} : vector<49x64xbf16>, vector<64x128xbf16>, vector<49x128xf32> -> vector<49x128xf32>
    %156 = arith.addf %148, %155 : vector<49x128xf32>
    %c2_125 = arith.constant 2 : index
    %c1_126 = arith.constant 1 : index
    %c1_127 = arith.constant 1 : index
    %c0_128 = arith.constant 0 : index
    %157 = vector.load %arg9[%c2_125, %c1_126, %c1_127, %c0_128] : memref<4x8x8x64xf32, #tpu.memory_space<vmem>>, vector<1x7x7x64xf32>
    %158 = vector.shape_cast %157 : vector<1x7x7x64xf32> to vector<7x7x64xf32>
    %159 = vector.shape_cast %158 : vector<7x7x64xf32> to vector<49x64xf32>
    %160 = arith.truncf %159 : vector<49x64xf32> to vector<49x64xbf16>
    %c14 = arith.constant 14 : index
    %c0_129 = arith.constant 0 : index
    %c0_130 = arith.constant 0 : index
    %161 = vector.load %arg3[%c14, %c0_129, %c0_130] : memref<16x64x128xbf16, #tpu.memory_space<vmem>>, vector<1x64x128xbf16>
    %162 = vector.shape_cast %161 : vector<1x64x128xbf16> to vector<64x128xbf16>
    %cst_131 = arith.constant dense<0.000000e+00> : vector<49x128xf32>
    %163 = tpu.matmul %160, %162, %cst_131 {dimension_numbers = #tpu.dot_dimension_numbers<[1], [0], [0], [1], [0, 0, 1, 1], [], []>} : vector<49x64xbf16>, vector<64x128xbf16>, vector<49x128xf32> -> vector<49x128xf32>
    %164 = arith.addf %156, %163 : vector<49x128xf32>
    %c3_132 = arith.constant 3 : index
    %c1_133 = arith.constant 1 : index
    %c1_134 = arith.constant 1 : index
    %c0_135 = arith.constant 0 : index
    %165 = vector.load %arg9[%c3_132, %c1_133, %c1_134, %c0_135] : memref<4x8x8x64xf32, #tpu.memory_space<vmem>>, vector<1x7x7x64xf32>
    %166 = vector.shape_cast %165 : vector<1x7x7x64xf32> to vector<7x7x64xf32>
    %167 = vector.shape_cast %166 : vector<7x7x64xf32> to vector<49x64xf32>
    %168 = arith.truncf %167 : vector<49x64xf32> to vector<49x64xbf16>
    %c15 = arith.constant 15 : index
    %c0_136 = arith.constant 0 : index
    %c0_137 = arith.constant 0 : index
    %169 = vector.load %arg3[%c15, %c0_136, %c0_137] : memref<16x64x128xbf16, #tpu.memory_space<vmem>>, vector<1x64x128xbf16>
    %170 = vector.shape_cast %169 : vector<1x64x128xbf16> to vector<64x128xbf16>
    %cst_138 = arith.constant dense<0.000000e+00> : vector<49x128xf32>
    %171 = tpu.matmul %168, %170, %cst_138 {dimension_numbers = #tpu.dot_dimension_numbers<[1], [0], [0], [1], [0, 0, 1, 1], [], []>} : vector<49x64xbf16>, vector<64x128xbf16>, vector<49x128xf32> -> vector<49x128xf32>
    %172 = arith.addf %164, %171 : vector<49x128xf32>
    %c0_139 = arith.constant 0 : index
    %c0_140 = arith.constant 0 : index
    %173 = vector.load %arg4[%c0_139, %c0_140] : memref<1x128xf32, #tpu.memory_space<vmem>>, vector<1x128xf32>
    %174 = vector.broadcast %173 : vector<1x128xf32> to vector<49x128xf32>
    %175 = arith.addf %172, %174 : vector<49x128xf32>
    %cst_141 = arith.constant 2.000000e-01 : f32
    %176 = vector.broadcast %cst_141 : f32 to vector<49x128xf32>
    %177 = arith.mulf %176, %175 : vector<49x128xf32>
    %178 = arith.maximumf %175, %177 : vector<49x128xf32>
    %cst_142 = arith.constant 0.000000e+00 : f32
    %179 = vector.broadcast %cst_142 : f32 to vector<8x8x128xf32>
    %c0_143 = arith.constant 0 : index
    %c0_144 = arith.constant 0 : index
    %c0_145 = arith.constant 0 : index
    %180 = vector.load %arg10[%c0_143, %c0_144, %c0_145] : memref<8x8x128xf32, #tpu.memory_space<vmem>>, vector<8x8x128xf32>
    tpu.vector_store %arg10[%c0_143, %c0_144, %c0_145], %179 {strides = array<i32>} : memref<8x8x128xf32, #tpu.memory_space<vmem>>, vector<8x8x128xf32>,
    %181 = vector.shape_cast %178 : vector<49x128xf32> to vector<7x7x128xf32>
    %c0_146 = arith.constant 0 : index
    %c0_147 = arith.constant 0 : index
    %c0_148 = arith.constant 0 : index
    %182 = vector.load %arg10[%c0_146, %c0_147, %c0_148] : memref<8x8x128xf32, #tpu.memory_space<vmem>>, vector<7x7x128xf32>
    tpu.vector_store %arg10[%c0_146, %c0_147, %c0_148], %181 {strides = array<i32>} : memref<8x8x128xf32, #tpu.memory_space<vmem>>, vector<7x7x128xf32>,
    %c0_149 = arith.constant 0 : index
    %c0_150 = arith.constant 0 : index
    %c0_151 = arith.constant 0 : index
    %183 = vector.load %arg10[%c0_149, %c0_150, %c0_151] : memref<8x8x128xf32, #tpu.memory_space<vmem>>, vector<8x8x128xf32>
    %cst_152 = arith.constant 0.000000e+00 : f32
    %184 = vector.broadcast %cst_152 : f32 to vector<4x5x5x128xf32>
    %c0_153 = arith.constant 0 : index
    %c0_154 = arith.constant 0 : index
    %c0_155 = arith.constant 0 : index
    %c0_156 = arith.constant 0 : index
    %185 = vector.load %arg11[%c0_153, %c0_154, %c0_155, %c0_156] : memref<4x5x5x128xf32, #tpu.memory_space<vmem>>, vector<4x5x5x128xf32>
    tpu.vector_store %arg11[%c0_153, %c0_154, %c0_155, %c0_156], %184 {strides = array<i32>} : memref<4x5x5x128xf32, #tpu.memory_space<vmem>>, vector<4x5x5x128xf32>,
    %186 = vector.shape_cast %183 : vector<8x8x128xf32> to vector<4x2x8x128xf32>
    %187 = vector.extract_strided_slice %186 {offsets = [0, 1, 0, 0], sizes = [4, 1, 8, 128], strides = [1, 1, 1, 1]} : vector<4x2x8x128xf32> to vector<4x1x8x128xf32>
    %188 = vector.shape_cast %187 : vector<4x1x8x128xf32> to vector<4x8x128xf32>
    %189 = vector.shape_cast %188 : vector<4x8x128xf32> to vector<4x4x2x128xf32>
    %190 = vector.extract_strided_slice %189 {offsets = [0, 0, 1, 0], sizes = [4, 4, 1, 128], strides = [1, 1, 1, 1]} : vector<4x4x2x128xf32> to vector<4x4x1x128xf32>
    %191 = vector.shape_cast %190 : vector<4x4x1x128xf32> to vector<4x4x128xf32>
    %c0_157 = arith.constant 0 : index
    %c1_158 = arith.constant 1 : index
    %c1_159 = arith.constant 1 : index
    %c0_160 = arith.constant 0 : index
    %192 = vector.load %arg11[%c0_157, %c1_158, %c1_159, %c0_160] : memref<4x5x5x128xf32, #tpu.memory_space<vmem>>, vector<1x4x4x128xf32>
    %193 = vector.shape_cast %192 : vector<1x4x4x128xf32> to vector<4x4x128xf32>
    %194 = vector.shape_cast %191 : vector<4x4x128xf32> to vector<1x4x4x128xf32>
    tpu.vector_store %arg11[%c0_157, %c1_158, %c1_159, %c0_160], %194 {strides = array<i32>} : memref<4x5x5x128xf32, #tpu.memory_space<vmem>>, vector<1x4x4x128xf32>,
    %195 = vector.shape_cast %183 : vector<8x8x128xf32> to vector<4x2x8x128xf32>
    %196 = vector.extract_strided_slice %195 {offsets = [0, 1, 0, 0], sizes = [4, 1, 8, 128], strides = [1, 1, 1, 1]} : vector<4x2x8x128xf32> to vector<4x1x8x128xf32>
    %197 = vector.shape_cast %196 : vector<4x1x8x128xf32> to vector<4x8x128xf32>
    %198 = vector.shape_cast %197 : vector<4x8x128xf32> to vector<4x4x2x128xf32>
    %199 = vector.extract_strided_slice %198 {offsets = [0, 0, 0, 0], sizes = [4, 4, 1, 128], strides = [1, 1, 1, 1]} : vector<4x4x2x128xf32> to vector<4x4x1x128xf32>
    %200 = vector.shape_cast %199 : vector<4x4x1x128xf32> to vector<4x4x128xf32>
    %c1_161 = arith.constant 1 : index
    %c1_162 = arith.constant 1 : index
    %c0_163 = arith.constant 0 : index
    %c0_164 = arith.constant 0 : index
    %201 = vector.load %arg11[%c1_161, %c1_162, %c0_163, %c0_164] : memref<4x5x5x128xf32, #tpu.memory_space<vmem>>, vector<1x4x4x128xf32>
    %202 = vector.shape_cast %201 : vector<1x4x4x128xf32> to vector<4x4x128xf32>
    %203 = vector.shape_cast %200 : vector<4x4x128xf32> to vector<1x4x4x128xf32>
    tpu.vector_store %arg11[%c1_161, %c1_162, %c0_163, %c0_164], %203 {strides = array<i32>} : memref<4x5x5x128xf32, #tpu.memory_space<vmem>>, vector<1x4x4x128xf32>,
    %204 = vector.shape_cast %183 : vector<8x8x128xf32> to vector<4x2x8x128xf32>
    %205 = vector.extract_strided_slice %204 {offsets = [0, 0, 0, 0], sizes = [4, 1, 8, 128], strides = [1, 1, 1, 1]} : vector<4x2x8x128xf32> to vector<4x1x8x128xf32>
    %206 = vector.shape_cast %205 : vector<4x1x8x128xf32> to vector<4x8x128xf32>
    %207 = vector.shape_cast %206 : vector<4x8x128xf32> to vector<4x4x2x128xf32>
    %208 = vector.extract_strided_slice %207 {offsets = [0, 0, 1, 0], sizes = [4, 4, 1, 128], strides = [1, 1, 1, 1]} : vector<4x4x2x128xf32> to vector<4x4x1x128xf32>
    %209 = vector.shape_cast %208 : vector<4x4x1x128xf32> to vector<4x4x128xf32>
    %c2_165 = arith.constant 2 : index
    %c0_166 = arith.constant 0 : index
    %c1_167 = arith.constant 1 : index
    %c0_168 = arith.constant 0 : index
    %210 = vector.load %arg11[%c2_165, %c0_166, %c1_167, %c0_168] : memref<4x5x5x128xf32, #tpu.memory_space<vmem>>, vector<1x4x4x128xf32>
    %211 = vector.shape_cast %210 : vector<1x4x4x128xf32> to vector<4x4x128xf32>
    %212 = vector.shape_cast %209 : vector<4x4x128xf32> to vector<1x4x4x128xf32>
    tpu.vector_store %arg11[%c2_165, %c0_166, %c1_167, %c0_168], %212 {strides = array<i32>} : memref<4x5x5x128xf32, #tpu.memory_space<vmem>>, vector<1x4x4x128xf32>,
    %213 = vector.shape_cast %183 : vector<8x8x128xf32> to vector<4x2x8x128xf32>
    %214 = vector.extract_strided_slice %213 {offsets = [0, 0, 0, 0], sizes = [4, 1, 8, 128], strides = [1, 1, 1, 1]} : vector<4x2x8x128xf32> to vector<4x1x8x128xf32>
    %215 = vector.shape_cast %214 : vector<4x1x8x128xf32> to vector<4x8x128xf32>
    %216 = vector.shape_cast %215 : vector<4x8x128xf32> to vector<4x4x2x128xf32>
    %217 = vector.extract_strided_slice %216 {offsets = [0, 0, 0, 0], sizes = [4, 4, 1, 128], strides = [1, 1, 1, 1]} : vector<4x4x2x128xf32> to vector<4x4x1x128xf32>
    %218 = vector.shape_cast %217 : vector<4x4x1x128xf32> to vector<4x4x128xf32>
    %c3_169 = arith.constant 3 : index
    %c0_170 = arith.constant 0 : index
    %c0_171 = arith.constant 0 : index
    %c0_172 = arith.constant 0 : index
    %219 = vector.load %arg11[%c3_169, %c0_170, %c0_171, %c0_172] : memref<4x5x5x128xf32, #tpu.memory_space<vmem>>, vector<1x4x4x128xf32>
    %220 = vector.shape_cast %219 : vector<1x4x4x128xf32> to vector<4x4x128xf32>
    %221 = vector.shape_cast %218 : vector<4x4x128xf32> to vector<1x4x4x128xf32>
    tpu.vector_store %arg11[%c3_169, %c0_170, %c0_171, %c0_172], %221 {strides = array<i32>} : memref<4x5x5x128xf32, #tpu.memory_space<vmem>>, vector<1x4x4x128xf32>,
    %c0_173 = arith.constant 0 : index
    %c0_174 = arith.constant 0 : index
    %c0_175 = arith.constant 0 : index
    %c0_176 = arith.constant 0 : index
    %222 = vector.load %arg11[%c0_173, %c0_174, %c0_175, %c0_176] : memref<4x5x5x128xf32, #tpu.memory_space<vmem>>, vector<1x4x4x128xf32>
    %223 = vector.shape_cast %222 : vector<1x4x4x128xf32> to vector<4x4x128xf32>
    %224 = vector.shape_cast %223 : vector<4x4x128xf32> to vector<16x128xf32>
    %225 = arith.truncf %224 : vector<16x128xf32> to vector<16x128xbf16>
    %c0_177 = arith.constant 0 : index
    %c0_178 = arith.constant 0 : index
    %c0_179 = arith.constant 0 : index
    %226 = vector.load %arg5[%c0_177, %c0_178, %c0_179] : memref<9x128x256xbf16, #tpu.memory_space<vmem>>, vector<1x128x256xbf16>
    %227 = vector.shape_cast %226 : vector<1x128x256xbf16> to vector<128x256xbf16>
    %cst_180 = arith.constant dense<0.000000e+00> : vector<16x256xf32>
    %228 = tpu.matmul %225, %227, %cst_180 {dimension_numbers = #tpu.dot_dimension_numbers<[1], [0], [0], [1], [0, 0, 1, 1], [], []>} : vector<16x128xbf16>, vector<128x256xbf16>, vector<16x256xf32> -> vector<16x256xf32>
    %c1_181 = arith.constant 1 : index
    %c0_182 = arith.constant 0 : index
    %c0_183 = arith.constant 0 : index
    %c0_184 = arith.constant 0 : index
    %229 = vector.load %arg11[%c1_181, %c0_182, %c0_183, %c0_184] : memref<4x5x5x128xf32, #tpu.memory_space<vmem>>, vector<1x4x4x128xf32>
    %230 = vector.shape_cast %229 : vector<1x4x4x128xf32> to vector<4x4x128xf32>
    %231 = vector.shape_cast %230 : vector<4x4x128xf32> to vector<16x128xf32>
    %232 = arith.truncf %231 : vector<16x128xf32> to vector<16x128xbf16>
    %c1_185 = arith.constant 1 : index
    %c0_186 = arith.constant 0 : index
    %c0_187 = arith.constant 0 : index
    %233 = vector.load %arg5[%c1_185, %c0_186, %c0_187] : memref<9x128x256xbf16, #tpu.memory_space<vmem>>, vector<1x128x256xbf16>
    %234 = vector.shape_cast %233 : vector<1x128x256xbf16> to vector<128x256xbf16>
    %cst_188 = arith.constant dense<0.000000e+00> : vector<16x256xf32>
    %235 = tpu.matmul %232, %234, %cst_188 {dimension_numbers = #tpu.dot_dimension_numbers<[1], [0], [0], [1], [0, 0, 1, 1], [], []>} : vector<16x128xbf16>, vector<128x256xbf16>, vector<16x256xf32> -> vector<16x256xf32>
    %236 = arith.addf %228, %235 : vector<16x256xf32>
    %c0_189 = arith.constant 0 : index
    %c0_190 = arith.constant 0 : index
    %c1_191 = arith.constant 1 : index
    %c0_192 = arith.constant 0 : index
    %237 = vector.load %arg11[%c0_189, %c0_190, %c1_191, %c0_192] : memref<4x5x5x128xf32, #tpu.memory_space<vmem>>, vector<1x4x4x128xf32>
    %238 = vector.shape_cast %237 : vector<1x4x4x128xf32> to vector<4x4x128xf32>
    %239 = vector.shape_cast %238 : vector<4x4x128xf32> to vector<16x128xf32>
    %240 = arith.truncf %239 : vector<16x128xf32> to vector<16x128xbf16>
    %c2_193 = arith.constant 2 : index
    %c0_194 = arith.constant 0 : index
    %c0_195 = arith.constant 0 : index
    %241 = vector.load %arg5[%c2_193, %c0_194, %c0_195] : memref<9x128x256xbf16, #tpu.memory_space<vmem>>, vector<1x128x256xbf16>
    %242 = vector.shape_cast %241 : vector<1x128x256xbf16> to vector<128x256xbf16>
    %cst_196 = arith.constant dense<0.000000e+00> : vector<16x256xf32>
    %243 = tpu.matmul %240, %242, %cst_196 {dimension_numbers = #tpu.dot_dimension_numbers<[1], [0], [0], [1], [0, 0, 1, 1], [], []>} : vector<16x128xbf16>, vector<128x256xbf16>, vector<16x256xf32> -> vector<16x256xf32>
    %244 = arith.addf %236, %243 : vector<16x256xf32>
    %c2_197 = arith.constant 2 : index
    %c0_198 = arith.constant 0 : index
    %c0_199 = arith.constant 0 : index
    %c0_200 = arith.constant 0 : index
    %245 = vector.load %arg11[%c2_197, %c0_198, %c0_199, %c0_200] : memref<4x5x5x128xf32, #tpu.memory_space<vmem>>, vector<1x4x4x128xf32>
    %246 = vector.shape_cast %245 : vector<1x4x4x128xf32> to vector<4x4x128xf32>
    %247 = vector.shape_cast %246 : vector<4x4x128xf32> to vector<16x128xf32>
    %248 = arith.truncf %247 : vector<16x128xf32> to vector<16x128xbf16>
    %c3_201 = arith.constant 3 : index
    %c0_202 = arith.constant 0 : index
    %c0_203 = arith.constant 0 : index
    %249 = vector.load %arg5[%c3_201, %c0_202, %c0_203] : memref<9x128x256xbf16, #tpu.memory_space<vmem>>, vector<1x128x256xbf16>
    %250 = vector.shape_cast %249 : vector<1x128x256xbf16> to vector<128x256xbf16>
    %cst_204 = arith.constant dense<0.000000e+00> : vector<16x256xf32>
    %251 = tpu.matmul %248, %250, %cst_204 {dimension_numbers = #tpu.dot_dimension_numbers<[1], [0], [0], [1], [0, 0, 1, 1], [], []>} : vector<16x128xbf16>, vector<128x256xbf16>, vector<16x256xf32> -> vector<16x256xf32>
    %252 = arith.addf %244, %251 : vector<16x256xf32>
    %c3_205 = arith.constant 3 : index
    %c0_206 = arith.constant 0 : index
    %c0_207 = arith.constant 0 : index
    %c0_208 = arith.constant 0 : index
    %253 = vector.load %arg11[%c3_205, %c0_206, %c0_207, %c0_208] : memref<4x5x5x128xf32, #tpu.memory_space<vmem>>, vector<1x4x4x128xf32>
    %254 = vector.shape_cast %253 : vector<1x4x4x128xf32> to vector<4x4x128xf32>
    %255 = vector.shape_cast %254 : vector<4x4x128xf32> to vector<16x128xf32>
    %256 = arith.truncf %255 : vector<16x128xf32> to vector<16x128xbf16>
    %c4_209 = arith.constant 4 : index
    %c0_210 = arith.constant 0 : index
    %c0_211 = arith.constant 0 : index
    %257 = vector.load %arg5[%c4_209, %c0_210, %c0_211] : memref<9x128x256xbf16, #tpu.memory_space<vmem>>, vector<1x128x256xbf16>
    %258 = vector.shape_cast %257 : vector<1x128x256xbf16> to vector<128x256xbf16>
    %cst_212 = arith.constant dense<0.000000e+00> : vector<16x256xf32>
    %259 = tpu.matmul %256, %258, %cst_212 {dimension_numbers = #tpu.dot_dimension_numbers<[1], [0], [0], [1], [0, 0, 1, 1], [], []>} : vector<16x128xbf16>, vector<128x256xbf16>, vector<16x256xf32> -> vector<16x256xf32>
    %260 = arith.addf %252, %259 : vector<16x256xf32>
    %c2_213 = arith.constant 2 : index
    %c0_214 = arith.constant 0 : index
    %c1_215 = arith.constant 1 : index
    %c0_216 = arith.constant 0 : index
    %261 = vector.load %arg11[%c2_213, %c0_214, %c1_215, %c0_216] : memref<4x5x5x128xf32, #tpu.memory_space<vmem>>, vector<1x4x4x128xf32>
    %262 = vector.shape_cast %261 : vector<1x4x4x128xf32> to vector<4x4x128xf32>
    %263 = vector.shape_cast %262 : vector<4x4x128xf32> to vector<16x128xf32>
    %264 = arith.truncf %263 : vector<16x128xf32> to vector<16x128xbf16>
    %c5_217 = arith.constant 5 : index
    %c0_218 = arith.constant 0 : index
    %c0_219 = arith.constant 0 : index
    %265 = vector.load %arg5[%c5_217, %c0_218, %c0_219] : memref<9x128x256xbf16, #tpu.memory_space<vmem>>, vector<1x128x256xbf16>
    %266 = vector.shape_cast %265 : vector<1x128x256xbf16> to vector<128x256xbf16>
    %cst_220 = arith.constant dense<0.000000e+00> : vector<16x256xf32>
    %267 = tpu.matmul %264, %266, %cst_220 {dimension_numbers = #tpu.dot_dimension_numbers<[1], [0], [0], [1], [0, 0, 1, 1], [], []>} : vector<16x128xbf16>, vector<128x256xbf16>, vector<16x256xf32> -> vector<16x256xf32>
    %268 = arith.addf %260, %267 : vector<16x256xf32>
    %c0_221 = arith.constant 0 : index
    %c1_222 = arith.constant 1 : index
    %c0_223 = arith.constant 0 : index
    %c0_224 = arith.constant 0 : index
    %269 = vector.load %arg11[%c0_221, %c1_222, %c0_223, %c0_224] : memref<4x5x5x128xf32, #tpu.memory_space<vmem>>, vector<1x4x4x128xf32>
    %270 = vector.shape_cast %269 : vector<1x4x4x128xf32> to vector<4x4x128xf32>
    %271 = vector.shape_cast %270 : vector<4x4x128xf32> to vector<16x128xf32>
    %272 = arith.truncf %271 : vector<16x128xf32> to vector<16x128xbf16>
    %c6_225 = arith.constant 6 : index
    %c0_226 = arith.constant 0 : index
    %c0_227 = arith.constant 0 : index
    %273 = vector.load %arg5[%c6_225, %c0_226, %c0_227] : memref<9x128x256xbf16, #tpu.memory_space<vmem>>, vector<1x128x256xbf16>
    %274 = vector.shape_cast %273 : vector<1x128x256xbf16> to vector<128x256xbf16>
    %cst_228 = arith.constant dense<0.000000e+00> : vector<16x256xf32>
    %275 = tpu.matmul %272, %274, %cst_228 {dimension_numbers = #tpu.dot_dimension_numbers<[1], [0], [0], [1], [0, 0, 1, 1], [], []>} : vector<16x128xbf16>, vector<128x256xbf16>, vector<16x256xf32> -> vector<16x256xf32>
    %276 = arith.addf %268, %275 : vector<16x256xf32>
    %c1_229 = arith.constant 1 : index
    %c1_230 = arith.constant 1 : index
    %c0_231 = arith.constant 0 : index
    %c0_232 = arith.constant 0 : index
    %277 = vector.load %arg11[%c1_229, %c1_230, %c0_231, %c0_232] : memref<4x5x5x128xf32, #tpu.memory_space<vmem>>, vector<1x4x4x128xf32>
    %278 = vector.shape_cast %277 : vector<1x4x4x128xf32> to vector<4x4x128xf32>
    %279 = vector.shape_cast %278 : vector<4x4x128xf32> to vector<16x128xf32>
    %280 = arith.truncf %279 : vector<16x128xf32> to vector<16x128xbf16>
    %c7_233 = arith.constant 7 : index
    %c0_234 = arith.constant 0 : index
    %c0_235 = arith.constant 0 : index
    %281 = vector.load %arg5[%c7_233, %c0_234, %c0_235] : memref<9x128x256xbf16, #tpu.memory_space<vmem>>, vector<1x128x256xbf16>
    %282 = vector.shape_cast %281 : vector<1x128x256xbf16> to vector<128x256xbf16>
    %cst_236 = arith.constant dense<0.000000e+00> : vector<16x256xf32>
    %283 = tpu.matmul %280, %282, %cst_236 {dimension_numbers = #tpu.dot_dimension_numbers<[1], [0], [0], [1], [0, 0, 1, 1], [], []>} : vector<16x128xbf16>, vector<128x256xbf16>, vector<16x256xf32> -> vector<16x256xf32>
    %284 = arith.addf %276, %283 : vector<16x256xf32>
    %c0_237 = arith.constant 0 : index
    %c1_238 = arith.constant 1 : index
    %c1_239 = arith.constant 1 : index
    %c0_240 = arith.constant 0 : index
    %285 = vector.load %arg11[%c0_237, %c1_238, %c1_239, %c0_240] : memref<4x5x5x128xf32, #tpu.memory_space<vmem>>, vector<1x4x4x128xf32>
    %286 = vector.shape_cast %285 : vector<1x4x4x128xf32> to vector<4x4x128xf32>
    %287 = vector.shape_cast %286 : vector<4x4x128xf32> to vector<16x128xf32>
    %288 = arith.truncf %287 : vector<16x128xf32> to vector<16x128xbf16>
    %c8_241 = arith.constant 8 : index
    %c0_242 = arith.constant 0 : index
    %c0_243 = arith.constant 0 : index
    %289 = vector.load %arg5[%c8_241, %c0_242, %c0_243] : memref<9x128x256xbf16, #tpu.memory_space<vmem>>, vector<1x128x256xbf16>
    %290 = vector.shape_cast %289 : vector<1x128x256xbf16> to vector<128x256xbf16>
    %cst_244 = arith.constant dense<0.000000e+00> : vector<16x256xf32>
    %291 = tpu.matmul %288, %290, %cst_244 {dimension_numbers = #tpu.dot_dimension_numbers<[1], [0], [0], [1], [0, 0, 1, 1], [], []>} : vector<16x128xbf16>, vector<128x256xbf16>, vector<16x256xf32> -> vector<16x256xf32>
    %292 = arith.addf %284, %291 : vector<16x256xf32>
    %c0_245 = arith.constant 0 : index
    %c0_246 = arith.constant 0 : index
    %293 = vector.load %arg6[%c0_245, %c0_246] : memref<1x256xf32, #tpu.memory_space<vmem>>, vector<1x256xf32>
    %294 = vector.broadcast %293 : vector<1x256xf32> to vector<16x256xf32>
    %295 = arith.addf %292, %294 : vector<16x256xf32>
    %cst_247 = arith.constant 2.000000e-01 : f32
    %296 = vector.broadcast %cst_247 : f32 to vector<16x256xf32>
    %297 = arith.mulf %296, %295 : vector<16x256xf32>
    %298 = arith.maximumf %295, %297 : vector<16x256xf32>
    %c0_248 = arith.constant 0 : index
    %c0_249 = arith.constant 0 : index
    %299 = vector.load %arg7[%c0_248, %c0_249] : memref<16x256xf32, #tpu.memory_space<vmem>>, vector<16x256xf32>
    %300 = arith.mulf %298, %299 : vector<16x256xf32>
    %cst_250 = arith.constant dense<0.000000e+00> : vector<16xf32>
    %301 = vector.multi_reduction <add>, %300, %cst_250 [1] : vector<16x256xf32> to vector<16xf32>
    %302 = vector.shape_cast %301 : vector<16xf32> to vector<16x1xf32>
    %cst_251 = arith.constant dense<0.000000e+00> : vector<1xf32>
    %303 = vector.multi_reduction <add>, %302, %cst_251 [0] : vector<16x1xf32> to vector<1xf32>
    %304 = vector.shape_cast %303 : vector<1xf32> to vector<1x1xf32>
    %cst_252 = arith.constant 0.000000e+00 : f32
    %305 = vector.broadcast %cst_252 : f32 to vector<1x1xf32>
    %306 = arith.subf %305, %304 : vector<1x1xf32>
    %307 = math.exp %306 : vector<1x1xf32>
    %cst_253 = arith.constant 1.000000e+00 : f32
    %308 = vector.broadcast %cst_253 : f32 to vector<1x1xf32>
    %309 = arith.addf %308, %307 : vector<1x1xf32>
    %cst_254 = arith.constant 1.000000e+00 : f32
    %310 = vector.broadcast %cst_254 : f32 to vector<1x1xf32>
    %311 = arith.divf %310, %309 : vector<1x1xf32>
    %c0_255 = arith.constant 0 : index
    %c0_256 = arith.constant 0 : index
    %c0_257 = arith.constant 0 : index
    %312 = vector.load %arg8[%c0_255, %c0_256, %c0_257] : memref<1x1x1xf32, #tpu.memory_space<vmem>>, vector<1x1x1xf32>
    %313 = vector.shape_cast %312 : vector<1x1x1xf32> to vector<1x1xf32>
    %314 = vector.shape_cast %311 : vector<1x1xf32> to vector<1x1x1xf32>
    tpu.vector_store %arg8[%c0_255, %c0_256, %c0_257], %314 {strides = array<i32>} : memref<1x1x1xf32, #tpu.memory_space<vmem>>, vector<1x1x1xf32>,
    return
  }
  func.func @transform_0(%arg0: i32) -> (i32, i32, i32) {
    %c0_i32 = arith.constant 0 : i32
    %c0_i32_0 = arith.constant 0 : i32
    %c0_i32_1 = arith.constant 0 : i32
    return %arg0, %c0_i32, %c0_i32_0 : i32, i32, i32
  }
  func.func @transform_1(%arg0: i32) -> (i32, i32) {
    %c0_i32 = arith.constant 0 : i32
    %c0_i32_0 = arith.constant 0 : i32
    %c0_i32_1 = arith.constant 0 : i32
    return %c0_i32, %c0_i32_0 : i32, i32
  }
  func.func @transform_2(%arg0: i32) -> (i32, i32, i32) {
    %c0_i32 = arith.constant 0 : i32
    %c0_i32_0 = arith.constant 0 : i32
    %c0_i32_1 = arith.constant 0 : i32
    %c0_i32_2 = arith.constant 0 : i32
    return %c0_i32, %c0_i32_0, %c0_i32_1 : i32, i32, i32
  }
  func.func @transform_3(%arg0: i32) -> (i32, i32) {
    %c0_i32 = arith.constant 0 : i32
    %c0_i32_0 = arith.constant 0 : i32
    %c0_i32_1 = arith.constant 0 : i32
    return %c0_i32, %c0_i32_0 : i32, i32
  }
  func.func @transform_4(%arg0: i32) -> (i32, i32, i32) {
    %c0_i32 = arith.constant 0 : i32
    %c0_i32_0 = arith.constant 0 : i32
    %c0_i32_1 = arith.constant 0 : i32
    %c0_i32_2 = arith.constant 0 : i32
    return %c0_i32, %c0_i32_0, %c0_i32_1 : i32, i32, i32
  }
  func.func @transform_5(%arg0: i32) -> (i32, i32) {
    %c0_i32 = arith.constant 0 : i32
    %c0_i32_0 = arith.constant 0 : i32
    %c0_i32_1 = arith.constant 0 : i32
    return %c0_i32, %c0_i32_0 : i32, i32
  }
  func.func @transform_6(%arg0: i32) -> (i32, i32) {
    %c0_i32 = arith.constant 0 : i32
    %c0_i32_0 = arith.constant 0 : i32
    %c0_i32_1 = arith.constant 0 : i32
    return %c0_i32, %c0_i32_0 : i32, i32
  }
  func.func @transform_7(%arg0: i32) -> (i32, i32, i32) {
    %c0_i32 = arith.constant 0 : i32
    %c0_i32_0 = arith.constant 0 : i32
    %c0_i32_1 = arith.constant 0 : i32
    return %arg0, %c0_i32, %c0_i32_0 : i32, i32, i32
  }
}

</mosaic_0001>

<bundles_post_ra>
// kernel: conditional_cnn_discriminator_forward.1
= control target key start
LH: loop header
LB: loop body
LE: loop exit
PB: predicated region body
PF: predicated region fallthrough
CT: control target
= control target key end

     0   :  { %s19050_s24 = smov 0   ;;  %s22366_s0 = inlined_call_operand.vmem [shape: bf16[2,196,32], index: 0, kind: input, shape index: {}]   ;;  %s22367_s1 = inlined_call_operand.vmem [shape: bf16[32,64], index: 1, kind: input, shape index: {}]   ;;  %s22368_s2 = inlined_call_operand.vmem [shape: bf16[16,64,128], index: 2, kind: input, shape index: {}]   ;;  %s22369_s3 = inlined_call_operand.vmem [shape: f32[1,128], index: 3, kind: input, shape index: {}]   ;;  %s22370_s4 = inlined_call_operand.vmem [shape: bf16[9,128,256], index: 4, kind: input, shape index: {}]   ;;  %s22371_s5 = inlined_call_operand.vmem [shape: f32[1,256], index: 5, kind: input, shape index: {}]   ;;  %s22372_s6 = inlined_call_operand.vmem [shape: f32[16,256], index: 6, kind: input, shape index: {}]   ;;  %s22373_s7 = inlined_call_operand.vmem [shape: f32[2,1,1], index: 7, kind: output, shape index: {}]  }
   0x1 LB: > { %s17367_s25 = sadd.s32 4294967295, %s19003_s24   ;;  %p17371_p0 = scmp.ge.s32.totalorder %s19003_s24, 1  ;;  %s19003_s24 = sphi %s19050_s24, %s17_s24  }
   0x2   : > { %p237_p1 = scmp.lt.s32.totalorder %s19003_s24, 3 }
   0x4   : > { %p238_p2 = pnand %p17371_p0, %p237_p1 }
   0x5   : > { %v18559_v0 = vld [vmem:[%s22367_s1] sm:$0xff] (!%p238_p2)   ;;  %v19005_v1 = vmov (!%p238_p2), 0.0   ;;  %v18560_v2 = vld [vmem:[%s22367_s1 + $0x8] sm:$0xff] (!%p238_p2)   ;;  %p267_p3 = scmp.lt.s32.totalorder (!%p238_p2), %s17367_s25, 1  ;;  %vm380_vm0 = vcmask (!%p238_p2), 261120   ;;  %vm19006_vm1 = vmmov (!%p238_p2), 0   ;;  %v668_v20 = vlaneseq (!%p238_p2) }
   0x6   : > { %241 = sbr.rel (%p238_p2) target bundleno = 1962 (0x7aa), region = 48  ;;  %18137 = vmatprep.subr.bf16.mxu0 (!%p238_p2), %v19005_v1  ;;  %14677 = vst [vmem:[#allocation3] sm:$0xff] (!%p238_p2), %v19005_v1  ;;  %14678 = vst [vmem:[#allocation3 + $0x8] sm:$0xff] (!%p238_p2), %v19005_v1  ;;  %18449 = vmatprep.subr.bf16.mxu1 (!%p238_p2), %v19005_v1  ;;  %vm606_vm2 = vcmask (!%p238_p2), 523264   ;;  %v18574_v16 = vld [vmem:[%s22368_s2 + $0x20] sm:$0xff] (!%p238_p2)   ;;  %v18575_v19 = vld [vmem:[%s22368_s2 + $0x28] sm:$0xff] (!%p238_p2)  }
   0x7   : > { %14679 = vst [vmem:[#allocation3 + $0x10] sm:$0xff] (!%p238_p2), %v19005_v1  ;;  %14680 = vst [vmem:[#allocation3 + $0x18] sm:$0xff] (!%p238_p2), %v19005_v1  ;;  %18138 = vmatpush3.bf16.msra.mxu0 (!%p238_p2), %v18559_v0  ;;  %18451 = vmatpush3.bf16.msra.mxu1 (!%p238_p2), %v18559_v0  ;;  %v19007_v17 = vmov (!%p238_p2), 1966171168   ;;  %v19008_v23 = vmov (!%p238_p2), 1983009808  }
   0x8   : > { %14681 = vst [vmem:[#allocation3 + $0x20] sm:$0xff] (!%p238_p2), %v19005_v1  ;;  %14682 = vst [vmem:[#allocation3 + $0x28] sm:$0xff] (!%p238_p2), %v19005_v1  ;;  %18139 = vmatprep.subr.bf16.mxu0 (!%p238_p2), %v19005_v1  ;;  %18450 = vmatprep.subr.bf16.mxu1 (!%p238_p2), %v19005_v1  ;;  %v2117_v18 = vunpack.c.l.s4 (!%p238_p2), %v19007_v17  ;;  %v666_v24 = vunpack.c.l.s4 (!%p238_p2), %v19008_v23  ;;  %v669_v25 = vshrl.u32 (!%p238_p2), %v668_v20, 7  ;;  %vm1276_vm3 = vcmask (!%p238_p2), 1042434  }
   0x9   : > { %14683 = vst [vmem:[#allocation3 + $0x30] sm:$0xff] (!%p238_p2), %v19005_v1  ;;  %14684 = vst [vmem:[#allocation3 + $0x38] sm:$0xff] (!%p238_p2), %v19005_v1  ;;  %18141 = vmatprep.mubr.msk.bf16.mxu0 (!%p238_p2), %vm19006_vm1, %v19005_v1  ;;  %18165 = vmatprep.mubr.msk.bf16.mxu1 (!%p238_p2), %vm19006_vm1, %v19005_v1  ;;  %vm1278_vm4 = vcmask (!%p238_p2), 1043459   ;;  %vm1536_vm5 = vcmask (!%p238_p2), 1041409   ;;  %vm1280_vm6 = vcmask (!%p238_p2), 1044484   ;;  %vm1282_vm7 = vcmask (!%p238_p2), 1045509  }
   0xa   : > { %15358 = vst [vmem:[#allocation4] sm:$0x1f] (!%p238_p2), %v19005_v1  ;;  %15359 = vst [vmem:[#allocation4 + $0x8] sm:$0x1f] (!%p238_p2), %v19005_v1  ;;  %v2118_v21 = vunpack.c.0.s8 (!%p238_p2), %v2117_v18  ;;  %v667_v28 = vunpack.c.0.s8 (!%p238_p2), %v666_v24  ;;  %v19234_v33 = vsub.s32 (!%p238_p2), 1, %v669_v25  ;;  %v19236_v36 = vsub.s32 (!%p238_p2), 0, %v669_v25 }
   0xb   : > { %15360 = vst [vmem:[#allocation4 + $0x10] sm:$0x1f] (!%p238_p2), %v19005_v1  ;;  %15361 = vst [vmem:[#allocation4 + $0x18] sm:$0x1f] (!%p238_p2), %v19005_v1  ;;  %18140 = vmatpush3.bf16.msra.mxu0 (!%p238_p2), %v18560_v2  ;;  %18452 = vmatpush3.bf16.msra.mxu1 (!%p238_p2), %v18560_v2  ;;  %vm1284_vm8 = vcmask (!%p238_p2), 1046534   ;;  %vm1286_vm9 = vcmask (!%p238_p2), 1047559  }
   0xc   : > { %15362 = vst [vmem:[#allocation4 + $0x20] sm:$0x1f] (!%p238_p2), %v19005_v1  ;;  %15363 = vst [vmem:[#allocation4 + $0x28] sm:$0x1f] (!%p238_p2), %v19005_v1  ;;  %18193 = vmatprep.subr.bf16.mxu1 (!%p238_p2), %v18574_v16  ;;  %v19228_v27 = vsub.s32 (!%p238_p2), %v2118_v21, %v669_v25  ;;  %v19232_v32 = vsub.s32 (!%p238_p2), %v667_v28, %v669_v25  ;;  %vm1332_vm10 = vcmask (!%p238_p2), 523265   ;;  %vm1587_vm11 = vcmask (!%p238_p2), 522240  }
   0xd   : > { %15364 = vst [vmem:[#allocation4 + $0x30] sm:$0x1f] %v19005_v1  ;;  %15365 = vst [vmem:[#allocation4 + $0x38] sm:$0x1f] %v19005_v1  ;;  %s22375_s25 = smov (!%p267_p3, %s17367_s25), 1  ;;  %vm17318_vm12 = vcmask 0  }
   0xe   : > { %15366 = vst [vmem:[#allocation4 + $0x40] sm:$0x1f] %v19005_v1  ;;  %15367 = vst [vmem:[#allocation4 + $0x48] sm:$0x1f] %v19005_v1  ;;  %s18545_s30 = smul.u32 100, %s22375_s25  ;;  %s274_s23 = scalar_lea.vmem %s22373_s7, %s22375_s25 }
   0xf   : > { %15368 = vst [vmem:[#allocation4 + $0x50] sm:$0x1f] %v19005_v1  ;;  %15369 = vst [vmem:[#allocation4 + $0x58] sm:$0x1f] %v19005_v1 }
  0x10   : > { %15370 = vst [vmem:[#allocation4 + $0x60] sm:$0x1f] %v19005_v1  ;;  %15371 = vst [vmem:[#allocation4 + $0x68] sm:$0x1f] %v19005_v1  ;;  %s19108_s10 = scalar_lea.vmem %s22366_s0, %s18545_s30 }
  0x11   : > { %15373 = vst [vmem:[#allocation4 + $0x78] sm:$0x1f] %v19005_v1  ;;  %15374 = vst [vmem:[#allocation4 + $0x80] sm:$0x1f] %v19005_v1  ;;  %v18561_v3 = vld [vmem:[%s19108_s10] sm:$0xff]   ;;  %v18562_v4 = vld [vmem:[%s19108_s10 + $0x30] sm:$0xff]  }
  0x12   : > { %15375 = vst [vmem:[#allocation4 + $0x88] sm:$0x1f] %v19005_v1  ;;  %15376 = vst [vmem:[#allocation4 + $0x90] sm:$0x1f] %v19005_v1  ;;  %18142 = vmatmul.mubr.msk.bf16.vlgmr.msra.gmra.mrb[0].mxu0 %vm380_vm0, %v18561_v3  ;;  %18166 = vmatmul.mubr.msk.bf16.vlgmr.msra.gmra.mrb[0].mxu1 %vm380_vm0, %v18562_v4  ;;  %v18563_v5 = vld [vmem:[%s19108_s10 + $0x8] sm:$0xff]   ;;  %v18564_v6 = vld [vmem:[%s19108_s10 + $0x38] sm:$0xff]  }
  0x13   : > { %18145 = vmatprep.mubr.msk.bf16.mxu0 %vm19006_vm1, %v19005_v1  ;;  %18169 = vmatprep.mubr.msk.bf16.mxu1 %vm19006_vm1, %v19005_v1  ;;  %v18565_v7 = vld [vmem:[%s19108_s10 + $0x10] sm:$0xff]   ;;  %v18566_v8 = vld [vmem:[%s19108_s10 + $0x40] sm:$0xff]   ;;  %v18567_v9 = vld [vmem:[%s19108_s10 + $0x18] sm:$0xff]   ;;  %623 = vst.msk [vmem:[#allocation2 + $0x80] sm:$0xff] %vm606_vm2, %v19005_v1 }
  0x14   : > { %v18568_v10 = vld [vmem:[%s19108_s10 + $0x48] sm:$0xff]   ;;  %v18569_v11 = vld [vmem:[%s19108_s10 + $0x20] sm:$0xff]   ;;  %v18570_v12 = vld [vmem:[%s19108_s10 + $0x50] sm:$0xff]   ;;  %631 = vst.msk [vmem:[#allocation2 + $0xc0] sm:$0xff] %vm606_vm2, %v19005_v1  ;;  %18194 = vmatpush3.bf16.msra.mxu1 %v18574_v16 }
  0x15   : > { %v18571_v13 = vld [vmem:[%s19108_s10 + $0x28] sm:$0xff]   ;;  %v18572_v14 = vld [vmem:[%s19108_s10 + $0x58] sm:$0xff]   ;;  %v18573_v15 = vld [vmem:[%s19108_s10 + $0x60] ss:$0 sps:$4 sm:$0x33]   ;;  %607 = vst.msk [vmem:[#allocation2] sm:$0xff] %vm606_vm2, %v19005_v1  ;;  %18195 = vmatprep.subr.bf16.mxu1 %v18575_v19 }
  0x16   : > { %608 = vst.msk [vmem:[#allocation2 + $0x8] sm:$0xff] %vm606_vm2, %v19005_v1  ;;  %609 = vst.msk [vmem:[#allocation2 + $0x10] sm:$0xff] %vm606_vm2, %v19005_v1 }
  0x17   : > { %610 = vst.msk [vmem:[#allocation2 + $0x18] sm:$0xff] %vm606_vm2, %v19005_v1  ;;  %611 = vst.msk [vmem:[#allocation2 + $0x20] sm:$0xff] %vm606_vm2, %v19005_v1 }
  0x18   : > { %612 = vst.msk [vmem:[#allocation2 + $0x28] sm:$0xff] %vm606_vm2, %v19005_v1  ;;  %613 = vst.msk [vmem:[#allocation2 + $0x30] sm:$0xff] %vm606_vm2, %v19005_v1  ;;  %18196 = vmatpush3.bf16.msra.mxu1 %v18575_v19 }
  0x19   : > { %614 = vst.msk [vmem:[#allocation2 + $0x38] sm:$0xff] %vm606_vm2, %v19005_v1  ;;  %615 = vst.msk [vmem:[#allocation2 + $0x40] sm:$0xff] %vm606_vm2, %v19005_v1 }
  0x1a   : > { %18146 = vmatmul.mubr.msk.bf16.gmra.mrb[4].mxu0 %vm380_vm0, %v18563_v5  ;;  %18170 = vmatmul.mubr.msk.bf16.gmra.mrb[4].mxu1 %vm380_vm0, %v18564_v6  ;;  %616 = vst.msk [vmem:[#allocation2 + $0x48] sm:$0xff] %vm606_vm2, %v19005_v1  ;;  %617 = vst.msk [vmem:[#allocation2 + $0x50] sm:$0xff] %vm606_vm2, %v19005_v1 }
  0x1b   : > { %18149 = vmatprep.mubr.msk.bf16.mxu0 %vm19006_vm1, %v19005_v1  ;;  %18173 = vmatprep.mubr.msk.bf16.mxu1 %vm19006_vm1, %v19005_v1  ;;  %618 = vst.msk [vmem:[#allocation2 + $0x58] sm:$0xff] %vm606_vm2, %v19005_v1  ;;  %619 = vst.msk [vmem:[#allocation2 + $0x60] sm:$0xff] %vm606_vm2, %v19005_v1 }
  0x1c   : > { %620 = vst.msk [vmem:[#allocation2 + $0x68] sm:$0xff] %vm606_vm2, %v19005_v1  ;;  %621 = vst.msk [vmem:[#allocation2 + $0x70] sm:$0xff] %vm606_vm2, %v19005_v1 }
  0x1d   : > { %622 = vst.msk [vmem:[#allocation2 + $0x78] sm:$0xff] %vm606_vm2, %v19005_v1  ;;  %624 = vst.msk [vmem:[#allocation2 + $0x88] sm:$0xff] %vm606_vm2, %v19005_v1 }
  0x1e   : > { %625 = vst.msk [vmem:[#allocation2 + $0x90] sm:$0xff] %vm606_vm2, %v19005_v1  ;;  %626 = vst.msk [vmem:[#allocation2 + $0x98] sm:$0xff] %vm606_vm2, %v19005_v1 }
  0x1f   : > { %627 = vst.msk [vmem:[#allocation2 + $0xa0] sm:$0xff] %vm606_vm2, %v19005_v1  ;;  %628 = vst.msk [vmem:[#allocation2 + $0xa8] sm:$0xff] %vm606_vm2, %v19005_v1 }
  0x20   : > { %629 = vst.msk [vmem:[#allocation2 + $0xb0] sm:$0xff] %vm606_vm2, %v19005_v1  ;;  %630 = vst.msk [vmem:[#allocation2 + $0xb8] sm:$0xff] %vm606_vm2, %v19005_v1  ;;  %v2779_v22 = vld [vmem:[#allocation2 + $0x40] sm:$0x7f] }
  0x21   : > { %632 = vst.msk [vmem:[#allocation2 + $0xc8] sm:$0xff] %vm606_vm2, %v19005_v1  ;;  %633 = vst.msk [vmem:[#allocation2 + $0xd0] sm:$0xff] %vm606_vm2, %v19005_v1  ;;  %v2793_v26 = vcombine.high %v2779_v22, %v2779_v22  ;;  %v2800_v29 = vrot.slane %v2779_v22, %v19228_v27 }
  0x22   : > { %18150 = vmatmul.mubr.msk.bf16.gmra.mrb[8].mxu0 %vm380_vm0, %v18565_v7  ;;  %18174 = vmatmul.mubr.msk.bf16.gmra.mrb[8].mxu1 %vm380_vm0, %v18566_v8  ;;  %634 = vst.msk [vmem:[#allocation2 + $0xd8] sm:$0xff] %vm606_vm2, %v19005_v1  ;;  %635 = vst.msk [vmem:[#allocation2 + $0xe0] sm:$0xff] %vm606_vm2, %v19005_v1 }
  0x23   : > { %18153 = vmatprep.mubr.msk.bf16.mxu0 %vm19006_vm1, %v19005_v1  ;;  %18177 = vmatprep.mubr.msk.bf16.mxu1 %vm19006_vm1, %v19005_v1  ;;  %636 = vst.msk [vmem:[#allocation2 + $0xe8] sm:$0xff] %vm606_vm2, %v19005_v1  ;;  %637 = vst.msk [vmem:[#allocation2 + $0xf0] sm:$0xff] %vm606_vm2, %v19005_v1  ;;  %v2807_v30 = vrot.slane %v2793_v26, %v19228_v27  ;;  %v2808_v34 = vcombine.high %v2800_v29, %v2800_v29 }
  0x24   : > { %638 = vst.msk [vmem:[#allocation2 + $0xf8] sm:$0xff] %vm606_vm2, %v19005_v1  ;;  %v19242_v51 = vrot.slane %v2800_v29, %v19228_v27 }
  0x25   : > { %v2809_v39 = vcombine.high %v2807_v30, %v2807_v30  ;;  %v19239_v43 = vrot.slane %v2807_v30, %v19228_v27  ;;  %v19245_v52 = vrot.slane %v2808_v34, %v19228_v27 }
  0x27   : > { %v19249_v56 = vrot.slane %v2809_v39, %v19228_v27  ;;  %v2839_v60 = vcombine.high %v19239_v43, %v19239_v43 }
  0x2a   : > { %18154 = vmatmul.mubr.msk.bf16.gmra.mrb[12].mxu0 %vm380_vm0, %v18567_v9  ;;  %18178 = vmatmul.mubr.msk.bf16.gmra.mrb[12].mxu1 %vm380_vm0, %v18568_v10 }
  0x2b   : > { %18157 = vmatprep.mubr.msk.bf16.mxu0 %vm19006_vm1, %v19005_v1  ;;  %18181 = vmatprep.mubr.msk.bf16.mxu1 %vm19006_vm1, %v19005_v1 }
  0x32   : > { %18158 = vmatmul.mubr.msk.bf16.gmra.mrb[16].mxu0 %vm380_vm0, %v18569_v11  ;;  %18182 = vmatmul.mubr.msk.bf16.gmra.mrb[16].mxu1 %vm380_vm0, %v18570_v12 }
  0x33   : > { %18161 = vmatprep.mubr.msk.bf16.mxu0 %vm19006_vm1, %v19005_v1  ;;  %18185 = vmatprep.mubr.msk.bf16.mxu1 %vm19006_vm1, %v19005_v1 }
  0x3a   : > { %18162 = vmatmul.mubr.msk.bf16.gmra.mrb[20].mxu0 %vm380_vm0, %v18571_v13  ;;  %18186 = vmatmul.mubr.msk.bf16.gmra.mrb[20].mxu1 %vm380_vm0, %v18572_v14 }
  0x3b   : > { %18189 = vmatprep.mubr.msk.bf16.mxu1 %vm19006_vm1, %v19005_v1 }
  0x42   : > { %18190 = vmatmul.mubr.msk.bf16.gmra.mrb[24].mxu1 %vm380_vm0, %v18573_v15 }
  0xe5   : > { %v454_v31 = vpop.f32.mrb[0].mxu0  ;;  %v502_v38 = vpop.f32.mrb[0].mxu1 }
  0xe6   : > { %v556_v35 = vmul.f32 0.2, %v454_v31  ;;  %v18143_v37 = vpop.f32.mrb[1].mxu0  ;;  %v568_v41 = vmul.f32 0.2, %v502_v38  ;;  %v18167_v42 = vpop.f32.mrb[1].mxu1 }
  0xe7   : > { %v457_v40 = vpop.f32.mrb[2].mxu0  ;;  %v505_v47 = vpop.f32.mrb[2].mxu1  ;;  %v18576_v37 = vld [vmem:[%s22368_s2 + $0x30] sm:$0xff]  }
  0xe8   : > { %v581_v44 = vmax.f32 %v454_v31, %v556_v35  ;;  %v557_v45 = vmul.f32 0.2, %v457_v40  ;;  %v18144_v46 = vpop.f32.mrb[3].mxu0  ;;  %v593_v48 = vmax.f32 %v502_v38, %v568_v41  ;;  %v569_v49 = vmul.f32 0.2, %v505_v47  ;;  %v18168_v50 = vpop.f32.mrb[3].mxu1  ;;  %18197 = vmatprep.subr.bf16.mxu1 %v18576_v37 }
  0xe9   : > { %18198 = vmatpush3.bf16.msra.mxu1 %v18576_v37 }
  0xea   : > { %v664_v53 = vcombine.high %v581_v44, %v581_v44  ;;  %v671_v54 = vrot.slane %v581_v44, %v19232_v32  ;;  %v582_v55 = vmax.f32 %v457_v40, %v557_v45  ;;  %v868_v57 = vcombine.high %v593_v48, %v593_v48 }
  0xeb   : > { %v19252_v58 = vrot.slane %v593_v48, %v19232_v32  ;;  %v19254_v59 = vmax.f32 %v505_v47, %v569_v49 }
  0xec   : > { %v678_v61 = vrot.slane %v664_v53, %v19232_v32  ;;  %v679_v62 = vcombine.high %v671_v54, %v671_v54  ;;  %v1598_v63 = vrot.slane %v671_v54, %v19234_v33  ;;  %v1851_v0 = vrot.slane %v671_v54, %v19236_v36 }
  0xed   : > { %v681_v1 = vcombine.high %v582_v55, %v582_v55  ;;  %v688_v2 = vrot.slane %v582_v55, %v19232_v32  ;;  %v882_v3 = vrot.slane %v868_v57, %v19232_v32  ;;  %v883_v4 = vcombine.high %v19252_v58, %v19252_v58  ;;  %v19265_v5 = vpop.f32.mrb[4].mxu0  ;;  %v19270_v11 = vpop.f32.mrb[4].mxu1 }
  0xee   : > { %v680_v6 = vcombine.high %v678_v61, %v678_v61  ;;  %v1602_v7 = vrot.slane %v679_v62, %v19234_v33  ;;  %v1606_v8 = vrot.slane %v678_v61, %v19234_v33  ;;  %v1855_v9 = vrot.slane %v679_v62, %v19236_v36  ;;  %v18147_v10 = vpop.f32.mrb[5].mxu0  ;;  %v18171_v17 = vpop.f32.mrb[5].mxu1 }
  0xef   : > { %v1859_v12 = vrot.slane %v678_v61, %v19236_v36  ;;  %v695_v13 = vrot.slane %v681_v1, %v19232_v32  ;;  %v696_v14 = vcombine.high %v688_v2, %v688_v2  ;;  %v1614_v15 = vrot.slane %v688_v2, %v19234_v33  ;;  %v19275_v16 = vpop.f32.mrb[6].mxu0  ;;  %v19281_v23 = vpop.f32.mrb[6].mxu1 }
  0xf0   : > { %v1610_v18 = vrot.slane %v680_v6, %v19234_v33  ;;  %v1791_v19 = vsel %vm1276_vm3, %v1602_v7, %v1598_v63  ;;  %v1863_v20 = vrot.slane %v680_v6, %v19236_v36  ;;  %v2044_v21 = vsel %vm1536_vm5, %v1855_v9, %v1851_v0  ;;  %v18148_v22 = vpop.f32.mrb[7].mxu0  ;;  %v18172_v29 = vpop.f32.mrb[7].mxu1 }
  0xf1   : > { %v1792_v24 = vsel %vm1278_vm4, %v1606_v8, %v1791_v19  ;;  %v2045_v25 = vsel %vm1276_vm3, %v1859_v12, %v2044_v21  ;;  %v19285_v26 = vcombine.high %v695_v13, %v695_v13  ;;  %v1618_v28 = vrot.slane %v696_v14, %v19234_v33 }
  0xf2   : > { %v1622_v30 = vrot.slane %v695_v13, %v19234_v33  ;;  %v1793_v31 = vsel %vm1280_vm6, %v1610_v18, %v1792_v24  ;;  %v1867_v34 = vrot.slane %v688_v2, %v19236_v36  ;;  %v1871_v35 = vrot.slane %v696_v14, %v19236_v36 }
  0xf3   : > { %v1083_v38 = vrot.slane %v19285_v26, %v19234_v33  ;;  %v1343_v39 = vrot.slane %v19285_v26, %v19236_v36  ;;  %v1794_v40 = vsel %vm1282_vm7, %v1614_v15, %v1793_v31  ;;  %v1875_v41 = vrot.slane %v695_v13, %v19236_v36 }
  0xf4   : > { %v1795_v42 = vsel %vm1284_vm8, %v1618_v28, %v1794_v40  ;;  %v2046_v44 = vsel %vm1278_vm4, %v1863_v20, %v2045_v25  ;;  %v884_v45 = vcombine.high %v882_v3, %v882_v3  ;;  %v1167_v46 = vrot.slane %v883_v4, %v19234_v33 }
  0xf5   : > { %v1796_v47 = vsel %vm1286_vm9, %v1622_v30, %v1795_v42  ;;  %v2047_v48 = vsel %vm1280_vm6, %v1867_v34, %v2046_v44  ;;  %v1171_v49 = vrot.slane %v882_v3, %v19234_v33  ;;  %v1427_v50 = vrot.slane %v883_v4, %v19236_v36  ;;  %v19308_v53 = vpop.f32.mrb[8].mxu0  ;;  %v19315_v62 = vpop.f32.mrb[8].mxu1 }
  0xf6   : > { %1841 = vst.msk [vmem:[#allocation2 + $0x80] sm:$0xfe] %vm1332_vm10, %v1796_v47  ;;  %v2048_v54 = vsel %vm1282_vm7, %v1871_v35, %v2047_v48  ;;  %v1175_v55 = vrot.slane %v884_v45, %v19234_v33  ;;  %v1431_v57 = vrot.slane %v882_v3, %v19236_v36  ;;  %v1435_v61 = vrot.slane %v884_v45, %v19236_v36  ;;  %v18151_v63 = vpop.f32.mrb[9].mxu0  ;;  %v18175_v7 = vpop.f32.mrb[9].mxu1 }
  0xf7   : > { %v2049_v0 = vsel %vm1284_vm8, %v1875_v41, %v2048_v54  ;;  %v1300_v1 = vsel %vm1276_vm3, %v1171_v49, %v1167_v46  ;;  %v1706_v2 = vrot.slane %v19252_v58, %v19234_v33  ;;  %v1959_v4 = vrot.slane %v19252_v58, %v19236_v36  ;;  %v19323_v6 = vpop.f32.mrb[10].mxu0  ;;  %v19332_v13 = vpop.f32.mrb[10].mxu1 }
  0xf8   : > { %2094 = vst.msk [vmem:[#allocation2 + $0xc0] sm:$0x7f] %vm1587_vm11, %v2049_v0  ;;  %v1555_v3 = vsel %vm1536_vm5, %v1431_v57, %v1427_v50  ;;  %v558_v8 = vmul.f32 0.2, %v19265_v5  ;;  %v885_v9 = vcombine.high %v19254_v59, %v19254_v59  ;;  %v892_v10 = vrot.slane %v19254_v59, %v19232_v32  ;;  %v18152_v12 = vpop.f32.mrb[11].mxu0  ;;  %v18176_v19 = vpop.f32.mrb[11].mxu1 }
  0xf9   : > { %v1301_v14 = vsel %vm1278_vm4, %v1175_v55, %v1300_v1  ;;  %v1556_v15 = vsel %vm1276_vm3, %v1435_v61, %v1555_v3  ;;  %v559_v17 = vmul.f32 0.2, %v19275_v16  ;;  %v570_v18 = vmul.f32 0.2, %v19270_v11 }
  0xfa   : > { %v583_v20 = vmax.f32 %v19265_v5, %v558_v8  ;;  %v899_v21 = vrot.slane %v885_v9, %v19232_v32  ;;  %v900_v22 = vcombine.high %v892_v10, %v892_v10  ;;  %v1179_v24 = vrot.slane %v892_v10, %v19234_v33 }
  0xfb   : > { %v1439_v59 = vrot.slane %v892_v10, %v19236_v36  ;;  %v584_v25 = vmax.f32 %v19275_v16, %v559_v17  ;;  %v19344_v28 = vmax.f32 %v19270_v11, %v570_v18  ;;  %v19347_v29 = vmul.f32 0.2, %v19281_v23 }
  0xfc   : > { %v698_v30 = vcombine.high %v583_v20, %v583_v20  ;;  %v705_v31 = vrot.slane %v583_v20, %v19232_v32  ;;  %v901_v34 = vcombine.high %v899_v21, %v899_v21  ;;  %v1183_v5 = vrot.slane %v900_v22, %v19234_v33 }
  0xfd   : > { %v1187_v35 = vrot.slane %v899_v21, %v19234_v33  ;;  %v1302_v37 = vsel %vm1280_vm6, %v1179_v24, %v1301_v14  ;;  %v1443_v40 = vrot.slane %v900_v22, %v19236_v36  ;;  %v1447_v16 = vrot.slane %v899_v21, %v19236_v36  ;;  %v19355_v41 = vpop.f32.mrb[12].mxu0  ;;  %v19360_v46 = vpop.f32.mrb[12].mxu1 }
  0xfe   : > { %v712_v11 = vrot.slane %v698_v30, %v19232_v32  ;;  %v713_v42 = vcombine.high %v705_v31, %v705_v31  ;;  %v1087_v44 = vrot.slane %v705_v31, %v19234_v33  ;;  %v1347_v45 = vrot.slane %v705_v31, %v19236_v36  ;;  %v18155_v47 = vpop.f32.mrb[13].mxu0  ;;  %v18179_v57 = vpop.f32.mrb[13].mxu1  ;;  %v18580_v30 = vld [vmem:[%s22368_s2 + $0x38] sm:$0xff]   ;;  %v18581_v31 = vld [vmem:[%s22368_s2] sm:$0xff]  }
  0xff   : > { %v1191_v48 = vrot.slane %v901_v34, %v19234_v33  ;;  %v1303_v49 = vsel %vm1282_vm7, %v1183_v5, %v1302_v37  ;;  %v1451_v50 = vrot.slane %v901_v34, %v19236_v36  ;;  %v1557_v54 = vsel %vm1278_vm4, %v1439_v59, %v1556_v15  ;;  %v19366_v55 = vpop.f32.mrb[14].mxu0  ;;  %v19374_v3 = vpop.f32.mrb[14].mxu1  ;;  %18199 = vmatprep.subr.bf16.mxu1 %v18580_v30 }
 0x100   : > { %v714_v61 = vcombine.high %v712_v11, %v712_v11  ;;  %v1091_v63 = vrot.slane %v713_v42, %v19234_v33  ;;  %v1095_v0 = vrot.slane %v712_v11, %v19234_v33  ;;  %v1277_v1 = vsel %vm1276_vm3, %v1087_v44, %v1083_v38  ;;  %v18156_v7 = vpop.f32.mrb[15].mxu0  ;;  %v18180_v14 = vpop.f32.mrb[15].mxu1  ;;  %18200 = vmatpush3.bf16.msra.mxu1 %v18580_v30 }
 0x101   : > { %v1351_v8 = vrot.slane %v713_v42, %v19236_v36  ;;  %v1355_v9 = vrot.slane %v712_v11, %v19236_v36  ;;  %v1537_v10 = vsel %vm1536_vm5, %v1347_v45, %v1343_v39  ;;  %v1304_v12 = vsel %vm1284_vm8, %v1187_v35, %v1303_v49  ;;  %18209 = vmatprep.subr.bf16.mxu1 %v18581_v31 }
 0x102   : > { %v1099_v15 = vrot.slane %v714_v61, %v19234_v33  ;;  %v1279_v17 = vsel %vm1278_vm4, %v1091_v63, %v1277_v1  ;;  %v1359_v38 = vrot.slane %v714_v61, %v19236_v36  ;;  %v1305_v18 = vsel %vm1286_vm9, %v1191_v48, %v1304_v12 }
 0x103   : > { %v1281_v19 = vsel %vm1280_vm6, %v1095_v0, %v1279_v17  ;;  %v1538_v20 = vsel %vm1276_vm3, %v1351_v8, %v1537_v10  ;;  %1336 = vst.msk [vmem:[#allocation2 + $0x20] sm:$0xfe] %vm1332_vm10, %v1305_v18  ;;  %v1558_v26 = vsel %vm1280_vm6, %v1443_v40, %v1557_v54  ;;  %v715_v39 = vcombine.high %v584_v25, %v584_v25 }
 0x104   : > { %v1539_v21 = vsel %vm1278_vm4, %v1355_v9, %v1538_v20  ;;  %v1559_v22 = vsel %vm1282_vm7, %v1447_v16, %v1558_v26  ;;  %v722_v24 = vrot.slane %v584_v25, %v19232_v32  ;;  %v1283_v59 = vsel %vm1282_vm7, %v1099_v15, %v1281_v19 }
 0x105   : > { %v1560_v34 = vsel %vm1284_vm8, %v1451_v50, %v1559_v22  ;;  %v729_v5 = vrot.slane %v715_v39, %v19232_v32  ;;  %v1540_v35 = vsel %vm1280_vm6, %v1359_v38, %v1539_v21  ;;  %v902_v37 = vcombine.high %v19344_v28, %v19344_v28  ;;  %v19406_v25 = vpop.f32.mrb[16].mxu0  ;;  %v19413_v44 = vpop.f32.mrb[16].mxu1 }
 0x106   : > { %1591 = vst.msk [vmem:[#allocation2 + $0x60] sm:$0x7f] %vm1587_vm11, %v1560_v34  ;;  %v730_v40 = vcombine.high %v722_v24, %v722_v24  ;;  %v1103_v16 = vrot.slane %v722_v24, %v19234_v33  ;;  %v1363_v11 = vrot.slane %v722_v24, %v19236_v36  ;;  %v909_v42 = vrot.slane %v19344_v28, %v19232_v32  ;;  %v18159_v45 = vpop.f32.mrb[17].mxu0  ;;  %v18183_v57 = vpop.f32.mrb[17].mxu1 }
 0x107   : > { %v731_v47 = vcombine.high %v729_v5, %v729_v5  ;;  %v1626_v48 = vrot.slane %v729_v5, %v19234_v33  ;;  %v1879_v49 = vrot.slane %v729_v5, %v19236_v36  ;;  %v916_v50 = vrot.slane %v902_v37, %v19232_v32  ;;  %v19418_v54 = vpop.f32.mrb[18].mxu0  ;;  %v19424_v7 = vpop.f32.mrb[18].mxu1 }
 0x108   : > { %v1107_v61 = vrot.slane %v730_v40, %v19234_v33  ;;  %v1285_v63 = vsel %vm1284_vm8, %v1103_v16, %v1283_v59  ;;  %v1367_v28 = vrot.slane %v730_v40, %v19236_v36  ;;  %v1541_v0 = vsel %vm1282_vm7, %v1363_v11, %v1540_v35  ;;  %v18160_v1 = vpop.f32.mrb[19].mxu0  ;;  %v18184_v14 = vpop.f32.mrb[19].mxu1 }
 0x109   : > { %v1630_v8 = vrot.slane %v731_v47, %v19234_v33  ;;  %v1883_v9 = vrot.slane %v731_v47, %v19236_v36  ;;  %v917_v10 = vcombine.high %v909_v42, %v909_v42  ;;  %v918_v12 = vcombine.high %v916_v50, %v916_v50 }
 0x10a   : > { %v1287_v15 = vsel %vm1286_vm9, %v1107_v61, %v1285_v63  ;;  %v1542_v17 = vsel %vm1284_vm8, %v1367_v28, %v1541_v0  ;;  %v1710_v38 = vrot.slane %v909_v42, %v19234_v33  ;;  %v1718_v18 = vrot.slane %v916_v50, %v19234_v33 }
 0x10b   : > { %1333 = vst.msk [vmem:[#allocation2 + $0x8] sm:$0xfe] %vm1332_vm10, %v1287_v15  ;;  %v19435_v19 = vsel %vm1276_vm3, %v1630_v8, %v1626_v48  ;;  %v19438_v20 = vsel %vm1536_vm5, %v1883_v9, %v1879_v49  ;;  %v1714_v26 = vrot.slane %v917_v10, %v19234_v33  ;;  %v1722_v39 = vrot.slane %v918_v12, %v19234_v33 }
 0x10c   : > { %1588 = vst.msk [vmem:[#allocation2 + $0x48] sm:$0x7f] %vm1587_vm11, %v1542_v17  ;;  %v1963_v21 = vrot.slane %v909_v42, %v19236_v36  ;;  %v1967_v22 = vrot.slane %v917_v10, %v19236_v36  ;;  %v1971_v24 = vrot.slane %v916_v50, %v19236_v36  ;;  %v1975_v59 = vrot.slane %v918_v12, %v19236_v36 }
 0x10d   : > { %v1815_v30 = vsel %vm1276_vm3, %v1714_v26, %v1710_v38  ;;  %v596_v31 = vmax.f32 %v19281_v23, %v19347_v29  ;;  %v560_v34 = vmul.f32 0.2, %v19308_v53  ;;  %v572_v5 = vmul.f32 0.2, %v19315_v62  ;;  %v19451_v35 = vpop.f32.mrb[20].mxu0  ;;  %v19459_v42 = vpop.f32.mrb[20].mxu1 }
 0x10e   : > { %v1816_v37 = vsel %vm1278_vm4, %v1718_v18, %v1815_v30  ;;  %v2068_v40 = vsel %vm1536_vm5, %v1967_v22, %v1963_v21  ;;  %v561_v16 = vmul.f32 0.2, %v19323_v6  ;;  %v19457_v11 = vmul.f32 0.2, %v19332_v13  ;;  %v18163_v45 = vpop.f32.mrb[21].mxu0  ;;  %v18187_v50 = vpop.f32.mrb[21].mxu1 }
 0x10f   : > { %v2069_v23 = vsel %vm1276_vm3, %v1971_v24, %v2068_v40  ;;  %v919_v29 = vcombine.high %v596_v31, %v596_v31  ;;  %v926_v47 = vrot.slane %v596_v31, %v19232_v32  ;;  %v1817_v48 = vsel %vm1280_vm6, %v1722_v39, %v1816_v37  ;;  %v19464_v49 = vpop.f32.mrb[22].mxu0  ;;  %v19472_v1 = vpop.f32.mrb[22].mxu1 }
 0x110   : > { %v2070_v57 = vsel %vm1278_vm4, %v1975_v59, %v2069_v23  ;;  %v585_v61 = vmax.f32 %v19308_v53, %v560_v34  ;;  %v597_v63 = vmax.f32 %v19315_v62, %v572_v5  ;;  %v19470_v28 = vmax.f32 %v19323_v6, %v561_v16  ;;  %v18164_v0 = vpop.f32.mrb[23].mxu0  ;;  %v18188_v14 = vpop.f32.mrb[23].mxu1 }
 0x111   : > { %v933_v8 = vrot.slane %v919_v29, %v19232_v32  ;;  %v934_v9 = vcombine.high %v926_v47, %v926_v47  ;;  %v1726_v10 = vrot.slane %v926_v47, %v19234_v33  ;;  %v1979_v12 = vrot.slane %v926_v47, %v19236_v36 }
 0x112   : > { %v732_v15 = vcombine.high %v585_v61, %v585_v61  ;;  %v739_v17 = vrot.slane %v585_v61, %v19232_v32  ;;  %v936_v53 = vcombine.high %v597_v63, %v597_v63  ;;  %v943_v62 = vrot.slane %v597_v63, %v19232_v32 }
 0x113   : > { %v935_v38 = vcombine.high %v933_v8, %v933_v8  ;;  %v1730_v6 = vrot.slane %v934_v9, %v19234_v33  ;;  %v1734_v18 = vrot.slane %v933_v8, %v19234_v33  ;;  %v1818_v26 = vsel %vm1282_vm7, %v1726_v10, %v1817_v48 }
 0x114   : > { %v1983_v39 = vrot.slane %v934_v9, %v19236_v36  ;;  %v1987_v21 = vrot.slane %v933_v8, %v19236_v36  ;;  %v2071_v22 = vsel %vm1280_vm6, %v1979_v12, %v2070_v57  ;;  %v746_v24 = vrot.slane %v732_v15, %v19232_v32 }
 0x115   : > { %v1195_v59 = vrot.slane %v935_v38, %v19234_v33  ;;  %v1455_v30 = vrot.slane %v935_v38, %v19236_v36  ;;  %v1819_v31 = vsel %vm1284_vm8, %v1730_v6, %v1818_v26  ;;  %v747_v34 = vcombine.high %v739_v17, %v739_v17  ;;  %v19492_v45 = vpop.f32.mrb[24].mxu1 }
 0x116   : > { %v1820_v5 = vsel %vm1286_vm9, %v1734_v18, %v1819_v31  ;;  %v2072_v37 = vsel %vm1282_vm7, %v1983_v39, %v2071_v22  ;;  %v748_v40 = vcombine.high %v746_v24, %v746_v24  ;;  %v1634_v16 = vrot.slane %v739_v17, %v19234_v33  ;;  %v18191_v50 = vpop.f32.mrb[25].mxu1 }
 0x117   : > { %1845 = vst.msk [vmem:[#allocation2 + $0xa0] sm:$0xfe] %vm1332_vm10, %v1820_v5  ;;  %v2073_v23 = vsel %vm1284_vm8, %v1987_v21, %v2072_v37  ;;  %v1638_v29 = vrot.slane %v747_v34, %v19234_v33  ;;  %v1642_v47 = vrot.slane %v746_v24, %v19234_v33  ;;  %v1887_v48 = vrot.slane %v739_v17, %v19236_v36  ;;  %v553_v8 = vpop.f32.mrb[26].mxu1 }
 0x118   : > { %2098 = vst.msk [vmem:[#allocation2 + $0xe0] sm:$0x7f] %vm1587_vm11, %v2073_v23  ;;  %v1646_v57 = vrot.slane %v748_v40, %v19234_v33  ;;  %v1798_v61 = vsel %vm1278_vm4, %v1634_v16, %v19435_v19  ;;  %v1891_v63 = vrot.slane %v747_v34, %v19236_v36  ;;  %v1895_v0 = vrot.slane %v746_v24, %v19236_v36  ;;  %v18192_v15 = vpop.f32.mrb[27].mxu1 }
 0x119   : > { %v1799_v9 = vsel %vm1280_vm6, %v1638_v29, %v1798_v61  ;;  %v1899_v10 = vrot.slane %v748_v40, %v19236_v36  ;;  %v2051_v12 = vsel %vm1276_vm3, %v1887_v48, %v19438_v20  ;;  %v950_v14 = vrot.slane %v936_v53, %v19232_v32 }
 0x11a   : > { %v1800_v17 = vsel %vm1282_vm7, %v1642_v47, %v1799_v9  ;;  %v2052_v38 = vsel %vm1278_vm4, %v1891_v63, %v2051_v12  ;;  %v951_v19 = vcombine.high %v943_v62, %v943_v62  ;;  %v1199_v6 = vrot.slane %v943_v62, %v19234_v33 }
 0x11b   : > { %v2053_v18 = vsel %vm1280_vm6, %v1895_v0, %v2052_v38  ;;  %v952_v26 = vcombine.high %v950_v14, %v950_v14  ;;  %v1207_v39 = vrot.slane %v950_v14, %v19234_v33  ;;  %v1459_v21 = vrot.slane %v943_v62, %v19236_v36 }
 0x11c   : > { %v1203_v22 = vrot.slane %v951_v19, %v19234_v33  ;;  %v1306_v20 = vsel %vm1276_vm3, %v1199_v6, %v1195_v59  ;;  %v1463_v53 = vrot.slane %v951_v19, %v19236_v36  ;;  %v1467_v24 = vrot.slane %v950_v14, %v19236_v36 }
 0x11d   : > { %v1211_v31 = vrot.slane %v952_v26, %v19234_v33  ;;  %v1471_v34 = vrot.slane %v952_v26, %v19236_v36  ;;  %v1561_v5 = vsel %vm1536_vm5, %v1459_v21, %v1455_v30  ;;  %v749_v37 = vcombine.high %v19470_v28, %v19470_v28 }
 0x11e   : > { %v1307_v40 = vsel %vm1278_vm4, %v1203_v22, %v1306_v20  ;;  %v1562_v62 = vsel %vm1276_vm3, %v1463_v53, %v1561_v5  ;;  %v756_v59 = vrot.slane %v19470_v28, %v19232_v32  ;;  %v1801_v16 = vsel %vm1284_vm8, %v1646_v57, %v1800_v17 }
 0x11f   : > { %v1308_v23 = vsel %vm1280_vm6, %v1207_v39, %v1307_v40  ;;  %v1563_v29 = vsel %vm1278_vm4, %v1467_v24, %v1562_v62  ;;  %v763_v47 = vrot.slane %v749_v37, %v19232_v32  ;;  %v2054_v30 = vsel %vm1282_vm7, %v1899_v10, %v2053_v18 }
 0x120   : > { %v764_v48 = vcombine.high %v756_v59, %v756_v59  ;;  %v1650_v50 = vrot.slane %v756_v59, %v19234_v33  ;;  %v1903_v61 = vrot.slane %v756_v59, %v19236_v36  ;;  %v598_v63 = vmax.f32 %v19332_v13, %v19457_v11 }
 0x121   : > { %v765_v0 = vcombine.high %v763_v47, %v763_v47  ;;  %v1115_v28 = vrot.slane %v763_v47, %v19234_v33  ;;  %v1375_v57 = vrot.slane %v763_v47, %v19236_v36  ;;  %v1309_v8 = vsel %vm1282_vm7, %v1211_v31, %v1308_v23 }
 0x122   : > { %v1111_v9 = vrot.slane %v764_v48, %v19234_v33  ;;  %v1371_v12 = vrot.slane %v764_v48, %v19236_v36  ;;  %v1802_v10 = vsel %vm1286_vm9, %v1650_v50, %v1801_v16  ;;  %v2055_v14 = vsel %vm1284_vm8, %v1903_v61, %v2054_v30 }
 0x123   : > { %v1119_v15 = vrot.slane %v765_v0, %v19234_v33  ;;  %v1379_v17 = vrot.slane %v765_v0, %v19236_v36  ;;  %1842 = vst.msk [vmem:[#allocation2 + $0x88] sm:$0xfe] %vm1332_vm10, %v1802_v10  ;;  %v953_v13 = vcombine.high %v598_v63, %v598_v63  ;;  %v960_v11 = vrot.slane %v598_v63, %v19232_v32 }
 0x124   : > { %2095 = vst.msk [vmem:[#allocation2 + $0xc8] sm:$0x7f] %vm1587_vm11, %v2055_v14  ;;  %v1288_v38 = vsel %vm1276_vm3, %v1115_v28, %v1111_v9  ;;  %v1543_v19 = vsel %vm1536_vm5, %v1375_v57, %v1371_v12  ;;  %v1564_v6 = vsel %vm1280_vm6, %v1471_v34, %v1563_v29  ;;  %v562_v18 = vmul.f32 0.2, %v19355_v41 }
 0x125   : > { %v967_v26 = vrot.slane %v953_v13, %v19232_v32  ;;  %v968_v39 = vcombine.high %v960_v11, %v960_v11  ;;  %v1215_v21 = vrot.slane %v960_v11, %v19234_v33  ;;  %v1475_v22 = vrot.slane %v960_v11, %v19236_v36 }
 0x126   : > { %v587_v20 = vmax.f32 %v19355_v41, %v562_v18  ;;  %v1289_v53 = vsel %vm1278_vm4, %v1119_v15, %v1288_v38  ;;  %v1544_v24 = vsel %vm1276_vm3, %v1379_v17, %v1543_v19  ;;  %v574_v31 = vmul.f32 0.2, %v19360_v46 }
 0x127   : > { %v969_v5 = vcombine.high %v967_v26, %v967_v26  ;;  %v1219_v34 = vrot.slane %v968_v39, %v19234_v33  ;;  %v1310_v37 = vsel %vm1284_vm8, %v1215_v21, %v1309_v8  ;;  %v1479_v40 = vrot.slane %v968_v39, %v19236_v36 }
 0x128   : > { %v1565_v62 = vsel %vm1282_vm7, %v1475_v22, %v1564_v6  ;;  %v1738_v59 = vrot.slane %v967_v26, %v19234_v33  ;;  %v1991_v16 = vrot.slane %v967_v26, %v19236_v36  ;;  %v766_v41 = vcombine.high %v587_v20, %v587_v20 }
 0x129   : > { %v1311_v23 = vsel %vm1286_vm9, %v1219_v34, %v1310_v37  ;;  %v1566_v29 = vsel %vm1284_vm8, %v1479_v40, %v1565_v62  ;;  %v1742_v47 = vrot.slane %v969_v5, %v19234_v33  ;;  %v1995_v30 = vrot.slane %v969_v5, %v19236_v36 }
 0x12a   : > { %1337 = vst.msk [vmem:[#allocation2 + $0x28] sm:$0xfe] %vm1332_vm10, %v1311_v23  ;;  %v773_v48 = vrot.slane %v587_v20, %v19232_v32  ;;  %v780_v50 = vrot.slane %v766_v41, %v19232_v32  ;;  %v599_v61 = vmax.f32 %v19360_v46, %v574_v31  ;;  %v563_v63 = vmul.f32 0.2, %v19366_v55 }
 0x12b   : > { %1592 = vst.msk [vmem:[#allocation2 + $0x68] sm:$0x7f] %vm1587_vm11, %v1566_v29  ;;  %v1821_v0 = vsel %vm1276_vm3, %v1742_v47, %v1738_v59  ;;  %v2074_v28 = vsel %vm1536_vm5, %v1995_v30, %v1991_v16  ;;  %v575_v57 = vmul.f32 0.2, %v19374_v3  ;;  %v564_v8 = vmul.f32 0.2, %v19406_v25 }
 0x12c   : > { %v781_v9 = vcombine.high %v773_v48, %v773_v48  ;;  %v782_v12 = vcombine.high %v780_v50, %v780_v50  ;;  %v1123_v10 = vrot.slane %v773_v48, %v19234_v33  ;;  %v1131_v14 = vrot.slane %v780_v50, %v19234_v33 }
 0x12d   : > { %v1383_v15 = vrot.slane %v773_v48, %v19236_v36  ;;  %v1391_v46 = vrot.slane %v780_v50, %v19236_v36  ;;  %v970_v17 = vcombine.high %v599_v61, %v599_v61  ;;  %v977_v13 = vrot.slane %v599_v61, %v19232_v32 }
 0x12e   : > { %v1127_v11 = vrot.slane %v781_v9, %v19234_v33  ;;  %v1135_v38 = vrot.slane %v782_v12, %v19234_v33  ;;  %v1290_v19 = vsel %vm1280_vm6, %v1123_v10, %v1289_v53  ;;  %v1387_v6 = vrot.slane %v781_v9, %v19236_v36 }
 0x12f   : > { %v1395_v18 = vrot.slane %v782_v12, %v19236_v36  ;;  %v1545_v26 = vsel %vm1278_vm4, %v1383_v15, %v1544_v24  ;;  %v984_v39 = vrot.slane %v970_v17, %v19232_v32  ;;  %v985_v21 = vcombine.high %v977_v13, %v977_v13 }
 0x130   : > { %v1291_v22 = vsel %vm1282_vm7, %v1127_v11, %v1290_v19  ;;  %v1546_v20 = vsel %vm1280_vm6, %v1387_v6, %v1545_v26  ;;  %v1746_v31 = vrot.slane %v977_v13, %v19234_v33  ;;  %v1999_v5 = vrot.slane %v977_v13, %v19236_v36 }
 0x131   : > { %v1292_v34 = vsel %vm1284_vm8, %v1131_v14, %v1291_v22  ;;  %v1547_v53 = vsel %vm1282_vm7, %v1391_v46, %v1546_v20  ;;  %v986_v37 = vcombine.high %v984_v39, %v984_v39  ;;  %v1750_v40 = vrot.slane %v985_v21, %v19234_v33 }
 0x132   : > { %v1293_v24 = vsel %vm1286_vm9, %v1135_v38, %v1292_v34  ;;  %v1548_v62 = vsel %vm1284_vm8, %v1395_v18, %v1547_v53  ;;  %v1754_v59 = vrot.slane %v984_v39, %v19234_v33  ;;  %v1822_v16 = vsel %vm1278_vm4, %v1746_v31, %v1821_v0 }
 0x133   : > { %1334 = vst.msk [vmem:[#allocation2 + $0x10] sm:$0xfe] %vm1332_vm10, %v1293_v24  ;;  %v1758_v41 = vrot.slane %v986_v37, %v19234_v33  ;;  %v1823_v23 = vsel %vm1280_vm6, %v1750_v40, %v1822_v16  ;;  %v2003_v29 = vrot.slane %v985_v21, %v19236_v36  ;;  %v2007_v47 = vrot.slane %v984_v39, %v19236_v36 }
 0x134   : > { %1589 = vst.msk [vmem:[#allocation2 + $0x50] sm:$0x7f] %vm1587_vm11, %v1548_v62  ;;  %v1824_v30 = vsel %vm1282_vm7, %v1754_v59, %v1823_v23  ;;  %v2011_v48 = vrot.slane %v986_v37, %v19236_v36  ;;  %v2075_v50 = vsel %vm1276_vm3, %v1999_v5, %v2074_v28  ;;  %v588_v61 = vmax.f32 %v19366_v55, %v563_v63 }
 0x135   : > { %v2076_v0 = vsel %vm1278_vm4, %v2003_v29, %v2075_v50  ;;  %v600_v9 = vmax.f32 %v19374_v3, %v575_v57  ;;  %v1825_v12 = vsel %vm1284_vm8, %v1758_v41, %v1824_v30  ;;  %v589_v10 = vmax.f32 %v19406_v25, %v564_v8 }
 0x136   : > { %v2077_v14 = vsel %vm1280_vm6, %v2007_v47, %v2076_v0  ;;  %v783_v15 = vcombine.high %v588_v61, %v588_v61  ;;  %v790_v46 = vrot.slane %v588_v61, %v19232_v32  ;;  %v576_v17 = vmul.f32 0.2, %v19413_v44 }
 0x137   : > { %v987_v13 = vcombine.high %v600_v9, %v600_v9  ;;  %v994_v28 = vrot.slane %v600_v9, %v19232_v32  ;;  %v2078_v55 = vsel %vm1282_vm7, %v2011_v48, %v2077_v14  ;;  %v800_v63 = vcombine.high %v589_v10, %v589_v10 }
 0x138   : > { %v797_v11 = vrot.slane %v783_v15, %v19232_v32  ;;  %v798_v3 = vcombine.high %v790_v46, %v790_v46  ;;  %v1654_v57 = vrot.slane %v790_v46, %v19234_v33  ;;  %v1907_v25 = vrot.slane %v790_v46, %v19236_v36 }
 0x139   : > { %v1001_v8 = vrot.slane %v987_v13, %v19232_v32  ;;  %v1002_v38 = vcombine.high %v994_v28, %v994_v28  ;;  %v1762_v19 = vrot.slane %v994_v28, %v19234_v33  ;;  %v2015_v6 = vrot.slane %v994_v28, %v19236_v36 }
 0x13a   : > { %v799_v18 = vcombine.high %v797_v11, %v797_v11  ;;  %v1658_v26 = vrot.slane %v798_v3, %v19234_v33  ;;  %v1662_v39 = vrot.slane %v797_v11, %v19234_v33  ;;  %v1911_v21 = vrot.slane %v798_v3, %v19236_v36 }
 0x13b   : > { %v1915_v22 = vrot.slane %v797_v11, %v19236_v36  ;;  %v1003_v20 = vcombine.high %v1001_v8, %v1001_v8  ;;  %v1223_v31 = vrot.slane %v1002_v38, %v19234_v33  ;;  %v1227_v5 = vrot.slane %v1001_v8, %v19234_v33 }
 0x13c   : > { %v1666_v34 = vrot.slane %v799_v18, %v19234_v33  ;;  %v1803_v53 = vsel %vm1276_vm3, %v1658_v26, %v1654_v57  ;;  %v1919_v37 = vrot.slane %v799_v18, %v19236_v36  ;;  %v2056_v40 = vsel %vm1536_vm5, %v1911_v21, %v1907_v25 }
 0x13d   : > { %v1804_v24 = vsel %vm1278_vm4, %v1662_v39, %v1803_v53  ;;  %v2057_v62 = vsel %vm1276_vm3, %v1915_v22, %v2056_v40  ;;  %v1231_v59 = vrot.slane %v1003_v20, %v19234_v33  ;;  %v1312_v16 = vsel %vm1276_vm3, %v1227_v5, %v1223_v31 }
 0x13e   : > { %v1483_v41 = vrot.slane %v1002_v38, %v19236_v36  ;;  %v1487_v23 = vrot.slane %v1001_v8, %v19236_v36  ;;  %v1491_v29 = vrot.slane %v1003_v20, %v19236_v36  ;;  %v1826_v47 = vsel %vm1286_vm9, %v1762_v19, %v1825_v12 }
 0x13f   : > { %1846 = vst.msk [vmem:[#allocation2 + $0xa8] sm:$0xfe] %vm1332_vm10, %v1826_v47  ;;  %v2079_v30 = vsel %vm1284_vm8, %v2015_v6, %v2078_v55  ;;  %v807_v48 = vrot.slane %v589_v10, %v19232_v32  ;;  %v814_v50 = vrot.slane %v800_v63, %v19232_v32  ;;  %v1805_v61 = vsel %vm1280_vm6, %v1666_v34, %v1804_v24 }
 0x140   : > { %v1567_v0 = vsel %vm1536_vm5, %v1487_v23, %v1483_v41  ;;  %2099 = vst.msk [vmem:[#allocation2 + $0xe8] sm:$0x7f] %vm1587_vm11, %v2079_v30  ;;  %v2058_v9 = vsel %vm1278_vm4, %v1919_v37, %v2057_v62  ;;  %v601_v14 = vmax.f32 %v19413_v44, %v576_v17  ;;  %v1313_v12 = vsel %vm1278_vm4, %v1231_v59, %v1312_v16 }
 0x141   : > { %v815_v15 = vcombine.high %v807_v48, %v807_v48  ;;  %v19657_v46 = vcombine.high %v814_v50, %v814_v50  ;;  %v1670_v13 = vrot.slane %v807_v48, %v19234_v33  ;;  %v1678_v10 = vrot.slane %v814_v50, %v19234_v33 }
 0x142   : > { %v1923_v28 = vrot.slane %v807_v48, %v19236_v36  ;;  %v1931_v55 = vrot.slane %v814_v50, %v19236_v36  ;;  %v1004_v63 = vcombine.high %v601_v14, %v601_v14  ;;  %v1011_v11 = vrot.slane %v601_v14, %v19232_v32 }
 0x143   : > { %v1139_v3 = vrot.slane %v19657_v46, %v19234_v33  ;;  %v1399_v44 = vrot.slane %v19657_v46, %v19236_v36  ;;  %v1674_v17 = vrot.slane %v815_v15, %v19234_v33  ;;  %v1806_v57 = vsel %vm1282_vm7, %v1670_v13, %v1805_v61 }
 0x144   : > { %v1927_v25 = vrot.slane %v815_v15, %v19236_v36  ;;  %v2059_v8 = vsel %vm1280_vm6, %v1923_v28, %v2058_v9  ;;  %v1018_v38 = vrot.slane %v1004_v63, %v19232_v32  ;;  %v1019_v19 = vcombine.high %v1011_v11, %v1011_v11 }
 0x145   : > { %v1807_v6 = vsel %vm1284_vm8, %v1674_v17, %v1806_v57  ;;  %v1235_v18 = vrot.slane %v1011_v11, %v19234_v33  ;;  %v1495_v26 = vrot.slane %v1011_v11, %v19236_v36  ;;  %v1568_v39 = vsel %vm1276_vm3, %v1491_v29, %v1567_v0 }
 0x146   : > { %v1808_v21 = vsel %vm1286_vm9, %v1678_v10, %v1807_v6  ;;  %v2060_v22 = vsel %vm1282_vm7, %v1927_v25, %v2059_v8  ;;  %v1020_v20 = vcombine.high %v1018_v38, %v1018_v38  ;;  %v1239_v31 = vrot.slane %v1019_v19, %v19234_v33 }
 0x147   : > { %1843 = vst.msk [vmem:[#allocation2 + $0x90] sm:$0xfe] %vm1332_vm10, %v1808_v21  ;;  %v2061_v5 = vsel %vm1284_vm8, %v1931_v55, %v2060_v22  ;;  %v1243_v34 = vrot.slane %v1018_v38, %v19234_v33  ;;  %v1314_v53 = vsel %vm1280_vm6, %v1235_v18, %v1313_v12  ;;  %v1499_v37 = vrot.slane %v1019_v19, %v19236_v36 }
 0x148   : > { %2096 = vst.msk [vmem:[#allocation2 + $0xd0] sm:$0x7f] %vm1587_vm11, %v2061_v5  ;;  %v1247_v40 = vrot.slane %v1020_v20, %v19234_v33  ;;  %v1315_v24 = vsel %vm1282_vm7, %v1239_v31, %v1314_v53  ;;  %v1503_v62 = vrot.slane %v1018_v38, %v19236_v36  ;;  %v1507_v59 = vrot.slane %v1020_v20, %v19236_v36 }
 0x149   : > { %v1316_v16 = vsel %vm1284_vm8, %v1243_v34, %v1315_v24  ;;  %v1569_v41 = vsel %vm1278_vm4, %v1495_v26, %v1568_v39  ;;  %v565_v23 = vmul.f32 0.2, %v19418_v54  ;;  %v577_v29 = vmul.f32 0.2, %v19424_v7 }
 0x14a   : > { %v1317_v47 = vsel %vm1286_vm9, %v1247_v40, %v1316_v16  ;;  %v1570_v30 = vsel %vm1280_vm6, %v1499_v37, %v1569_v41  ;;  %v566_v48 = vmul.f32 0.2, %v19451_v35  ;;  %v578_v50 = vmul.f32 0.2, %v19459_v42 }
 0x14b   : > { %1338 = vst.msk [vmem:[#allocation2 + $0x30] sm:$0xfe] %vm1332_vm10, %v1317_v47  ;;  %v1571_v61 = vsel %vm1282_vm7, %v1503_v62, %v1570_v30  ;;  %v590_v0 = vmax.f32 %v19418_v54, %v565_v23  ;;  %v602_v9 = vmax.f32 %v19424_v7, %v577_v29  ;;  %v19703_v14 = vmul.f32 0.2, %v19464_v49 }
 0x14c   : > { %v1572_v12 = vsel %vm1284_vm8, %v1507_v59, %v1571_v61  ;;  %v591_v15 = vmax.f32 %v19451_v35, %v566_v48  ;;  %v603_v13 = vmax.f32 %v19459_v42, %v578_v50  ;;  %v19709_v10 = vmul.f32 0.2, %v19472_v1 }
 0x14d   : > { %1593 = vst.msk [vmem:[#allocation2 + $0x70] sm:$0x7f] %vm1587_vm11, %v1572_v12  ;;  %v817_v28 = vcombine.high %v590_v0, %v590_v0  ;;  %v824_v55 = vrot.slane %v590_v0, %v19232_v32  ;;  %v1021_v54 = vcombine.high %v602_v9, %v602_v9  ;;  %v1028_v7 = vrot.slane %v602_v9, %v19232_v32 }
 0x14e   : > { %v834_v63 = vcombine.high %v591_v15, %v591_v15  ;;  %v841_v11 = vrot.slane %v591_v15, %v19232_v32  ;;  %v1038_v17 = vcombine.high %v603_v13, %v603_v13  ;;  %v19716_v57 = vrot.slane %v603_v13, %v19232_v32 }
 0x14f   : > { %v831_v35 = vrot.slane %v817_v28, %v19232_v32  ;;  %v832_v42 = vcombine.high %v824_v55, %v824_v55  ;;  %v1143_v25 = vrot.slane %v824_v55, %v19234_v33  ;;  %v1403_v8 = vrot.slane %v824_v55, %v19236_v36 }
 0x150   : > { %v1035_v38 = vrot.slane %v1021_v54, %v19232_v32  ;;  %v1036_v19 = vcombine.high %v1028_v7, %v1028_v7  ;;  %v1766_v6 = vrot.slane %v1028_v7, %v19234_v33  ;;  %v2019_v18 = vrot.slane %v1028_v7, %v19236_v36 }
 0x151   : > { %v833_v26 = vcombine.high %v831_v35, %v831_v35  ;;  %v1147_v39 = vrot.slane %v832_v42, %v19234_v33  ;;  %v1151_v21 = vrot.slane %v831_v35, %v19234_v33  ;;  %v1294_v22 = vsel %vm1276_vm3, %v1143_v25, %v1139_v3 }
 0x152   : > { %v1407_v20 = vrot.slane %v832_v42, %v19236_v36  ;;  %v1411_v31 = vrot.slane %v831_v35, %v19236_v36  ;;  %v1549_v5 = vsel %vm1536_vm5, %v1403_v8, %v1399_v44  ;;  %v1037_v34 = vcombine.high %v1035_v38, %v1035_v38 }
 0x153   : > { %v1155_v53 = vrot.slane %v833_v26, %v19234_v33  ;;  %v1295_v37 = vsel %vm1278_vm4, %v1147_v39, %v1294_v22  ;;  %v1415_v40 = vrot.slane %v833_v26, %v19236_v36  ;;  %v1770_v24 = vrot.slane %v1036_v19, %v19234_v33 }
 0x154   : > { %v1296_v3 = vsel %vm1280_vm6, %v1151_v21, %v1295_v37  ;;  %v1550_v62 = vsel %vm1276_vm3, %v1407_v20, %v1549_v5  ;;  %v1774_v59 = vrot.slane %v1035_v38, %v19234_v33  ;;  %v1778_v16 = vrot.slane %v1037_v34, %v19234_v33 }
 0x155   : > { %v1551_v46 = vsel %vm1278_vm4, %v1411_v31, %v1550_v62  ;;  %v1827_v44 = vsel %vm1276_vm3, %v1770_v24, %v1766_v6  ;;  %v2023_v41 = vrot.slane %v1036_v19, %v19236_v36  ;;  %v2027_v23 = vrot.slane %v1035_v38, %v19236_v36 }
 0x156   : > { %v1828_v29 = vsel %vm1278_vm4, %v1774_v59, %v1827_v44  ;;  %v2031_v47 = vrot.slane %v1037_v34, %v19236_v36  ;;  %v848_v30 = vrot.slane %v834_v63, %v19232_v32  ;;  %v849_v48 = vcombine.high %v841_v11, %v841_v11 }
 0x157   : > { %v2080_v50 = vsel %vm1536_vm5, %v2023_v41, %v2019_v18  ;;  %v1159_v61 = vrot.slane %v841_v11, %v19234_v33  ;;  %v1297_v0 = vsel %vm1282_vm7, %v1155_v53, %v1296_v3  ;;  %v1419_v9 = vrot.slane %v841_v11, %v19236_v36 }
 0x158   : > { %v2081_v12 = vsel %vm1276_vm3, %v2027_v23, %v2080_v50  ;;  %v850_v15 = vcombine.high %v848_v30, %v848_v30  ;;  %v1163_v13 = vrot.slane %v849_v48, %v19234_v33  ;;  %v1423_v28 = vrot.slane %v849_v48, %v19236_v36 }
 0x159   : > { %v1298_v55 = vsel %vm1284_vm8, %v1159_v61, %v1297_v0  ;;  %v1552_v54 = vsel %vm1280_vm6, %v1415_v40, %v1551_v46  ;;  %v1682_v7 = vrot.slane %v848_v30, %v19234_v33  ;;  %v1935_v63 = vrot.slane %v848_v30, %v19236_v36  ;;  %v2780_v40 = vld [vmem:[#allocation2 + $0x48] sm:$0x7f] }
 0x15a   : > { %v1299_v35 = vsel %vm1286_vm9, %v1163_v13, %v1298_v55  ;;  %v1553_v42 = vsel %vm1282_vm7, %v1419_v9, %v1552_v54  ;;  %v1686_v11 = vrot.slane %v850_v15, %v19234_v33  ;;  %v1939_v25 = vrot.slane %v850_v15, %v19236_v36 }
 0x15b   : > { %1335 = vst.msk [vmem:[#allocation2 + $0x18] sm:$0xfe] %vm1332_vm10, %v1299_v35  ;;  %v1554_v8 = vsel %vm1284_vm8, %v1423_v28, %v1553_v42  ;;  %v1052_v38 = vrot.slane %v1038_v17, %v19232_v32  ;;  %v1053_v19 = vcombine.high %v19716_v57, %v19716_v57  ;;  %v1782_v6 = vrot.slane %v19716_v57, %v19234_v33 }
 0x15c   : > { %1590 = vst.msk [vmem:[#allocation2 + $0x58] sm:$0x7f] %vm1587_vm11, %v1554_v8  ;;  %v1809_v18 = vsel %vm1276_vm3, %v1686_v11, %v1682_v7  ;;  %v2062_v26 = vsel %vm1536_vm5, %v1939_v25, %v1935_v63  ;;  %v1829_v39 = vsel %vm1280_vm6, %v1778_v16, %v1828_v29  ;;  %v2035_v21 = vrot.slane %v19716_v57, %v19236_v36 }
 0x15d   : > { %v19779_v22 = vcombine.high %v1052_v38, %v1052_v38  ;;  %v1786_v17 = vrot.slane %v1053_v19, %v19234_v33  ;;  %v1790_v20 = vrot.slane %v1052_v38, %v19234_v33  ;;  %v1830_v31 = vsel %vm1282_vm7, %v1782_v6, %v1829_v39 }
 0x15e   : > { %v2039_v5 = vrot.slane %v1053_v19, %v19236_v36  ;;  %v2043_v34 = vrot.slane %v1052_v38, %v19236_v36  ;;  %v2082_v53 = vsel %vm1278_vm4, %v2031_v47, %v2081_v12  ;;  %v592_v37 = vmax.f32 %v19464_v49, %v19703_v14 }
 0x15f   : > { %v1251_v57 = vrot.slane %v19779_v22, %v19234_v33  ;;  %v1511_v24 = vrot.slane %v19779_v22, %v19236_v36  ;;  %v1831_v3 = vsel %vm1284_vm8, %v1786_v17, %v1830_v31  ;;  %v2083_v62 = vsel %vm1280_vm6, %v2035_v21, %v2082_v53 }
 0x160   : > { %v1832_v59 = vsel %vm1286_vm9, %v1790_v20, %v1831_v3  ;;  %v2084_v16 = vsel %vm1282_vm7, %v2039_v5, %v2083_v62  ;;  %v851_v46 = vcombine.high %v592_v37, %v592_v37  ;;  %v858_v44 = vrot.slane %v592_v37, %v19232_v32 }
 0x161   : > { %1847 = vst.msk [vmem:[#allocation2 + $0xb0] sm:$0xfe] %vm1332_vm10, %v1832_v59  ;;  %v2085_v49 = vsel %vm1284_vm8, %v2043_v34, %v2084_v16  ;;  %v604_v14 = vmax.f32 %v19472_v1, %v19709_v10  ;;  %v580_v41 = vmul.f32 0.2, %v19492_v45  ;;  %v2841_v23 = vcombine.high %v2780_v40, %v2780_v40 }
 0x162   : > { %2100 = vst.msk [vmem:[#allocation2 + $0xf0] sm:$0x7f] %vm1587_vm11, %v2085_v49  ;;  %v865_v29 = vrot.slane %v851_v46, %v19232_v32  ;;  %v866_v47 = vcombine.high %v858_v44, %v858_v44  ;;  %v1690_v30 = vrot.slane %v858_v44, %v19234_v33  ;;  %v1943_v48 = vrot.slane %v858_v44, %v19236_v36  ;;  %v2781_v44 = vld [vmem:[#allocation2 + $0x50] sm:$0x7f] }
 0x163   : > { %v1055_v50 = vcombine.high %v604_v14, %v604_v14  ;;  %v1062_v61 = vrot.slane %v604_v14, %v19232_v32  ;;  %v605_v0 = vmax.f32 %v19492_v45, %v580_v41  ;;  %v2848_v9 = vrot.slane %v2780_v40, %v19228_v27 }
 0x164   : > { %v867_v1 = vcombine.high %v865_v29, %v865_v29  ;;  %v1694_v10 = vrot.slane %v866_v47, %v19234_v33  ;;  %v1698_v12 = vrot.slane %v865_v29, %v19234_v33  ;;  %v1810_v15 = vsel %vm1278_vm4, %v1690_v30, %v1809_v18 }
 0x165   : > { %v1947_v13 = vrot.slane %v866_v47, %v19236_v36  ;;  %v1951_v28 = vrot.slane %v865_v29, %v19236_v36  ;;  %v2063_v55 = vsel %vm1276_vm3, %v1943_v48, %v2062_v26  ;;  %v1069_v54 = vrot.slane %v1055_v50, %v19232_v32 }
 0x166   : > { %v1702_v7 = vrot.slane %v867_v1, %v19234_v33  ;;  %v1811_v45 = vsel %vm1280_vm6, %v1694_v10, %v1810_v15  ;;  %v1955_v63 = vrot.slane %v867_v1, %v19236_v36  ;;  %v1070_v35 = vcombine.high %v1062_v61, %v1062_v61 }
 0x167   : > { %v1812_v42 = vsel %vm1282_vm7, %v1698_v12, %v1811_v45  ;;  %v2064_v11 = vsel %vm1278_vm4, %v1947_v13, %v2063_v55  ;;  %v1071_v25 = vcombine.high %v1069_v54, %v1069_v54  ;;  %v1255_v8 = vrot.slane %v1062_v61, %v19234_v33 }
 0x168   : > { %v1813_v38 = vsel %vm1284_vm8, %v1702_v7, %v1812_v42  ;;  %v2065_v19 = vsel %vm1280_vm6, %v1951_v28, %v2064_v11  ;;  %v1259_v6 = vrot.slane %v1070_v35, %v19234_v33  ;;  %v1263_v18 = vrot.slane %v1069_v54, %v19234_v33 }
 0x169   : > { %v1814_v26 = vsel %vm1286_vm9, %v1706_v2, %v1813_v38  ;;  %v2066_v39 = vsel %vm1282_vm7, %v1955_v63, %v2065_v19  ;;  %v1267_v21 = vrot.slane %v1071_v25, %v19234_v33  ;;  %v1318_v22 = vsel %vm1276_vm3, %v1255_v8, %v1251_v57  ;;  %v2782_v19 = vld [vmem:[#allocation2 + $0x58] sm:$0x7f] }
 0x16a   : > { %1844 = vst.msk [vmem:[#allocation2 + $0x98] sm:$0xfe] %vm1332_vm10, %v1814_v26  ;;  %v2067_v17 = vsel %vm1284_vm8, %v1959_v4, %v2066_v39  ;;  %v1319_v20 = vsel %vm1278_vm4, %v1259_v6, %v1318_v22  ;;  %v1515_v31 = vrot.slane %v1062_v61, %v19236_v36  ;;  %v1519_v5 = vrot.slane %v1070_v35, %v19236_v36  ;;  %v2783_v26 = vld [vmem:[#allocation2 + $0x60] sm:$0x7f] }
 0x16b   : > { %2097 = vst.msk [vmem:[#allocation2 + $0xd8] sm:$0x7f] %vm1587_vm11, %v2067_v17  ;;  %v1320_v2 = vsel %vm1280_vm6, %v1263_v18, %v1319_v20  ;;  %v1523_v34 = vrot.slane %v1069_v54, %v19236_v36  ;;  %v1527_v53 = vrot.slane %v1071_v25, %v19236_v36  ;;  %v1078_v37 = vrot.slane %v605_v0, %v19232_v32 }
 0x16c   : > { %v1573_v58 = vsel %vm1536_vm5, %v1515_v31, %v1511_v24  ;;  %v1321_v4 = vsel %vm1282_vm7, %v1267_v21, %v1320_v2  ;;  %v2855_v40 = vrot.slane %v2841_v23, %v19228_v27  ;;  %v2856_v57 = vcombine.high %v2848_v9, %v2848_v9 }
 0x16d   : > { %v1574_v3 = vsel %vm1276_vm3, %v1519_v5, %v1573_v58  ;;  %v1079_v62 = vcombine.high %v1078_v37, %v1078_v37  ;;  %v1271_v59 = vrot.slane %v1078_v37, %v19234_v33  ;;  %v1531_v16 = vrot.slane %v1078_v37, %v19236_v36 }
 0x16e   : > { %v1575_v46 = vsel %vm1278_vm4, %v1523_v34, %v1574_v3  ;;  %v2857_v49 = vcombine.high %v2855_v40, %v2855_v40  ;;  %v2864_v14 = vrot.slane %v2848_v9, %v19228_v27  ;;  %v2871_v24 = vrot.slane %v2855_v40, %v19228_v27 }
 0x16f   : > { %v1275_v41 = vrot.slane %v1079_v62, %v19234_v33  ;;  %v1322_v23 = vsel %vm1284_vm8, %v1271_v59, %v1321_v4  ;;  %v1535_v29 = vrot.slane %v1079_v62, %v19236_v36  ;;  %v1576_v47 = vsel %vm1280_vm6, %v1527_v53, %v1575_v46 }
 0x170   : > { %v1577_v30 = vsel %vm1282_vm7, %v1531_v16, %v1576_v47  ;;  %v2878_v48 = vrot.slane %v2856_v57, %v19228_v27  ;;  %v2885_v50 = vrot.slane %v2857_v49, %v19228_v27  ;;  %v2886_v61 = vcombine.high %v2864_v14, %v2864_v14 }
 0x171   : > { %v1323_v0 = vsel %vm1286_vm9, %v1275_v41, %v1322_v23  ;;  %v1578_v9 = vsel %vm1284_vm8, %v1535_v29, %v1577_v30  ;;  %v2887_v1 = vcombine.high %v2871_v24, %v2871_v24  ;;  %v2889_v10 = vcombine.high %v2781_v44, %v2781_v44 }
 0x172   : > { %1339 = vst.msk [vmem:[#allocation2 + $0x38] sm:$0xfe] %vm1332_vm10, %v1323_v0  ;;  %v2888_v12 = vcombine.high %v2878_v48, %v2878_v48  ;;  %v2896_v15 = vrot.slane %v2781_v44, %v19228_v27  ;;  %v3129_v13 = vcombine.low %v19242_v51, %v19245_v52  ;;  %v17405_v28 = vcombine.high %v19242_v51, %v19245_v52 }
 0x173   : > { %1594 = vst.msk [vmem:[#allocation2 + $0x78] sm:$0x7f] %vm1587_vm11, %v1578_v9  ;;  %v2903_v55 = vrot.slane %v2889_v10, %v19228_v27  ;;  %v3131_v54 = vcombine.low %v19239_v43, %v19249_v56  ;;  %v3132_v7 = vcombine.low %v2839_v60, %v2864_v14  ;;  %v3178_v45 = vcombine.low %v2878_v48, %v2886_v61 }
 0x174   : > { %v2904_v63 = vcombine.high %v2896_v15, %v2896_v15  ;;  %v2912_v35 = vrot.slane %v2896_v15, %v19228_v27  ;;  %v3139_v42 = vrot.slane %v3129_v13, %v19228_v27  ;;  %v3146_v11 = vrot.slane %v17405_v28, %v19228_v27 }
 0x175   : > { %v2905_v25 = vcombine.high %v2903_v55, %v2903_v55  ;;  %v2919_v51 = vrot.slane %v2903_v55, %v19228_v27  ;;  %v3153_v52 = vrot.slane %v3131_v54, %v19228_v27  ;;  %v3160_v8 = vrot.slane %v3132_v7, %v19228_v27  ;;  %v2784_v7 = vld [vmem:[#allocation2 + $0x68] sm:$0x7f] }
 0x176   : > { %v2926_v56 = vrot.slane %v2904_v63, %v19228_v27  ;;  %v3161_v38 = vcombine.low %v3139_v42, %v3146_v11  ;;  %v3179_v43 = vcombine.low %v2888_v12, %v2871_v24  ;;  %v3180_v60 = vcombine.low %v2885_v50, %v2887_v1  ;;  %v2785_v42 = vld [vmem:[#allocation2 + $0x70] sm:$0x7f] }
 0x177   : > { %v3162_v6 = vcombine.low %v3153_v52, %v3160_v8  ;;  %v3188_v18 = vrot.slane %v3178_v45, %v19228_v27  ;;  %v2933_v39 = vrot.slane %v2905_v25, %v19228_v27  ;;  %v2935_v21 = vcombine.high %v2919_v51, %v2919_v51 }
 0x178   : > { %v3169_v22 = vrot.slane %v3161_v38, %v19228_v27  ;;  %v3181_v17 = vcombine.low %v2912_v35, %v2926_v56  ;;  %v3195_v20 = vrot.slane %v3179_v43, %v19228_v27  ;;  %v3202_v31 = vrot.slane %v3180_v60, %v19228_v27 }
 0x179   : > { %v3176_v5 = vrot.slane %v3162_v6, %v19228_v27  ;;  %v17406_v2 = vcombine.high %v2912_v35, %v2926_v56  ;;  %v2937_v34 = vcombine.high %v2782_v19, %v2782_v19  ;;  %v2944_v53 = vrot.slane %v2782_v19, %v19228_v27 }
 0x17a   : > { %v3209_v37 = vrot.slane %v3181_v17, %v19228_v27  ;;  %v3210_v58 = vcombine.low %v3188_v18, %v3195_v20  ;;  %v2992_v4 = vrot.slane %v2783_v26, %v19228_v27  ;;  %v3228_v40 = vcombine.low %v2919_v51, %v2933_v39 }
 0x17b   : > { %v3177_v57 = vcombine.low %v3169_v22, %v3176_v5  ;;  %v3237_v3 = vrot.slane %v17406_v2, %v19228_v27  ;;  %v2951_v62 = vrot.slane %v2937_v34, %v19228_v27  ;;  %v2952_v59 = vcombine.high %v2944_v53, %v2944_v53 }
 0x17c   : > { %v3211_v16 = vcombine.low %v3202_v31, %v3209_v37  ;;  %v3218_v46 = vrot.slane %v3210_v58, %v19228_v27  ;;  %v2960_v44 = vrot.slane %v2944_v53, %v19228_v27  ;;  %v3000_v49 = vcombine.high %v2992_v4, %v2992_v4 }
 0x17d   : > { %v2953_v14 = vcombine.high %v2951_v62, %v2951_v62  ;;  %v2967_v24 = vrot.slane %v2951_v62, %v19228_v27  ;;  %v2974_v41 = vrot.slane %v2952_v59, %v19228_v27  ;;  %v3008_v23 = vrot.slane %v2992_v4, %v19228_v27 }
 0x17e   : > { %v3225_v29 = vrot.slane %v3211_v16, %v19228_v27  ;;  %v2982_v47 = vcombine.high %v2960_v44, %v2960_v44  ;;  %v3022_v30 = vrot.slane %v3000_v49, %v19228_v27  ;;  %v3229_v48 = vcombine.low %v2935_v21, %v2960_v44 }
 0x17f   : > { %v2981_v50 = vrot.slane %v2953_v14, %v19228_v27  ;;  %v2983_v61 = vcombine.high %v2967_v24, %v2967_v24  ;;  %v2984_v0 = vcombine.high %v2974_v41, %v2974_v41  ;;  %v3244_v9 = vrot.slane %v3228_v40, %v19228_v27 }
 0x180   : > { %v3226_v1 = vcombine.low %v3218_v46, %v3225_v29  ;;  %v3230_v10 = vcombine.low %v2974_v41, %v2982_v47  ;;  %v3251_v12 = vrot.slane %v3229_v48, %v19228_v27  ;;  %v3278_v15 = vcombine.low %v3008_v23, %v3022_v30  ;;  %v18586_v41 = vld [vmem:[%s22368_s2 + $0x8] sm:$0xff]  }
 0x181   : > { %v3259_v13 = vcombine.low %v3237_v3, %v3244_v9  ;;  %v3276_v28 = vcombine.low %v2984_v0, %v2967_v24  ;;  %v3277_v55 = vcombine.low %v2981_v50, %v2983_v61  ;;  %v17407_v54 = vcombine.high %v3008_v23, %v3022_v30  ;;  %v18995_v9 = vld [vmem:[%s22368_s2] sm:$0xff]  }
 0x182   : > { %v3444_v45 = vpack.c.bf16 %v3226_v1, %v3177_v57  ;;  %v3258_v63 = vrot.slane %v3230_v10, %v19228_v27  ;;  %v3300_v35 = vrot.slane %v3278_v15, %v19228_v27  ;;  %v2985_v11 = vcombine.high %v2783_v26, %v2783_v26 }
 0x183   : > { %v3267_v25 = vrot.slane %v3259_v13, %v19228_v27  ;;  %v3286_v51 = vrot.slane %v3276_v28, %v19228_v27  ;;  %v3293_v52 = vrot.slane %v3277_v55, %v19228_v27  ;;  %v3307_v8 = vrot.slane %v17407_v54, %v19228_v27  ;;  %v2101_v13 = vld [vmem:[#allocation2] sm:$0x7f] }
 0x184   : > { %18201 = vmatprep.mubr.msk.bf16.mxu1 %vm606_vm2, %v3444_v45  ;;  %v3260_v56 = vcombine.low %v3251_v12, %v3258_v63  ;;  %v2999_v38 = vrot.slane %v2985_v11, %v19228_v27  ;;  %v3033_v43 = vcombine.high %v2784_v7, %v2784_v7  ;;  %v3040_v60 = vrot.slane %v2784_v7, %v19228_v27  ;;  %v18587_v7 = vld [vmem:[%s22368_s2 + $0x10] sm:$0xff]   ;;  %v2102_v63 = vld [vmem:[#allocation2 + $0x8] sm:$0x7f] }
 0x185   : > { %v3308_v19 = vcombine.low %v3286_v51, %v3293_v52  ;;  %v3309_v6 = vcombine.low %v3300_v35, %v3307_v8  ;;  %v3081_v18 = vcombine.high %v2785_v42, %v2785_v42  ;;  %v3088_v26 = vrot.slane %v2785_v42, %v19228_v27 }
 0x186   : > { %v3274_v39 = vrot.slane %v3260_v56, %v19228_v27  ;;  %v3001_v21 = vcombine.high %v2999_v38, %v2999_v38  ;;  %v3015_v22 = vrot.slane %v2999_v38, %v19228_v27  ;;  %v3047_v17 = vrot.slane %v3033_v43, %v19228_v27 }
 0x187   : > { %v3316_v20 = vrot.slane %v3308_v19, %v19228_v27  ;;  %v3323_v31 = vrot.slane %v3309_v6, %v19228_v27  ;;  %v3048_v5 = vcombine.high %v3040_v60, %v3040_v60  ;;  %v3056_v2 = vrot.slane %v3040_v60, %v19228_v27 }
 0x188   : > { %v3275_v34 = vcombine.low %v3267_v25, %v3274_v39  ;;  %v3029_v53 = vrot.slane %v3001_v21, %v19228_v27  ;;  %v3031_v37 = vcombine.high %v3015_v22, %v3015_v22  ;;  %v3049_v58 = vcombine.high %v3047_v17, %v3047_v17  ;;  %v18591_v21 = vld [vmem:[%s22368_s2 + $0x18] sm:$0xff]  }
 0x189   : > { %v3324_v4 = vcombine.low %v3316_v20, %v3323_v31  ;;  %v3063_v40 = vrot.slane %v3047_v17, %v19228_v27  ;;  %v3070_v57 = vrot.slane %v3048_v5, %v19228_v27  ;;  %v3078_v3 = vcombine.high %v3056_v2, %v3056_v2  ;;  %v2103_v20 = vld [vmem:[#allocation2 + $0x10] sm:$0x7f] }
 0x18a   : > { %v3077_v62 = vrot.slane %v3049_v58, %v19228_v27  ;;  %v3095_v59 = vrot.slane %v3081_v18, %v19228_v27  ;;  %v3096_v16 = vcombine.high %v3088_v26, %v3088_v26  ;;  %v3104_v46 = vrot.slane %v3088_v26, %v19228_v27 }
 0x18b   : > { %v3445_v44 = vpack.c.bf16 %v3324_v4, %v3275_v34  ;;  %v3079_v49 = vcombine.high %v3063_v40, %v3063_v40  ;;  %v3080_v14 = vcombine.high %v3070_v57, %v3070_v57  ;;  %v3325_v24 = vcombine.low %v3015_v22, %v3029_v53 }
 0x18c   : > { %v3097_v23 = vcombine.high %v3095_v59, %v3095_v59  ;;  %v3111_v29 = vrot.slane %v3095_v59, %v19228_v27  ;;  %v3118_v47 = vrot.slane %v3096_v16, %v19228_v27  ;;  %v3326_v30 = vcombine.low %v3031_v37, %v3056_v2 }
 0x18d   : > { %18202 = vmatmul.mubr.msk.bf16.vlgmr.msra.gmra.mrb[28].mxu1 %vm606_vm2, %v3445_v44  ;;  %v3327_v48 = vcombine.low %v3070_v57, %v3078_v3  ;;  %v3328_v50 = vcombine.low %v3080_v14, %v3063_v40  ;;  %v3335_v61 = vrot.slane %v3325_v24, %v19228_v27  ;;  %v3374_v0 = vcombine.low %v3077_v62, %v3079_v49 }
 0x18e   : > { %18210 = vmatpush3.bf16.msra.mxu1 %v18995_v9  ;;  %v3125_v1 = vrot.slane %v3097_v23, %v19228_v27  ;;  %v3342_v10 = vrot.slane %v3326_v30, %v19228_v27  ;;  %v3375_v12 = vcombine.low %v3104_v46, %v3118_v47  ;;  %v17408_v15 = vcombine.high %v3104_v46, %v3118_v47  ;;  %v19970_v46 = vld [vmem:[%s22368_s2 + $0x40] sm:$0xff]  }
 0x18f   : > { %v3349_v28 = vrot.slane %v3327_v48, %v19228_v27  ;;  %v3356_v55 = vrot.slane %v3328_v50, %v19228_v27  ;;  %v3384_v54 = vrot.slane %v3374_v0, %v19228_v27  ;;  %18211 = vmatprep.subr.bf16.mxu1 %v18586_v41  ;;  %v3127_v45 = vcombine.high %v3111_v29, %v3111_v29 }
 0x190   : > { %v3357_v35 = vcombine.low %v3335_v61, %v3342_v10  ;;  %v3377_v42 = vcombine.low %v3111_v29, %v3125_v1  ;;  %v3391_v11 = vrot.slane %v3375_v12, %v19228_v27  ;;  %v3398_v25 = vrot.slane %v17408_v15, %v19228_v27 }
 0x191   : > { %v3358_v51 = vcombine.low %v3349_v28, %v3356_v55  ;;  %v3429_v52 = vrot.slane %v3127_v45, %v19228_v27  ;;  %v2115_v8 = vcombine.high %v2101_v13, %v2101_v13  ;;  %v2122_v56 = vrot.slane %v2101_v13, %v19228_v27 }
 0x192   : > { %v3365_v38 = vrot.slane %v3357_v35, %v19228_v27  ;;  %v3405_v43 = vrot.slane %v3377_v42, %v19228_v27  ;;  %v3406_v60 = vcombine.low %v3384_v54, %v3391_v11  ;;  %18212 = vmatpush3.bf16.msra.mxu1 %v18586_v41  ;;  %v2163_v19 = vcombine.high %v2102_v63, %v2102_v63  ;;  %v2104_v11 = vld [vmem:[#allocation2 + $0x18] sm:$0x7f] }
 0x193   : > { %v3372_v6 = vrot.slane %v3358_v51, %v19228_v27  ;;  %18213 = vmatprep.subr.bf16.mxu1 %v18587_v7  ;;  %v3436_v18 = vrot.slane %v3429_v52, %v19228_v27  ;;  %v2129_v26 = vrot.slane %v2115_v8, %v19228_v27  ;;  %v2130_v39 = vcombine.high %v2122_v56, %v2122_v56 }
 0x194   : > { %v3407_v22 = vcombine.low %v3398_v25, %v3405_v43  ;;  %v3414_v17 = vrot.slane %v3406_v60, %v19228_v27  ;;  %v2138_v31 = vrot.slane %v2122_v56, %v19228_v27  ;;  %v2170_v5 = vrot.slane %v2102_v63, %v19228_v27 }
 0x195   : > { %v3373_v2 = vcombine.low %v3365_v38, %v3372_v6  ;;  %v3447_v34 = vpack.c.bf16 %v3436_v18, %v3436_v18  ;;  %v2131_v53 = vcombine.high %v2129_v26, %v2129_v26  ;;  %v2145_v37 = vrot.slane %v2129_v26, %v19228_v27  ;;  %v2105_v38 = vld [vmem:[#allocation2 + $0x20] sm:$0x7f] }
 0x196   : > { %v3421_v58 = vrot.slane %v3407_v22, %v19228_v27  ;;  %18214 = vmatpush3.bf16.msra.mxu1 %v18587_v7  ;;  %v2152_v4 = vrot.slane %v2130_v39, %v19228_v27  ;;  %v2177_v40 = vrot.slane %v2163_v19, %v19228_v27  ;;  %v2178_v57 = vcombine.high %v2170_v5, %v2170_v5 }
 0x197   : > { %v2159_v3 = vrot.slane %v2131_v53, %v19228_v27  ;;  %v2161_v62 = vcombine.high %v2145_v37, %v2145_v37  ;;  %v2186_v59 = vrot.slane %v2170_v5, %v19228_v27  ;;  %v2211_v16 = vcombine.high %v2103_v20, %v2103_v20  ;;  %18215 = vmatprep.subr.bf16.mxu1 %v18591_v21 }
 0x198   : > { %v3422_v44 = vcombine.low %v3414_v17, %v3421_v58  ;;  %v2179_v49 = vcombine.high %v2177_v40, %v2177_v40  ;;  %v2193_v14 = vrot.slane %v2177_v40, %v19228_v27  ;;  %v2200_v24 = vrot.slane %v2178_v57, %v19228_v27 }
 0x199   : > { %v2208_v41 = vcombine.high %v2186_v59, %v2186_v59  ;;  %v2218_v23 = vrot.slane %v2103_v20, %v19228_v27  ;;  %v2225_v29 = vrot.slane %v2211_v16, %v19228_v27  ;;  %v2451_v47 = vcombine.low %v2138_v31, %v2152_v4 }
 0x19a   : > { %v3446_v30 = vpack.c.bf16 %v3422_v44, %v3373_v2  ;;  %v2207_v48 = vrot.slane %v2179_v49, %v19228_v27  ;;  %v2209_v50 = vcombine.high %v2193_v14, %v2193_v14  ;;  %v2210_v61 = vcombine.high %v2200_v24, %v2200_v24  ;;  %18216 = vmatpush3.bf16.msra.mxu1 %v18591_v21 }
 0x19b   : > { %v2226_v0 = vcombine.high %v2218_v23, %v2218_v23  ;;  %v2227_v9 = vcombine.high %v2225_v29, %v2225_v29  ;;  %v2234_v1 = vrot.slane %v2218_v23, %v19228_v27  ;;  %v2241_v10 = vrot.slane %v2225_v29, %v19228_v27  ;;  %18225 = vmatprep.subr.bf16.mxu1 %v19970_v46 }
 0x19c   : > { %18205 = vmatprep.mubr.msk.bf16.mxu1 %vm606_vm2, %v3446_v30  ;;  %v17401_v12 = vcombine.high %v2138_v31, %v2152_v4  ;;  %v2453_v15 = vcombine.low %v2145_v37, %v2159_v3  ;;  %v2454_v13 = vcombine.low %v2161_v62, %v2186_v59  ;;  %v2461_v28 = vrot.slane %v2451_v47, %v19228_v27 }
 0x19d   : > { %18206 = vmatmul.mubr.msk.bf16.gmra.mrb[32].mxu1 %vm606_vm2, %v3447_v34  ;;  %v2248_v55 = vrot.slane %v2226_v0, %v19228_v27  ;;  %v2500_v54 = vcombine.low %v2200_v24, %v2208_v41  ;;  %v2501_v7 = vcombine.low %v2210_v61, %v2193_v14  ;;  %v2502_v45 = vcombine.low %v2207_v48, %v2209_v50 }
 0x19e   : > { %v2468_v63 = vrot.slane %v17401_v12, %v19228_v27  ;;  %v2475_v35 = vrot.slane %v2453_v15, %v19228_v27  ;;  %v2482_v42 = vrot.slane %v2454_v13, %v19228_v27  ;;  %v2255_v25 = vrot.slane %v2227_v9, %v19228_v27  ;;  %v2106_v12 = vld [vmem:[#allocation2 + $0x28] sm:$0x7f] }
 0x19f   : > { %v2503_v51 = vcombine.low %v2234_v1, %v2248_v55  ;;  %v2510_v52 = vrot.slane %v2500_v54, %v19228_v27  ;;  %v2517_v8 = vrot.slane %v2501_v7, %v19228_v27  ;;  %v2524_v56 = vrot.slane %v2502_v45, %v19228_v27 }
 0x1a0   : > { %v2483_v43 = vcombine.low %v2461_v28, %v2468_v63  ;;  %v2484_v60 = vcombine.low %v2475_v35, %v2482_v42  ;;  %v17402_v19 = vcombine.high %v2234_v1, %v2248_v55  ;;  %v2257_v6 = vcombine.high %v2241_v10, %v2241_v10  ;;  %v2107_v28 = vld [vmem:[#allocation2 + $0x30] sm:$0x7f] }
 0x1a1   : > { %v2531_v18 = vrot.slane %v2503_v51, %v19228_v27  ;;  %v2532_v26 = vcombine.low %v2510_v52, %v2517_v8  ;;  %v2259_v39 = vcombine.high %v2104_v11, %v2104_v11  ;;  %v2266_v21 = vrot.slane %v2104_v11, %v19228_v27 }
 0x1a2   : > { %v2491_v22 = vrot.slane %v2483_v43, %v19228_v27  ;;  %v2498_v17 = vrot.slane %v2484_v60, %v19228_v27  ;;  %v2559_v20 = vrot.slane %v17402_v19, %v19228_v27  ;;  %v2314_v31 = vrot.slane %v2105_v38, %v19228_v27 }
 0x1a3   : > { %v2533_v5 = vcombine.low %v2524_v56, %v2531_v18  ;;  %v2540_v2 = vrot.slane %v2532_v26, %v19228_v27  ;;  %v2273_v34 = vrot.slane %v2259_v39, %v19228_v27  ;;  %v2274_v53 = vcombine.high %v2266_v21, %v2266_v21 }
 0x1a4   : > { %v2499_v37 = vcombine.low %v2491_v22, %v2498_v17  ;;  %v2282_v58 = vrot.slane %v2266_v21, %v19228_v27  ;;  %v2322_v4 = vcombine.high %v2314_v31, %v2314_v31  ;;  %v2330_v40 = vrot.slane %v2314_v31, %v19228_v27 }
 0x1a5   : > { %v2547_v57 = vrot.slane %v2533_v5, %v19228_v27  ;;  %v2275_v3 = vcombine.high %v2273_v34, %v2273_v34  ;;  %v2289_v62 = vrot.slane %v2273_v34, %v19228_v27  ;;  %v2296_v59 = vrot.slane %v2274_v53, %v19228_v27 }
 0x1a6   : > { %v2304_v16 = vcombine.high %v2282_v58, %v2282_v58  ;;  %v2344_v44 = vrot.slane %v2322_v4, %v19228_v27  ;;  %v2550_v49 = vcombine.low %v2241_v10, %v2255_v25  ;;  %v2551_v14 = vcombine.low %v2257_v6, %v2282_v58 }
 0x1a7   : > { %v2548_v24 = vcombine.low %v2540_v2, %v2547_v57  ;;  %v2303_v41 = vrot.slane %v2275_v3, %v19228_v27  ;;  %v2305_v23 = vcombine.high %v2289_v62, %v2289_v62  ;;  %v2306_v29 = vcombine.high %v2296_v59, %v2296_v59 }
 0x1a8   : > { %v2552_v47 = vcombine.low %v2296_v59, %v2304_v16  ;;  %v2566_v30 = vrot.slane %v2550_v49, %v19228_v27  ;;  %v2573_v48 = vrot.slane %v2551_v14, %v19228_v27  ;;  %v2600_v50 = vcombine.low %v2330_v40, %v2344_v44  ;;  %v18597_v59 = vld [vmem:[%s22368_s2 + $0x48] sm:$0xff]  }
 0x1a9   : > { %v2766_v61 = vpack.c.bf16 %v2548_v24, %v2499_v37  ;;  %v2598_v0 = vcombine.low %v2306_v29, %v2289_v62  ;;  %v2599_v9 = vcombine.low %v2303_v41, %v2305_v23  ;;  %v17403_v1 = vcombine.high %v2330_v40, %v2344_v44  ;;  %v3657_v24 = vld [vmem:[#allocation2 + $0x1] sm:$0x7f] }
 0x1aa   : > { %v2580_v15 = vrot.slane %v2552_v47, %v19228_v27  ;;  %v2581_v10 = vcombine.low %v2559_v20, %v2566_v30  ;;  %v2622_v13 = vrot.slane %v2600_v50, %v19228_v27  ;;  %v2307_v55 = vcombine.high %v2105_v38, %v2105_v38 }
 0x1ab   : > { %18217 = vmatprep.mubr.msk.bf16.mxu1 %vm606_vm2, %v2766_v61  ;;  %v2608_v54 = vrot.slane %v2598_v0, %v19228_v27  ;;  %v2615_v7 = vrot.slane %v2599_v9, %v19228_v27  ;;  %v2629_v45 = vrot.slane %v17403_v1, %v19228_v27  ;;  %v2355_v63 = vcombine.high %v2106_v12, %v2106_v12  ;;  %v18598_v1 = vld [vmem:[%s22368_s2 + $0x50] sm:$0xff]  }
 0x1ac   : > { %v2582_v35 = vcombine.low %v2573_v48, %v2580_v15  ;;  %v2589_v42 = vrot.slane %v2581_v10, %v19228_v27  ;;  %v2321_v11 = vrot.slane %v2307_v55, %v19228_v27  ;;  %v2362_v25 = vrot.slane %v2106_v12, %v19228_v27 }
 0x1ad   : > { %v2630_v51 = vcombine.low %v2608_v54, %v2615_v7  ;;  %v2631_v52 = vcombine.low %v2622_v13, %v2629_v45  ;;  %v2369_v8 = vrot.slane %v2355_v63, %v19228_v27  ;;  %v2403_v56 = vcombine.high %v2107_v28, %v2107_v28 }
 0x1ae   : > { %v2596_v38 = vrot.slane %v2582_v35, %v19228_v27  ;;  %v2323_v43 = vcombine.high %v2321_v11, %v2321_v11  ;;  %v2337_v60 = vrot.slane %v2321_v11, %v19228_v27  ;;  %v2370_v19 = vcombine.high %v2362_v25, %v2362_v25  ;;  %v3658_v11 = vld [vmem:[#allocation2 + $0x9] sm:$0x7f] }
 0x1af   : > { %v2638_v6 = vrot.slane %v2630_v51, %v19228_v27  ;;  %v2645_v18 = vrot.slane %v2631_v52, %v19228_v27  ;;  %v2371_v26 = vcombine.high %v2369_v8, %v2369_v8  ;;  %v2378_v39 = vrot.slane %v2362_v25, %v19228_v27 }
 0x1b0   : > { %v2597_v21 = vcombine.low %v2589_v42, %v2596_v38  ;;  %v2351_v22 = vrot.slane %v2323_v43, %v19228_v27  ;;  %v2353_v17 = vcombine.high %v2337_v60, %v2337_v60  ;;  %v2385_v20 = vrot.slane %v2369_v8, %v19228_v27  ;;  %v18602_v38 = vld [vmem:[%s22368_s2 + $0x58] sm:$0xff]  }
 0x1b1   : > { %v2646_v31 = vcombine.low %v2638_v6, %v2645_v18  ;;  %v2392_v5 = vrot.slane %v2370_v19, %v19228_v27  ;;  %v2399_v2 = vrot.slane %v2371_v26, %v19228_v27  ;;  %v2400_v34 = vcombine.high %v2378_v39, %v2378_v39  ;;  %v3659_v19 = vld [vmem:[#allocation2 + $0x11] sm:$0x7f] }
 0x1b2   : > { %v2401_v53 = vcombine.high %v2385_v20, %v2385_v20  ;;  %v2410_v37 = vrot.slane %v2107_v28, %v19228_v27  ;;  %v2417_v58 = vrot.slane %v2403_v56, %v19228_v27  ;;  %v2647_v4 = vcombine.low %v2337_v60, %v2351_v22 }
 0x1b3   : > { %v2767_v40 = vpack.c.bf16 %v2646_v31, %v2597_v21  ;;  %v2402_v57 = vcombine.high %v2392_v5, %v2392_v5  ;;  %v2648_v3 = vcombine.low %v2353_v17, %v2378_v39  ;;  %v2649_v62 = vcombine.low %v2392_v5, %v2400_v34 }
 0x1b4   : > { %v2418_v16 = vcombine.high %v2410_v37, %v2410_v37  ;;  %v2419_v44 = vcombine.high %v2417_v58, %v2417_v58  ;;  %v2426_v49 = vrot.slane %v2410_v37, %v19228_v27  ;;  %v2433_v14 = vrot.slane %v2417_v58, %v19228_v27  ;;  %v20070_v58 = vld [vmem:[%s22368_s2 + $0x60] sm:$0xff]  }
 0x1b5   : > { %18218 = vmatmul.mubr.msk.bf16.vlgmr.msra.gmra.mrb[28].mxu1 %vm606_vm2, %v2767_v40  ;;  %v2650_v41 = vcombine.low %v2402_v57, %v2385_v20  ;;  %v2657_v23 = vrot.slane %v2647_v4, %v19228_v27  ;;  %v2664_v29 = vrot.slane %v2648_v3, %v19228_v27  ;;  %v2671_v47 = vrot.slane %v2649_v62, %v19228_v27 }
 0x1b6   : > { %18226 = vmatpush3.bf16.msra.mxu1 %v19970_v46  ;;  %v2440_v30 = vrot.slane %v2418_v16, %v19228_v27  ;;  %v2447_v48 = vrot.slane %v2419_v44, %v19228_v27  ;;  %v2696_v50 = vcombine.low %v2399_v2, %v2401_v53  ;;  %v2449_v61 = vcombine.high %v2433_v14, %v2433_v14 }
 0x1b7   : > { %v2678_v0 = vrot.slane %v2650_v41, %v19228_v27  ;;  %v2679_v9 = vcombine.low %v2657_v23, %v2664_v29  ;;  %18227 = vmatprep.subr.bf16.mxu1 %v18597_v59  ;;  %v3671_v12 = vcombine.high %v3657_v24, %v3657_v24  ;;  %v3678_v15 = vrot.slane %v3657_v24, %v19228_v27 }
 0x1b8   : > { %v2697_v10 = vcombine.low %v2426_v49, %v2440_v30  ;;  %v17404_v13 = vcombine.high %v2426_v49, %v2440_v30  ;;  %v2699_v46 = vcombine.low %v2433_v14, %v2447_v48  ;;  %v2706_v28 = vrot.slane %v2696_v50, %v19228_v27 }
 0x1b9   : > { %v2680_v55 = vcombine.low %v2671_v47, %v2678_v0  ;;  %v2687_v54 = vrot.slane %v2679_v9, %v19228_v27  ;;  %v2751_v7 = vrot.slane %v2449_v61, %v19228_v27  ;;  %v3685_v45 = vrot.slane %v3671_v12, %v19228_v27 }
 0x1ba   : > { %v2713_v63 = vrot.slane %v2697_v10, %v19228_v27  ;;  %v2720_v35 = vrot.slane %v17404_v13, %v19228_v27  ;;  %v2727_v42 = vrot.slane %v2699_v46, %v19228_v27  ;;  %18228 = vmatpush3.bf16.msra.mxu1 %v18597_v59  ;;  %v3686_v25 = vcombine.high %v3678_v15, %v3678_v15 }
 0x1bb   : > { %v2694_v51 = vrot.slane %v2680_v55, %v19228_v27  ;;  %18229 = vmatprep.subr.bf16.mxu1 %v18598_v1  ;;  %v2758_v52 = vrot.slane %v2751_v7, %v19228_v27  ;;  %v3687_v8 = vcombine.high %v3685_v45, %v3685_v45  ;;  %v3694_v56 = vrot.slane %v3678_v15, %v19228_v27  ;;  %v3660_v55 = vld [vmem:[#allocation2 + $0x19] sm:$0x7f] }
 0x1bc   : > { %v2728_v43 = vcombine.low %v2706_v28, %v2713_v63  ;;  %v2729_v60 = vcombine.low %v2720_v35, %v2727_v42  ;;  %v3701_v6 = vrot.slane %v3685_v45, %v19228_v27  ;;  %v3708_v18 = vrot.slane %v3686_v25, %v19228_v27  ;;  %v3661_v25 = vld [vmem:[#allocation2 + $0x21] sm:$0x7f] }
 0x1bd   : > { %v2695_v26 = vcombine.low %v2687_v54, %v2694_v51  ;;  %v2769_v39 = vpack.c.bf16 %v2758_v52, %v2758_v52  ;;  %v3715_v21 = vrot.slane %v3687_v8, %v19228_v27  ;;  %v3719_v22 = vcombine.high %v3658_v11, %v3658_v11 }
 0x1be   : > { %v2736_v17 = vrot.slane %v2728_v43, %v19228_v27  ;;  %v2743_v20 = vrot.slane %v2729_v60, %v19228_v27  ;;  %18230 = vmatpush3.bf16.msra.mxu1 %v18598_v1  ;;  %v3717_v31 = vcombine.high %v3701_v6, %v3701_v6  ;;  %v3726_v5 = vrot.slane %v3658_v11, %v19228_v27 }
 0x1bf   : > { %v3733_v2 = vrot.slane %v3719_v22, %v19228_v27  ;;  %v3767_v34 = vcombine.high %v3659_v19, %v3659_v19  ;;  %v3774_v53 = vrot.slane %v3659_v19, %v19228_v27  ;;  %v4007_v37 = vcombine.low %v3694_v56, %v3708_v18  ;;  %18231 = vmatprep.subr.bf16.mxu1 %v18602_v38 }
 0x1c0   : > { %v2744_v4 = vcombine.low %v2736_v17, %v2743_v20  ;;  %v3734_v40 = vcombine.high %v3726_v5, %v3726_v5  ;;  %v3742_v57 = vrot.slane %v3726_v5, %v19228_v27  ;;  %v17433_v3 = vcombine.high %v3694_v56, %v3708_v18 }
 0x1c1   : > { %v3735_v62 = vcombine.high %v3733_v2, %v3733_v2  ;;  %v3749_v59 = vrot.slane %v3733_v2, %v19228_v27  ;;  %v3781_v16 = vrot.slane %v3767_v34, %v19228_v27  ;;  %v3782_v44 = vcombine.high %v3774_v53, %v3774_v53 }
 0x1c2   : > { %v2768_v49 = vpack.c.bf16 %v2744_v4, %v2695_v26  ;;  %v3756_v14 = vrot.slane %v3734_v40, %v19228_v27  ;;  %v3764_v24 = vcombine.high %v3742_v57, %v3742_v57  ;;  %v3790_v41 = vrot.slane %v3774_v53, %v19228_v27  ;;  %18232 = vmatpush3.bf16.msra.mxu1 %v18602_v38 }
 0x1c3   : > { %v3763_v23 = vrot.slane %v3735_v62, %v19228_v27  ;;  %v3765_v29 = vcombine.high %v3749_v59, %v3749_v59  ;;  %v3783_v47 = vcombine.high %v3781_v16, %v3781_v16  ;;  %v3797_v30 = vrot.slane %v3781_v16, %v19228_v27  ;;  %18241 = vmatprep.subr.bf16.mxu1 %v20070_v58 }
 0x1c4   : > { %18221 = vmatprep.mubr.msk.bf16.mxu1 %vm606_vm2, %v2768_v49  ;;  %v3766_v48 = vcombine.high %v3756_v14, %v3756_v14  ;;  %v3804_v50 = vrot.slane %v3782_v44, %v19228_v27  ;;  %v4009_v61 = vcombine.low %v3701_v6, %v3715_v21  ;;  %v4010_v0 = vcombine.low %v3717_v31, %v3742_v57 }
 0x1c5   : > { %18222 = vmatmul.mubr.msk.bf16.gmra.mrb[36].mxu1 %vm606_vm2, %v2769_v39  ;;  %v4017_v9 = vrot.slane %v4007_v37, %v19228_v27  ;;  %v4024_v1 = vrot.slane %v17433_v3, %v19228_v27  ;;  %v4056_v12 = vcombine.low %v3756_v14, %v3764_v24  ;;  %v4058_v15 = vcombine.low %v3763_v23, %v3765_v29 }
 0x1c6   : > { %v4031_v10 = vrot.slane %v4009_v61, %v19228_v27  ;;  %v4038_v13 = vrot.slane %v4010_v0, %v19228_v27  ;;  %v4057_v46 = vcombine.low %v3766_v48, %v3749_v59  ;;  %v4059_v28 = vcombine.low %v3790_v41, %v3804_v50  ;;  %v3662_v61 = vld [vmem:[#allocation2 + $0x29] sm:$0x7f]  ;;  %v3663_v0 = vld [vmem:[#allocation2 + $0x31] sm:$0x7f] }
 0x1c7   : > { %v4039_v54 = vcombine.low %v4017_v9, %v4024_v1  ;;  %v4066_v7 = vrot.slane %v4056_v12, %v19228_v27  ;;  %v4080_v45 = vrot.slane %v4058_v15, %v19228_v27  ;;  %v17434_v63 = vcombine.high %v3790_v41, %v3804_v50 }
 0x1c8   : > { %v4040_v35 = vcombine.low %v4031_v10, %v4038_v13  ;;  %v4073_v42 = vrot.slane %v4057_v46, %v19228_v27  ;;  %v4087_v11 = vrot.slane %v4059_v28, %v19228_v27  ;;  %v3811_v51 = vrot.slane %v3783_v47, %v19228_v27 }
 0x1c9   : > { %v4047_v52 = vrot.slane %v4039_v54, %v19228_v27  ;;  %v4115_v8 = vrot.slane %v17434_v63, %v19228_v27  ;;  %v3813_v56 = vcombine.high %v3797_v30, %v3797_v30  ;;  %v3815_v38 = vcombine.high %v3660_v55, %v3660_v55 }
 0x1ca   : > { %v4054_v43 = vrot.slane %v4040_v35, %v19228_v27  ;;  %v4088_v60 = vcombine.low %v4066_v7, %v4073_v42  ;;  %v4089_v19 = vcombine.low %v4080_v45, %v4087_v11  ;;  %v3822_v6 = vrot.slane %v3660_v55, %v19228_v27 }
 0x1cb   : > { %v3829_v18 = vrot.slane %v3815_v38, %v19228_v27  ;;  %v3870_v26 = vrot.slane %v3661_v25, %v19228_v27  ;;  %v4106_v39 = vcombine.low %v3797_v30, %v3811_v51  ;;  %v3863_v21 = vcombine.high %v3661_v25, %v3661_v25 }
 0x1cc   : > { %v4055_v22 = vcombine.low %v4047_v52, %v4054_v43  ;;  %v4096_v17 = vrot.slane %v4088_v60, %v19228_v27  ;;  %v4103_v20 = vrot.slane %v4089_v19, %v19228_v27  ;;  %v3830_v31 = vcombine.high %v3822_v6, %v3822_v6 }
 0x1cd   : > { %v3831_v5 = vcombine.high %v3829_v18, %v3829_v18  ;;  %v3838_v2 = vrot.slane %v3822_v6, %v19228_v27  ;;  %v3845_v34 = vrot.slane %v3829_v18, %v19228_v27  ;;  %v3878_v53 = vcombine.high %v3870_v26, %v3870_v26 }
 0x1ce   : > { %v4104_v37 = vcombine.low %v4096_v17, %v4103_v20  ;;  %v3852_v4 = vrot.slane %v3830_v31, %v19228_v27  ;;  %v3886_v40 = vrot.slane %v3870_v26, %v19228_v27  ;;  %v4122_v57 = vrot.slane %v4106_v39, %v19228_v27 }
 0x1cf   : > { %v3859_v3 = vrot.slane %v3831_v5, %v19228_v27  ;;  %v3860_v62 = vcombine.high %v3838_v2, %v3838_v2  ;;  %v3861_v59 = vcombine.high %v3845_v34, %v3845_v34  ;;  %v3900_v16 = vrot.slane %v3878_v53, %v19228_v27 }
 0x1d0   : > { %v4322_v44 = vpack.c.bf16 %v4104_v37, %v4055_v22  ;;  %v3862_v49 = vcombine.high %v3852_v4, %v3852_v4  ;;  %v4107_v14 = vcombine.low %v3813_v56, %v3838_v2  ;;  %v4137_v24 = vcombine.low %v4115_v8, %v4122_v57  ;;  %v18608_v57 = vld [vmem:[%s22368_s2 + $0x68] sm:$0xff]  }
 0x1d1   : > { %v4108_v41 = vcombine.low %v3852_v4, %v3860_v62  ;;  %v4155_v23 = vcombine.low %v3859_v3, %v3861_v59  ;;  %v4156_v29 = vcombine.low %v3886_v40, %v3900_v16  ;;  %v17435_v47 = vcombine.high %v3886_v40, %v3900_v16 }
 0x1d2   : > { %18233 = vmatprep.mubr.msk.bf16.mxu1 %vm606_vm2, %v4322_v44  ;;  %v4129_v30 = vrot.slane %v4107_v14, %v19228_v27  ;;  %v4145_v48 = vrot.slane %v4137_v24, %v19228_v27  ;;  %v4154_v50 = vcombine.low %v3862_v49, %v3845_v34  ;;  %v3877_v9 = vrot.slane %v3863_v21, %v19228_v27 }
 0x1d3   : > { %v4136_v1 = vrot.slane %v4108_v41, %v19228_v27  ;;  %v4171_v12 = vrot.slane %v4155_v23, %v19228_v27  ;;  %v4178_v15 = vrot.slane %v4156_v29, %v19228_v27  ;;  %v4185_v10 = vrot.slane %v17435_v47, %v19228_v27  ;;  %v4442_v41 = vld [vmem:[#allocation2 + $0x41] sm:$0x7f] }
 0x1d4   : > { %v4164_v13 = vrot.slane %v4154_v50, %v19228_v27  ;;  %v3879_v46 = vcombine.high %v3877_v9, %v3877_v9  ;;  %v3893_v28 = vrot.slane %v3877_v9, %v19228_v27  ;;  %v3911_v55 = vcombine.high %v3662_v61, %v3662_v61  ;;  %v18609_v9 = vld [vmem:[%s22368_s2 + $0x70] sm:$0xff]  }
 0x1d5   : > { %v4138_v54 = vcombine.low %v4129_v30, %v4136_v1  ;;  %v4187_v7 = vcombine.low %v4178_v15, %v4185_v10  ;;  %v3918_v45 = vrot.slane %v3662_v61, %v19228_v27  ;;  %v3959_v63 = vcombine.high %v3663_v0, %v3663_v0 }
 0x1d6   : > { %v4186_v35 = vcombine.low %v4164_v13, %v4171_v12  ;;  %v3907_v42 = vrot.slane %v3879_v46, %v19228_v27  ;;  %v3909_v11 = vcombine.high %v3893_v28, %v3893_v28  ;;  %v3925_v25 = vrot.slane %v3911_v55, %v19228_v27 }
 0x1d7   : > { %v4152_v51 = vrot.slane %v4138_v54, %v19228_v27  ;;  %v4201_v52 = vrot.slane %v4187_v7, %v19228_v27  ;;  %v3926_v8 = vcombine.high %v3918_v45, %v3918_v45  ;;  %v3934_v56 = vrot.slane %v3918_v45, %v19228_v27 }
 0x1d8   : > { %v4194_v38 = vrot.slane %v4186_v35, %v19228_v27  ;;  %v3927_v43 = vcombine.high %v3925_v25, %v3925_v25  ;;  %v3941_v60 = vrot.slane %v3925_v25, %v19228_v27  ;;  %v3966_v19 = vrot.slane %v3663_v0, %v19228_v27 }
 0x1d9   : > { %v4153_v6 = vcombine.low %v4145_v48, %v4152_v51  ;;  %v3948_v18 = vrot.slane %v3926_v8, %v19228_v27  ;;  %v3956_v26 = vcombine.high %v3934_v56, %v3934_v56  ;;  %v3973_v39 = vrot.slane %v3959_v63, %v19228_v27  ;;  %v4443_v48 = vld [vmem:[#allocation2 + $0x49] sm:$0x7f]  ;;  %v18613_v51 = vld [vmem:[%s22368_s2 + $0x78] sm:$0xff]  }
 0x1da   : > { %v4202_v21 = vcombine.low %v4194_v38, %v4201_v52  ;;  %v3955_v22 = vrot.slane %v3927_v43, %v19228_v27  ;;  %v3957_v17 = vcombine.high %v3941_v60, %v3941_v60  ;;  %v3974_v20 = vcombine.high %v3966_v19, %v3966_v19 }
 0x1db   : > { %v3958_v31 = vcombine.high %v3948_v18, %v3948_v18  ;;  %v3975_v5 = vcombine.high %v3973_v39, %v3973_v39  ;;  %v3982_v2 = vrot.slane %v3966_v19, %v19228_v27  ;;  %v3989_v34 = vrot.slane %v3973_v39, %v19228_v27 }
 0x1dc   : > { %v4323_v53 = vpack.c.bf16 %v4202_v21, %v4153_v6  ;;  %v3996_v37 = vrot.slane %v3974_v20, %v19228_v27  ;;  %v4203_v4 = vcombine.low %v3893_v28, %v3907_v42  ;;  %v4204_v40 = vcombine.low %v3909_v11, %v3934_v56  ;;  %v4444_v56 = vld [vmem:[#allocation2 + $0x51] sm:$0x7f] }
 0x1dd   : > { %v4003_v3 = vrot.slane %v3975_v5, %v19228_v27  ;;  %v4205_v62 = vcombine.low %v3948_v18, %v3956_v26  ;;  %v4206_v59 = vcombine.low %v3958_v31, %v3941_v60  ;;  %v4252_v16 = vcombine.low %v3955_v22, %v3957_v17 }
 0x1de   : > { %18234 = vmatmul.mubr.msk.bf16.vlgmr.msra.gmra.mrb[28].mxu1 %vm606_vm2, %v4323_v53  ;;  %v4213_v44 = vrot.slane %v4203_v4, %v19228_v27  ;;  %v4220_v49 = vrot.slane %v4204_v40, %v19228_v27  ;;  %v4253_v14 = vcombine.low %v3982_v2, %v3996_v37  ;;  %v17436_v24 = vcombine.high %v3982_v2, %v3996_v37 }
 0x1df   : > { %18242 = vmatpush3.bf16.msra.mxu1 %v20070_v58  ;;  %v4227_v23 = vrot.slane %v4205_v62, %v19228_v27  ;;  %v4234_v29 = vrot.slane %v4206_v59, %v19228_v27  ;;  %v4255_v47 = vcombine.low %v3989_v34, %v4003_v3  ;;  %v4262_v30 = vrot.slane %v4252_v16, %v19228_v27  ;;  %v20175_v62 = vld [vmem:[%s22368_s2 + $0x80] sm:$0xff]  }
 0x1e0   : > { %v4235_v50 = vcombine.low %v4213_v44, %v4220_v49  ;;  %v4269_v61 = vrot.slane %v4253_v14, %v19228_v27  ;;  %v4276_v0 = vrot.slane %v17436_v24, %v19228_v27  ;;  %18243 = vmatprep.subr.bf16.mxu1 %v18608_v57  ;;  %v4005_v1 = vcombine.high %v3989_v34, %v3989_v34 }
 0x1e1   : > { %v4236_v58 = vcombine.low %v4227_v23, %v4234_v29  ;;  %v4283_v12 = vrot.slane %v4255_v47, %v19228_v27  ;;  %v4456_v15 = vcombine.high %v4442_v41, %v4442_v41  ;;  %v4463_v10 = vrot.slane %v4442_v41, %v19228_v27 }
 0x1e2   : > { %v4243_v13 = vrot.slane %v4235_v50, %v19228_v27  ;;  %v4284_v46 = vcombine.low %v4262_v30, %v4269_v61  ;;  %v4307_v28 = vrot.slane %v4005_v1, %v19228_v27  ;;  %v4504_v55 = vcombine.high %v4443_v48, %v4443_v48 }
 0x1e3   : > { %v4250_v54 = vrot.slane %v4236_v58, %v19228_v27  ;;  %v4285_v7 = vcombine.low %v4276_v0, %v4283_v12  ;;  %18244 = vmatpush3.bf16.msra.mxu1 %v18608_v57  ;;  %v4470_v45 = vrot.slane %v4456_v15, %v19228_v27  ;;  %v4471_v63 = vcombine.high %v4463_v10, %v4463_v10 }
 0x1e4   : > { %v4292_v35 = vrot.slane %v4284_v46, %v19228_v27  ;;  %18245 = vmatprep.subr.bf16.mxu1 %v18609_v9  ;;  %v4314_v42 = vrot.slane %v4307_v28, %v19228_v27  ;;  %v4479_v11 = vrot.slane %v4463_v10, %v19228_v27  ;;  %v4511_v25 = vrot.slane %v4443_v48, %v19228_v27 }
 0x1e5   : > { %v4251_v52 = vcombine.low %v4243_v13, %v4250_v54  ;;  %v4299_v8 = vrot.slane %v4285_v7, %v19228_v27  ;;  %v4472_v38 = vcombine.high %v4470_v45, %v4470_v45  ;;  %v4486_v43 = vrot.slane %v4470_v45, %v19228_v27  ;;  %v4446_v13 = vld [vmem:[#allocation2 + $0x61] sm:$0x7f] }
 0x1e6   : > { %v4325_v60 = vpack.c.bf16 %v4314_v42, %v4314_v42  ;;  %v4493_v19 = vrot.slane %v4471_v63, %v19228_v27  ;;  %v4518_v6 = vrot.slane %v4504_v55, %v19228_v27  ;;  %v4519_v18 = vcombine.high %v4511_v25, %v4511_v25 }
 0x1e7   : > { %v4300_v26 = vcombine.low %v4292_v35, %v4299_v8  ;;  %18246 = vmatpush3.bf16.msra.mxu1 %v18609_v9  ;;  %v4500_v39 = vrot.slane %v4472_v38, %v19228_v27  ;;  %v4502_v21 = vcombine.high %v4486_v43, %v4486_v43  ;;  %v4527_v22 = vrot.slane %v4511_v25, %v19228_v27  ;;  %v4445_v9 = vld [vmem:[#allocation2 + $0x59] sm:$0x7f] }
 0x1e8   : > { %v4520_v17 = vcombine.high %v4518_v6, %v4518_v6  ;;  %v4534_v20 = vrot.slane %v4518_v6, %v19228_v27  ;;  %v4541_v31 = vrot.slane %v4519_v18, %v19228_v27  ;;  %v4552_v5 = vcombine.high %v4444_v56, %v4444_v56  ;;  %18247 = vmatprep.subr.bf16.mxu1 %v18613_v51 }
 0x1e9   : > { %v4324_v2 = vpack.c.bf16 %v4300_v26, %v4251_v52  ;;  %v4549_v34 = vcombine.high %v4527_v22, %v4527_v22  ;;  %v4559_v53 = vrot.slane %v4444_v56, %v19228_v27  ;;  %v4792_v37 = vcombine.low %v4479_v11, %v4493_v19 }
 0x1ea   : > { %v4548_v4 = vrot.slane %v4520_v17, %v19228_v27  ;;  %v4550_v40 = vcombine.high %v4534_v20, %v4534_v20  ;;  %v4551_v57 = vcombine.high %v4541_v31, %v4541_v31  ;;  %v4566_v3 = vrot.slane %v4552_v5, %v19228_v27 }
 0x1eb   : > { %18237 = vmatprep.mubr.msk.bf16.mxu1 %vm606_vm2, %v4324_v2  ;;  %v4567_v59 = vcombine.high %v4559_v53, %v4559_v53  ;;  %v4575_v16 = vrot.slane %v4559_v53, %v19228_v27  ;;  %v17453_v44 = vcombine.high %v4479_v11, %v4493_v19  ;;  %v4794_v49 = vcombine.low %v4486_v43, %v4500_v39 }
 0x1ec   : > { %18238 = vmatmul.mubr.msk.bf16.gmra.mrb[40].mxu1 %vm606_vm2, %v4325_v60  ;;  %v4568_v14 = vcombine.high %v4566_v3, %v4566_v3  ;;  %v4582_v24 = vrot.slane %v4566_v3, %v19228_v27  ;;  %v4795_v41 = vcombine.low %v4502_v21, %v4527_v22  ;;  %v4802_v23 = vrot.slane %v4792_v37, %v19228_v27 }
 0x1ed   : > { %v4589_v29 = vrot.slane %v4567_v59, %v19228_v27  ;;  %v4809_v47 = vrot.slane %v17453_v44, %v19228_v27  ;;  %v4816_v30 = vrot.slane %v4794_v49, %v19228_v27  ;;  %v4841_v48 = vcombine.low %v4541_v31, %v4549_v34  ;;  %18248 = vmatpush3.bf16.msra.mxu1 %v18613_v51 }
 0x1ee   : > { %v4823_v50 = vrot.slane %v4795_v41, %v19228_v27  ;;  %v4842_v61 = vcombine.low %v4551_v57, %v4534_v20  ;;  %v4843_v0 = vcombine.low %v4548_v4, %v4550_v40  ;;  %18257 = vmatprep.subr.bf16.mxu1 %v20175_v62  ;;  %v4596_v1 = vrot.slane %v4568_v14, %v19228_v27  ;;  %v4447_v41 = vld [vmem:[#allocation2 + $0x69] sm:$0x7f] }
 0x1ef   : > { %v4824_v58 = vcombine.low %v4802_v23, %v4809_v47  ;;  %v4844_v12 = vcombine.low %v4575_v16, %v4589_v29  ;;  %v4851_v15 = vrot.slane %v4841_v48, %v19228_v27  ;;  %v17454_v10 = vcombine.high %v4575_v16, %v4589_v29  ;;  %v4448_v48 = vld [vmem:[#allocation2 + $0x71] sm:$0x7f] }
 0x1f0   : > { %v4825_v46 = vcombine.low %v4816_v30, %v4823_v50  ;;  %v4858_v28 = vrot.slane %v4842_v61, %v19228_v27  ;;  %v4865_v55 = vrot.slane %v4843_v0, %v19228_v27  ;;  %v4598_v54 = vcombine.high %v4582_v24, %v4582_v24 }
 0x1f1   : > { %v4832_v7 = vrot.slane %v4824_v58, %v19228_v27  ;;  %v4872_v45 = vrot.slane %v4844_v12, %v19228_v27  ;;  %v4900_v63 = vrot.slane %v17454_v10, %v19228_v27  ;;  %v4600_v35 = vcombine.high %v4445_v9, %v4445_v9 }
 0x1f2   : > { %v4839_v42 = vrot.slane %v4825_v46, %v19228_v27  ;;  %v4873_v11 = vcombine.low %v4851_v15, %v4858_v28  ;;  %v4607_v25 = vrot.slane %v4445_v9, %v19228_v27  ;;  %v4655_v51 = vrot.slane %v4446_v13, %v19228_v27 }
 0x1f3   : > { %v4874_v52 = vcombine.low %v4865_v55, %v4872_v45  ;;  %v4614_v8 = vrot.slane %v4600_v35, %v19228_v27  ;;  %v4891_v56 = vcombine.low %v4582_v24, %v4596_v1  ;;  %v4648_v38 = vcombine.high %v4446_v13, %v4446_v13 }
 0x1f4   : > { %v4840_v43 = vcombine.low %v4832_v7, %v4839_v42  ;;  %v4881_v60 = vrot.slane %v4873_v11, %v19228_v27  ;;  %v4615_v19 = vcombine.high %v4607_v25, %v4607_v25  ;;  %v4623_v6 = vrot.slane %v4607_v25, %v19228_v27 }
 0x1f5   : > { %v4888_v18 = vrot.slane %v4874_v52, %v19228_v27  ;;  %v4616_v26 = vcombine.high %v4614_v8, %v4614_v8  ;;  %v4630_v39 = vrot.slane %v4614_v8, %v19228_v27  ;;  %v4663_v21 = vcombine.high %v4655_v51, %v4655_v51 }
 0x1f6   : > { %v4637_v22 = vrot.slane %v4615_v19, %v19228_v27  ;;  %v4645_v17 = vcombine.high %v4623_v6, %v4623_v6  ;;  %v4671_v20 = vrot.slane %v4655_v51, %v19228_v27  ;;  %v4892_v31 = vcombine.low %v4598_v54, %v4623_v6 }
 0x1f7   : > { %v4889_v5 = vcombine.low %v4881_v60, %v4888_v18  ;;  %v4644_v2 = vrot.slane %v4616_v26, %v19228_v27  ;;  %v4646_v34 = vcombine.high %v4630_v39, %v4630_v39  ;;  %v4685_v53 = vrot.slane %v4663_v21, %v19228_v27 }
 0x1f8   : > { %v4647_v37 = vcombine.high %v4637_v22, %v4637_v22  ;;  %v4893_v4 = vcombine.low %v4637_v22, %v4645_v17  ;;  %v4907_v40 = vrot.slane %v4891_v56, %v19228_v27  ;;  %v4914_v57 = vrot.slane %v4892_v31, %v19228_v27  ;;  %v18619_v31 = vld [vmem:[%s22368_s2 + $0x88] sm:$0xff]  }
 0x1f9   : > { %v5107_v3 = vpack.c.bf16 %v4889_v5, %v4840_v43  ;;  %v4940_v59 = vcombine.low %v4644_v2, %v4646_v34  ;;  %v4941_v16 = vcombine.low %v4671_v20, %v4685_v53  ;;  %v17455_v44 = vcombine.high %v4671_v20, %v4685_v53 }
 0x1fa   : > { %v4921_v49 = vrot.slane %v4893_v4, %v19228_v27  ;;  %v4922_v14 = vcombine.low %v4900_v63, %v4907_v40  ;;  %v4939_v24 = vcombine.low %v4647_v37, %v4630_v39  ;;  %v4662_v23 = vrot.slane %v4648_v38, %v19228_v27  ;;  %v5227_v37 = vld [vmem:[#allocation2 + $0x80] sm:$0x7f] }
 0x1fb   : > { %18249 = vmatprep.mubr.msk.bf16.mxu1 %vm606_vm2, %v5107_v3  ;;  %v4956_v29 = vrot.slane %v4940_v59, %v19228_v27  ;;  %v4963_v47 = vrot.slane %v4941_v16, %v19228_v27  ;;  %v4970_v30 = vrot.slane %v17455_v44, %v19228_v27  ;;  %v4696_v50 = vcombine.high %v4447_v41, %v4447_v41 }
 0x1fc   : > { %v4923_v61 = vcombine.low %v4914_v57, %v4921_v49  ;;  %v4930_v0 = vrot.slane %v4922_v14, %v19228_v27  ;;  %v4949_v9 = vrot.slane %v4939_v24, %v19228_v27  ;;  %v4664_v1 = vcombine.high %v4662_v23, %v4662_v23 }
 0x1fd   : > { %v4972_v58 = vcombine.low %v4963_v47, %v4970_v30  ;;  %v4678_v12 = vrot.slane %v4662_v23, %v19228_v27  ;;  %v4703_v15 = vrot.slane %v4447_v41, %v19228_v27  ;;  %v4710_v10 = vrot.slane %v4696_v50, %v19228_v27  ;;  %v18620_v41 = vld [vmem:[%s22368_s2 + $0x90] sm:$0xff]  }
 0x1fe   : > { %v4937_v13 = vrot.slane %v4923_v61, %v19228_v27  ;;  %v4971_v46 = vcombine.low %v4949_v9, %v4956_v29  ;;  %v4692_v28 = vrot.slane %v4664_v1, %v19228_v27  ;;  %v4744_v55 = vcombine.high %v4448_v48, %v4448_v48  ;;  %v5228_v29 = vld [vmem:[#allocation2 + $0x88] sm:$0x7f] }
 0x1ff   : > { %v4986_v54 = vrot.slane %v4972_v58, %v19228_v27  ;;  %v4694_v7 = vcombine.high %v4678_v12, %v4678_v12  ;;  %v4711_v45 = vcombine.high %v4703_v15, %v4703_v15  ;;  %v4712_v63 = vcombine.high %v4710_v10, %v4710_v10 }
 0x200   : > { %v4938_v35 = vcombine.low %v4930_v0, %v4937_v13  ;;  %v4979_v42 = vrot.slane %v4971_v46, %v19228_v27  ;;  %v4719_v11 = vrot.slane %v4703_v15, %v19228_v27  ;;  %v4726_v25 = vrot.slane %v4710_v10, %v19228_v27  ;;  %v5229_v46 = vld [vmem:[#allocation2 + $0x90] sm:$0x7f] }
 0x201   : > { %v4733_v51 = vrot.slane %v4711_v45, %v19228_v27  ;;  %v4740_v52 = vrot.slane %v4712_v63, %v19228_v27  ;;  %v4751_v8 = vrot.slane %v4448_v48, %v19228_v27  ;;  %v4758_v56 = vrot.slane %v4744_v55, %v19228_v27 }
 0x202   : > { %v4987_v38 = vcombine.low %v4979_v42, %v4986_v54  ;;  %v4741_v43 = vcombine.high %v4719_v11, %v4719_v11  ;;  %v4742_v60 = vcombine.high %v4726_v25, %v4726_v25  ;;  %v4988_v19 = vcombine.low %v4678_v12, %v4692_v28 }
 0x203   : > { %v4743_v6 = vcombine.high %v4733_v51, %v4733_v51  ;;  %v4759_v18 = vcombine.high %v4751_v8, %v4751_v8  ;;  %v4760_v26 = vcombine.high %v4758_v56, %v4758_v56  ;;  %v4767_v39 = vrot.slane %v4751_v8, %v19228_v27 }
 0x204   : > { %v5108_v21 = vpack.c.bf16 %v4987_v38, %v4938_v35  ;;  %v4774_v22 = vrot.slane %v4758_v56, %v19228_v27  ;;  %v4989_v17 = vcombine.low %v4694_v7, %v4719_v11  ;;  %v4990_v20 = vcombine.low %v4733_v51, %v4741_v43  ;;  %v18624_v7 = vld [vmem:[%s22368_s2 + $0x98] sm:$0xff]  }
 0x205   : > { %v4781_v5 = vrot.slane %v4759_v18, %v19228_v27  ;;  %v4788_v2 = vrot.slane %v4760_v26, %v19228_v27  ;;  %v4991_v34 = vcombine.low %v4743_v6, %v4726_v25  ;;  %v4998_v53 = vrot.slane %v4988_v19, %v19228_v27 }
 0x206   : > { %18250 = vmatmul.mubr.msk.bf16.vlgmr.msra.gmra.mrb[28].mxu1 %vm606_vm2, %v5108_v21  ;;  %v5005_v4 = vrot.slane %v4989_v17, %v19228_v27  ;;  %v5012_v40 = vrot.slane %v4990_v20, %v19228_v27  ;;  %v5037_v57 = vcombine.low %v4740_v52, %v4742_v60  ;;  %v4790_v3 = vcombine.high %v4774_v22, %v4774_v22 }
 0x207   : > { %18258 = vmatpush3.bf16.msra.mxu1 %v20175_v62  ;;  %v5019_v59 = vrot.slane %v4991_v34, %v19228_v27  ;;  %v5038_v16 = vcombine.low %v4767_v39, %v4781_v5  ;;  %v17456_v44 = vcombine.high %v4767_v39, %v4781_v5  ;;  %v5040_v49 = vcombine.low %v4774_v22, %v4788_v2  ;;  %v20276_v2 = vld [vmem:[%s22368_s2 + $0xa0] sm:$0xff]  }
 0x208   : > { %v5020_v14 = vcombine.low %v4998_v53, %v5005_v4  ;;  %v5047_v24 = vrot.slane %v5037_v57, %v19228_v27  ;;  %18259 = vmatprep.subr.bf16.mxu1 %v18619_v31  ;;  %v5092_v23 = vrot.slane %v4790_v3, %v19228_v27  ;;  %v5241_v47 = vcombine.high %v5227_v37, %v5227_v37 }
 0x209   : > { %v5021_v30 = vcombine.low %v5012_v40, %v5019_v59  ;;  %v5054_v62 = vrot.slane %v5038_v16, %v19228_v27  ;;  %v5061_v48 = vrot.slane %v17456_v44, %v19228_v27  ;;  %v5068_v50 = vrot.slane %v5040_v49, %v19228_v27 }
 0x20a   : > { %v5028_v61 = vrot.slane %v5020_v14, %v19228_v27  ;;  %v5099_v0 = vrot.slane %v5092_v23, %v19228_v27  ;;  %v5248_v9 = vrot.slane %v5227_v37, %v19228_v27  ;;  %v5255_v1 = vrot.slane %v5241_v47, %v19228_v27  ;;  %v5230_v47 = vld [vmem:[#allocation2 + $0x98] sm:$0x7f] }
 0x20b   : > { %v5035_v58 = vrot.slane %v5021_v30, %v19228_v27  ;;  %v5069_v12 = vcombine.low %v5047_v24, %v5054_v62  ;;  %v5070_v15 = vcombine.low %v5061_v48, %v5068_v50  ;;  %18260 = vmatpush3.bf16.msra.mxu1 %v18619_v31  ;;  %v5289_v10 = vcombine.high %v5228_v29, %v5228_v29 }
 0x20c   : > { %18261 = vmatprep.subr.bf16.mxu1 %v18620_v41  ;;  %v5110_v13 = vpack.c.bf16 %v5099_v0, %v5099_v0  ;;  %v5256_v28 = vcombine.high %v5248_v9, %v5248_v9  ;;  %v5257_v55 = vcombine.high %v5255_v1, %v5255_v1  ;;  %v5264_v54 = vrot.slane %v5248_v9, %v19228_v27 }
 0x20d   : > { %v5036_v45 = vcombine.low %v5028_v61, %v5035_v58  ;;  %v5077_v63 = vrot.slane %v5069_v12, %v19228_v27  ;;  %v5084_v35 = vrot.slane %v5070_v15, %v19228_v27  ;;  %v5271_v42 = vrot.slane %v5255_v1, %v19228_v27  ;;  %v5231_v1 = vld [vmem:[#allocation2 + $0xa0] sm:$0x7f] }
 0x20e   : > { %v5278_v11 = vrot.slane %v5256_v28, %v19228_v27  ;;  %v5285_v25 = vrot.slane %v5257_v55, %v19228_v27  ;;  %v5296_v51 = vrot.slane %v5228_v29, %v19228_v27  ;;  %v5303_v52 = vrot.slane %v5289_v10, %v19228_v27 }
 0x20f   : > { %v5085_v8 = vcombine.low %v5077_v63, %v5084_v35  ;;  %18262 = vmatpush3.bf16.msra.mxu1 %v18620_v41  ;;  %v5287_v56 = vcombine.high %v5271_v42, %v5271_v42  ;;  %v5337_v38 = vcombine.high %v5229_v46, %v5229_v46  ;;  %v5344_v43 = vrot.slane %v5229_v46, %v19228_v27 }
 0x210   : > { %v5304_v60 = vcombine.high %v5296_v51, %v5296_v51  ;;  %v5305_v19 = vcombine.high %v5303_v52, %v5303_v52  ;;  %v5312_v6 = vrot.slane %v5296_v51, %v19228_v27  ;;  %v5319_v18 = vrot.slane %v5303_v52, %v19228_v27  ;;  %18263 = vmatprep.subr.bf16.mxu1 %v18624_v7 }
 0x211   : > { %v5109_v26 = vpack.c.bf16 %v5085_v8, %v5036_v45  ;;  %v5351_v39 = vrot.slane %v5337_v38, %v19228_v27  ;;  %v5352_v21 = vcombine.high %v5344_v43, %v5344_v43  ;;  %v5360_v22 = vrot.slane %v5344_v43, %v19228_v27 }
 0x212   : > { %v5326_v17 = vrot.slane %v5304_v60, %v19228_v27  ;;  %v5333_v20 = vrot.slane %v5305_v19, %v19228_v27  ;;  %v5334_v31 = vcombine.high %v5312_v6, %v5312_v6  ;;  %v5335_v5 = vcombine.high %v5319_v18, %v5319_v18 }
 0x213   : > { %18253 = vmatprep.mubr.msk.bf16.mxu1 %vm606_vm2, %v5109_v26  ;;  %v5353_v34 = vcombine.high %v5351_v39, %v5351_v39  ;;  %v5367_v53 = vrot.slane %v5351_v39, %v19228_v27  ;;  %v5374_v37 = vrot.slane %v5352_v21, %v19228_v27  ;;  %v5577_v4 = vcombine.low %v5264_v54, %v5278_v11 }
 0x214   : > { %18254 = vmatmul.mubr.msk.bf16.gmra.mrb[44].mxu1 %vm606_vm2, %v5110_v13  ;;  %v5336_v40 = vcombine.high %v5326_v17, %v5326_v17  ;;  %v17473_v57 = vcombine.high %v5264_v54, %v5278_v11  ;;  %v5579_v3 = vcombine.low %v5271_v42, %v5285_v25  ;;  %v5580_v59 = vcombine.low %v5287_v56, %v5312_v6 }
 0x215   : > { %v5587_v16 = vrot.slane %v5577_v4, %v19228_v27  ;;  %v5626_v44 = vcombine.low %v5326_v17, %v5334_v31  ;;  %v5628_v49 = vcombine.low %v5333_v20, %v5335_v5  ;;  %v5629_v14 = vcombine.low %v5360_v22, %v5374_v37  ;;  %18264 = vmatpush3.bf16.msra.mxu1 %v18624_v7  ;;  %v5232_v4 = vld [vmem:[#allocation2 + $0xa8] sm:$0x7f] }
 0x216   : > { %v5594_v24 = vrot.slane %v17473_v57, %v19228_v27  ;;  %v5601_v41 = vrot.slane %v5579_v3, %v19228_v27  ;;  %v5608_v23 = vrot.slane %v5580_v59, %v19228_v27  ;;  %v5627_v29 = vcombine.low %v5336_v40, %v5319_v18  ;;  %18273 = vmatprep.subr.bf16.mxu1 %v20276_v2  ;;  %v5233_v3 = vld [vmem:[#allocation2 + $0xb0] sm:$0x7f] }
 0x217   : > { %v5636_v30 = vrot.slane %v5626_v44, %v19228_v27  ;;  %v5650_v62 = vrot.slane %v5628_v49, %v19228_v27  ;;  %v5657_v48 = vrot.slane %v5629_v14, %v19228_v27  ;;  %v17474_v50 = vcombine.high %v5360_v22, %v5374_v37 }
 0x218   : > { %v5609_v61 = vcombine.low %v5587_v16, %v5594_v24  ;;  %v5610_v0 = vcombine.low %v5601_v41, %v5608_v23  ;;  %v5643_v9 = vrot.slane %v5627_v29, %v19228_v27  ;;  %v5381_v58 = vrot.slane %v5353_v34, %v19228_v27 }
 0x219   : > { %v5659_v12 = vcombine.low %v5650_v62, %v5657_v48  ;;  %v5685_v15 = vrot.slane %v17474_v50, %v19228_v27  ;;  %v5383_v10 = vcombine.high %v5367_v53, %v5367_v53  ;;  %v5385_v13 = vcombine.high %v5230_v47, %v5230_v47 }
 0x21a   : > { %v5617_v46 = vrot.slane %v5609_v61, %v19228_v27  ;;  %v5624_v28 = vrot.slane %v5610_v0, %v19228_v27  ;;  %v5658_v55 = vcombine.low %v5636_v30, %v5643_v9  ;;  %v5392_v54 = vrot.slane %v5230_v47, %v19228_v27 }
 0x21b   : > { %v5673_v7 = vrot.slane %v5659_v12, %v19228_v27  ;;  %v5399_v45 = vrot.slane %v5385_v13, %v19228_v27  ;;  %v5440_v63 = vrot.slane %v5231_v1, %v19228_v27  ;;  %v5676_v35 = vcombine.low %v5367_v53, %v5381_v58 }
 0x21c   : > { %v5625_v42 = vcombine.low %v5617_v46, %v5624_v28  ;;  %v5666_v11 = vrot.slane %v5658_v55, %v19228_v27  ;;  %v5400_v25 = vcombine.high %v5392_v54, %v5392_v54  ;;  %v5408_v51 = vrot.slane %v5392_v54, %v19228_v27 }
 0x21d   : > { %v5401_v52 = vcombine.high %v5399_v45, %v5399_v45  ;;  %v5415_v8 = vrot.slane %v5399_v45, %v19228_v27  ;;  %v5448_v56 = vcombine.high %v5440_v63, %v5440_v63  ;;  %v5456_v38 = vrot.slane %v5440_v63, %v19228_v27 }
 0x21e   : > { %v5674_v43 = vcombine.low %v5666_v11, %v5673_v7  ;;  %v5422_v60 = vrot.slane %v5400_v25, %v19228_v27  ;;  %v5430_v19 = vcombine.high %v5408_v51, %v5408_v51  ;;  %v5677_v6 = vcombine.low %v5383_v10, %v5408_v51 }
 0x21f   : > { %v5429_v18 = vrot.slane %v5401_v52, %v19228_v27  ;;  %v5431_v26 = vcombine.high %v5415_v8, %v5415_v8  ;;  %v5470_v39 = vrot.slane %v5448_v56, %v19228_v27  ;;  %v5692_v21 = vrot.slane %v5676_v35, %v19228_v27 }
 0x220   : > { %v5892_v22 = vpack.c.bf16 %v5674_v43, %v5625_v42  ;;  %v5432_v17 = vcombine.high %v5422_v60, %v5422_v60  ;;  %v5678_v20 = vcombine.low %v5422_v60, %v5430_v19  ;;  %v5699_v31 = vrot.slane %v5677_v6, %v19228_v27  ;;  %v18630_v6 = vld [vmem:[%s22368_s2 + $0xa8] sm:$0xff]  }
 0x221   : > { %v5707_v5 = vcombine.low %v5685_v15, %v5692_v21  ;;  %v5725_v34 = vcombine.low %v5429_v18, %v5431_v26  ;;  %v5726_v53 = vcombine.low %v5456_v38, %v5470_v39  ;;  %v17475_v37 = vcombine.high %v5456_v38, %v5470_v39 }
 0x222   : > { %18265 = vmatprep.mubr.msk.bf16.mxu1 %vm606_vm2, %v5892_v22  ;;  %v5706_v40 = vrot.slane %v5678_v20, %v19228_v27  ;;  %v5724_v57 = vcombine.low %v5432_v17, %v5415_v8  ;;  %v5433_v59 = vcombine.high %v5231_v1, %v5231_v1  ;;  %v5481_v16 = vcombine.high %v5232_v4, %v5232_v4 }
 0x223   : > { %v5715_v44 = vrot.slane %v5707_v5, %v19228_v27  ;;  %v5741_v49 = vrot.slane %v5725_v34, %v19228_v27  ;;  %v5748_v14 = vrot.slane %v5726_v53, %v19228_v27  ;;  %v5755_v24 = vrot.slane %v17475_v37, %v19228_v27  ;;  %v6012_v5 = vld [vmem:[#allocation2 + $0xc0] sm:$0x7f] }
 0x224   : > { %v5708_v41 = vcombine.low %v5699_v31, %v5706_v40  ;;  %v5734_v23 = vrot.slane %v5724_v57, %v19228_v27  ;;  %v5447_v29 = vrot.slane %v5433_v59, %v19228_v27  ;;  %v5488_v47 = vrot.slane %v5232_v4, %v19228_v27  ;;  %v6013_v40 = vld [vmem:[#allocation2 + $0xc8] sm:$0x7f] }
 0x225   : > { %v5757_v30 = vcombine.low %v5748_v14, %v5755_v24  ;;  %v5495_v62 = vrot.slane %v5481_v16, %v19228_v27  ;;  %v5529_v48 = vcombine.high %v5233_v3, %v5233_v3  ;;  %v5536_v50 = vrot.slane %v5233_v3, %v19228_v27 }
 0x226   : > { %v5722_v61 = vrot.slane %v5708_v41, %v19228_v27  ;;  %v5756_v0 = vcombine.low %v5734_v23, %v5741_v49  ;;  %v5449_v9 = vcombine.high %v5447_v29, %v5447_v29  ;;  %v5463_v1 = vrot.slane %v5447_v29, %v19228_v27 }
 0x227   : > { %v5771_v58 = vrot.slane %v5757_v30, %v19228_v27  ;;  %v5496_v12 = vcombine.high %v5488_v47, %v5488_v47  ;;  %v5497_v15 = vcombine.high %v5495_v62, %v5495_v62  ;;  %v5504_v10 = vrot.slane %v5488_v47, %v19228_v27 }
 0x228   : > { %v5723_v13 = vcombine.low %v5715_v44, %v5722_v61  ;;  %v5764_v46 = vrot.slane %v5756_v0, %v19228_v27  ;;  %v5477_v28 = vrot.slane %v5449_v9, %v19228_v27  ;;  %v5479_v55 = vcombine.high %v5463_v1, %v5463_v1  ;;  %v18631_v44 = vld [vmem:[%s22368_s2 + $0xb0] sm:$0xff]  }
 0x229   : > { %v5511_v54 = vrot.slane %v5495_v62, %v19228_v27  ;;  %v5518_v7 = vrot.slane %v5496_v12, %v19228_v27  ;;  %v5525_v45 = vrot.slane %v5497_v15, %v19228_v27  ;;  %v5526_v63 = vcombine.high %v5504_v10, %v5504_v10  ;;  %v6014_v9 = vld [vmem:[#allocation2 + $0xd0] sm:$0x7f]  ;;  %v18635_v12 = vld [vmem:[%s22368_s2 + $0xb8] sm:$0xff]  }
 0x22a   : > { %v5772_v35 = vcombine.low %v5764_v46, %v5771_v58  ;;  %v5543_v42 = vrot.slane %v5529_v48, %v19228_v27  ;;  %v5544_v11 = vcombine.high %v5536_v50, %v5536_v50  ;;  %v5552_v25 = vrot.slane %v5536_v50, %v19228_v27 }
 0x22b   : > { %v5527_v51 = vcombine.high %v5511_v54, %v5511_v54  ;;  %v5528_v52 = vcombine.high %v5518_v7, %v5518_v7  ;;  %v5773_v8 = vcombine.low %v5463_v1, %v5477_v28  ;;  %v5774_v56 = vcombine.low %v5479_v55, %v5504_v10 }
 0x22c   : > { %v5893_v38 = vpack.c.bf16 %v5772_v35, %v5723_v13  ;;  %v5545_v43 = vcombine.high %v5543_v42, %v5543_v42  ;;  %v5559_v60 = vrot.slane %v5543_v42, %v19228_v27  ;;  %v5566_v19 = vrot.slane %v5544_v11, %v19228_v27 }
 0x22d   : > { %v5775_v18 = vcombine.low %v5518_v7, %v5526_v63  ;;  %v5776_v26 = vcombine.low %v5528_v52, %v5511_v54  ;;  %v5783_v39 = vrot.slane %v5773_v8, %v19228_v27  ;;  %v5790_v21 = vrot.slane %v5774_v56, %v19228_v27 }
 0x22e   : > { %18266 = vmatmul.mubr.msk.bf16.vlgmr.msra.gmra.mrb[28].mxu1 %vm606_vm2, %v5893_v38  ;;  %v5573_v22 = vrot.slane %v5545_v43, %v19228_v27  ;;  %v5822_v17 = vcombine.low %v5525_v45, %v5527_v51  ;;  %v5823_v20 = vcombine.low %v5552_v25, %v5566_v19  ;;  %v17476_v31 = vcombine.high %v5552_v25, %v5566_v19 }
 0x22f   : > { %18274 = vmatpush3.bf16.msra.mxu1 %v20276_v2  ;;  %v5797_v34 = vrot.slane %v5775_v18, %v19228_v27  ;;  %v5804_v53 = vrot.slane %v5776_v26, %v19228_v27  ;;  %v5805_v37 = vcombine.low %v5783_v39, %v5790_v21  ;;  %v5575_v4 = vcombine.high %v5559_v60, %v5559_v60  ;;  %v20375_v26 = vld [vmem:[%s22368_s2 + $0xc0] sm:$0xff]  }
 0x230   : > { %v5825_v57 = vcombine.low %v5559_v60, %v5573_v22  ;;  %v5832_v3 = vrot.slane %v5822_v17, %v19228_v27  ;;  %v5839_v59 = vrot.slane %v5823_v20, %v19228_v27  ;;  %v5846_v16 = vrot.slane %v17476_v31, %v19228_v27  ;;  %18275 = vmatprep.subr.bf16.mxu1 %v18630_v6 }
 0x231   : > { %v5806_v2 = vcombine.low %v5797_v34, %v5804_v53  ;;  %v5813_v49 = vrot.slane %v5805_v37, %v19228_v27  ;;  %v5877_v14 = vrot.slane %v5575_v4, %v19228_v27  ;;  %v6026_v24 = vcombine.high %v6012_v5, %v6012_v5 }
 0x232   : > { %v5853_v41 = vrot.slane %v5825_v57, %v19228_v27  ;;  %v5854_v23 = vcombine.low %v5832_v3, %v5839_v59  ;;  %v6033_v29 = vrot.slane %v6012_v5, %v19228_v27  ;;  %v6074_v47 = vcombine.high %v6013_v40, %v6013_v40 }
 0x233   : > { %v5820_v30 = vrot.slane %v5806_v2, %v19228_v27  ;;  %18276 = vmatpush3.bf16.msra.mxu1 %v18630_v6  ;;  %v5884_v62 = vrot.slane %v5877_v14, %v19228_v27  ;;  %v6040_v48 = vrot.slane %v6026_v24, %v19228_v27  ;;  %v6081_v50 = vrot.slane %v6013_v40, %v19228_v27 }
 0x234   : > { %v5855_v61 = vcombine.low %v5846_v16, %v5853_v41  ;;  %v5862_v0 = vrot.slane %v5854_v23, %v19228_v27  ;;  %18277 = vmatprep.subr.bf16.mxu1 %v18631_v44  ;;  %v6041_v1 = vcombine.high %v6033_v29, %v6033_v29  ;;  %v6049_v58 = vrot.slane %v6033_v29, %v19228_v27  ;;  %v6015_v16 = vld [vmem:[#allocation2 + $0xd8] sm:$0x7f]  ;;  %v6016_v41 = vld [vmem:[#allocation2 + $0xe0] sm:$0x7f] }
 0x235   : > { %v5821_v15 = vcombine.low %v5813_v49, %v5820_v30  ;;  %v5895_v10 = vpack.c.bf16 %v5884_v62, %v5884_v62  ;;  %v6042_v13 = vcombine.high %v6040_v48, %v6040_v48  ;;  %v6056_v46 = vrot.slane %v6040_v48, %v19228_v27 }
 0x236   : > { %v5869_v28 = vrot.slane %v5855_v61, %v19228_v27  ;;  %v6063_v55 = vrot.slane %v6041_v1, %v19228_v27  ;;  %v6088_v54 = vrot.slane %v6074_v47, %v19228_v27  ;;  %v6089_v7 = vcombine.high %v6081_v50, %v6081_v50 }
 0x237   : > { %18278 = vmatpush3.bf16.msra.mxu1 %v18631_v44  ;;  %v6070_v45 = vrot.slane %v6042_v13, %v19228_v27  ;;  %v6072_v63 = vcombine.high %v6056_v46, %v6056_v46  ;;  %v6097_v35 = vrot.slane %v6081_v50, %v19228_v27  ;;  %v6122_v42 = vcombine.high %v6014_v9, %v6014_v9 }
 0x238   : > { %v5870_v11 = vcombine.low %v5862_v0, %v5869_v28  ;;  %v6090_v25 = vcombine.high %v6088_v54, %v6088_v54  ;;  %v6104_v51 = vrot.slane %v6088_v54, %v19228_v27  ;;  %v6111_v52 = vrot.slane %v6089_v7, %v19228_v27  ;;  %18279 = vmatprep.subr.bf16.mxu1 %v18635_v12 }
 0x239   : > { %v6119_v8 = vcombine.high %v6097_v35, %v6097_v35  ;;  %v6129_v56 = vrot.slane %v6014_v9, %v19228_v27  ;;  %v6136_v38 = vrot.slane %v6122_v42, %v19228_v27  ;;  %v6362_v43 = vcombine.low %v6049_v58, %v6063_v55 }
 0x23a   : > { %v5894_v60 = vpack.c.bf16 %v5870_v11, %v5821_v15  ;;  %v6118_v19 = vrot.slane %v6090_v25, %v19228_v27  ;;  %v6120_v6 = vcombine.high %v6104_v51, %v6104_v51  ;;  %v6121_v18 = vcombine.high %v6111_v52, %v6111_v52 }
 0x23b   : > { %v6137_v39 = vcombine.high %v6129_v56, %v6129_v56  ;;  %v6138_v21 = vcombine.high %v6136_v38, %v6136_v38  ;;  %v6145_v22 = vrot.slane %v6129_v56, %v19228_v27  ;;  %v6152_v17 = vrot.slane %v6136_v38, %v19228_v27  ;;  %18280 = vmatpush3.bf16.msra.mxu1 %v18635_v12 }
 0x23c   : > { %18269 = vmatprep.mubr.msk.bf16.mxu1 %vm606_vm2, %v5894_v60  ;;  %v17493_v20 = vcombine.high %v6049_v58, %v6063_v55  ;;  %v6364_v31 = vcombine.low %v6056_v46, %v6070_v45  ;;  %v6365_v5 = vcombine.low %v6072_v63, %v6097_v35  ;;  %v6372_v34 = vrot.slane %v6362_v43, %v19228_v27 }
 0x23d   : > { %18270 = vmatmul.mubr.msk.bf16.gmra.mrb[48].mxu1 %vm606_vm2, %v5895_v10  ;;  %v6159_v53 = vrot.slane %v6137_v39, %v19228_v27  ;;  %v6411_v37 = vcombine.low %v6111_v52, %v6119_v8  ;;  %v6412_v4 = vcombine.low %v6121_v18, %v6104_v51  ;;  %v6413_v40 = vcombine.low %v6118_v19, %v6120_v6 }
 0x23e   : > { %v6379_v57 = vrot.slane %v17493_v20, %v19228_v27  ;;  %v6386_v3 = vrot.slane %v6364_v31, %v19228_v27  ;;  %v6393_v59 = vrot.slane %v6365_v5, %v19228_v27  ;;  %18289 = vmatprep.subr.bf16.mxu1 %v20375_v26  ;;  %v6166_v44 = vrot.slane %v6138_v21, %v19228_v27  ;;  %v6017_v20 = vld [vmem:[#allocation2 + $0xe8] sm:$0x7f] }
 0x23f   : > { %v6414_v2 = vcombine.low %v6145_v22, %v6159_v53  ;;  %v6421_v49 = vrot.slane %v6411_v37, %v19228_v27  ;;  %v6428_v14 = vrot.slane %v6412_v4, %v19228_v27  ;;  %v6435_v24 = vrot.slane %v6413_v40, %v19228_v27 }
 0x240   : > { %v6394_v23 = vcombine.low %v6372_v34, %v6379_v57  ;;  %v6395_v29 = vcombine.low %v6386_v3, %v6393_v59  ;;  %v17494_v47 = vcombine.high %v6145_v22, %v6159_v53  ;;  %v6168_v30 = vcombine.high %v6152_v17, %v6152_v17  ;;  %v6018_v34 = vld [vmem:[#allocation2 + $0xf0] sm:$0x7f] }
 0x241   : > { %v6442_v62 = vrot.slane %v6414_v2, %v19228_v27  ;;  %v6443_v48 = vcombine.low %v6421_v49, %v6428_v14  ;;  %v6170_v50 = vcombine.high %v6015_v16, %v6015_v16  ;;  %v6177_v61 = vrot.slane %v6015_v16, %v19228_v27 }
 0x242   : > { %v6402_v0 = vrot.slane %v6394_v23, %v19228_v27  ;;  %v6409_v9 = vrot.slane %v6395_v29, %v19228_v27  ;;  %v6470_v1 = vrot.slane %v17494_v47, %v19228_v27  ;;  %v6225_v58 = vrot.slane %v6016_v41, %v19228_v27 }
 0x243   : > { %v6444_v12 = vcombine.low %v6435_v24, %v6442_v62  ;;  %v6451_v15 = vrot.slane %v6443_v48, %v19228_v27  ;;  %v6184_v10 = vrot.slane %v6170_v50, %v19228_v27  ;;  %v6185_v13 = vcombine.high %v6177_v61, %v6177_v61 }
 0x244   : > { %v6410_v46 = vcombine.low %v6402_v0, %v6409_v9  ;;  %v6193_v28 = vrot.slane %v6177_v61, %v19228_v27  ;;  %v6233_v55 = vcombine.high %v6225_v58, %v6225_v58  ;;  %v6241_v54 = vrot.slane %v6225_v58, %v19228_v27 }
 0x245   : > { %v6458_v7 = vrot.slane %v6444_v12, %v19228_v27  ;;  %v6186_v45 = vcombine.high %v6184_v10, %v6184_v10  ;;  %v6200_v63 = vrot.slane %v6184_v10, %v19228_v27  ;;  %v6207_v35 = vrot.slane %v6185_v13, %v19228_v27 }
 0x246   : > { %v6215_v42 = vcombine.high %v6193_v28, %v6193_v28  ;;  %v6255_v11 = vrot.slane %v6233_v55, %v19228_v27  ;;  %v6461_v25 = vcombine.low %v6152_v17, %v6166_v44  ;;  %v6462_v51 = vcombine.low %v6168_v30, %v6193_v28 }
 0x247   : > { %v6459_v52 = vcombine.low %v6451_v15, %v6458_v7  ;;  %v6214_v8 = vrot.slane %v6186_v45, %v19228_v27  ;;  %v6216_v56 = vcombine.high %v6200_v63, %v6200_v63  ;;  %v6217_v38 = vcombine.high %v6207_v35, %v6207_v35 }
 0x248   : > { %v6463_v43 = vcombine.low %v6207_v35, %v6215_v42  ;;  %v6477_v60 = vrot.slane %v6461_v25, %v19228_v27  ;;  %v6484_v19 = vrot.slane %v6462_v51, %v19228_v27  ;;  %v6511_v6 = vcombine.low %v6241_v54, %v6255_v11  ;;  %v18641_v35 = vld [vmem:[%s22368_s2 + $0xc8] sm:$0xff]  }
 0x249   : > { %v6677_v18 = vpack.c.bf16 %v6459_v52, %v6410_v46  ;;  %v6509_v39 = vcombine.low %v6217_v38, %v6200_v63  ;;  %v6510_v21 = vcombine.low %v6214_v8, %v6216_v56  ;;  %v17495_v22 = vcombine.high %v6241_v54, %v6255_v11  ;;  %v6797_v52 = vld [vmem:[#allocation2 + $0x81] sm:$0x7f] }
 0x24a   : > { %v6491_v31 = vrot.slane %v6463_v43, %v19228_v27  ;;  %v6492_v17 = vcombine.low %v6470_v1, %v6477_v60  ;;  %v6533_v5 = vrot.slane %v6511_v6, %v19228_v27  ;;  %v6218_v53 = vcombine.high %v6016_v41, %v6016_v41 }
 0x24b   : > { %18281 = vmatprep.mubr.msk.bf16.mxu1 %vm606_vm2, %v6677_v18  ;;  %v6519_v37 = vrot.slane %v6509_v39, %v19228_v27  ;;  %v6526_v4 = vrot.slane %v6510_v21, %v19228_v27  ;;  %v6540_v40 = vrot.slane %v17495_v22, %v19228_v27  ;;  %v6266_v57 = vcombine.high %v6017_v20, %v6017_v20  ;;  %v18642_v22 = vld [vmem:[%s22368_s2 + $0xd0] sm:$0xff]  }
 0x24c   : > { %v6493_v3 = vcombine.low %v6484_v19, %v6491_v31  ;;  %v6500_v59 = vrot.slane %v6492_v17, %v19228_v27  ;;  %v6232_v16 = vrot.slane %v6218_v53, %v19228_v27  ;;  %v6273_v44 = vrot.slane %v6017_v20, %v19228_v27 }
 0x24d   : > { %v6541_v2 = vcombine.low %v6519_v37, %v6526_v4  ;;  %v6542_v49 = vcombine.low %v6533_v5, %v6540_v40  ;;  %v6280_v14 = vrot.slane %v6266_v57, %v19228_v27  ;;  %v6314_v24 = vcombine.high %v6018_v34, %v6018_v34 }
 0x24e   : > { %v6507_v41 = vrot.slane %v6493_v3, %v19228_v27  ;;  %v6234_v23 = vcombine.high %v6232_v16, %v6232_v16  ;;  %v6248_v29 = vrot.slane %v6232_v16, %v19228_v27  ;;  %v6281_v47 = vcombine.high %v6273_v44, %v6273_v44  ;;  %v6798_v16 = vld [vmem:[#allocation2 + $0x89] sm:$0x7f] }
 0x24f   : > { %v6549_v30 = vrot.slane %v6541_v2, %v19228_v27  ;;  %v6556_v62 = vrot.slane %v6542_v49, %v19228_v27  ;;  %v6282_v48 = vcombine.high %v6280_v14, %v6280_v14  ;;  %v6289_v50 = vrot.slane %v6273_v44, %v19228_v27 }
 0x250   : > { %v6508_v61 = vcombine.low %v6500_v59, %v6507_v41  ;;  %v6262_v0 = vrot.slane %v6234_v23, %v19228_v27  ;;  %v6264_v9 = vcombine.high %v6248_v29, %v6248_v29  ;;  %v6296_v1 = vrot.slane %v6280_v14, %v19228_v27  ;;  %v18646_v41 = vld [vmem:[%s22368_s2 + $0xd8] sm:$0xff]  }
 0x251   : > { %v6557_v58 = vcombine.low %v6549_v30, %v6556_v62  ;;  %v6303_v12 = vrot.slane %v6281_v47, %v19228_v27  ;;  %v6310_v15 = vrot.slane %v6282_v48, %v19228_v27  ;;  %v6311_v10 = vcombine.high %v6289_v50, %v6289_v50  ;;  %v6799_v47 = vld [vmem:[#allocation2 + $0x91] sm:$0x7f] }
 0x252   : > { %v6312_v13 = vcombine.high %v6296_v1, %v6296_v1  ;;  %v6321_v46 = vrot.slane %v6018_v34, %v19228_v27  ;;  %v6328_v28 = vrot.slane %v6314_v24, %v19228_v27  ;;  %v6558_v55 = vcombine.low %v6248_v29, %v6262_v0 }
 0x253   : > { %v6678_v54 = vpack.c.bf16 %v6557_v58, %v6508_v61  ;;  %v6313_v7 = vcombine.high %v6303_v12, %v6303_v12  ;;  %v6559_v45 = vcombine.low %v6264_v9, %v6289_v50  ;;  %v6560_v63 = vcombine.low %v6303_v12, %v6311_v10 }
 0x254   : > { %v6329_v42 = vcombine.high %v6321_v46, %v6321_v46  ;;  %v6330_v11 = vcombine.high %v6328_v28, %v6328_v28  ;;  %v6337_v25 = vrot.slane %v6321_v46, %v19228_v27  ;;  %v6344_v51 = vrot.slane %v6328_v28, %v19228_v27  ;;  %v20470_v28 = vld [vmem:[%s22368_s2 + $0xe0] sm:$0xff]  }
 0x255   : > { %18282 = vmatmul.mubr.msk.bf16.vlgmr.msra.gmra.mrb[28].mxu1 %vm606_vm2, %v6678_v54  ;;  %v6561_v8 = vcombine.low %v6313_v7, %v6296_v1  ;;  %v6568_v56 = vrot.slane %v6558_v55, %v19228_v27  ;;  %v6575_v38 = vrot.slane %v6559_v45, %v19228_v27  ;;  %v6582_v43 = vrot.slane %v6560_v63, %v19228_v27 }
 0x256   : > { %18290 = vmatpush3.bf16.msra.mxu1 %v20375_v26  ;;  %v6351_v60 = vrot.slane %v6329_v42, %v19228_v27  ;;  %v6358_v19 = vrot.slane %v6330_v11, %v19228_v27  ;;  %v6607_v6 = vcombine.low %v6310_v15, %v6312_v13  ;;  %v6360_v18 = vcombine.high %v6344_v51, %v6344_v51 }
 0x257   : > { %v6589_v39 = vrot.slane %v6561_v8, %v19228_v27  ;;  %v6590_v21 = vcombine.low %v6568_v56, %v6575_v38  ;;  %18291 = vmatprep.subr.bf16.mxu1 %v18641_v35  ;;  %v6811_v20 = vcombine.high %v6797_v52, %v6797_v52  ;;  %v6818_v31 = vrot.slane %v6797_v52, %v19228_v27 }
 0x258   : > { %v6608_v17 = vcombine.low %v6337_v25, %v6351_v60  ;;  %v17496_v5 = vcombine.high %v6337_v25, %v6351_v60  ;;  %v6610_v26 = vcombine.low %v6344_v51, %v6358_v19  ;;  %v6617_v34 = vrot.slane %v6607_v6, %v19228_v27 }
 0x259   : > { %v6591_v53 = vcombine.low %v6582_v43, %v6589_v39  ;;  %v6598_v37 = vrot.slane %v6590_v21, %v19228_v27  ;;  %v6662_v4 = vrot.slane %v6360_v18, %v19228_v27  ;;  %v6825_v40 = vrot.slane %v6811_v20, %v19228_v27 }
 0x25a   : > { %v6624_v57 = vrot.slane %v6608_v17, %v19228_v27  ;;  %v6631_v3 = vrot.slane %v17496_v5, %v19228_v27  ;;  %v6638_v59 = vrot.slane %v6610_v26, %v19228_v27  ;;  %18292 = vmatpush3.bf16.msra.mxu1 %v18641_v35  ;;  %v6826_v44 = vcombine.high %v6818_v31, %v6818_v31 }
 0x25b   : > { %v6605_v2 = vrot.slane %v6591_v53, %v19228_v27  ;;  %18293 = vmatprep.subr.bf16.mxu1 %v18642_v22  ;;  %v6669_v49 = vrot.slane %v6662_v4, %v19228_v27  ;;  %v6827_v14 = vcombine.high %v6825_v40, %v6825_v40  ;;  %v6834_v24 = vrot.slane %v6818_v31, %v19228_v27  ;;  %v6800_v53 = vld [vmem:[#allocation2 + $0x99] sm:$0x7f] }
 0x25c   : > { %v6639_v23 = vcombine.low %v6617_v34, %v6624_v57  ;;  %v6640_v29 = vcombine.low %v6631_v3, %v6638_v59  ;;  %v6841_v30 = vrot.slane %v6825_v40, %v19228_v27  ;;  %v6848_v62 = vrot.slane %v6826_v44, %v19228_v27  ;;  %v6801_v44 = vld [vmem:[#allocation2 + $0xa1] sm:$0x7f] }
 0x25d   : > { %v6606_v48 = vcombine.low %v6598_v37, %v6605_v2  ;;  %v6680_v50 = vpack.c.bf16 %v6669_v49, %v6669_v49  ;;  %v6855_v61 = vrot.slane %v6827_v14, %v19228_v27  ;;  %v6859_v0 = vcombine.high %v6798_v16, %v6798_v16 }
 0x25e   : > { %v6647_v9 = vrot.slane %v6639_v23, %v19228_v27  ;;  %v6654_v1 = vrot.slane %v6640_v29, %v19228_v27  ;;  %18294 = vmatpush3.bf16.msra.mxu1 %v18642_v22  ;;  %v6857_v58 = vcombine.high %v6841_v30, %v6841_v30  ;;  %v6866_v12 = vrot.slane %v6798_v16, %v19228_v27 }
 0x25f   : > { %v6873_v15 = vrot.slane %v6859_v0, %v19228_v27  ;;  %v6907_v10 = vcombine.high %v6799_v47, %v6799_v47  ;;  %v6914_v13 = vrot.slane %v6799_v47, %v19228_v27  ;;  %v7147_v46 = vcombine.low %v6834_v24, %v6848_v62  ;;  %18295 = vmatprep.subr.bf16.mxu1 %v18646_v41 }
 0x260   : > { %v6655_v55 = vcombine.low %v6647_v9, %v6654_v1  ;;  %v6874_v54 = vcombine.high %v6866_v12, %v6866_v12  ;;  %v6882_v7 = vrot.slane %v6866_v12, %v19228_v27  ;;  %v17513_v45 = vcombine.high %v6834_v24, %v6848_v62 }
 0x261   : > { %v6875_v63 = vcombine.high %v6873_v15, %v6873_v15  ;;  %v6889_v35 = vrot.slane %v6873_v15, %v19228_v27  ;;  %v6921_v42 = vrot.slane %v6907_v10, %v19228_v27  ;;  %v6922_v11 = vcombine.high %v6914_v13, %v6914_v13 }
 0x262   : > { %v6679_v25 = vpack.c.bf16 %v6655_v55, %v6606_v48  ;;  %v6896_v51 = vrot.slane %v6874_v54, %v19228_v27  ;;  %v6904_v52 = vcombine.high %v6882_v7, %v6882_v7  ;;  %v6930_v8 = vrot.slane %v6914_v13, %v19228_v27  ;;  %18296 = vmatpush3.bf16.msra.mxu1 %v18646_v41 }
 0x263   : > { %v6903_v56 = vrot.slane %v6875_v63, %v19228_v27  ;;  %v6905_v38 = vcombine.high %v6889_v35, %v6889_v35  ;;  %v6923_v43 = vcombine.high %v6921_v42, %v6921_v42  ;;  %v6937_v60 = vrot.slane %v6921_v42, %v19228_v27  ;;  %18305 = vmatprep.subr.bf16.mxu1 %v20470_v28 }
 0x264   : > { %18285 = vmatprep.mubr.msk.bf16.mxu1 %vm606_vm2, %v6679_v25  ;;  %v6906_v19 = vcombine.high %v6896_v51, %v6896_v51  ;;  %v6944_v6 = vrot.slane %v6922_v11, %v19228_v27  ;;  %v7149_v18 = vcombine.low %v6841_v30, %v6855_v61  ;;  %v7150_v39 = vcombine.low %v6857_v58, %v6882_v7 }
 0x265   : > { %18286 = vmatmul.mubr.msk.bf16.gmra.mrb[52].mxu1 %vm606_vm2, %v6680_v50  ;;  %v7157_v21 = vrot.slane %v7147_v46, %v19228_v27  ;;  %v7164_v22 = vrot.slane %v17513_v45, %v19228_v27  ;;  %v7196_v20 = vcombine.low %v6896_v51, %v6904_v52  ;;  %v7198_v31 = vcombine.low %v6903_v56, %v6905_v38 }
 0x266   : > { %v7171_v17 = vrot.slane %v7149_v18, %v19228_v27  ;;  %v7178_v5 = vrot.slane %v7150_v39, %v19228_v27  ;;  %v7197_v26 = vcombine.low %v6906_v19, %v6889_v35  ;;  %v7199_v34 = vcombine.low %v6930_v8, %v6944_v6  ;;  %v6802_v18 = vld [vmem:[#allocation2 + $0xa9] sm:$0x7f]  ;;  %v6803_v39 = vld [vmem:[#allocation2 + $0xb1] sm:$0x7f] }
 0x267   : > { %v7179_v37 = vcombine.low %v7157_v21, %v7164_v22  ;;  %v7206_v4 = vrot.slane %v7196_v20, %v19228_v27  ;;  %v7220_v40 = vrot.slane %v7198_v31, %v19228_v27  ;;  %v17514_v57 = vcombine.high %v6930_v8, %v6944_v6 }
 0x268   : > { %v7180_v3 = vcombine.low %v7171_v17, %v7178_v5  ;;  %v7213_v59 = vrot.slane %v7197_v26, %v19228_v27  ;;  %v7227_v16 = vrot.slane %v7199_v34, %v19228_v27  ;;  %v6951_v2 = vrot.slane %v6923_v43, %v19228_v27 }
 0x269   : > { %v7187_v49 = vrot.slane %v7179_v37, %v19228_v27  ;;  %v7255_v14 = vrot.slane %v17514_v57, %v19228_v27  ;;  %v6953_v24 = vcombine.high %v6937_v60, %v6937_v60  ;;  %v6955_v41 = vcombine.high %v6800_v53, %v6800_v53 }
 0x26a   : > { %v7194_v23 = vrot.slane %v7180_v3, %v19228_v27  ;;  %v7228_v29 = vcombine.low %v7206_v4, %v7213_v59  ;;  %v7229_v47 = vcombine.low %v7220_v40, %v7227_v16  ;;  %v6962_v30 = vrot.slane %v6800_v53, %v19228_v27 }
 0x26b   : > { %v6969_v62 = vrot.slane %v6955_v41, %v19228_v27  ;;  %v7010_v48 = vrot.slane %v6801_v44, %v19228_v27  ;;  %v7246_v50 = vcombine.low %v6937_v60, %v6951_v2  ;;  %v7003_v61 = vcombine.high %v6801_v44, %v6801_v44 }
 0x26c   : > { %v7195_v0 = vcombine.low %v7187_v49, %v7194_v23  ;;  %v7236_v9 = vrot.slane %v7228_v29, %v19228_v27  ;;  %v7243_v1 = vrot.slane %v7229_v47, %v19228_v27  ;;  %v6970_v58 = vcombine.high %v6962_v30, %v6962_v30 }
 0x26d   : > { %v6971_v12 = vcombine.high %v6969_v62, %v6969_v62  ;;  %v6978_v15 = vrot.slane %v6962_v30, %v19228_v27  ;;  %v6985_v10 = vrot.slane %v6969_v62, %v19228_v27  ;;  %v7018_v13 = vcombine.high %v7010_v48, %v7010_v48 }
 0x26e   : > { %v7244_v46 = vcombine.low %v7236_v9, %v7243_v1  ;;  %v6992_v55 = vrot.slane %v6970_v58, %v19228_v27  ;;  %v7026_v54 = vrot.slane %v7010_v48, %v19228_v27  ;;  %v7262_v7 = vrot.slane %v7246_v50, %v19228_v27 }
 0x26f   : > { %v6999_v45 = vrot.slane %v6971_v12, %v19228_v27  ;;  %v7000_v63 = vcombine.high %v6978_v15, %v6978_v15  ;;  %v7001_v35 = vcombine.high %v6985_v10, %v6985_v10  ;;  %v7040_v42 = vrot.slane %v7018_v13, %v19228_v27 }
 0x270   : > { %v7462_v11 = vpack.c.bf16 %v7244_v46, %v7195_v0  ;;  %v7002_v25 = vcombine.high %v6992_v55, %v6992_v55  ;;  %v7247_v51 = vcombine.low %v6953_v24, %v6978_v15  ;;  %v7277_v52 = vcombine.low %v7255_v14, %v7262_v7  ;;  %v18652_v7 = vld [vmem:[%s22368_s2 + $0xe8] sm:$0xff]  }
 0x271   : > { %v7248_v8 = vcombine.low %v6992_v55, %v7000_v63  ;;  %v7295_v56 = vcombine.low %v6999_v45, %v7001_v35  ;;  %v7296_v38 = vcombine.low %v7026_v54, %v7040_v42  ;;  %v17515_v43 = vcombine.high %v7026_v54, %v7040_v42 }
 0x272   : > { %18297 = vmatprep.mubr.msk.bf16.mxu1 %vm606_vm2, %v7462_v11  ;;  %v7269_v60 = vrot.slane %v7247_v51, %v19228_v27  ;;  %v7285_v19 = vrot.slane %v7277_v52, %v19228_v27  ;;  %v7294_v6 = vcombine.low %v7002_v25, %v6985_v10  ;;  %v7017_v21 = vrot.slane %v7003_v61, %v19228_v27 }
 0x273   : > { %v7276_v22 = vrot.slane %v7248_v8, %v19228_v27  ;;  %v7311_v20 = vrot.slane %v7295_v56, %v19228_v27  ;;  %v7318_v31 = vrot.slane %v7296_v38, %v19228_v27  ;;  %v7325_v17 = vrot.slane %v17515_v43, %v19228_v27  ;;  %v7582_v8 = vld [vmem:[#allocation2 + $0xc1] sm:$0x7f] }
 0x274   : > { %v7304_v5 = vrot.slane %v7294_v6, %v19228_v27  ;;  %v7019_v26 = vcombine.high %v7017_v21, %v7017_v21  ;;  %v7033_v34 = vrot.slane %v7017_v21, %v19228_v27  ;;  %v7051_v53 = vcombine.high %v6802_v18, %v6802_v18  ;;  %v18653_v21 = vld [vmem:[%s22368_s2 + $0xf0] sm:$0xff]  }
 0x275   : > { %v7278_v37 = vcombine.low %v7269_v60, %v7276_v22  ;;  %v7327_v4 = vcombine.low %v7318_v31, %v7325_v17  ;;  %v7058_v40 = vrot.slane %v6802_v18, %v19228_v27  ;;  %v7099_v57 = vcombine.high %v6803_v39, %v6803_v39 }
 0x276   : > { %v7326_v3 = vcombine.low %v7304_v5, %v7311_v20  ;;  %v7047_v59 = vrot.slane %v7019_v26, %v19228_v27  ;;  %v7049_v16 = vcombine.high %v7033_v34, %v7033_v34  ;;  %v7065_v44 = vrot.slane %v7051_v53, %v19228_v27 }
 0x277   : > { %v7292_v2 = vrot.slane %v7278_v37, %v19228_v27  ;;  %v7341_v49 = vrot.slane %v7327_v4, %v19228_v27  ;;  %v7066_v14 = vcombine.high %v7058_v40, %v7058_v40  ;;  %v7074_v24 = vrot.slane %v7058_v40, %v19228_v27 }
 0x278   : > { %v7334_v41 = vrot.slane %v7326_v3, %v19228_v27  ;;  %v7067_v23 = vcombine.high %v7065_v44, %v7065_v44  ;;  %v7081_v29 = vrot.slane %v7065_v44, %v19228_v27  ;;  %v7106_v47 = vrot.slane %v6803_v39, %v19228_v27 }
 0x279   : > { %v7293_v30 = vcombine.low %v7285_v19, %v7292_v2  ;;  %v7088_v62 = vrot.slane %v7066_v14, %v19228_v27  ;;  %v7096_v48 = vcombine.high %v7074_v24, %v7074_v24  ;;  %v7113_v50 = vrot.slane %v7099_v57, %v19228_v27  ;;  %v7583_v19 = vld [vmem:[#allocation2 + $0xc9] sm:$0x7f]  ;;  %v18657_v2 = vld [vmem:[%s22368_s2 + $0xf8] sm:$0xff]  }
 0x27a   : > { %v7342_v61 = vcombine.low %v7334_v41, %v7341_v49  ;;  %v7095_v0 = vrot.slane %v7067_v23, %v19228_v27  ;;  %v7097_v9 = vcombine.high %v7081_v29, %v7081_v29  ;;  %v7114_v1 = vcombine.high %v7106_v47, %v7106_v47 }
 0x27b   : > { %v7098_v58 = vcombine.high %v7088_v62, %v7088_v62  ;;  %v7115_v12 = vcombine.high %v7113_v50, %v7113_v50  ;;  %v7122_v15 = vrot.slane %v7106_v47, %v19228_v27  ;;  %v7129_v10 = vrot.slane %v7113_v50, %v19228_v27 }
 0x27c   : > { %v7463_v13 = vpack.c.bf16 %v7342_v61, %v7293_v30  ;;  %v7136_v46 = vrot.slane %v7114_v1, %v19228_v27  ;;  %v7343_v55 = vcombine.low %v7033_v34, %v7047_v59  ;;  %v7344_v54 = vcombine.low %v7049_v16, %v7074_v24  ;;  %v7584_v24 = vld [vmem:[#allocation2 + $0xd1] sm:$0x7f] }
 0x27d   : > { %v7143_v45 = vrot.slane %v7115_v12, %v19228_v27  ;;  %v7345_v63 = vcombine.low %v7088_v62, %v7096_v48  ;;  %v7346_v35 = vcombine.low %v7098_v58, %v7081_v29  ;;  %v7392_v42 = vcombine.low %v7095_v0, %v7097_v9 }
 0x27e   : > { %18298 = vmatmul.mubr.msk.bf16.vlgmr.msra.gmra.mrb[28].mxu1 %vm606_vm2, %v7463_v13  ;;  %v7353_v11 = vrot.slane %v7343_v55, %v19228_v27  ;;  %v7360_v25 = vrot.slane %v7344_v54, %v19228_v27  ;;  %v7393_v51 = vcombine.low %v7122_v15, %v7136_v46  ;;  %v17516_v52 = vcombine.high %v7122_v15, %v7136_v46 }
 0x27f   : > { %18306 = vmatpush3.bf16.msra.mxu1 %v20470_v28  ;;  %v7367_v56 = vrot.slane %v7345_v63, %v19228_v27  ;;  %v7374_v38 = vrot.slane %v7346_v35, %v19228_v27  ;;  %v7395_v43 = vcombine.low %v7129_v10, %v7143_v45  ;;  %v7402_v60 = vrot.slane %v7392_v42, %v19228_v27  ;;  %v20575_v63 = vld [vmem:[%s22368_s2 + $0x100] sm:$0xff]  }
 0x280   : > { %v7375_v6 = vcombine.low %v7353_v11, %v7360_v25  ;;  %v7409_v18 = vrot.slane %v7393_v51, %v19228_v27  ;;  %v7416_v39 = vrot.slane %v17516_v52, %v19228_v27  ;;  %18307 = vmatprep.subr.bf16.mxu1 %v18652_v7  ;;  %v7145_v22 = vcombine.high %v7129_v10, %v7129_v10 }
 0x281   : > { %v7376_v28 = vcombine.low %v7367_v56, %v7374_v38  ;;  %v7423_v20 = vrot.slane %v7395_v43, %v19228_v27  ;;  %v7596_v31 = vcombine.high %v7582_v8, %v7582_v8  ;;  %v7603_v17 = vrot.slane %v7582_v8, %v19228_v27 }
 0x282   : > { %v7383_v5 = vrot.slane %v7375_v6, %v19228_v27  ;;  %v7424_v26 = vcombine.low %v7402_v60, %v7409_v18  ;;  %v7447_v34 = vrot.slane %v7145_v22, %v19228_v27  ;;  %v7644_v53 = vcombine.high %v7583_v19, %v7583_v19 }
 0x283   : > { %v7390_v37 = vrot.slane %v7376_v28, %v19228_v27  ;;  %v7425_v4 = vcombine.low %v7416_v39, %v7423_v20  ;;  %18308 = vmatpush3.bf16.msra.mxu1 %v18652_v7  ;;  %v7610_v40 = vrot.slane %v7596_v31, %v19228_v27  ;;  %v7611_v57 = vcombine.high %v7603_v17, %v7603_v17 }
 0x284   : > { %v7432_v3 = vrot.slane %v7424_v26, %v19228_v27  ;;  %18309 = vmatprep.subr.bf16.mxu1 %v18653_v21  ;;  %v7454_v59 = vrot.slane %v7447_v34, %v19228_v27  ;;  %v7619_v16 = vrot.slane %v7603_v17, %v19228_v27  ;;  %v7651_v44 = vrot.slane %v7583_v19, %v19228_v27 }
 0x285   : > { %v7391_v49 = vcombine.low %v7383_v5, %v7390_v37  ;;  %v7439_v14 = vrot.slane %v7425_v4, %v19228_v27  ;;  %v7612_v41 = vcombine.high %v7610_v40, %v7610_v40  ;;  %v7626_v23 = vrot.slane %v7610_v40, %v19228_v27  ;;  %v7586_v5 = vld [vmem:[#allocation2 + $0xe1] sm:$0x7f] }
 0x286   : > { %v7465_v29 = vpack.c.bf16 %v7454_v59, %v7454_v59  ;;  %v7633_v47 = vrot.slane %v7611_v57, %v19228_v27  ;;  %v7658_v30 = vrot.slane %v7644_v53, %v19228_v27  ;;  %v7659_v62 = vcombine.high %v7651_v44, %v7651_v44 }
 0x287   : > { %v7440_v48 = vcombine.low %v7432_v3, %v7439_v14  ;;  %18310 = vmatpush3.bf16.msra.mxu1 %v18653_v21  ;;  %v7640_v50 = vrot.slane %v7612_v41, %v19228_v27  ;;  %v7642_v61 = vcombine.high %v7626_v23, %v7626_v23  ;;  %v7667_v0 = vrot.slane %v7651_v44, %v19228_v27  ;;  %v7585_v21 = vld [vmem:[#allocation2 + $0xd9] sm:$0x7f] }
 0x288   : > { %v7660_v9 = vcombine.high %v7658_v30, %v7658_v30  ;;  %v7674_v1 = vrot.slane %v7658_v30, %v19228_v27  ;;  %v7681_v58 = vrot.slane %v7659_v62, %v19228_v27  ;;  %v7692_v12 = vcombine.high %v7584_v24, %v7584_v24  ;;  %18311 = vmatprep.subr.bf16.mxu1 %v18657_v2 }
 0x289   : > { %v7464_v15 = vpack.c.bf16 %v7440_v48, %v7391_v49  ;;  %v7689_v10 = vcombine.high %v7667_v0, %v7667_v0  ;;  %v7699_v13 = vrot.slane %v7584_v24, %v19228_v27  ;;  %v7932_v46 = vcombine.low %v7619_v16, %v7633_v47 }
 0x28a   : > { %v7688_v55 = vrot.slane %v7660_v9, %v19228_v27  ;;  %v7690_v54 = vcombine.high %v7674_v1, %v7674_v1  ;;  %v7691_v7 = vcombine.high %v7681_v58, %v7681_v58  ;;  %v7706_v45 = vrot.slane %v7692_v12, %v19228_v27 }
 0x28b   : > { %18301 = vmatprep.mubr.msk.bf16.mxu1 %vm606_vm2, %v7464_v15  ;;  %v7707_v35 = vcombine.high %v7699_v13, %v7699_v13  ;;  %v7715_v42 = vrot.slane %v7699_v13, %v19228_v27  ;;  %v17533_v11 = vcombine.high %v7619_v16, %v7633_v47  ;;  %v7934_v25 = vcombine.low %v7626_v23, %v7640_v50 }
 0x28c   : > { %18302 = vmatmul.mubr.msk.bf16.gmra.mrb[56].mxu1 %vm606_vm2, %v7465_v29  ;;  %v7708_v51 = vcombine.high %v7706_v45, %v7706_v45  ;;  %v7722_v52 = vrot.slane %v7706_v45, %v19228_v27  ;;  %v7935_v8 = vcombine.low %v7642_v61, %v7667_v0  ;;  %v7942_v56 = vrot.slane %v7932_v46, %v19228_v27 }
 0x28d   : > { %v7729_v38 = vrot.slane %v7707_v35, %v19228_v27  ;;  %v7949_v43 = vrot.slane %v17533_v11, %v19228_v27  ;;  %v7956_v60 = vrot.slane %v7934_v25, %v19228_v27  ;;  %v7981_v19 = vcombine.low %v7681_v58, %v7689_v10  ;;  %18312 = vmatpush3.bf16.msra.mxu1 %v18657_v2 }
 0x28e   : > { %v7963_v6 = vrot.slane %v7935_v8, %v19228_v27  ;;  %v7982_v18 = vcombine.low %v7691_v7, %v7674_v1  ;;  %v7983_v39 = vcombine.low %v7688_v55, %v7690_v54  ;;  %18321 = vmatprep.subr.bf16.mxu1 %v20575_v63  ;;  %v7736_v22 = vrot.slane %v7708_v51, %v19228_v27  ;;  %v7587_v8 = vld [vmem:[#allocation2 + $0xe9] sm:$0x7f] }
 0x28f   : > { %v7964_v28 = vcombine.low %v7942_v56, %v7949_v43  ;;  %v7984_v20 = vcombine.low %v7715_v42, %v7729_v38  ;;  %v7991_v31 = vrot.slane %v7981_v19, %v19228_v27  ;;  %v17534_v17 = vcombine.high %v7715_v42, %v7729_v38  ;;  %v7588_v19 = vld [vmem:[#allocation2 + $0xf1] sm:$0x7f] }
 0x290   : > { %v7965_v26 = vcombine.low %v7956_v60, %v7963_v6  ;;  %v7998_v34 = vrot.slane %v7982_v18, %v19228_v27  ;;  %v8005_v53 = vrot.slane %v7983_v39, %v19228_v27  ;;  %v7738_v37 = vcombine.high %v7722_v52, %v7722_v52 }
 0x291   : > { %v7972_v4 = vrot.slane %v7964_v28, %v19228_v27  ;;  %v8012_v40 = vrot.slane %v7984_v20, %v19228_v27  ;;  %v8040_v57 = vrot.slane %v17534_v17, %v19228_v27  ;;  %v7740_v3 = vcombine.high %v7585_v21, %v7585_v21 }
 0x292   : > { %v7979_v59 = vrot.slane %v7965_v26, %v19228_v27  ;;  %v8013_v16 = vcombine.low %v7991_v31, %v7998_v34  ;;  %v7747_v44 = vrot.slane %v7585_v21, %v19228_v27  ;;  %v7795_v2 = vrot.slane %v7586_v5, %v19228_v27 }
 0x293   : > { %v8014_v49 = vcombine.low %v8005_v53, %v8012_v40  ;;  %v7754_v14 = vrot.slane %v7740_v3, %v19228_v27  ;;  %v8031_v24 = vcombine.low %v7722_v52, %v7736_v22  ;;  %v7788_v41 = vcombine.high %v7586_v5, %v7586_v5 }
 0x294   : > { %v7980_v23 = vcombine.low %v7972_v4, %v7979_v59  ;;  %v8021_v29 = vrot.slane %v8013_v16, %v19228_v27  ;;  %v7755_v47 = vcombine.high %v7747_v44, %v7747_v44  ;;  %v7763_v30 = vrot.slane %v7747_v44, %v19228_v27 }
 0x295   : > { %v8028_v62 = vrot.slane %v8014_v49, %v19228_v27  ;;  %v7756_v48 = vcombine.high %v7754_v14, %v7754_v14  ;;  %v7770_v50 = vrot.slane %v7754_v14, %v19228_v27  ;;  %v7803_v61 = vcombine.high %v7795_v2, %v7795_v2 }
 0x296   : > { %v7777_v0 = vrot.slane %v7755_v47, %v19228_v27  ;;  %v7785_v9 = vcombine.high %v7763_v30, %v7763_v30  ;;  %v7811_v1 = vrot.slane %v7795_v2, %v19228_v27  ;;  %v8032_v58 = vcombine.low %v7738_v37, %v7763_v30 }
 0x297   : > { %v8029_v12 = vcombine.low %v8021_v29, %v8028_v62  ;;  %v7784_v15 = vrot.slane %v7756_v48, %v19228_v27  ;;  %v7786_v10 = vcombine.high %v7770_v50, %v7770_v50  ;;  %v7825_v13 = vrot.slane %v7803_v61, %v19228_v27 }
 0x298   : > { %v7787_v46 = vcombine.high %v7777_v0, %v7777_v0  ;;  %v8033_v55 = vcombine.low %v7777_v0, %v7785_v9  ;;  %v8047_v54 = vrot.slane %v8031_v24, %v19228_v27  ;;  %v8054_v7 = vrot.slane %v8032_v58, %v19228_v27  ;;  %v18663_v58 = vld [vmem:[%s22368_s2 + $0x108] sm:$0xff]  }
 0x299   : > { %v8247_v45 = vpack.c.bf16 %v8029_v12, %v7980_v23  ;;  %v8080_v35 = vcombine.low %v7784_v15, %v7786_v10  ;;  %v8081_v42 = vcombine.low %v7811_v1, %v7825_v13  ;;  %v17535_v11 = vcombine.high %v7811_v1, %v7825_v13 }
 0x29a   : > { %v8061_v25 = vrot.slane %v8033_v55, %v19228_v27  ;;  %v8062_v51 = vcombine.low %v8040_v57, %v8047_v54  ;;  %v8079_v52 = vcombine.low %v7787_v46, %v7770_v50  ;;  %v7802_v56 = vrot.slane %v7788_v41, %v19228_v27  ;;  %v8367_v46 = vld [vmem:[#allocation2 + $0x8] sm:$0x7f] }
 0x29b   : > { %18313 = vmatprep.mubr.msk.bf16.mxu1 %vm606_vm2, %v8247_v45  ;;  %v8096_v38 = vrot.slane %v8080_v35, %v19228_v27  ;;  %v8103_v43 = vrot.slane %v8081_v42, %v19228_v27  ;;  %v8110_v60 = vrot.slane %v17535_v11, %v19228_v27  ;;  %v7836_v6 = vcombine.high %v7587_v8, %v7587_v8 }
 0x29c   : > { %v8063_v18 = vcombine.low %v8054_v7, %v8061_v25  ;;  %v8070_v39 = vrot.slane %v8062_v51, %v19228_v27  ;;  %v8089_v21 = vrot.slane %v8079_v52, %v19228_v27  ;;  %v7804_v22 = vcombine.high %v7802_v56, %v7802_v56 }
 0x29d   : > { %v8112_v28 = vcombine.low %v8103_v43, %v8110_v60  ;;  %v7818_v20 = vrot.slane %v7802_v56, %v19228_v27  ;;  %v7843_v31 = vrot.slane %v7587_v8, %v19228_v27  ;;  %v7850_v17 = vrot.slane %v7836_v6, %v19228_v27  ;;  %v18664_v8 = vld [vmem:[%s22368_s2 + $0x110] sm:$0xff]  }
 0x29e   : > { %v8077_v5 = vrot.slane %v8063_v18, %v19228_v27  ;;  %v8111_v26 = vcombine.low %v8089_v21, %v8096_v38  ;;  %v7832_v34 = vrot.slane %v7804_v22, %v19228_v27  ;;  %v7884_v53 = vcombine.high %v7588_v19, %v7588_v19  ;;  %v8368_v38 = vld [vmem:[#allocation2 + $0x10] sm:$0x7f] }
 0x29f   : > { %v8126_v37 = vrot.slane %v8112_v28, %v19228_v27  ;;  %v7834_v4 = vcombine.high %v7818_v20, %v7818_v20  ;;  %v7851_v40 = vcombine.high %v7843_v31, %v7843_v31  ;;  %v7852_v57 = vcombine.high %v7850_v17, %v7850_v17 }
 0x2a0   : > { %v8078_v3 = vcombine.low %v8070_v39, %v8077_v5  ;;  %v8119_v59 = vrot.slane %v8111_v26, %v19228_v27  ;;  %v7859_v16 = vrot.slane %v7843_v31, %v19228_v27  ;;  %v7866_v44 = vrot.slane %v7850_v17, %v19228_v27  ;;  %v8369_v26 = vld [vmem:[#allocation2 + $0x18] sm:$0x7f] }
 0x2a1   : > { %v7873_v2 = vrot.slane %v7851_v40, %v19228_v27  ;;  %v7880_v49 = vrot.slane %v7852_v57, %v19228_v27  ;;  %v7891_v14 = vrot.slane %v7588_v19, %v19228_v27  ;;  %v7898_v24 = vrot.slane %v7884_v53, %v19228_v27 }
 0x2a2   : > { %v8127_v41 = vcombine.low %v8119_v59, %v8126_v37  ;;  %v7881_v23 = vcombine.high %v7859_v16, %v7859_v16  ;;  %v7882_v29 = vcombine.high %v7866_v44, %v7866_v44  ;;  %v8128_v47 = vcombine.low %v7818_v20, %v7832_v34 }
 0x2a3   : > { %v7883_v30 = vcombine.high %v7873_v2, %v7873_v2  ;;  %v7899_v62 = vcombine.high %v7891_v14, %v7891_v14  ;;  %v7900_v48 = vcombine.high %v7898_v24, %v7898_v24  ;;  %v7907_v50 = vrot.slane %v7891_v14, %v19228_v27 }
 0x2a4   : > { %v8248_v61 = vpack.c.bf16 %v8127_v41, %v8078_v3  ;;  %v7914_v0 = vrot.slane %v7898_v24, %v19228_v27  ;;  %v8129_v9 = vcombine.low %v7834_v4, %v7859_v16  ;;  %v8130_v1 = vcombine.low %v7873_v2, %v7881_v23  ;;  %v18668_v4 = vld [vmem:[%s22368_s2 + $0x118] sm:$0xff]  }
 0x2a5   : > { %v7921_v12 = vrot.slane %v7899_v62, %v19228_v27  ;;  %v7928_v15 = vrot.slane %v7900_v48, %v19228_v27  ;;  %v8131_v10 = vcombine.low %v7883_v30, %v7866_v44  ;;  %v8138_v13 = vrot.slane %v8128_v47, %v19228_v27 }
 0x2a6   : > { %18314 = vmatmul.mubr.msk.bf16.vlgmr.msra.gmra.mrb[28].mxu1 %vm606_vm2, %v8248_v61  ;;  %v8145_v55 = vrot.slane %v8129_v9, %v19228_v27  ;;  %v8152_v54 = vrot.slane %v8130_v1, %v19228_v27  ;;  %v8177_v7 = vcombine.low %v7880_v49, %v7882_v29  ;;  %v7930_v45 = vcombine.high %v7914_v0, %v7914_v0 }
 0x2a7   : > { %18322 = vmatpush3.bf16.msra.mxu1 %v20575_v63  ;;  %v8159_v35 = vrot.slane %v8131_v10, %v19228_v27  ;;  %v8178_v42 = vcombine.low %v7907_v50, %v7921_v12  ;;  %v17536_v11 = vcombine.high %v7907_v50, %v7921_v12  ;;  %v8180_v25 = vcombine.low %v7914_v0, %v7928_v15  ;;  %v20676_v15 = vld [vmem:[%s22368_s2 + $0x120] sm:$0xff]  }
 0x2a8   : > { %v8160_v51 = vcombine.low %v8138_v13, %v8145_v55  ;;  %v8187_v52 = vrot.slane %v8177_v7, %v19228_v27  ;;  %18323 = vmatprep.subr.bf16.mxu1 %v18663_v58  ;;  %v8232_v56 = vrot.slane %v7930_v45, %v19228_v27  ;;  %v8381_v43 = vcombine.high %v8367_v46, %v8367_v46 }
 0x2a9   : > { %v8161_v60 = vcombine.low %v8152_v54, %v8159_v35  ;;  %v8194_v63 = vrot.slane %v8178_v42, %v19228_v27  ;;  %v8201_v19 = vrot.slane %v17536_v11, %v19228_v27  ;;  %v8208_v6 = vrot.slane %v8180_v25, %v19228_v27 }
 0x2aa   : > { %v8168_v18 = vrot.slane %v8160_v51, %v19228_v27  ;;  %v8239_v39 = vrot.slane %v8232_v56, %v19228_v27  ;;  %v8388_v21 = vrot.slane %v8367_v46, %v19228_v27  ;;  %v8395_v22 = vrot.slane %v8381_v43, %v19228_v27  ;;  %v8370_v43 = vld [vmem:[#allocation2 + $0x20] sm:$0x7f] }
 0x2ab   : > { %v8175_v28 = vrot.slane %v8161_v60, %v19228_v27  ;;  %v8209_v20 = vcombine.low %v8187_v52, %v8194_v63  ;;  %v8210_v31 = vcombine.low %v8201_v19, %v8208_v6  ;;  %18324 = vmatpush3.bf16.msra.mxu1 %v18663_v58  ;;  %v8429_v17 = vcombine.high %v8368_v38, %v8368_v38 }
 0x2ac   : > { %18325 = vmatprep.subr.bf16.mxu1 %v18664_v8  ;;  %v8250_v5 = vpack.c.bf16 %v8239_v39, %v8239_v39  ;;  %v8396_v34 = vcombine.high %v8388_v21, %v8388_v21  ;;  %v8397_v53 = vcombine.high %v8395_v22, %v8395_v22  ;;  %v8404_v37 = vrot.slane %v8388_v21, %v19228_v27 }
 0x2ad   : > { %v8176_v40 = vcombine.low %v8168_v18, %v8175_v28  ;;  %v8217_v57 = vrot.slane %v8209_v20, %v19228_v27  ;;  %v8224_v3 = vrot.slane %v8210_v31, %v19228_v27  ;;  %v8411_v59 = vrot.slane %v8395_v22, %v19228_v27  ;;  %v8371_v22 = vld [vmem:[#allocation2 + $0x28] sm:$0x7f] }
 0x2ae   : > { %v8418_v16 = vrot.slane %v8396_v34, %v19228_v27  ;;  %v8425_v44 = vrot.slane %v8397_v53, %v19228_v27  ;;  %v8436_v2 = vrot.slane %v8368_v38, %v19228_v27  ;;  %v8443_v49 = vrot.slane %v8429_v17, %v19228_v27 }
 0x2af   : > { %v8225_v14 = vcombine.low %v8217_v57, %v8224_v3  ;;  %18326 = vmatpush3.bf16.msra.mxu1 %v18664_v8  ;;  %v8427_v24 = vcombine.high %v8411_v59, %v8411_v59  ;;  %v8477_v41 = vcombine.high %v8369_v26, %v8369_v26  ;;  %v8484_v23 = vrot.slane %v8369_v26, %v19228_v27 }
 0x2b0   : > { %v8444_v29 = vcombine.high %v8436_v2, %v8436_v2  ;;  %v8445_v47 = vcombine.high %v8443_v49, %v8443_v49  ;;  %v8452_v30 = vrot.slane %v8436_v2, %v19228_v27  ;;  %v8459_v62 = vrot.slane %v8443_v49, %v19228_v27  ;;  %18327 = vmatprep.subr.bf16.mxu1 %v18668_v4 }
 0x2b1   : > { %v8249_v48 = vpack.c.bf16 %v8225_v14, %v8176_v40  ;;  %v8491_v50 = vrot.slane %v8477_v41, %v19228_v27  ;;  %v8492_v61 = vcombine.high %v8484_v23, %v8484_v23  ;;  %v8500_v0 = vrot.slane %v8484_v23, %v19228_v27 }
 0x2b2   : > { %v8466_v9 = vrot.slane %v8444_v29, %v19228_v27  ;;  %v8473_v1 = vrot.slane %v8445_v47, %v19228_v27  ;;  %v8474_v58 = vcombine.high %v8452_v30, %v8452_v30  ;;  %v8475_v12 = vcombine.high %v8459_v62, %v8459_v62 }
 0x2b3   : > { %18317 = vmatprep.mubr.msk.bf16.mxu1 %vm606_vm2, %v8249_v48  ;;  %v8493_v10 = vcombine.high %v8491_v50, %v8491_v50  ;;  %v8507_v13 = vrot.slane %v8491_v50, %v19228_v27  ;;  %v8514_v46 = vrot.slane %v8492_v61, %v19228_v27  ;;  %v8717_v55 = vcombine.low %v8404_v37, %v8418_v16 }
 0x2b4   : > { %18318 = vmatmul.mubr.msk.bf16.gmra.mrb[60].mxu1 %vm606_vm2, %v8250_v5  ;;  %v8476_v54 = vcombine.high %v8466_v9, %v8466_v9  ;;  %v17553_v7 = vcombine.high %v8404_v37, %v8418_v16  ;;  %v8719_v45 = vcombine.low %v8411_v59, %v8425_v44  ;;  %v8720_v35 = vcombine.low %v8427_v24, %v8452_v30 }
 0x2b5   : > { %v8727_v42 = vrot.slane %v8717_v55, %v19228_v27  ;;  %v8766_v11 = vcombine.low %v8466_v9, %v8474_v58  ;;  %v8768_v25 = vcombine.low %v8473_v1, %v8475_v12  ;;  %v8769_v51 = vcombine.low %v8500_v0, %v8514_v46  ;;  %18328 = vmatpush3.bf16.msra.mxu1 %v18668_v4  ;;  %v8372_v55 = vld [vmem:[#allocation2 + $0x30] sm:$0x7f] }
 0x2b6   : > { %v8734_v52 = vrot.slane %v17553_v7, %v19228_v27  ;;  %v8741_v8 = vrot.slane %v8719_v45, %v19228_v27  ;;  %v8748_v56 = vrot.slane %v8720_v35, %v19228_v27  ;;  %v8767_v38 = vcombine.low %v8476_v54, %v8459_v62  ;;  %18337 = vmatprep.subr.bf16.mxu1 %v20676_v15  ;;  %v8373_v45 = vld [vmem:[#allocation2 + $0x38] sm:$0x7f] }
 0x2b7   : > { %v8776_v60 = vrot.slane %v8766_v11, %v19228_v27  ;;  %v8790_v63 = vrot.slane %v8768_v25, %v19228_v27  ;;  %v8797_v19 = vrot.slane %v8769_v51, %v19228_v27  ;;  %v17554_v6 = vcombine.high %v8500_v0, %v8514_v46 }
 0x2b8   : > { %v8749_v18 = vcombine.low %v8727_v42, %v8734_v52  ;;  %v8750_v39 = vcombine.low %v8741_v8, %v8748_v56  ;;  %v8783_v21 = vrot.slane %v8767_v38, %v19228_v27  ;;  %v8521_v28 = vrot.slane %v8493_v10, %v19228_v27 }
 0x2b9   : > { %v8799_v20 = vcombine.low %v8790_v63, %v8797_v19  ;;  %v8825_v31 = vrot.slane %v17554_v6, %v19228_v27  ;;  %v8523_v17 = vcombine.high %v8507_v13, %v8507_v13  ;;  %v8525_v5 = vcombine.high %v8370_v43, %v8370_v43 }
 0x2ba   : > { %v8757_v26 = vrot.slane %v8749_v18, %v19228_v27  ;;  %v8764_v34 = vrot.slane %v8750_v39, %v19228_v27  ;;  %v8798_v53 = vcombine.low %v8776_v60, %v8783_v21  ;;  %v8532_v37 = vrot.slane %v8370_v43, %v19228_v27 }
 0x2bb   : > { %v8813_v4 = vrot.slane %v8799_v20, %v19228_v27  ;;  %v8539_v40 = vrot.slane %v8525_v5, %v19228_v27  ;;  %v8580_v57 = vrot.slane %v8371_v22, %v19228_v27  ;;  %v8816_v3 = vcombine.low %v8507_v13, %v8521_v28 }
 0x2bc   : > { %v8765_v59 = vcombine.low %v8757_v26, %v8764_v34  ;;  %v8806_v16 = vrot.slane %v8798_v53, %v19228_v27  ;;  %v8540_v44 = vcombine.high %v8532_v37, %v8532_v37  ;;  %v8548_v2 = vrot.slane %v8532_v37, %v19228_v27 }
 0x2bd   : > { %v8541_v49 = vcombine.high %v8539_v40, %v8539_v40  ;;  %v8555_v14 = vrot.slane %v8539_v40, %v19228_v27  ;;  %v8588_v24 = vcombine.high %v8580_v57, %v8580_v57  ;;  %v8596_v41 = vrot.slane %v8580_v57, %v19228_v27 }
 0x2be   : > { %v8814_v23 = vcombine.low %v8806_v16, %v8813_v4  ;;  %v8562_v29 = vrot.slane %v8540_v44, %v19228_v27  ;;  %v8570_v47 = vcombine.high %v8548_v2, %v8548_v2  ;;  %v8817_v30 = vcombine.low %v8523_v17, %v8548_v2 }
 0x2bf   : > { %v8569_v62 = vrot.slane %v8541_v49, %v19228_v27  ;;  %v8571_v48 = vcombine.high %v8555_v14, %v8555_v14  ;;  %v8610_v50 = vrot.slane %v8588_v24, %v19228_v27  ;;  %v8832_v61 = vrot.slane %v8816_v3, %v19228_v27 }
 0x2c0   : > { %v9032_v0 = vpack.c.bf16 %v8814_v23, %v8765_v59  ;;  %v8572_v9 = vcombine.high %v8562_v29, %v8562_v29  ;;  %v8818_v1 = vcombine.low %v8562_v29, %v8570_v47  ;;  %v8839_v58 = vrot.slane %v8817_v30, %v19228_v27  ;;  %v18674_v30 = vld [vmem:[%s22368_s2 + $0x128] sm:$0xff]  }
 0x2c1   : > { %v8847_v12 = vcombine.low %v8825_v31, %v8832_v61  ;;  %v8865_v10 = vcombine.low %v8569_v62, %v8571_v48  ;;  %v8866_v13 = vcombine.low %v8596_v41, %v8610_v50  ;;  %v17555_v46 = vcombine.high %v8596_v41, %v8610_v50 }
 0x2c2   : > { %18329 = vmatprep.mubr.msk.bf16.mxu1 %vm606_vm2, %v9032_v0  ;;  %v8846_v54 = vrot.slane %v8818_v1, %v19228_v27  ;;  %v8864_v7 = vcombine.low %v8572_v9, %v8555_v14  ;;  %v8573_v35 = vcombine.high %v8371_v22, %v8371_v22  ;;  %v8621_v42 = vcombine.high %v8372_v55, %v8372_v55 }
 0x2c3   : > { %v8855_v11 = vrot.slane %v8847_v12, %v19228_v27  ;;  %v8881_v25 = vrot.slane %v8865_v10, %v19228_v27  ;;  %v8888_v51 = vrot.slane %v8866_v13, %v19228_v27  ;;  %v8895_v52 = vrot.slane %v17555_v46, %v19228_v27  ;;  %v9152_v12 = vld [vmem:[#allocation2 + $0x48] sm:$0x7f] }
 0x2c4   : > { %v8848_v8 = vcombine.low %v8839_v58, %v8846_v54  ;;  %v8874_v56 = vrot.slane %v8864_v7, %v19228_v27  ;;  %v8587_v38 = vrot.slane %v8573_v35, %v19228_v27  ;;  %v8628_v43 = vrot.slane %v8372_v55, %v19228_v27  ;;  %v9153_v54 = vld [vmem:[#allocation2 + $0x50] sm:$0x7f] }
 0x2c5   : > { %v8897_v60 = vcombine.low %v8888_v51, %v8895_v52  ;;  %v8635_v63 = vrot.slane %v8621_v42, %v19228_v27  ;;  %v8669_v19 = vcombine.high %v8373_v45, %v8373_v45  ;;  %v8676_v6 = vrot.slane %v8373_v45, %v19228_v27 }
 0x2c6   : > { %v8862_v18 = vrot.slane %v8848_v8, %v19228_v27  ;;  %v8896_v39 = vcombine.low %v8874_v56, %v8881_v25  ;;  %v8589_v21 = vcombine.high %v8587_v38, %v8587_v38  ;;  %v8603_v22 = vrot.slane %v8587_v38, %v19228_v27 }
 0x2c7   : > { %v8911_v28 = vrot.slane %v8897_v60, %v19228_v27  ;;  %v8636_v20 = vcombine.high %v8628_v43, %v8628_v43  ;;  %v8637_v31 = vcombine.high %v8635_v63, %v8635_v63  ;;  %v8644_v17 = vrot.slane %v8628_v43, %v19228_v27 }
 0x2c8   : > { %v8863_v5 = vcombine.low %v8855_v11, %v8862_v18  ;;  %v8904_v26 = vrot.slane %v8896_v39, %v19228_v27  ;;  %v8617_v34 = vrot.slane %v8589_v21, %v19228_v27  ;;  %v8619_v53 = vcombine.high %v8603_v22, %v8603_v22  ;;  %v18675_v11 = vld [vmem:[%s22368_s2 + $0x130] sm:$0xff]   ;;  %v9154_v21 = vld [vmem:[#allocation2 + $0x58] sm:$0x7f] }
 0x2c9   : > { %v8651_v37 = vrot.slane %v8635_v63, %v19228_v27  ;;  %v8658_v4 = vrot.slane %v8636_v20, %v19228_v27  ;;  %v8665_v40 = vrot.slane %v8637_v31, %v19228_v27  ;;  %v8666_v57 = vcombine.high %v8644_v17, %v8644_v17  ;;  %v18679_v20 = vld [vmem:[%s22368_s2 + $0x138] sm:$0xff]  }
 0x2ca   : > { %v8912_v3 = vcombine.low %v8904_v26, %v8911_v28  ;;  %v8683_v59 = vrot.slane %v8669_v19, %v19228_v27  ;;  %v8684_v16 = vcombine.high %v8676_v6, %v8676_v6  ;;  %v8692_v44 = vrot.slane %v8676_v6, %v19228_v27 }
 0x2cb   : > { %v8667_v2 = vcombine.high %v8651_v37, %v8651_v37  ;;  %v8668_v49 = vcombine.high %v8658_v4, %v8658_v4  ;;  %v8913_v14 = vcombine.low %v8603_v22, %v8617_v34  ;;  %v8914_v24 = vcombine.low %v8619_v53, %v8644_v17 }
 0x2cc   : > { %v9033_v41 = vpack.c.bf16 %v8912_v3, %v8863_v5  ;;  %v8685_v23 = vcombine.high %v8683_v59, %v8683_v59  ;;  %v8699_v29 = vrot.slane %v8683_v59, %v19228_v27  ;;  %v8706_v47 = vrot.slane %v8684_v16, %v19228_v27 }
 0x2cd   : > { %v8915_v62 = vcombine.low %v8658_v4, %v8666_v57  ;;  %v8916_v48 = vcombine.low %v8668_v49, %v8651_v37  ;;  %v8923_v50 = vrot.slane %v8913_v14, %v19228_v27  ;;  %v8930_v61 = vrot.slane %v8914_v24, %v19228_v27 }
 0x2ce   : > { %18330 = vmatmul.mubr.msk.bf16.vlgmr.msra.gmra.mrb[28].mxu1 %vm606_vm2, %v9033_v41  ;;  %v8713_v0 = vrot.slane %v8685_v23, %v19228_v27  ;;  %v8962_v9 = vcombine.low %v8665_v40, %v8667_v2  ;;  %v8963_v1 = vcombine.low %v8692_v44, %v8706_v47  ;;  %v17556_v58 = vcombine.high %v8692_v44, %v8706_v47 }
 0x2cf   : > { %18338 = vmatpush3.bf16.msra.mxu1 %v20676_v15  ;;  %v8937_v10 = vrot.slane %v8915_v62, %v19228_v27  ;;  %v8944_v13 = vrot.slane %v8916_v48, %v19228_v27  ;;  %v8945_v46 = vcombine.low %v8923_v50, %v8930_v61  ;;  %v8715_v55 = vcombine.high %v8699_v29, %v8699_v29  ;;  %v20775_v48 = vld [vmem:[%s22368_s2 + $0x140] sm:$0xff]  }
 0x2d0   : > { %v8965_v7 = vcombine.low %v8699_v29, %v8713_v0  ;;  %v8972_v45 = vrot.slane %v8962_v9, %v19228_v27  ;;  %v8979_v35 = vrot.slane %v8963_v1, %v19228_v27  ;;  %v8986_v42 = vrot.slane %v17556_v58, %v19228_v27  ;;  %18339 = vmatprep.subr.bf16.mxu1 %v18674_v30 }
 0x2d1   : > { %v8946_v15 = vcombine.low %v8937_v10, %v8944_v13  ;;  %v8953_v25 = vrot.slane %v8945_v46, %v19228_v27  ;;  %v9017_v51 = vrot.slane %v8715_v55, %v19228_v27  ;;  %v9166_v52 = vcombine.high %v9152_v12, %v9152_v12 }
 0x2d2   : > { %v8993_v8 = vrot.slane %v8965_v7, %v19228_v27  ;;  %v8994_v56 = vcombine.low %v8972_v45, %v8979_v35  ;;  %v9173_v38 = vrot.slane %v9152_v12, %v19228_v27  ;;  %v9214_v43 = vcombine.high %v9153_v54, %v9153_v54 }
 0x2d3   : > { %v8960_v60 = vrot.slane %v8946_v15, %v19228_v27  ;;  %18340 = vmatpush3.bf16.msra.mxu1 %v18674_v30  ;;  %v9024_v63 = vrot.slane %v9017_v51, %v19228_v27  ;;  %v9180_v19 = vrot.slane %v9166_v52, %v19228_v27  ;;  %v9221_v6 = vrot.slane %v9153_v54, %v19228_v27 }
 0x2d4   : > { %v8995_v18 = vcombine.low %v8986_v42, %v8993_v8  ;;  %v9002_v39 = vrot.slane %v8994_v56, %v19228_v27  ;;  %18341 = vmatprep.subr.bf16.mxu1 %v18675_v11  ;;  %v9181_v22 = vcombine.high %v9173_v38, %v9173_v38  ;;  %v9189_v28 = vrot.slane %v9173_v38, %v19228_v27  ;;  %v9155_v42 = vld [vmem:[#allocation2 + $0x60] sm:$0x7f]  ;;  %v9156_v8 = vld [vmem:[#allocation2 + $0x68] sm:$0x7f] }
 0x2d5   : > { %v8961_v31 = vcombine.low %v8953_v25, %v8960_v60  ;;  %v9035_v17 = vpack.c.bf16 %v9024_v63, %v9024_v63  ;;  %v9182_v5 = vcombine.high %v9180_v19, %v9180_v19  ;;  %v9196_v26 = vrot.slane %v9180_v19, %v19228_v27 }
 0x2d6   : > { %v9009_v34 = vrot.slane %v8995_v18, %v19228_v27  ;;  %v9203_v53 = vrot.slane %v9181_v22, %v19228_v27  ;;  %v9228_v37 = vrot.slane %v9214_v43, %v19228_v27  ;;  %v9229_v4 = vcombine.high %v9221_v6, %v9221_v6 }
 0x2d7   : > { %18342 = vmatpush3.bf16.msra.mxu1 %v18675_v11  ;;  %v9210_v40 = vrot.slane %v9182_v5, %v19228_v27  ;;  %v9212_v57 = vcombine.high %v9196_v26, %v9196_v26  ;;  %v9237_v3 = vrot.slane %v9221_v6, %v19228_v27  ;;  %v9262_v59 = vcombine.high %v9154_v21, %v9154_v21 }
 0x2d8   : > { %v9010_v16 = vcombine.low %v9002_v39, %v9009_v34  ;;  %v9230_v44 = vcombine.high %v9228_v37, %v9228_v37  ;;  %v9244_v2 = vrot.slane %v9228_v37, %v19228_v27  ;;  %v9251_v49 = vrot.slane %v9229_v4, %v19228_v27  ;;  %18343 = vmatprep.subr.bf16.mxu1 %v18679_v20 }
 0x2d9   : > { %v9259_v14 = vcombine.high %v9237_v3, %v9237_v3  ;;  %v9269_v24 = vrot.slane %v9154_v21, %v19228_v27  ;;  %v9276_v41 = vrot.slane %v9262_v59, %v19228_v27  ;;  %v9502_v23 = vcombine.low %v9189_v28, %v9203_v53 }
 0x2da   : > { %v9034_v29 = vpack.c.bf16 %v9010_v16, %v8961_v31  ;;  %v9258_v47 = vrot.slane %v9230_v44, %v19228_v27  ;;  %v9260_v30 = vcombine.high %v9244_v2, %v9244_v2  ;;  %v9261_v62 = vcombine.high %v9251_v49, %v9251_v49 }
 0x2db   : > { %v9277_v50 = vcombine.high %v9269_v24, %v9269_v24  ;;  %v9278_v61 = vcombine.high %v9276_v41, %v9276_v41  ;;  %v9285_v0 = vrot.slane %v9269_v24, %v19228_v27  ;;  %v9292_v9 = vrot.slane %v9276_v41, %v19228_v27  ;;  %18344 = vmatpush3.bf16.msra.mxu1 %v18679_v20 }
 0x2dc   : > { %18333 = vmatprep.mubr.msk.bf16.mxu1 %vm606_vm2, %v9034_v29  ;;  %v17573_v1 = vcombine.high %v9189_v28, %v9203_v53  ;;  %v9504_v58 = vcombine.low %v9196_v26, %v9210_v40  ;;  %v9505_v12 = vcombine.low %v9212_v57, %v9237_v3  ;;  %v9512_v10 = vrot.slane %v9502_v23, %v19228_v27 }
 0x2dd   : > { %18334 = vmatmul.mubr.msk.bf16.gmra.mrb[64].mxu1 %vm606_vm2, %v9035_v17  ;;  %v9299_v13 = vrot.slane %v9277_v50, %v19228_v27  ;;  %v9551_v46 = vcombine.low %v9251_v49, %v9259_v14  ;;  %v9552_v55 = vcombine.low %v9261_v62, %v9244_v2  ;;  %v9553_v54 = vcombine.low %v9258_v47, %v9260_v30 }
 0x2de   : > { %v9519_v7 = vrot.slane %v17573_v1, %v19228_v27  ;;  %v9526_v45 = vrot.slane %v9504_v58, %v19228_v27  ;;  %v9533_v35 = vrot.slane %v9505_v12, %v19228_v27  ;;  %18353 = vmatprep.subr.bf16.mxu1 %v20775_v48  ;;  %v9306_v11 = vrot.slane %v9278_v61, %v19228_v27  ;;  %v9157_v1 = vld [vmem:[#allocation2 + $0x70] sm:$0x7f] }
 0x2df   : > { %v9554_v15 = vcombine.low %v9285_v0, %v9299_v13  ;;  %v9561_v25 = vrot.slane %v9551_v46, %v19228_v27  ;;  %v9568_v51 = vrot.slane %v9552_v55, %v19228_v27  ;;  %v9575_v52 = vrot.slane %v9553_v54, %v19228_v27 }
 0x2e0   : > { %v9534_v56 = vcombine.low %v9512_v10, %v9519_v7  ;;  %v9535_v38 = vcombine.low %v9526_v45, %v9533_v35  ;;  %v17574_v43 = vcombine.high %v9285_v0, %v9299_v13  ;;  %v9308_v60 = vcombine.high %v9292_v9, %v9292_v9  ;;  %v9158_v10 = vld [vmem:[#allocation2 + $0x78] sm:$0x7f] }
 0x2e1   : > { %v9582_v63 = vrot.slane %v9554_v15, %v19228_v27  ;;  %v9583_v19 = vcombine.low %v9561_v25, %v9568_v51  ;;  %v9310_v6 = vcombine.high %v9155_v42, %v9155_v42  ;;  %v9317_v18 = vrot.slane %v9155_v42, %v19228_v27 }
 0x2e2   : > { %v9542_v39 = vrot.slane %v9534_v56, %v19228_v27  ;;  %v9549_v21 = vrot.slane %v9535_v38, %v19228_v27  ;;  %v9610_v22 = vrot.slane %v17574_v43, %v19228_v27  ;;  %v9365_v28 = vrot.slane %v9156_v8, %v19228_v27 }
 0x2e3   : > { %v9584_v20 = vcombine.low %v9575_v52, %v9582_v63  ;;  %v9591_v31 = vrot.slane %v9583_v19, %v19228_v27  ;;  %v9324_v17 = vrot.slane %v9310_v6, %v19228_v27  ;;  %v9325_v5 = vcombine.high %v9317_v18, %v9317_v18 }
 0x2e4   : > { %v9550_v26 = vcombine.low %v9542_v39, %v9549_v21  ;;  %v9333_v34 = vrot.slane %v9317_v18, %v19228_v27  ;;  %v9373_v53 = vcombine.high %v9365_v28, %v9365_v28  ;;  %v9381_v37 = vrot.slane %v9365_v28, %v19228_v27 }
 0x2e5   : > { %v9598_v4 = vrot.slane %v9584_v20, %v19228_v27  ;;  %v9326_v40 = vcombine.high %v9324_v17, %v9324_v17  ;;  %v9340_v57 = vrot.slane %v9324_v17, %v19228_v27  ;;  %v9347_v3 = vrot.slane %v9325_v5, %v19228_v27 }
 0x2e6   : > { %v9355_v59 = vcombine.high %v9333_v34, %v9333_v34  ;;  %v9395_v16 = vrot.slane %v9373_v53, %v19228_v27  ;;  %v9601_v44 = vcombine.low %v9292_v9, %v9306_v11  ;;  %v9602_v2 = vcombine.low %v9308_v60, %v9333_v34 }
 0x2e7   : > { %v9599_v49 = vcombine.low %v9591_v31, %v9598_v4  ;;  %v9354_v14 = vrot.slane %v9326_v40, %v19228_v27  ;;  %v9356_v24 = vcombine.high %v9340_v57, %v9340_v57  ;;  %v9357_v41 = vcombine.high %v9347_v3, %v9347_v3 }
 0x2e8   : > { %v9603_v23 = vcombine.low %v9347_v3, %v9355_v59  ;;  %v9617_v29 = vrot.slane %v9601_v44, %v19228_v27  ;;  %v9624_v47 = vrot.slane %v9602_v2, %v19228_v27  ;;  %v9651_v30 = vcombine.low %v9381_v37, %v9395_v16  ;;  %v18685_v3 = vld [vmem:[%s22368_s2 + $0x148] sm:$0xff]  }
 0x2e9   : > { %v9817_v62 = vpack.c.bf16 %v9599_v49, %v9550_v26  ;;  %v9649_v50 = vcombine.low %v9357_v41, %v9340_v57  ;;  %v9650_v61 = vcombine.low %v9354_v14, %v9356_v24  ;;  %v17575_v0 = vcombine.high %v9381_v37, %v9395_v16  ;;  %v9937_v49 = vld [vmem:[#allocation2 + $0x9] sm:$0x7f] }
 0x2ea   : > { %v9631_v58 = vrot.slane %v9603_v23, %v19228_v27  ;;  %v9632_v9 = vcombine.low %v9610_v22, %v9617_v29  ;;  %v9673_v12 = vrot.slane %v9651_v30, %v19228_v27  ;;  %v9358_v13 = vcombine.high %v9156_v8, %v9156_v8 }
 0x2eb   : > { %18345 = vmatprep.mubr.msk.bf16.mxu1 %vm606_vm2, %v9817_v62  ;;  %v9659_v46 = vrot.slane %v9649_v50, %v19228_v27  ;;  %v9666_v55 = vrot.slane %v9650_v61, %v19228_v27  ;;  %v9680_v54 = vrot.slane %v17575_v0, %v19228_v27  ;;  %v9406_v7 = vcombine.high %v9157_v1, %v9157_v1  ;;  %v18686_v0 = vld [vmem:[%s22368_s2 + $0x150] sm:$0xff]  }
 0x2ec   : > { %v9633_v45 = vcombine.low %v9624_v47, %v9631_v58  ;;  %v9640_v35 = vrot.slane %v9632_v9, %v19228_v27  ;;  %v9372_v42 = vrot.slane %v9358_v13, %v19228_v27  ;;  %v9413_v11 = vrot.slane %v9157_v1, %v19228_v27 }
 0x2ed   : > { %v9681_v15 = vcombine.low %v9659_v46, %v9666_v55  ;;  %v9682_v25 = vcombine.low %v9673_v12, %v9680_v54  ;;  %v9420_v51 = vrot.slane %v9406_v7, %v19228_v27  ;;  %v9454_v52 = vcombine.high %v9158_v10, %v9158_v10 }
 0x2ee   : > { %v9647_v8 = vrot.slane %v9633_v45, %v19228_v27  ;;  %v9374_v56 = vcombine.high %v9372_v42, %v9372_v42  ;;  %v9388_v38 = vrot.slane %v9372_v42, %v19228_v27  ;;  %v9421_v43 = vcombine.high %v9413_v11, %v9413_v11  ;;  %v9938_v42 = vld [vmem:[#allocation2 + $0x11] sm:$0x7f] }
 0x2ef   : > { %v9689_v60 = vrot.slane %v9681_v15, %v19228_v27  ;;  %v9696_v63 = vrot.slane %v9682_v25, %v19228_v27  ;;  %v9422_v19 = vcombine.high %v9420_v51, %v9420_v51  ;;  %v9429_v6 = vrot.slane %v9413_v11, %v19228_v27 }
 0x2f0   : > { %v9648_v18 = vcombine.low %v9640_v35, %v9647_v8  ;;  %v9402_v39 = vrot.slane %v9374_v56, %v19228_v27  ;;  %v9404_v21 = vcombine.high %v9388_v38, %v9388_v38  ;;  %v9436_v22 = vrot.slane %v9420_v51, %v19228_v27  ;;  %v18690_v8 = vld [vmem:[%s22368_s2 + $0x158] sm:$0xff]  }
 0x2f1   : > { %v9697_v28 = vcombine.low %v9689_v60, %v9696_v63  ;;  %v9443_v20 = vrot.slane %v9421_v43, %v19228_v27  ;;  %v9450_v31 = vrot.slane %v9422_v19, %v19228_v27  ;;  %v9451_v17 = vcombine.high %v9429_v6, %v9429_v6  ;;  %v9939_v43 = vld [vmem:[#allocation2 + $0x19] sm:$0x7f] }
 0x2f2   : > { %v9452_v5 = vcombine.high %v9436_v22, %v9436_v22  ;;  %v9461_v26 = vrot.slane %v9158_v10, %v19228_v27  ;;  %v9468_v34 = vrot.slane %v9454_v52, %v19228_v27  ;;  %v9698_v53 = vcombine.low %v9388_v38, %v9402_v39 }
 0x2f3   : > { %v9818_v37 = vpack.c.bf16 %v9697_v28, %v9648_v18  ;;  %v9453_v4 = vcombine.high %v9443_v20, %v9443_v20  ;;  %v9699_v40 = vcombine.low %v9404_v21, %v9429_v6  ;;  %v9700_v57 = vcombine.low %v9443_v20, %v9451_v17 }
 0x2f4   : > { %v9469_v59 = vcombine.high %v9461_v26, %v9461_v26  ;;  %v9470_v16 = vcombine.high %v9468_v34, %v9468_v34  ;;  %v9477_v44 = vrot.slane %v9461_v26, %v19228_v27  ;;  %v9484_v2 = vrot.slane %v9468_v34, %v19228_v27  ;;  %v20870_v34 = vld [vmem:[%s22368_s2 + $0x160] sm:$0xff]  }
 0x2f5   : > { %18346 = vmatmul.mubr.msk.bf16.vlgmr.msra.gmra.mrb[28].mxu1 %vm606_vm2, %v9818_v37  ;;  %v9701_v14 = vcombine.low %v9453_v4, %v9436_v22  ;;  %v9708_v24 = vrot.slane %v9698_v53, %v19228_v27  ;;  %v9715_v41 = vrot.slane %v9699_v40, %v19228_v27  ;;  %v9722_v23 = vrot.slane %v9700_v57, %v19228_v27 }
 0x2f6   : > { %18354 = vmatpush3.bf16.msra.mxu1 %v20775_v48  ;;  %v9491_v29 = vrot.slane %v9469_v59, %v19228_v27  ;;  %v9498_v47 = vrot.slane %v9470_v16, %v19228_v27  ;;  %v9747_v30 = vcombine.low %v9450_v31, %v9452_v5  ;;  %v9500_v62 = vcombine.high %v9484_v2, %v9484_v2 }
 0x2f7   : > { %v9729_v50 = vrot.slane %v9701_v14, %v19228_v27  ;;  %v9730_v61 = vcombine.low %v9708_v24, %v9715_v41  ;;  %18355 = vmatprep.subr.bf16.mxu1 %v18685_v3  ;;  %v9951_v1 = vcombine.high %v9937_v49, %v9937_v49  ;;  %v9958_v58 = vrot.slane %v9937_v49, %v19228_v27 }
 0x2f8   : > { %v9748_v9 = vcombine.low %v9477_v44, %v9491_v29  ;;  %v17576_v12 = vcombine.high %v9477_v44, %v9491_v29  ;;  %v9750_v48 = vcombine.low %v9484_v2, %v9498_v47  ;;  %v9757_v10 = vrot.slane %v9747_v30, %v19228_v27 }
 0x2f9   : > { %v9731_v13 = vcombine.low %v9722_v23, %v9729_v50  ;;  %v9738_v46 = vrot.slane %v9730_v61, %v19228_v27  ;;  %v9802_v55 = vrot.slane %v9500_v62, %v19228_v27  ;;  %v9965_v54 = vrot.slane %v9951_v1, %v19228_v27 }
 0x2fa   : > { %v9764_v7 = vrot.slane %v9748_v9, %v19228_v27  ;;  %v9771_v45 = vrot.slane %v17576_v12, %v19228_v27  ;;  %v9778_v35 = vrot.slane %v9750_v48, %v19228_v27  ;;  %18356 = vmatpush3.bf16.msra.mxu1 %v18685_v3  ;;  %v9966_v11 = vcombine.high %v9958_v58, %v9958_v58 }
 0x2fb   : > { %v9745_v15 = vrot.slane %v9731_v13, %v19228_v27  ;;  %18357 = vmatprep.subr.bf16.mxu1 %v18686_v0  ;;  %v9809_v25 = vrot.slane %v9802_v55, %v19228_v27  ;;  %v9967_v51 = vcombine.high %v9965_v54, %v9965_v54  ;;  %v9974_v52 = vrot.slane %v9958_v58, %v19228_v27  ;;  %v9940_v13 = vld [vmem:[#allocation2 + $0x21] sm:$0x7f] }
 0x2fc   : > { %v9779_v56 = vcombine.low %v9757_v10, %v9764_v7  ;;  %v9780_v38 = vcombine.low %v9771_v45, %v9778_v35  ;;  %v9981_v60 = vrot.slane %v9965_v54, %v19228_v27  ;;  %v9988_v63 = vrot.slane %v9966_v11, %v19228_v27  ;;  %v9941_v11 = vld [vmem:[#allocation2 + $0x29] sm:$0x7f] }
 0x2fd   : > { %v9746_v19 = vcombine.low %v9738_v46, %v9745_v15  ;;  %v9820_v6 = vpack.c.bf16 %v9809_v25, %v9809_v25  ;;  %v9995_v18 = vrot.slane %v9967_v51, %v19228_v27  ;;  %v9999_v39 = vcombine.high %v9938_v42, %v9938_v42 }
 0x2fe   : > { %v9787_v21 = vrot.slane %v9779_v56, %v19228_v27  ;;  %v9794_v22 = vrot.slane %v9780_v38, %v19228_v27  ;;  %18358 = vmatpush3.bf16.msra.mxu1 %v18686_v0  ;;  %v9997_v28 = vcombine.high %v9981_v60, %v9981_v60  ;;  %v10006_v20 = vrot.slane %v9938_v42, %v19228_v27 }
 0x2ff   : > { %v10013_v31 = vrot.slane %v9999_v39, %v19228_v27  ;;  %v10047_v17 = vcombine.high %v9939_v43, %v9939_v43  ;;  %v10054_v5 = vrot.slane %v9939_v43, %v19228_v27  ;;  %v10287_v26 = vcombine.low %v9974_v52, %v9988_v63  ;;  %18359 = vmatprep.subr.bf16.mxu1 %v18690_v8 }
 0x300   : > { %v9795_v53 = vcombine.low %v9787_v21, %v9794_v22  ;;  %v10014_v37 = vcombine.high %v10006_v20, %v10006_v20  ;;  %v10022_v4 = vrot.slane %v10006_v20, %v19228_v27  ;;  %v17593_v40 = vcombine.high %v9974_v52, %v9988_v63 }
 0x301   : > { %v10015_v57 = vcombine.high %v10013_v31, %v10013_v31  ;;  %v10029_v3 = vrot.slane %v10013_v31, %v19228_v27  ;;  %v10061_v59 = vrot.slane %v10047_v17, %v19228_v27  ;;  %v10062_v16 = vcombine.high %v10054_v5, %v10054_v5 }
 0x302   : > { %v9819_v44 = vpack.c.bf16 %v9795_v53, %v9746_v19  ;;  %v10036_v2 = vrot.slane %v10014_v37, %v19228_v27  ;;  %v10044_v49 = vcombine.high %v10022_v4, %v10022_v4  ;;  %v10070_v14 = vrot.slane %v10054_v5, %v19228_v27  ;;  %18360 = vmatpush3.bf16.msra.mxu1 %v18690_v8 }
 0x303   : > { %v10043_v24 = vrot.slane %v10015_v57, %v19228_v27  ;;  %v10045_v41 = vcombine.high %v10029_v3, %v10029_v3  ;;  %v10063_v23 = vcombine.high %v10061_v59, %v10061_v59  ;;  %v10077_v29 = vrot.slane %v10061_v59, %v19228_v27  ;;  %18369 = vmatprep.subr.bf16.mxu1 %v20870_v34 }
 0x304   : > { %18349 = vmatprep.mubr.msk.bf16.mxu1 %vm606_vm2, %v9819_v44  ;;  %v10046_v47 = vcombine.high %v10036_v2, %v10036_v2  ;;  %v10084_v30 = vrot.slane %v10062_v16, %v19228_v27  ;;  %v10289_v62 = vcombine.low %v9981_v60, %v9995_v18  ;;  %v10290_v50 = vcombine.low %v9997_v28, %v10022_v4 }
 0x305   : > { %18350 = vmatmul.mubr.msk.bf16.gmra.mrb[68].mxu1 %vm606_vm2, %v9820_v6  ;;  %v10297_v61 = vrot.slane %v10287_v26, %v19228_v27  ;;  %v10304_v0 = vrot.slane %v17593_v40, %v19228_v27  ;;  %v10336_v1 = vcombine.low %v10036_v2, %v10044_v49  ;;  %v10338_v58 = vcombine.low %v10043_v24, %v10045_v41 }
 0x306   : > { %v10311_v9 = vrot.slane %v10289_v62, %v19228_v27  ;;  %v10318_v12 = vrot.slane %v10290_v50, %v19228_v27  ;;  %v10337_v48 = vcombine.low %v10046_v47, %v10029_v3  ;;  %v10339_v10 = vcombine.low %v10070_v14, %v10084_v30  ;;  %v9942_v62 = vld [vmem:[#allocation2 + $0x31] sm:$0x7f]  ;;  %v9943_v50 = vld [vmem:[#allocation2 + $0x39] sm:$0x7f] }
 0x307   : > { %v10319_v46 = vcombine.low %v10297_v61, %v10304_v0  ;;  %v10346_v55 = vrot.slane %v10336_v1, %v19228_v27  ;;  %v10360_v54 = vrot.slane %v10338_v58, %v19228_v27  ;;  %v17594_v7 = vcombine.high %v10070_v14, %v10084_v30 }
 0x308   : > { %v10320_v45 = vcombine.low %v10311_v9, %v10318_v12  ;;  %v10353_v35 = vrot.slane %v10337_v48, %v19228_v27  ;;  %v10367_v42 = vrot.slane %v10339_v10, %v19228_v27  ;;  %v10091_v15 = vrot.slane %v10063_v23, %v19228_v27 }
 0x309   : > { %v10327_v25 = vrot.slane %v10319_v46, %v19228_v27  ;;  %v10395_v51 = vrot.slane %v17594_v7, %v19228_v27  ;;  %v10093_v52 = vcombine.high %v10077_v29, %v10077_v29  ;;  %v10095_v8 = vcombine.high %v9940_v13, %v9940_v13 }
 0x30a   : > { %v10334_v56 = vrot.slane %v10320_v45, %v19228_v27  ;;  %v10368_v38 = vcombine.low %v10346_v55, %v10353_v35  ;;  %v10369_v43 = vcombine.low %v10360_v54, %v10367_v42  ;;  %v10102_v60 = vrot.slane %v9940_v13, %v19228_v27 }
 0x30b   : > { %v10109_v63 = vrot.slane %v10095_v8, %v19228_v27  ;;  %v10150_v19 = vrot.slane %v9941_v11, %v19228_v27  ;;  %v10386_v6 = vcombine.low %v10077_v29, %v10091_v15  ;;  %v10143_v18 = vcombine.high %v9941_v11, %v9941_v11 }
 0x30c   : > { %v10335_v39 = vcombine.low %v10327_v25, %v10334_v56  ;;  %v10376_v21 = vrot.slane %v10368_v38, %v19228_v27  ;;  %v10383_v22 = vrot.slane %v10369_v43, %v19228_v27  ;;  %v10110_v28 = vcombine.high %v10102_v60, %v10102_v60 }
 0x30d   : > { %v10111_v20 = vcombine.high %v10109_v63, %v10109_v63  ;;  %v10118_v31 = vrot.slane %v10102_v60, %v19228_v27  ;;  %v10125_v17 = vrot.slane %v10109_v63, %v19228_v27  ;;  %v10158_v5 = vcombine.high %v10150_v19, %v10150_v19 }
 0x30e   : > { %v10384_v26 = vcombine.low %v10376_v21, %v10383_v22  ;;  %v10132_v53 = vrot.slane %v10110_v28, %v19228_v27  ;;  %v10166_v37 = vrot.slane %v10150_v19, %v19228_v27  ;;  %v10402_v4 = vrot.slane %v10386_v6, %v19228_v27 }
 0x30f   : > { %v10139_v40 = vrot.slane %v10111_v20, %v19228_v27  ;;  %v10140_v57 = vcombine.high %v10118_v31, %v10118_v31  ;;  %v10141_v3 = vcombine.high %v10125_v17, %v10125_v17  ;;  %v10180_v59 = vrot.slane %v10158_v5, %v19228_v27 }
 0x310   : > { %v10602_v16 = vpack.c.bf16 %v10384_v26, %v10335_v39  ;;  %v10142_v44 = vcombine.high %v10132_v53, %v10132_v53  ;;  %v10387_v2 = vcombine.low %v10093_v52, %v10118_v31  ;;  %v10417_v49 = vcombine.low %v10395_v51, %v10402_v4  ;;  %v18696_v4 = vld [vmem:[%s22368_s2 + $0x168] sm:$0xff]  }
 0x311   : > { %v10388_v14 = vcombine.low %v10132_v53, %v10140_v57  ;;  %v10435_v24 = vcombine.low %v10139_v40, %v10141_v3  ;;  %v10436_v41 = vcombine.low %v10166_v37, %v10180_v59  ;;  %v17595_v23 = vcombine.high %v10166_v37, %v10180_v59 }
 0x312   : > { %18361 = vmatprep.mubr.msk.bf16.mxu1 %vm606_vm2, %v10602_v16  ;;  %v10409_v29 = vrot.slane %v10387_v2, %v19228_v27  ;;  %v10425_v47 = vrot.slane %v10417_v49, %v19228_v27  ;;  %v10434_v30 = vcombine.low %v10142_v44, %v10125_v17  ;;  %v10157_v61 = vrot.slane %v10143_v18, %v19228_v27 }
 0x313   : > { %v10416_v0 = vrot.slane %v10388_v14, %v19228_v27  ;;  %v10451_v1 = vrot.slane %v10435_v24, %v19228_v27  ;;  %v10458_v58 = vrot.slane %v10436_v41, %v19228_v27  ;;  %v10465_v9 = vrot.slane %v17595_v23, %v19228_v27  ;;  %v10722_v14 = vld [vmem:[#allocation2 + $0x49] sm:$0x7f] }
 0x314   : > { %v10444_v12 = vrot.slane %v10434_v30, %v19228_v27  ;;  %v10159_v48 = vcombine.high %v10157_v61, %v10157_v61  ;;  %v10173_v10 = vrot.slane %v10157_v61, %v19228_v27  ;;  %v10191_v13 = vcombine.high %v9942_v62, %v9942_v62  ;;  %v18697_v61 = vld [vmem:[%s22368_s2 + $0x170] sm:$0xff]  }
 0x315   : > { %v10418_v46 = vcombine.low %v10409_v29, %v10416_v0  ;;  %v10467_v55 = vcombine.low %v10458_v58, %v10465_v9  ;;  %v10198_v54 = vrot.slane %v9942_v62, %v19228_v27  ;;  %v10239_v7 = vcombine.high %v9943_v50, %v9943_v50 }
 0x316   : > { %v10466_v45 = vcombine.low %v10444_v12, %v10451_v1  ;;  %v10187_v35 = vrot.slane %v10159_v48, %v19228_v27  ;;  %v10189_v42 = vcombine.high %v10173_v10, %v10173_v10  ;;  %v10205_v11 = vrot.slane %v10191_v13, %v19228_v27 }
 0x317   : > { %v10432_v15 = vrot.slane %v10418_v46, %v19228_v27  ;;  %v10481_v25 = vrot.slane %v10467_v55, %v19228_v27  ;;  %v10206_v51 = vcombine.high %v10198_v54, %v10198_v54  ;;  %v10214_v52 = vrot.slane %v10198_v54, %v19228_v27 }
 0x318   : > { %v10474_v8 = vrot.slane %v10466_v45, %v19228_v27  ;;  %v10207_v56 = vcombine.high %v10205_v11, %v10205_v11  ;;  %v10221_v38 = vrot.slane %v10205_v11, %v19228_v27  ;;  %v10246_v43 = vrot.slane %v9943_v50, %v19228_v27 }
 0x319   : > { %v10433_v60 = vcombine.low %v10425_v47, %v10432_v15  ;;  %v10228_v63 = vrot.slane %v10206_v51, %v19228_v27  ;;  %v10236_v19 = vcombine.high %v10214_v52, %v10214_v52  ;;  %v10253_v6 = vrot.slane %v10239_v7, %v19228_v27  ;;  %v10723_v47 = vld [vmem:[#allocation2 + $0x51] sm:$0x7f]  ;;  %v18701_v15 = vld [vmem:[%s22368_s2 + $0x178] sm:$0xff]  }
 0x31a   : > { %v10482_v18 = vcombine.low %v10474_v8, %v10481_v25  ;;  %v10235_v39 = vrot.slane %v10207_v56, %v19228_v27  ;;  %v10237_v21 = vcombine.high %v10221_v38, %v10221_v38  ;;  %v10254_v22 = vcombine.high %v10246_v43, %v10246_v43 }
 0x31b   : > { %v10238_v28 = vcombine.high %v10228_v63, %v10228_v63  ;;  %v10255_v20 = vcombine.high %v10253_v6, %v10253_v6  ;;  %v10262_v31 = vrot.slane %v10246_v43, %v19228_v27  ;;  %v10269_v17 = vrot.slane %v10253_v6, %v19228_v27 }
 0x31c   : > { %v10603_v5 = vpack.c.bf16 %v10482_v18, %v10433_v60  ;;  %v10276_v26 = vrot.slane %v10254_v22, %v19228_v27  ;;  %v10483_v53 = vcombine.low %v10173_v10, %v10187_v35  ;;  %v10484_v37 = vcombine.low %v10189_v42, %v10214_v52  ;;  %v10724_v52 = vld [vmem:[#allocation2 + $0x59] sm:$0x7f] }
 0x31d   : > { %v10283_v40 = vrot.slane %v10255_v20, %v19228_v27  ;;  %v10485_v57 = vcombine.low %v10228_v63, %v10236_v19  ;;  %v10486_v3 = vcombine.low %v10238_v28, %v10221_v38  ;;  %v10532_v59 = vcombine.low %v10235_v39, %v10237_v21 }
 0x31e   : > { %18362 = vmatmul.mubr.msk.bf16.vlgmr.msra.gmra.mrb[28].mxu1 %vm606_vm2, %v10603_v5  ;;  %v10493_v16 = vrot.slane %v10483_v53, %v19228_v27  ;;  %v10500_v44 = vrot.slane %v10484_v37, %v19228_v27  ;;  %v10533_v2 = vcombine.low %v10262_v31, %v10276_v26  ;;  %v17596_v49 = vcombine.high %v10262_v31, %v10276_v26 }
 0x31f   : > { %18370 = vmatpush3.bf16.msra.mxu1 %v20870_v34  ;;  %v10507_v24 = vrot.slane %v10485_v57, %v19228_v27  ;;  %v10514_v41 = vrot.slane %v10486_v3, %v19228_v27  ;;  %v10535_v23 = vcombine.low %v10269_v17, %v10283_v40  ;;  %v10542_v29 = vrot.slane %v10532_v59, %v19228_v27  ;;  %v20975_v57 = vld [vmem:[%s22368_s2 + $0x180] sm:$0xff]  }
 0x320   : > { %v10515_v30 = vcombine.low %v10493_v16, %v10500_v44  ;;  %v10549_v62 = vrot.slane %v10533_v2, %v19228_v27  ;;  %v10556_v50 = vrot.slane %v17596_v49, %v19228_v27  ;;  %18371 = vmatprep.subr.bf16.mxu1 %v18696_v4  ;;  %v10285_v0 = vcombine.high %v10269_v17, %v10269_v17 }
 0x321   : > { %v10516_v34 = vcombine.low %v10507_v24, %v10514_v41  ;;  %v10563_v1 = vrot.slane %v10535_v23, %v19228_v27  ;;  %v10736_v58 = vcombine.high %v10722_v14, %v10722_v14  ;;  %v10743_v9 = vrot.slane %v10722_v14, %v19228_v27 }
 0x322   : > { %v10523_v12 = vrot.slane %v10515_v30, %v19228_v27  ;;  %v10564_v48 = vcombine.low %v10542_v29, %v10549_v62  ;;  %v10587_v10 = vrot.slane %v10285_v0, %v19228_v27  ;;  %v10784_v13 = vcombine.high %v10723_v47, %v10723_v47 }
 0x323   : > { %v10530_v46 = vrot.slane %v10516_v34, %v19228_v27  ;;  %v10565_v55 = vcombine.low %v10556_v50, %v10563_v1  ;;  %18372 = vmatpush3.bf16.msra.mxu1 %v18696_v4  ;;  %v10750_v54 = vrot.slane %v10736_v58, %v19228_v27  ;;  %v10751_v7 = vcombine.high %v10743_v9, %v10743_v9 }
 0x324   : > { %v10572_v45 = vrot.slane %v10564_v48, %v19228_v27  ;;  %18373 = vmatprep.subr.bf16.mxu1 %v18697_v61  ;;  %v10594_v35 = vrot.slane %v10587_v10, %v19228_v27  ;;  %v10759_v42 = vrot.slane %v10743_v9, %v19228_v27  ;;  %v10791_v11 = vrot.slane %v10723_v47, %v19228_v27 }
 0x325   : > { %v10531_v25 = vcombine.low %v10523_v12, %v10530_v46  ;;  %v10579_v51 = vrot.slane %v10565_v55, %v19228_v27  ;;  %v10752_v8 = vcombine.high %v10750_v54, %v10750_v54  ;;  %v10766_v56 = vrot.slane %v10750_v54, %v19228_v27  ;;  %v10726_v12 = vld [vmem:[#allocation2 + $0x69] sm:$0x7f] }
 0x326   : > { %v10605_v38 = vpack.c.bf16 %v10594_v35, %v10594_v35  ;;  %v10773_v43 = vrot.slane %v10751_v7, %v19228_v27  ;;  %v10798_v60 = vrot.slane %v10784_v13, %v19228_v27  ;;  %v10799_v63 = vcombine.high %v10791_v11, %v10791_v11 }
 0x327   : > { %v10580_v19 = vcombine.low %v10572_v45, %v10579_v51  ;;  %18374 = vmatpush3.bf16.msra.mxu1 %v18697_v61  ;;  %v10780_v6 = vrot.slane %v10752_v8, %v19228_v27  ;;  %v10782_v18 = vcombine.high %v10766_v56, %v10766_v56  ;;  %v10807_v39 = vrot.slane %v10791_v11, %v19228_v27  ;;  %v10725_v61 = vld [vmem:[#allocation2 + $0x61] sm:$0x7f] }
 0x328   : > { %v10800_v21 = vcombine.high %v10798_v60, %v10798_v60  ;;  %v10814_v22 = vrot.slane %v10798_v60, %v19228_v27  ;;  %v10821_v28 = vrot.slane %v10799_v63, %v19228_v27  ;;  %v10832_v20 = vcombine.high %v10724_v52, %v10724_v52  ;;  %18375 = vmatprep.subr.bf16.mxu1 %v18701_v15 }
 0x329   : > { %v10604_v31 = vpack.c.bf16 %v10580_v19, %v10531_v25  ;;  %v10829_v17 = vcombine.high %v10807_v39, %v10807_v39  ;;  %v10839_v5 = vrot.slane %v10724_v52, %v19228_v27  ;;  %v11072_v26 = vcombine.low %v10759_v42, %v10773_v43  ;;  %v20997_v25 = vpop.f32.mrb[32].mxu1 }
 0x32a   : > { %v10828_v53 = vrot.slane %v10800_v21, %v19228_v27  ;;  %v10830_v37 = vcombine.high %v10814_v22, %v10814_v22  ;;  %v10831_v4 = vcombine.high %v10821_v28, %v10821_v28  ;;  %v10846_v40 = vrot.slane %v10832_v20, %v19228_v27 }
 0x32b   : > { %18365 = vmatprep.mubr.msk.bf16.mxu1 %vm606_vm2, %v10604_v31  ;;  %v10847_v3 = vcombine.high %v10839_v5, %v10839_v5  ;;  %v10855_v59 = vrot.slane %v10839_v5, %v19228_v27  ;;  %v17613_v16 = vcombine.high %v10759_v42, %v10773_v43  ;;  %v11074_v44 = vcombine.low %v10766_v56, %v10780_v6 }
 0x32c   : > { %18366 = vmatmul.mubr.msk.bf16.gmra.mrb[72].mxu1 %vm606_vm2, %v10605_v38  ;;  %v10848_v2 = vcombine.high %v10846_v40, %v10846_v40  ;;  %v10862_v49 = vrot.slane %v10846_v40, %v19228_v27  ;;  %v11075_v14 = vcombine.low %v10782_v18, %v10807_v39  ;;  %v11082_v24 = vrot.slane %v11072_v26, %v19228_v27  ;;  %v21000_v38 = vpop.f32.mrb[33].mxu1 }
 0x32d   : > { %v10869_v41 = vrot.slane %v10847_v3, %v19228_v27  ;;  %v11089_v23 = vrot.slane %v17613_v16, %v19228_v27  ;;  %v11096_v29 = vrot.slane %v11074_v44, %v19228_v27  ;;  %v11121_v47 = vcombine.low %v10821_v28, %v10829_v17  ;;  %18376 = vmatpush3.bf16.msra.mxu1 %v18701_v15  ;;  %v18208_v6 = vpop.f32.mrb[34].mxu1 }
 0x32e   : > { %v11103_v30 = vrot.slane %v11075_v14, %v19228_v27  ;;  %v11122_v62 = vcombine.low %v10831_v4, %v10814_v22  ;;  %v11123_v50 = vcombine.low %v10828_v53, %v10830_v37  ;;  %18385 = vmatprep.subr.bf16.mxu1 %v20975_v57  ;;  %v10876_v0 = vrot.slane %v10848_v2, %v19228_v27  ;;  %v21006_v28 = vpop.f32.mrb[35].mxu1 }
 0x32f   : > { %v11104_v34 = vcombine.low %v11082_v24, %v11089_v23  ;;  %v11124_v1 = vcombine.low %v10855_v59, %v10869_v41  ;;  %v11131_v58 = vrot.slane %v11121_v47, %v19228_v27  ;;  %v17614_v9 = vcombine.high %v10855_v59, %v10869_v41 }
 0x330   : > { %v11105_v48 = vcombine.low %v11096_v29, %v11103_v30  ;;  %v11138_v10 = vrot.slane %v11122_v62, %v19228_v27  ;;  %v11145_v13 = vrot.slane %v11123_v50, %v19228_v27  ;;  %v10878_v46 = vcombine.high %v10862_v49, %v10862_v49  ;;  %v10727_v29 = vld [vmem:[#allocation2 + $0x71] sm:$0x7f] }
 0x331   : > { %v11112_v55 = vrot.slane %v11104_v34, %v19228_v27  ;;  %v11152_v54 = vrot.slane %v11124_v1, %v19228_v27  ;;  %v11180_v7 = vrot.slane %v17614_v9, %v19228_v27  ;;  %v10880_v45 = vcombine.high %v10725_v61, %v10725_v61 }
 0x332   : > { %v11119_v35 = vrot.slane %v11105_v48, %v19228_v27  ;;  %v11153_v42 = vcombine.low %v11131_v58, %v11138_v10  ;;  %v10887_v11 = vrot.slane %v10725_v61, %v19228_v27  ;;  %v10935_v15 = vrot.slane %v10726_v12, %v19228_v27  ;;  %v10728_v61 = vld [vmem:[#allocation2 + $0x79] sm:$0x7f] }
 0x333   : > { %v11154_v51 = vcombine.low %v11145_v13, %v11152_v54  ;;  %v10894_v52 = vrot.slane %v10880_v45, %v19228_v27  ;;  %v11171_v8 = vcombine.low %v10862_v49, %v10876_v0  ;;  %v10928_v56 = vcombine.high %v10726_v12, %v10726_v12 }
 0x334   : > { %v11120_v43 = vcombine.low %v11112_v55, %v11119_v35  ;;  %v11161_v60 = vrot.slane %v11153_v42, %v19228_v27  ;;  %v10895_v63 = vcombine.high %v10887_v11, %v10887_v11  ;;  %v10903_v19 = vrot.slane %v10887_v11, %v19228_v27 }
 0x335   : > { %v11168_v18 = vrot.slane %v11154_v51, %v19228_v27  ;;  %v10896_v39 = vcombine.high %v10894_v52, %v10894_v52  ;;  %v10910_v21 = vrot.slane %v10894_v52, %v19228_v27  ;;  %v10943_v22 = vcombine.high %v10935_v15, %v10935_v15 }
 0x336   : > { %v10917_v20 = vrot.slane %v10895_v63, %v19228_v27  ;;  %v10925_v31 = vcombine.high %v10903_v19, %v10903_v19  ;;  %v10951_v17 = vrot.slane %v10935_v15, %v19228_v27  ;;  %v11172_v5 = vcombine.low %v10878_v46, %v10903_v19 }
 0x337   : > { %v11169_v26 = vcombine.low %v11161_v60, %v11168_v18  ;;  %v10924_v53 = vrot.slane %v10896_v39, %v19228_v27  ;;  %v10926_v37 = vcombine.high %v10910_v21, %v10910_v21  ;;  %v10965_v4 = vrot.slane %v10943_v22, %v19228_v27 }
 0x338   : > { %v10927_v40 = vcombine.high %v10917_v20, %v10917_v20  ;;  %v11173_v3 = vcombine.low %v10917_v20, %v10925_v31  ;;  %v11187_v59 = vrot.slane %v11171_v8, %v19228_v27  ;;  %v11194_v16 = vrot.slane %v11172_v5, %v19228_v27 }
 0x339   : > { %v11387_v44 = vpack.c.bf16 %v11169_v26, %v11120_v43  ;;  %v11220_v2 = vcombine.low %v10924_v53, %v10926_v37  ;;  %v11221_v49 = vcombine.low %v10951_v17, %v10965_v4  ;;  %v17615_v14 = vcombine.high %v10951_v17, %v10965_v4  ;;  %v18707_v37 = vld [vmem:[%s22368_s2 + $0x188] sm:$0xff]  }
 0x33a   : > { %v11201_v24 = vrot.slane %v11173_v3, %v19228_v27  ;;  %v11202_v41 = vcombine.low %v11180_v7, %v11187_v59  ;;  %v11219_v23 = vcombine.low %v10927_v40, %v10910_v21  ;;  %v10942_v47 = vrot.slane %v10928_v56, %v19228_v27 }
 0x33b   : > { %18377 = vmatprep.mubr.msk.bf16.mxu1 %vm606_vm2, %v11387_v44  ;;  %v11236_v30 = vrot.slane %v11220_v2, %v19228_v27  ;;  %v11243_v62 = vrot.slane %v11221_v49, %v19228_v27  ;;  %v11250_v50 = vrot.slane %v17615_v14, %v19228_v27  ;;  %v10976_v0 = vcombine.high %v10727_v29, %v10727_v29 }
 0x33c   : > { %v11203_v34 = vcombine.low %v11194_v16, %v11201_v24  ;;  %v11210_v1 = vrot.slane %v11202_v41, %v19228_v27  ;;  %v11229_v58 = vrot.slane %v11219_v23, %v19228_v27  ;;  %v10944_v9 = vcombine.high %v10942_v47, %v10942_v47  ;;  %v11508_v16 = vld [vmem:[#allocation2 + $0x88] sm:$0x7f] }
 0x33d   : > { %v11252_v12 = vcombine.low %v11243_v62, %v11250_v50  ;;  %v10958_v48 = vrot.slane %v10942_v47, %v19228_v27  ;;  %v10983_v10 = vrot.slane %v10727_v29, %v19228_v27  ;;  %v10990_v13 = vrot.slane %v10976_v0, %v19228_v27  ;;  %v18708_v62 = vld [vmem:[%s22368_s2 + $0x190] sm:$0xff]  }
 0x33e   : > { %v11217_v46 = vrot.slane %v11203_v34, %v19228_v27  ;;  %v11251_v55 = vcombine.low %v11229_v58, %v11236_v30  ;;  %v10972_v54 = vrot.slane %v10944_v9, %v19228_v27  ;;  %v11024_v7 = vcombine.high %v10728_v61, %v10728_v61 }
 0x33f   : > { %v11266_v45 = vrot.slane %v11252_v12, %v19228_v27  ;;  %v10974_v35 = vcombine.high %v10958_v48, %v10958_v48  ;;  %v10991_v42 = vcombine.high %v10983_v10, %v10983_v10  ;;  %v10992_v11 = vcombine.high %v10990_v13, %v10990_v13 }
 0x340   : > { %v11218_v15 = vcombine.low %v11210_v1, %v11217_v46  ;;  %v11259_v51 = vrot.slane %v11251_v55, %v19228_v27  ;;  %v10999_v52 = vrot.slane %v10983_v10, %v19228_v27  ;;  %v11006_v8 = vrot.slane %v10990_v13, %v19228_v27 }
 0x341   : > { %v11013_v56 = vrot.slane %v10991_v42, %v19228_v27  ;;  %v11020_v43 = vrot.slane %v10992_v11, %v19228_v27  ;;  %v11031_v60 = vrot.slane %v10728_v61, %v19228_v27  ;;  %v11038_v63 = vrot.slane %v11024_v7, %v19228_v27  ;;  %v11509_v61 = vld [vmem:[#allocation2 + $0x90] sm:$0x7f] }
 0x342   : > { %v11267_v19 = vcombine.low %v11259_v51, %v11266_v45  ;;  %v11021_v6 = vcombine.high %v10999_v52, %v10999_v52  ;;  %v11022_v18 = vcombine.high %v11006_v8, %v11006_v8  ;;  %v11268_v39 = vcombine.low %v10958_v48, %v10972_v54  ;;  %v11510_v45 = vld [vmem:[#allocation2 + $0x98] sm:$0x7f] }
 0x343   : > { %v11023_v21 = vcombine.high %v11013_v56, %v11013_v56  ;;  %v11039_v22 = vcombine.high %v11031_v60, %v11031_v60  ;;  %v11040_v20 = vcombine.high %v11038_v63, %v11038_v63  ;;  %v11047_v31 = vrot.slane %v11031_v60, %v19228_v27 }
 0x344   : > { %v11388_v17 = vpack.c.bf16 %v11267_v19, %v11218_v15  ;;  %v11054_v5 = vrot.slane %v11038_v63, %v19228_v27  ;;  %v11269_v26 = vcombine.low %v10974_v35, %v10999_v52  ;;  %v11270_v53 = vcombine.low %v11013_v56, %v11021_v6  ;;  %v18712_v15 = vld [vmem:[%s22368_s2 + $0x198] sm:$0xff]  }
 0x345   : > { %v11061_v4 = vrot.slane %v11039_v22, %v19228_v27  ;;  %v11068_v40 = vrot.slane %v11040_v20, %v19228_v27  ;;  %v11271_v3 = vcombine.low %v11023_v21, %v11006_v8  ;;  %v11278_v59 = vrot.slane %v11268_v39, %v19228_v27 }
 0x346   : > { %18378 = vmatmul.mubr.msk.bf16.vlgmr.msra.gmra.mrb[28].mxu1 %vm606_vm2, %v11388_v17  ;;  %v11285_v44 = vrot.slane %v11269_v26, %v19228_v27  ;;  %v11292_v2 = vrot.slane %v11270_v53, %v19228_v27  ;;  %v11317_v49 = vcombine.low %v11020_v43, %v11022_v18  ;;  %v11070_v14 = vcombine.high %v11054_v5, %v11054_v5 }
 0x347   : > { %18386 = vmatpush3.bf16.msra.mxu1 %v20975_v57  ;;  %v11299_v24 = vrot.slane %v11271_v3, %v19228_v27  ;;  %v11318_v41 = vcombine.low %v11047_v31, %v11061_v4  ;;  %v17616_v23 = vcombine.high %v11047_v31, %v11061_v4  ;;  %v11320_v29 = vcombine.low %v11054_v5, %v11068_v40 }
 0x348   : > { %v11300_v47 = vcombine.low %v11278_v59, %v11285_v44  ;;  %v11327_v30 = vrot.slane %v11317_v49, %v19228_v27  ;;  %18387 = vmatprep.subr.bf16.mxu1 %v18707_v37  ;;  %v11372_v50 = vrot.slane %v11070_v14, %v19228_v27  ;;  %v11522_v0 = vcombine.high %v11508_v16, %v11508_v16 }
 0x349   : > { %v11301_v34 = vcombine.low %v11292_v2, %v11299_v24  ;;  %v11334_v57 = vrot.slane %v11318_v41, %v19228_v27  ;;  %v11341_v1 = vrot.slane %v17616_v23, %v19228_v27  ;;  %v11348_v58 = vrot.slane %v11320_v29, %v19228_v27 }
 0x34a   : > { %v11308_v9 = vrot.slane %v11300_v47, %v19228_v27  ;;  %v11379_v12 = vrot.slane %v11372_v50, %v19228_v27  ;;  %v11529_v48 = vrot.slane %v11508_v16, %v19228_v27  ;;  %v11536_v10 = vrot.slane %v11522_v0, %v19228_v27  ;;  %v21082_v16 = vld [vmem:[%s22368_s2 + $0x1a0] sm:$0xff]  }
 0x34b   : > { %v11315_v13 = vrot.slane %v11301_v34, %v19228_v27  ;;  %v11349_v46 = vcombine.low %v11327_v30, %v11334_v57  ;;  %v11350_v55 = vcombine.low %v11341_v1, %v11348_v58  ;;  %18388 = vmatpush3.bf16.msra.mxu1 %v18707_v37  ;;  %v11570_v54 = vcombine.high %v11509_v61, %v11509_v61  ;;  %v11511_v1 = vld [vmem:[#allocation2 + $0xa0] sm:$0x7f] }
 0x34c   : > { %18389 = vmatprep.subr.bf16.mxu1 %v18708_v62  ;;  %v11390_v7 = vpack.c.bf16 %v11379_v12, %v11379_v12  ;;  %v11537_v35 = vcombine.high %v11529_v48, %v11529_v48  ;;  %v11538_v42 = vcombine.high %v11536_v10, %v11536_v10  ;;  %v11545_v11 = vrot.slane %v11529_v48, %v19228_v27 }
 0x34d   : > { %v11316_v51 = vcombine.low %v11308_v9, %v11315_v13  ;;  %v11357_v52 = vrot.slane %v11349_v46, %v19228_v27  ;;  %v11364_v8 = vrot.slane %v11350_v55, %v19228_v27  ;;  %v11552_v56 = vrot.slane %v11536_v10, %v19228_v27  ;;  %v11512_v55 = vld [vmem:[#allocation2 + $0xa8] sm:$0x7f] }
 0x34e   : > { %v11559_v43 = vrot.slane %v11537_v35, %v19228_v27  ;;  %v11566_v60 = vrot.slane %v11538_v42, %v19228_v27  ;;  %v11577_v63 = vrot.slane %v11509_v61, %v19228_v27  ;;  %v11584_v19 = vrot.slane %v11570_v54, %v19228_v27 }
 0x34f   : > { %v11365_v6 = vcombine.low %v11357_v52, %v11364_v8  ;;  %18390 = vmatpush3.bf16.msra.mxu1 %v18708_v62  ;;  %v11568_v18 = vcombine.high %v11552_v56, %v11552_v56  ;;  %v11618_v39 = vcombine.high %v11510_v45, %v11510_v45  ;;  %v11625_v21 = vrot.slane %v11510_v45, %v19228_v27 }
 0x350   : > { %v11585_v22 = vcombine.high %v11577_v63, %v11577_v63  ;;  %v11586_v20 = vcombine.high %v11584_v19, %v11584_v19  ;;  %v11593_v31 = vrot.slane %v11577_v63, %v19228_v27  ;;  %v11600_v17 = vrot.slane %v11584_v19, %v19228_v27  ;;  %18391 = vmatprep.subr.bf16.mxu1 %v18712_v15  ;;  %v21105_v63 = vpop.f32.mrb[36].mxu1 }
 0x351   : > { %v11389_v5 = vpack.c.bf16 %v11365_v6, %v11316_v51  ;;  %v11632_v26 = vrot.slane %v11618_v39, %v19228_v27  ;;  %v11633_v53 = vcombine.high %v11625_v21, %v11625_v21  ;;  %v11641_v37 = vrot.slane %v11625_v21, %v19228_v27  ;;  %v21109_v21 = vpop.f32.mrb[37].mxu1 }
 0x352   : > { %v11607_v4 = vrot.slane %v11585_v22, %v19228_v27  ;;  %v11614_v40 = vrot.slane %v11586_v20, %v19228_v27  ;;  %v11615_v3 = vcombine.high %v11593_v31, %v11593_v31  ;;  %v11616_v59 = vcombine.high %v11600_v17, %v11600_v17 }
 0x353   : > { %18381 = vmatprep.mubr.msk.bf16.mxu1 %vm606_vm2, %v11389_v5  ;;  %v11634_v44 = vcombine.high %v11632_v26, %v11632_v26  ;;  %v11648_v2 = vrot.slane %v11632_v26, %v19228_v27  ;;  %v11655_v49 = vrot.slane %v11633_v53, %v19228_v27  ;;  %v11858_v14 = vcombine.low %v11545_v11, %v11559_v43  ;;  %v18224_v5 = vpop.f32.mrb[38].mxu1 }
 0x354   : > { %18382 = vmatmul.mubr.msk.bf16.gmra.mrb[76].mxu1 %vm606_vm2, %v11390_v7  ;;  %v11617_v24 = vcombine.high %v11607_v4, %v11607_v4  ;;  %v17633_v41 = vcombine.high %v11545_v11, %v11559_v43  ;;  %v11860_v23 = vcombine.low %v11552_v56, %v11566_v60  ;;  %v11861_v29 = vcombine.low %v11568_v18, %v11593_v31 }
 0x355   : > { %v11868_v47 = vrot.slane %v11858_v14, %v19228_v27  ;;  %v11907_v30 = vcombine.low %v11607_v4, %v11615_v3  ;;  %v11909_v62 = vcombine.low %v11614_v40, %v11616_v59  ;;  %v11910_v50 = vcombine.low %v11641_v37, %v11655_v49  ;;  %18392 = vmatpush3.bf16.msra.mxu1 %v18712_v15  ;;  %v21114_v40 = vpop.f32.mrb[39].mxu1 }
 0x356   : > { %v11875_v61 = vrot.slane %v17633_v41, %v19228_v27  ;;  %v11882_v0 = vrot.slane %v11860_v23, %v19228_v27  ;;  %v11889_v34 = vrot.slane %v11861_v29, %v19228_v27  ;;  %v11908_v57 = vcombine.low %v11617_v24, %v11600_v17  ;;  %18401 = vmatprep.subr.bf16.mxu1 %v21082_v16 }
 0x357   : > { %v11917_v58 = vrot.slane %v11907_v30, %v19228_v27  ;;  %v11931_v9 = vrot.slane %v11909_v62, %v19228_v27  ;;  %v11938_v12 = vrot.slane %v11910_v50, %v19228_v27  ;;  %v17634_v48 = vcombine.high %v11641_v37, %v11655_v49  ;;  %v11513_v49 = vld [vmem:[#allocation2 + $0xb0] sm:$0x7f] }
 0x358   : > { %v11890_v10 = vcombine.low %v11868_v47, %v11875_v61  ;;  %v11891_v13 = vcombine.low %v11882_v0, %v11889_v34  ;;  %v11924_v46 = vrot.slane %v11908_v57, %v19228_v27  ;;  %v11662_v54 = vrot.slane %v11634_v44, %v19228_v27  ;;  %v11514_v0 = vld [vmem:[#allocation2 + $0xb8] sm:$0x7f] }
 0x359   : > { %v11940_v7 = vcombine.low %v11931_v9, %v11938_v12  ;;  %v11966_v45 = vrot.slane %v17634_v48, %v19228_v27  ;;  %v11664_v35 = vcombine.high %v11648_v2, %v11648_v2  ;;  %v11666_v42 = vcombine.high %v11511_v1, %v11511_v1 }
 0x35a   : > { %v11898_v11 = vrot.slane %v11890_v10, %v19228_v27  ;;  %v11905_v15 = vrot.slane %v11891_v13, %v19228_v27  ;;  %v11939_v51 = vcombine.low %v11917_v58, %v11924_v46  ;;  %v11673_v52 = vrot.slane %v11511_v1, %v19228_v27 }
 0x35b   : > { %v11954_v8 = vrot.slane %v11940_v7, %v19228_v27  ;;  %v11680_v56 = vrot.slane %v11666_v42, %v19228_v27  ;;  %v11721_v43 = vrot.slane %v11512_v55, %v19228_v27  ;;  %v11957_v60 = vcombine.low %v11648_v2, %v11662_v54 }
 0x35c   : > { %v11906_v19 = vcombine.low %v11898_v11, %v11905_v15  ;;  %v11947_v6 = vrot.slane %v11939_v51, %v19228_v27  ;;  %v11681_v18 = vcombine.high %v11673_v52, %v11673_v52  ;;  %v11689_v39 = vrot.slane %v11673_v52, %v19228_v27 }
 0x35d   : > { %v11682_v22 = vcombine.high %v11680_v56, %v11680_v56  ;;  %v11696_v20 = vrot.slane %v11680_v56, %v19228_v27  ;;  %v11729_v31 = vcombine.high %v11721_v43, %v11721_v43  ;;  %v11737_v17 = vrot.slane %v11721_v43, %v19228_v27 }
 0x35e   : > { %v11955_v26 = vcombine.low %v11947_v6, %v11954_v8  ;;  %v11703_v53 = vrot.slane %v11681_v18, %v19228_v27  ;;  %v11711_v37 = vcombine.high %v11689_v39, %v11689_v39  ;;  %v11958_v4 = vcombine.low %v11664_v35, %v11689_v39 }
 0x35f   : > { %v11710_v3 = vrot.slane %v11682_v22, %v19228_v27  ;;  %v11712_v59 = vcombine.high %v11696_v20, %v11696_v20  ;;  %v11751_v44 = vrot.slane %v11729_v31, %v19228_v27  ;;  %v11973_v2 = vrot.slane %v11957_v60, %v19228_v27 }
 0x360   : > { %v12173_v14 = vpack.c.bf16 %v11955_v26, %v11906_v19  ;;  %v11713_v24 = vcombine.high %v11703_v53, %v11703_v53  ;;  %v11959_v41 = vcombine.low %v11703_v53, %v11711_v37  ;;  %v11980_v23 = vrot.slane %v11958_v4, %v19228_v27 }
 0x361   : > { %v11988_v29 = vcombine.low %v11966_v45, %v11973_v2  ;;  %v12006_v47 = vcombine.low %v11710_v3, %v11712_v59  ;;  %v12007_v30 = vcombine.low %v11737_v17, %v11751_v44  ;;  %v17635_v62 = vcombine.high %v11737_v17, %v11751_v44 }
 0x362   : > { %18393 = vmatprep.mubr.msk.bf16.mxu1 %vm606_vm2, %v12173_v14  ;;  %v11987_v50 = vrot.slane %v11959_v41, %v19228_v27  ;;  %v12005_v61 = vcombine.low %v11713_v24, %v11696_v20  ;;  %v11714_v34 = vcombine.high %v11512_v55, %v11512_v55  ;;  %v11762_v57 = vcombine.high %v11513_v49, %v11513_v49  ;;  %v18718_v14 = vld [vmem:[%s22368_s2 + $0x1a8] sm:$0xff]  }
 0x363   : > { %v11996_v1 = vrot.slane %v11988_v29, %v19228_v27  ;;  %v12022_v58 = vrot.slane %v12006_v47, %v19228_v27  ;;  %v12029_v9 = vrot.slane %v12007_v30, %v19228_v27  ;;  %v12036_v12 = vrot.slane %v17635_v62, %v19228_v27 }
 0x364   : > { %v11989_v48 = vcombine.low %v11980_v23, %v11987_v50  ;;  %v12015_v10 = vrot.slane %v12005_v61, %v19228_v27  ;;  %v11728_v13 = vrot.slane %v11714_v34, %v19228_v27  ;;  %v11769_v46 = vrot.slane %v11513_v49, %v19228_v27  ;;  %v12294_v61 = vld [vmem:[#allocation2 + $0xc8] sm:$0x7f] }
 0x365   : > { %v12038_v54 = vcombine.low %v12029_v9, %v12036_v12  ;;  %v11776_v7 = vrot.slane %v11762_v57, %v19228_v27  ;;  %v11810_v55 = vcombine.high %v11514_v0, %v11514_v0  ;;  %v11817_v45 = vrot.slane %v11514_v0, %v19228_v27 }
 0x366   : > { %v12003_v35 = vrot.slane %v11989_v48, %v19228_v27  ;;  %v12037_v42 = vcombine.low %v12015_v10, %v12022_v58  ;;  %v11730_v11 = vcombine.high %v11728_v13, %v11728_v13  ;;  %v11744_v15 = vrot.slane %v11728_v13, %v19228_v27  ;;  %v12295_v58 = vld [vmem:[#allocation2 + $0xd0] sm:$0x7f] }
 0x367   : > { %v12052_v51 = vrot.slane %v12038_v54, %v19228_v27  ;;  %v11777_v52 = vcombine.high %v11769_v46, %v11769_v46  ;;  %v11778_v8 = vcombine.high %v11776_v7, %v11776_v7  ;;  %v11785_v56 = vrot.slane %v11769_v46, %v19228_v27  ;;  %v18719_v13 = vld [vmem:[%s22368_s2 + $0x1b0] sm:$0xff]  }
 0x368   : > { %v12004_v43 = vcombine.low %v11996_v1, %v12003_v35  ;;  %v12045_v60 = vrot.slane %v12037_v42, %v19228_v27  ;;  %v11758_v19 = vrot.slane %v11730_v11, %v19228_v27  ;;  %v11760_v6 = vcombine.high %v11744_v15, %v11744_v15 }
 0x369   : > { %v11792_v18 = vrot.slane %v11776_v7, %v19228_v27  ;;  %v11799_v39 = vrot.slane %v11777_v52, %v19228_v27  ;;  %v11806_v22 = vrot.slane %v11778_v8, %v19228_v27  ;;  %v11807_v20 = vcombine.high %v11785_v56, %v11785_v56 }
 0x36a   : > { %v12053_v31 = vcombine.low %v12045_v60, %v12052_v51  ;;  %v11824_v17 = vrot.slane %v11810_v55, %v19228_v27  ;;  %v11825_v5 = vcombine.high %v11817_v45, %v11817_v45  ;;  %v11833_v26 = vrot.slane %v11817_v45, %v19228_v27 }
 0x36b   : > { %v11808_v53 = vcombine.high %v11792_v18, %v11792_v18  ;;  %v11809_v37 = vcombine.high %v11799_v39, %v11799_v39  ;;  %v12054_v4 = vcombine.low %v11744_v15, %v11758_v19  ;;  %v12055_v3 = vcombine.low %v11760_v6, %v11785_v56  ;;  %v18723_v6 = vld [vmem:[%s22368_s2 + $0x1b8] sm:$0xff]  }
 0x36c   : > { %v12174_v59 = vpack.c.bf16 %v12053_v31, %v12004_v43  ;;  %v11826_v44 = vcombine.high %v11824_v17, %v11824_v17  ;;  %v11840_v2 = vrot.slane %v11824_v17, %v19228_v27  ;;  %v11847_v49 = vrot.slane %v11825_v5, %v19228_v27  ;;  %v12296_v43 = vld [vmem:[#allocation2 + $0xd8] sm:$0x7f] }
 0x36d   : > { %v12056_v24 = vcombine.low %v11799_v39, %v11807_v20  ;;  %v12057_v41 = vcombine.low %v11809_v37, %v11792_v18  ;;  %v12064_v23 = vrot.slane %v12054_v4, %v19228_v27  ;;  %v12071_v29 = vrot.slane %v12055_v3, %v19228_v27  ;;  %v21173_v18 = vpop.f32.mrb[40].mxu1 }
 0x36e   : > { %18394 = vmatmul.mubr.msk.bf16.vlgmr.msra.gmra.mrb[28].mxu1 %vm606_vm2, %v12174_v59  ;;  %v11854_v47 = vrot.slane %v11826_v44, %v19228_v27  ;;  %v12103_v30 = vcombine.low %v11806_v22, %v11808_v53  ;;  %v12104_v62 = vcombine.low %v11833_v26, %v11847_v49  ;;  %v17636_v50 = vcombine.high %v11833_v26, %v11847_v49  ;;  %v21176_v17 = vpop.f32.mrb[41].mxu1 }
 0x36f   : > { %18402 = vmatpush3.bf16.msra.mxu1 %v21082_v16  ;;  %v12078_v0 = vrot.slane %v12056_v24, %v19228_v27  ;;  %v12085_v34 = vrot.slane %v12057_v41, %v19228_v27  ;;  %v12086_v57 = vcombine.low %v12064_v23, %v12071_v29  ;;  %v11856_v1 = vcombine.high %v11840_v2, %v11840_v2  ;;  %v18240_v4 = vpop.f32.mrb[42].mxu1 }
 0x370   : > { %v12106_v9 = vcombine.low %v11840_v2, %v11854_v47  ;;  %v12113_v12 = vrot.slane %v12103_v30, %v19228_v27  ;;  %v12120_v48 = vrot.slane %v12104_v62, %v19228_v27  ;;  %v12127_v10 = vrot.slane %v17636_v50, %v19228_v27  ;;  %18403 = vmatprep.subr.bf16.mxu1 %v18718_v14  ;;  %v21183_v49 = vpop.f32.mrb[43].mxu1 }
 0x371   : > { %v12087_v16 = vcombine.low %v12078_v0, %v12085_v34  ;;  %v12094_v46 = vrot.slane %v12086_v57, %v19228_v27  ;;  %v12158_v54 = vrot.slane %v11856_v1, %v19228_v27  ;;  %v12308_v7 = vcombine.high %v12294_v61, %v12294_v61  ;;  %v21187_v29 = vpop.f32.mrb[44].mxu1 }
 0x372   : > { %v12134_v55 = vrot.slane %v12106_v9, %v19228_v27  ;;  %v12135_v45 = vcombine.low %v12113_v12, %v12120_v48  ;;  %v12315_v35 = vrot.slane %v12294_v61, %v19228_v27  ;;  %v12356_v42 = vcombine.high %v12295_v58, %v12295_v58  ;;  %v21191_v61 = vpop.f32.mrb[45].mxu1 }
 0x373   : > { %v12101_v11 = vrot.slane %v12087_v16, %v19228_v27  ;;  %18404 = vmatpush3.bf16.msra.mxu1 %v18718_v14  ;;  %v12165_v15 = vrot.slane %v12158_v54, %v19228_v27  ;;  %v12322_v51 = vrot.slane %v12308_v7, %v19228_v27  ;;  %v12363_v52 = vrot.slane %v12295_v58, %v19228_v27  ;;  %v21197_v58 = vld [vmem:[%s22368_s2 + $0x1c0] sm:$0xff]   ;;  %v18256_v9 = vpop.f32.mrb[46].mxu1 }
 0x374   : > { %v12136_v8 = vcombine.low %v12127_v10, %v12134_v55  ;;  %v12143_v56 = vrot.slane %v12135_v45, %v19228_v27  ;;  %18405 = vmatprep.subr.bf16.mxu1 %v18719_v13  ;;  %v12323_v60 = vcombine.high %v12315_v35, %v12315_v35  ;;  %v12331_v19 = vrot.slane %v12315_v35, %v19228_v27  ;;  %v21203_v16 = vpop.f32.mrb[47].mxu1 }
 0x375   : > { %v12102_v39 = vcombine.low %v12094_v46, %v12101_v11  ;;  %v12176_v22 = vpack.c.bf16 %v12165_v15, %v12165_v15  ;;  %v12324_v20 = vcombine.high %v12322_v51, %v12322_v51  ;;  %v12338_v31 = vrot.slane %v12322_v51, %v19228_v27  ;;  %v21207_v45 = vpop.f32.mrb[48].mxu1 }
 0x376   : > { %v12150_v5 = vrot.slane %v12136_v8, %v19228_v27  ;;  %v12345_v26 = vrot.slane %v12323_v60, %v19228_v27  ;;  %v12370_v53 = vrot.slane %v12356_v42, %v19228_v27  ;;  %v12371_v37 = vcombine.high %v12363_v52, %v12363_v52  ;;  %v21211_v51 = vpop.f32.mrb[49].mxu1 }
 0x377   : > { %18406 = vmatpush3.bf16.msra.mxu1 %v18719_v13  ;;  %v12352_v3 = vrot.slane %v12324_v20, %v19228_v27  ;;  %v12354_v59 = vcombine.high %v12338_v31, %v12338_v31  ;;  %v12379_v44 = vrot.slane %v12363_v52, %v19228_v27  ;;  %v12404_v2 = vcombine.high %v12296_v43, %v12296_v43 }
 0x378   : > { %v12151_v14 = vcombine.low %v12143_v56, %v12150_v5  ;;  %v12372_v24 = vcombine.high %v12370_v53, %v12370_v53  ;;  %v12386_v41 = vrot.slane %v12370_v53, %v19228_v27  ;;  %v12393_v23 = vrot.slane %v12371_v37, %v19228_v27  ;;  %18407 = vmatprep.subr.bf16.mxu1 %v18723_v6 }
 0x379   : > { %v12401_v47 = vcombine.high %v12379_v44, %v12379_v44  ;;  %v12411_v30 = vrot.slane %v12296_v43, %v19228_v27  ;;  %v12418_v62 = vrot.slane %v12404_v2, %v19228_v27  ;;  %v12644_v50 = vcombine.low %v12331_v19, %v12345_v26  ;;  %v12297_v43 = vld [vmem:[#allocation2 + $0xe0] sm:$0x7f] }
 0x37a   : > { %v12175_v0 = vpack.c.bf16 %v12151_v14, %v12102_v39  ;;  %v12400_v34 = vrot.slane %v12372_v24, %v19228_v27  ;;  %v12402_v57 = vcombine.high %v12386_v41, %v12386_v41  ;;  %v12403_v1 = vcombine.high %v12393_v23, %v12393_v23 }
 0x37b   : > { %v12419_v12 = vcombine.high %v12411_v30, %v12411_v30  ;;  %v12420_v48 = vcombine.high %v12418_v62, %v12418_v62  ;;  %v12427_v10 = vrot.slane %v12411_v30, %v19228_v27  ;;  %v21201_v13 = vrot.slane %v12418_v62, %v19228_v27  ;;  %18408 = vmatpush3.bf16.msra.mxu1 %v18723_v6 }
 0x37c   : > { %18397 = vmatprep.mubr.msk.bf16.mxu1 %vm606_vm2, %v12175_v0  ;;  %v17653_v46 = vcombine.high %v12331_v19, %v12345_v26  ;;  %v12646_v54 = vcombine.low %v12338_v31, %v12352_v3  ;;  %v12647_v7 = vcombine.low %v12354_v59, %v12379_v44  ;;  %v12654_v55 = vrot.slane %v12644_v50, %v19228_v27  ;;  %v18272_v19 = vpop.f32.mrb[50].mxu1  ;;  %v21221_v31 = vld [vmem:[#allocation2 + $0xe8] sm:$0x7f] }
 0x37d   : > { %18398 = vmatmul.mubr.msk.bf16.gmra.mrb[80].mxu1 %vm606_vm2, %v12176_v22  ;;  %v12441_v35 = vrot.slane %v12419_v12, %v19228_v27  ;;  %v12693_v42 = vcombine.low %v12393_v23, %v12401_v47  ;;  %v12694_v11 = vcombine.low %v12403_v1, %v12386_v41  ;;  %v12695_v15 = vcombine.low %v12400_v34, %v12402_v57  ;;  %v21223_v5 = vpop.f32.mrb[51].mxu1 }
 0x37e   : > { %v12661_v52 = vrot.slane %v17653_v46, %v19228_v27  ;;  %v12668_v8 = vrot.slane %v12646_v54, %v19228_v27  ;;  %v12675_v56 = vrot.slane %v12647_v7, %v19228_v27  ;;  %18417 = vmatprep.subr.bf16.mxu1 %v21197_v58  ;;  %v12448_v60 = vrot.slane %v12420_v48, %v19228_v27  ;;  %v21227_v3 = vpop.f32.mrb[52].mxu1 }
 0x37f   : > { %v12696_v6 = vcombine.low %v12427_v10, %v12441_v35  ;;  %v12703_v39 = vrot.slane %v12693_v42, %v19228_v27  ;;  %v12710_v22 = vrot.slane %v12694_v11, %v19228_v27  ;;  %v12717_v20 = vrot.slane %v12695_v15, %v19228_v27  ;;  %v21231_v24 = vpop.f32.mrb[53].mxu1 }
 0x380   : > { %v12676_v26 = vcombine.low %v12654_v55, %v12661_v52  ;;  %v12677_v53 = vcombine.low %v12668_v8, %v12675_v56  ;;  %v17654_v37 = vcombine.high %v12427_v10, %v12441_v35  ;;  %v12450_v4 = vcombine.high %v21201_v13, %v21201_v13  ;;  %v18288_v62 = vpop.f32.mrb[54].mxu1 }
 0x381   : > { %v12724_v59 = vrot.slane %v12696_v6, %v19228_v27  ;;  %v12725_v44 = vcombine.low %v12703_v39, %v12710_v22  ;;  %v12452_v2 = vcombine.high %v12297_v43, %v12297_v43  ;;  %v12459_v14 = vrot.slane %v12297_v43, %v19228_v27  ;;  %v21240_v1 = vpop.f32.mrb[55].mxu1  ;;  %v12300_v62 = vld [vmem:[#allocation2 + $0xf8] sm:$0x7f] }
 0x382   : > { %v12684_v41 = vrot.slane %v12676_v26, %v19228_v27  ;;  %v12691_v23 = vrot.slane %v12677_v53, %v19228_v27  ;;  %v12752_v47 = vrot.slane %v17654_v37, %v19228_v27  ;;  %v12507_v30 = vrot.slane %v21221_v31, %v19228_v27  ;;  %v21244_v46 = vpop.f32.mrb[56].mxu1 }
 0x383   : > { %v12726_v50 = vcombine.low %v12717_v20, %v12724_v59  ;;  %v12733_v0 = vrot.slane %v12725_v44, %v19228_v27  ;;  %v12466_v34 = vrot.slane %v12452_v2, %v19228_v27  ;;  %v12467_v57 = vcombine.high %v12459_v14, %v12459_v14  ;;  %v21249_v42 = vpop.f32.mrb[57].mxu1  ;;  %v12299_v59 = vld [vmem:[#allocation2 + $0xf0] sm:$0x7f] }
 0x384   : > { %v12692_v9 = vcombine.low %v12684_v41, %v12691_v23  ;;  %v12475_v12 = vrot.slane %v12459_v14, %v19228_v27  ;;  %v12515_v48 = vcombine.high %v12507_v30, %v12507_v30  ;;  %v12523_v10 = vrot.slane %v12507_v30, %v19228_v27  ;;  %v18304_v56 = vpop.f32.mrb[58].mxu1 }
 0x385   : > { %v12740_v54 = vrot.slane %v12726_v50, %v19228_v27  ;;  %v12468_v7 = vcombine.high %v12466_v34, %v12466_v34  ;;  %v12482_v55 = vrot.slane %v12466_v34, %v19228_v27  ;;  %v12489_v35 = vrot.slane %v12467_v57, %v19228_v27  ;;  %v21254_v22 = vpop.f32.mrb[59].mxu1 }
 0x386   : > { %v12497_v11 = vcombine.high %v12475_v12, %v12475_v12  ;;  %v12537_v15 = vrot.slane %v12515_v48, %v19228_v27  ;;  %v12743_v52 = vcombine.low %v21201_v13, %v12448_v60  ;;  %v12744_v8 = vcombine.low %v12450_v4, %v12475_v12 }
 0x387   : > { %v12741_v43 = vcombine.low %v12733_v0, %v12740_v54  ;;  %v12496_v19 = vrot.slane %v12468_v7, %v19228_v27  ;;  %v12498_v6 = vcombine.high %v12482_v55, %v12482_v55  ;;  %v12499_v39 = vcombine.high %v12489_v35, %v12489_v35  ;;  %v21258_v44 = vpop.f32.mrb[60].mxu1 }
 0x388   : > { %v12745_v20 = vcombine.low %v12489_v35, %v12497_v11  ;;  %v12759_v26 = vrot.slane %v12743_v52, %v19228_v27  ;;  %v12766_v53 = vrot.slane %v12744_v8, %v19228_v27  ;;  %v12793_v37 = vcombine.low %v12523_v10, %v12537_v15  ;;  %v21260_v14 = vpop.f32.mrb[61].mxu1 }
 0x389   : > { %v12959_v2 = vpack.c.bf16 %v12741_v43, %v12692_v9  ;;  %v12791_v13 = vcombine.low %v12499_v39, %v12482_v55  ;;  %v12792_v60 = vcombine.low %v12496_v19, %v12498_v6  ;;  %v17655_v4 = vcombine.high %v12523_v10, %v12537_v15  ;;  %v18320_v0 = vpop.f32.mrb[62].mxu1 }
 0x38a   : > { %v12773_v41 = vrot.slane %v12745_v20, %v19228_v27  ;;  %v12774_v23 = vcombine.low %v12752_v47, %v12759_v26  ;;  %v12815_v30 = vrot.slane %v12793_v37, %v19228_v27  ;;  %v12500_v50 = vcombine.high %v21221_v31, %v21221_v31  ;;  %v21270_v48 = vpop.f32.mrb[63].mxu1 }
 0x38b   : > { %18409 = vmatprep.mubr.msk.bf16.mxu1 %vm606_vm2, %v12959_v2  ;;  %v12801_v34 = vrot.slane %v12791_v13, %v19228_v27  ;;  %v12808_v57 = vrot.slane %v12792_v60, %v19228_v27  ;;  %v12822_v9 = vrot.slane %v17655_v4, %v19228_v27  ;;  %v12548_v12 = vcombine.high %v12299_v59, %v12299_v59 }
 0x38c   : > { %v12775_v10 = vcombine.low %v12766_v53, %v12773_v41  ;;  %v12782_v47 = vrot.slane %v12774_v23, %v19228_v27  ;;  %v12514_v54 = vrot.slane %v12500_v50, %v19228_v27  ;;  %v12555_v7 = vrot.slane %v12299_v59, %v19228_v27 }
 0x38d   : > { %v12823_v31 = vcombine.low %v12801_v34, %v12808_v57  ;;  %v12824_v55 = vcombine.low %v12815_v30, %v12822_v9  ;;  %v12562_v35 = vrot.slane %v12548_v12, %v19228_v27  ;;  %v12596_v11 = vcombine.high %v12300_v62, %v12300_v62  ;;  %v18729_v9 = vld [vmem:[%s22368_s2 + $0x1c8] sm:$0xff]  }
 0x38e   : > { %v12789_v15 = vrot.slane %v12775_v10, %v19228_v27  ;;  %v12516_v52 = vcombine.high %v12514_v54, %v12514_v54  ;;  %v12530_v8 = vrot.slane %v12514_v54, %v19228_v27  ;;  %v12563_v56 = vcombine.high %v12555_v7, %v12555_v7 }
 0x38f   : > { %v12831_v43 = vrot.slane %v12823_v31, %v19228_v27  ;;  %v12838_v19 = vrot.slane %v12824_v55, %v19228_v27  ;;  %v12564_v6 = vcombine.high %v12562_v35, %v12562_v35  ;;  %v12571_v39 = vrot.slane %v12555_v7, %v19228_v27  ;;  %v13079_v7 = vld [vmem:[#allocation2 + $0x89] sm:$0x7f] }
 0x390   : > { %v12790_v20 = vcombine.low %v12782_v47, %v12789_v15  ;;  %v12544_v26 = vrot.slane %v12516_v52, %v19228_v27  ;;  %v12546_v53 = vcombine.high %v12530_v8, %v12530_v8  ;;  %v12578_v37 = vrot.slane %v12562_v35, %v19228_v27 }
 0x391   : > { %v12839_v59 = vcombine.low %v12831_v43, %v12838_v19  ;;  %v12585_v2 = vrot.slane %v12563_v56, %v19228_v27  ;;  %v12592_v13 = vrot.slane %v12564_v6, %v19228_v27  ;;  %v12593_v60 = vcombine.high %v12571_v39, %v12571_v39  ;;  %v18730_v19 = vld [vmem:[%s22368_s2 + $0x1d0] sm:$0xff]  }
 0x392   : > { %v12594_v4 = vcombine.high %v12578_v37, %v12578_v37  ;;  %v12603_v41 = vrot.slane %v12300_v62, %v19228_v27  ;;  %v12610_v23 = vrot.slane %v12596_v11, %v19228_v27  ;;  %v12840_v30 = vcombine.low %v12530_v8, %v12544_v26 }
 0x393   : > { %v12960_v50 = vpack.c.bf16 %v12839_v59, %v12790_v20  ;;  %v12595_v0 = vcombine.high %v12585_v2, %v12585_v2  ;;  %v12841_v34 = vcombine.low %v12546_v53, %v12571_v39  ;;  %v12842_v57 = vcombine.low %v12585_v2, %v12593_v60 }
 0x394   : > { %v12611_v12 = vcombine.high %v12603_v41, %v12603_v41  ;;  %v12612_v10 = vcombine.high %v12610_v23, %v12610_v23  ;;  %v12619_v47 = vrot.slane %v12603_v41, %v19228_v27  ;;  %v12626_v54 = vrot.slane %v12610_v23, %v19228_v27  ;;  %v13080_v23 = vld [vmem:[#allocation2 + $0x91] sm:$0x7f] }
 0x395   : > { %18410 = vmatmul.mubr.msk.bf16.vlgmr.msra.gmra.mrb[28].mxu1 %vm606_vm2, %v12960_v50  ;;  %v12843_v62 = vcombine.low %v12595_v0, %v12578_v37  ;;  %v12850_v31 = vrot.slane %v12840_v30, %v19228_v27  ;;  %v12857_v55 = vrot.slane %v12841_v34, %v19228_v27  ;;  %v12864_v35 = vrot.slane %v12842_v57, %v19228_v27 }
 0x396   : > { %18418 = vmatpush3.bf16.msra.mxu1 %v21197_v58  ;;  %v12633_v11 = vrot.slane %v12611_v12, %v19228_v27  ;;  %v12640_v15 = vrot.slane %v12612_v10, %v19228_v27  ;;  %v12889_v52 = vcombine.low %v12592_v13, %v12594_v4  ;;  %v12642_v8 = vcombine.high %v12626_v54, %v12626_v54  ;;  %v18734_v12 = vld [vmem:[%s22368_s2 + $0x1d8] sm:$0xff]  }
 0x397   : > { %v12871_v56 = vrot.slane %v12843_v62, %v19228_v27  ;;  %v12872_v43 = vcombine.low %v12850_v31, %v12857_v55  ;;  %18419 = vmatprep.subr.bf16.mxu1 %v18729_v9  ;;  %v13093_v6 = vcombine.high %v13079_v7, %v13079_v7  ;;  %v13100_v39 = vrot.slane %v13079_v7, %v19228_v27 }
 0x398   : > { %v12890_v20 = vcombine.low %v12619_v47, %v12633_v11  ;;  %v17656_v26 = vcombine.high %v12619_v47, %v12633_v11  ;;  %v12892_v58 = vcombine.low %v12626_v54, %v12640_v15  ;;  %v12899_v53 = vrot.slane %v12889_v52, %v19228_v27  ;;  %v13081_v54 = vld [vmem:[#allocation2 + $0x99] sm:$0x7f] }
 0x399   : > { %v12873_v37 = vcombine.low %v12864_v35, %v12871_v56  ;;  %v12880_v59 = vrot.slane %v12872_v43, %v19228_v27  ;;  %v12944_v2 = vrot.slane %v12642_v8, %v19228_v27  ;;  %v13107_v13 = vrot.slane %v13093_v6, %v19228_v27 }
 0x39a   : > { %v12906_v60 = vrot.slane %v12890_v20, %v19228_v27  ;;  %v12913_v4 = vrot.slane %v17656_v26, %v19228_v27  ;;  %v12920_v41 = vrot.slane %v12892_v58, %v19228_v27  ;;  %18420 = vmatpush3.bf16.msra.mxu1 %v18729_v9  ;;  %v13108_v30 = vcombine.high %v13100_v39, %v13100_v39  ;;  %v21328_v20 = vld [vmem:[%s22368_s2 + $0x1e0] sm:$0xff]  }
 0x39b   : > { %v12887_v50 = vrot.slane %v12873_v37, %v19228_v27  ;;  %18421 = vmatprep.subr.bf16.mxu1 %v18730_v19  ;;  %v12951_v0 = vrot.slane %v12944_v2, %v19228_v27  ;;  %v13109_v34 = vcombine.high %v13107_v13, %v13107_v13  ;;  %v13116_v57 = vrot.slane %v13100_v39, %v19228_v27 }
 0x39c   : > { %v12921_v10 = vcombine.low %v12899_v53, %v12906_v60  ;;  %v12922_v47 = vcombine.low %v12913_v4, %v12920_v41  ;;  %v13123_v7 = vrot.slane %v13107_v13, %v19228_v27  ;;  %v13130_v9 = vrot.slane %v13108_v30, %v19228_v27 }
 0x39d   : > { %v12888_v62 = vcombine.low %v12880_v59, %v12887_v50  ;;  %v12962_v31 = vpack.c.bf16 %v12951_v0, %v12951_v0  ;;  %v13137_v55 = vrot.slane %v13109_v34, %v19228_v27  ;;  %v13141_v35 = vcombine.high %v13080_v23, %v13080_v23 }
 0x39e   : > { %v12929_v11 = vrot.slane %v12921_v10, %v19228_v27  ;;  %v12936_v15 = vrot.slane %v12922_v47, %v19228_v27  ;;  %18422 = vmatpush3.bf16.msra.mxu1 %v18730_v19  ;;  %v13139_v52 = vcombine.high %v13123_v7, %v13123_v7  ;;  %v13148_v8 = vrot.slane %v13080_v23, %v19228_v27 }
 0x39f   : > { %v13155_v56 = vrot.slane %v13141_v35, %v19228_v27  ;;  %v13189_v43 = vcombine.high %v13081_v54, %v13081_v54  ;;  %v13196_v6 = vrot.slane %v13081_v54, %v19228_v27  ;;  %v13429_v39 = vcombine.low %v13116_v57, %v13130_v9  ;;  %18423 = vmatprep.subr.bf16.mxu1 %v18734_v12 }
 0x3a0   : > { %v12937_v26 = vcombine.low %v12929_v11, %v12936_v15  ;;  %v13156_v58 = vcombine.high %v13148_v8, %v13148_v8  ;;  %v13164_v53 = vrot.slane %v13148_v8, %v19228_v27  ;;  %v17673_v19 = vcombine.high %v13116_v57, %v13130_v9 }
 0x3a1   : > { %v13157_v37 = vcombine.high %v13155_v56, %v13155_v56  ;;  %v13171_v59 = vrot.slane %v13155_v56, %v19228_v27  ;;  %v13203_v2 = vrot.slane %v13189_v43, %v19228_v27  ;;  %v13204_v13 = vcombine.high %v13196_v6, %v13196_v6  ;;  %v13082_v43 = vld [vmem:[#allocation2 + $0xa1] sm:$0x7f] }
 0x3a2   : > { %v12961_v60 = vpack.c.bf16 %v12937_v26, %v12888_v62  ;;  %v13178_v4 = vrot.slane %v13156_v58, %v19228_v27  ;;  %v13186_v41 = vcombine.high %v13164_v53, %v13164_v53  ;;  %v13212_v23 = vrot.slane %v13196_v6, %v19228_v27  ;;  %18424 = vmatpush3.bf16.msra.mxu1 %v18734_v12  ;;  %v13083_v58 = vld [vmem:[#allocation2 + $0xa9] sm:$0x7f] }
 0x3a3   : > { %v13185_v30 = vrot.slane %v13157_v37, %v19228_v27  ;;  %v13187_v50 = vcombine.high %v13171_v59, %v13171_v59  ;;  %v13205_v0 = vcombine.high %v13203_v2, %v13203_v2  ;;  %v13219_v34 = vrot.slane %v13203_v2, %v19228_v27  ;;  %18433 = vmatprep.subr.bf16.mxu1 %v21328_v20 }
 0x3a4   : > { %18413 = vmatprep.mubr.msk.bf16.mxu1 %vm606_vm2, %v12961_v60  ;;  %v13188_v57 = vcombine.high %v13178_v4, %v13178_v4  ;;  %v13226_v10 = vrot.slane %v13204_v13, %v19228_v27  ;;  %v13431_v47 = vcombine.low %v13123_v7, %v13137_v55  ;;  %v13432_v54 = vcombine.low %v13139_v52, %v13164_v53 }
 0x3a5   : > { %18414 = vmatmul.mubr.msk.bf16.gmra.mrb[84].mxu1 %vm606_vm2, %v12962_v31  ;;  %v13439_v9 = vrot.slane %v13429_v39, %v19228_v27  ;;  %v13446_v12 = vrot.slane %v17673_v19, %v19228_v27  ;;  %v13478_v62 = vcombine.low %v13178_v4, %v13186_v41  ;;  %v13480_v35 = vcombine.low %v13185_v30, %v13187_v50 }
 0x3a6   : > { %v13453_v11 = vrot.slane %v13431_v47, %v19228_v27  ;;  %v13460_v15 = vrot.slane %v13432_v54, %v19228_v27  ;;  %v13479_v8 = vcombine.low %v13188_v57, %v13171_v59  ;;  %v13481_v56 = vcombine.low %v13212_v23, %v13226_v10 }
 0x3a7   : > { %v13461_v6 = vcombine.low %v13439_v9, %v13446_v12  ;;  %v13488_v26 = vrot.slane %v13478_v62, %v19228_v27  ;;  %v13502_v7 = vrot.slane %v13480_v35, %v19228_v27  ;;  %v17674_v55 = vcombine.high %v13212_v23, %v13226_v10 }
 0x3a8   : > { %v13462_v31 = vcombine.low %v13453_v11, %v13460_v15  ;;  %v13495_v52 = vrot.slane %v13479_v8, %v19228_v27  ;;  %v13509_v39 = vrot.slane %v13481_v56, %v19228_v27  ;;  %v13233_v53 = vrot.slane %v13205_v0, %v19228_v27 }
 0x3a9   : > { %v13469_v19 = vrot.slane %v13461_v6, %v19228_v27  ;;  %v13537_v37 = vrot.slane %v17674_v55, %v19228_v27  ;;  %v13235_v59 = vcombine.high %v13219_v34, %v13219_v34  ;;  %v13237_v2 = vcombine.high %v13082_v43, %v13082_v43 }
 0x3aa   : > { %v13476_v13 = vrot.slane %v13462_v31, %v19228_v27  ;;  %v13510_v60 = vcombine.low %v13488_v26, %v13495_v52  ;;  %v13511_v4 = vcombine.low %v13502_v7, %v13509_v39  ;;  %v13244_v41 = vrot.slane %v13082_v43, %v19228_v27 }
 0x3ab   : > { %v13251_v23 = vrot.slane %v13237_v2, %v19228_v27  ;;  %v13292_v30 = vrot.slane %v13083_v58, %v19228_v27  ;;  %v13528_v50 = vcombine.low %v13219_v34, %v13233_v53  ;;  %v13285_v57 = vcombine.high %v13083_v58, %v13083_v58 }
 0x3ac   : > { %v13477_v10 = vcombine.low %v13469_v19, %v13476_v13  ;;  %v13518_v0 = vrot.slane %v13510_v60, %v19228_v27  ;;  %v13525_v47 = vrot.slane %v13511_v4, %v19228_v27  ;;  %v13252_v54 = vcombine.high %v13244_v41, %v13244_v41  ;;  %v13084_v13 = vld [vmem:[#allocation2 + $0xb1] sm:$0x7f] }
 0x3ad   : > { %v13253_v9 = vcombine.high %v13251_v23, %v13251_v23  ;;  %v13260_v12 = vrot.slane %v13244_v41, %v19228_v27  ;;  %v13267_v62 = vrot.slane %v13251_v23, %v19228_v27  ;;  %v13300_v35 = vcombine.high %v13292_v30, %v13292_v30 }
 0x3ae   : > { %v13526_v11 = vcombine.low %v13518_v0, %v13525_v47  ;;  %v13274_v15 = vrot.slane %v13252_v54, %v19228_v27  ;;  %v13308_v8 = vrot.slane %v13292_v30, %v19228_v27  ;;  %v13544_v34 = vrot.slane %v13528_v50, %v19228_v27  ;;  %v13085_v30 = vld [vmem:[#allocation2 + $0xb9] sm:$0x7f] }
 0x3af   : > { %v13281_v56 = vrot.slane %v13253_v9, %v19228_v27  ;;  %v13282_v43 = vcombine.high %v13260_v12, %v13260_v12  ;;  %v13283_v6 = vcombine.high %v13267_v62, %v13267_v62  ;;  %v13322_v26 = vrot.slane %v13300_v35, %v19228_v27 }
 0x3b0   : > { %v13744_v7 = vpack.c.bf16 %v13526_v11, %v13477_v10  ;;  %v13284_v55 = vcombine.high %v13274_v15, %v13274_v15  ;;  %v13529_v31 = vcombine.low %v13235_v59, %v13260_v12  ;;  %v13559_v52 = vcombine.low %v13537_v37, %v13544_v34  ;;  %v21365_v39 = vpop.f32.mrb[64].mxu1 }
 0x3b1   : > { %v13530_v58 = vcombine.low %v13274_v15, %v13282_v43  ;;  %v13577_v53 = vcombine.low %v13281_v56, %v13283_v6  ;;  %v13578_v19 = vcombine.low %v13308_v8, %v13322_v26  ;;  %v17675_v2 = vcombine.high %v13308_v8, %v13322_v26  ;;  %v21367_v60 = vpop.f32.mrb[65].mxu1 }
 0x3b2   : > { %18425 = vmatprep.mubr.msk.bf16.mxu1 %vm606_vm2, %v13744_v7  ;;  %v13551_v4 = vrot.slane %v13529_v31, %v19228_v27  ;;  %v13567_v41 = vrot.slane %v13559_v52, %v19228_v27  ;;  %v13576_v23 = vcombine.low %v13284_v55, %v13267_v62  ;;  %v13299_v59 = vrot.slane %v13285_v57, %v19228_v27  ;;  %v18336_v37 = vpop.f32.mrb[66].mxu1 }
 0x3b3   : > { %v13558_v50 = vrot.slane %v13530_v58, %v19228_v27  ;;  %v13593_v10 = vrot.slane %v13577_v53, %v19228_v27  ;;  %v13600_v0 = vrot.slane %v13578_v19, %v19228_v27  ;;  %v13607_v47 = vrot.slane %v17675_v2, %v19228_v27  ;;  %v21377_v54 = vpop.f32.mrb[67].mxu1 }
 0x3b4   : > { %v13586_v9 = vrot.slane %v13576_v23, %v19228_v27  ;;  %v13301_v12 = vcombine.high %v13299_v59, %v13299_v59  ;;  %v13315_v35 = vrot.slane %v13299_v59, %v19228_v27  ;;  %v13333_v62 = vcombine.high %v13084_v13, %v13084_v13 }
 0x3b5   : > { %v13560_v11 = vcombine.low %v13551_v4, %v13558_v50  ;;  %v13609_v15 = vcombine.low %v13600_v0, %v13607_v47  ;;  %v13340_v57 = vrot.slane %v13084_v13, %v19228_v27  ;;  %v13381_v8 = vcombine.high %v13085_v30, %v13085_v30 }
 0x3b6   : > { %v13608_v34 = vcombine.low %v13586_v9, %v13593_v10  ;;  %v13329_v56 = vrot.slane %v13301_v12, %v19228_v27  ;;  %v13331_v43 = vcombine.high %v13315_v35, %v13315_v35  ;;  %v13347_v6 = vrot.slane %v13333_v62, %v19228_v27 }
 0x3b7   : > { %v13574_v26 = vrot.slane %v13560_v11, %v19228_v27  ;;  %v13623_v7 = vrot.slane %v13609_v15, %v19228_v27  ;;  %v13348_v55 = vcombine.high %v13340_v57, %v13340_v57  ;;  %v13356_v31 = vrot.slane %v13340_v57, %v19228_v27  ;;  %v18740_v15 = vld [vmem:[%s22368_s2 + $0x1e8] sm:$0xff]  }
 0x3b8   : > { %v13616_v52 = vrot.slane %v13608_v34, %v19228_v27  ;;  %v13349_v58 = vcombine.high %v13347_v6, %v13347_v6  ;;  %v13363_v53 = vrot.slane %v13347_v6, %v19228_v27  ;;  %v13388_v19 = vrot.slane %v13085_v30, %v19228_v27 }
 0x3b9   : > { %v13575_v2 = vcombine.low %v13567_v41, %v13574_v26  ;;  %v13370_v13 = vrot.slane %v13348_v55, %v19228_v27  ;;  %v13378_v4 = vcombine.high %v13356_v31, %v13356_v31  ;;  %v13395_v23 = vrot.slane %v13381_v8, %v19228_v27 }
 0x3ba   : > { %v13624_v59 = vcombine.low %v13616_v52, %v13623_v7  ;;  %v13377_v37 = vrot.slane %v13349_v58, %v19228_v27  ;;  %v13379_v50 = vcombine.high %v13363_v53, %v13363_v53  ;;  %v13396_v10 = vcombine.high %v13388_v19, %v13388_v19  ;;  %v13864_v58 = vld [vmem:[#allocation2 + $0xc9] sm:$0x7f] }
 0x3bb   : > { %v13380_v0 = vcombine.high %v13370_v13, %v13370_v13  ;;  %v13397_v47 = vcombine.high %v13395_v23, %v13395_v23  ;;  %v13404_v9 = vrot.slane %v13388_v19, %v19228_v27  ;;  %v13411_v12 = vrot.slane %v13395_v23, %v19228_v27 }
 0x3bc   : > { %v13745_v62 = vpack.c.bf16 %v13624_v59, %v13575_v2  ;;  %v13418_v30 = vrot.slane %v13396_v10, %v19228_v27  ;;  %v13625_v41 = vcombine.low %v13315_v35, %v13329_v56  ;;  %v13626_v11 = vcombine.low %v13331_v43, %v13356_v31 }
 0x3bd   : > { %v13425_v57 = vrot.slane %v13397_v47, %v19228_v27  ;;  %v13627_v8 = vcombine.low %v13370_v13, %v13378_v4  ;;  %v13628_v34 = vcombine.low %v13380_v0, %v13363_v53  ;;  %v13674_v6 = vcombine.low %v13377_v37, %v13379_v50  ;;  %v13865_v53 = vld [vmem:[#allocation2 + $0xd1] sm:$0x7f] }
 0x3be   : > { %18426 = vmatmul.mubr.msk.bf16.vlgmr.msra.gmra.mrb[28].mxu1 %vm606_vm2, %v13745_v62  ;;  %v13635_v26 = vrot.slane %v13625_v41, %v19228_v27  ;;  %v13642_v7 = vrot.slane %v13626_v11, %v19228_v27  ;;  %v13675_v55 = vcombine.low %v13404_v9, %v13418_v30  ;;  %v17676_v52 = vcombine.high %v13404_v9, %v13418_v30  ;;  %v18741_v4 = vld [vmem:[%s22368_s2 + $0x1f0] sm:$0xff]  }
 0x3bf   : > { %18434 = vmatpush3.bf16.msra.mxu1 %v21328_v20  ;;  %v13649_v35 = vrot.slane %v13627_v8, %v19228_v27  ;;  %v13656_v56 = vrot.slane %v13628_v34, %v19228_v27  ;;  %v13677_v43 = vcombine.low %v13411_v12, %v13425_v57  ;;  %v13684_v31 = vrot.slane %v13674_v6, %v19228_v27  ;;  %v18745_v6 = vld [vmem:[%s22368_s2 + $0x1f8] sm:$0xff]  }
 0x3c0   : > { %v13657_v19 = vcombine.low %v13635_v26, %v13642_v7  ;;  %v13691_v2 = vrot.slane %v13675_v55, %v19228_v27  ;;  %v13698_v13 = vrot.slane %v17676_v52, %v19228_v27  ;;  %18435 = vmatprep.subr.bf16.mxu1 %v18740_v15  ;;  %v13427_v23 = vcombine.high %v13411_v12, %v13411_v12 }
 0x3c1   : > { %v13658_v20 = vcombine.low %v13649_v35, %v13656_v56  ;;  %v13705_v59 = vrot.slane %v13677_v43, %v19228_v27  ;;  %v13878_v37 = vcombine.high %v13864_v58, %v13864_v58  ;;  %v13885_v50 = vrot.slane %v13864_v58, %v19228_v27 }
 0x3c2   : > { %v13665_v10 = vrot.slane %v13657_v19, %v19228_v27  ;;  %v13706_v0 = vcombine.low %v13684_v31, %v13691_v2  ;;  %v13729_v47 = vrot.slane %v13427_v23, %v19228_v27  ;;  %v13926_v9 = vcombine.high %v13865_v53, %v13865_v53 }
 0x3c3   : > { %v13672_v62 = vrot.slane %v13658_v20, %v19228_v27  ;;  %v13707_v30 = vcombine.low %v13698_v13, %v13705_v59  ;;  %18436 = vmatpush3.bf16.msra.mxu1 %v18740_v15  ;;  %v13892_v41 = vrot.slane %v13878_v37, %v19228_v27  ;;  %v13893_v11 = vcombine.high %v13885_v50, %v13885_v50  ;;  %v13866_v15 = vld [vmem:[#allocation2 + $0xd9] sm:$0x7f] }
 0x3c4   : > { %v13714_v12 = vrot.slane %v13706_v0, %v19228_v27  ;;  %18437 = vmatprep.subr.bf16.mxu1 %v18741_v4  ;;  %v13736_v57 = vrot.slane %v13729_v47, %v19228_v27  ;;  %v13901_v8 = vrot.slane %v13885_v50, %v19228_v27  ;;  %v13933_v34 = vrot.slane %v13865_v53, %v19228_v27 }
 0x3c5   : > { %v13673_v26 = vcombine.low %v13665_v10, %v13672_v62  ;;  %v13721_v7 = vrot.slane %v13707_v30, %v19228_v27  ;;  %v13894_v55 = vcombine.high %v13892_v41, %v13892_v41  ;;  %v13908_v52 = vrot.slane %v13892_v41, %v19228_v27 }
 0x3c6   : > { %v13747_v58 = vpack.c.bf16 %v13736_v57, %v13736_v57  ;;  %v13915_v35 = vrot.slane %v13893_v11, %v19228_v27  ;;  %v13940_v56 = vrot.slane %v13926_v9, %v19228_v27  ;;  %v13941_v43 = vcombine.high %v13933_v34, %v13933_v34 }
 0x3c7   : > { %v13722_v31 = vcombine.low %v13714_v12, %v13721_v7  ;;  %18438 = vmatpush3.bf16.msra.mxu1 %v18741_v4  ;;  %v13922_v53 = vrot.slane %v13894_v55, %v19228_v27  ;;  %v13924_v19 = vcombine.high %v13908_v52, %v13908_v52  ;;  %v13949_v2 = vrot.slane %v13933_v34, %v19228_v27 }
 0x3c8   : > { %v13942_v13 = vcombine.high %v13940_v56, %v13940_v56  ;;  %v13956_v23 = vrot.slane %v13940_v56, %v19228_v27  ;;  %v13963_v20 = vrot.slane %v13941_v43, %v19228_v27  ;;  %v13974_v59 = vcombine.high %v13866_v15, %v13866_v15  ;;  %18439 = vmatprep.subr.bf16.mxu1 %v18745_v6 }
 0x3c9   : > { %v13746_v37 = vpack.c.bf16 %v13722_v31, %v13673_v26  ;;  %v13971_v50 = vcombine.high %v13949_v2, %v13949_v2  ;;  %v13981_v10 = vrot.slane %v13866_v15, %v19228_v27  ;;  %v14214_v0 = vcombine.low %v13901_v8, %v13915_v35 }
 0x3ca   : > { %v13970_v47 = vrot.slane %v13942_v13, %v19228_v27  ;;  %v13972_v4 = vcombine.high %v13956_v23, %v13956_v23  ;;  %v13973_v9 = vcombine.high %v13963_v20, %v13963_v20  ;;  %v13988_v62 = vrot.slane %v13974_v59, %v19228_v27 }
 0x3cb   : > { %18429 = vmatprep.mubr.msk.bf16.mxu1 %vm606_vm2, %v13746_v37  ;;  %v13989_v30 = vcombine.high %v13981_v10, %v13981_v10  ;;  %v13997_v41 = vrot.slane %v13981_v10, %v19228_v27  ;;  %v17693_v11 = vcombine.high %v13901_v8, %v13915_v35  ;;  %v14216_v12 = vcombine.low %v13908_v52, %v13922_v53 }
 0x3cc   : > { %18430 = vmatmul.mubr.msk.bf16.gmra.mrb[88].mxu1 %vm606_vm2, %v13747_v58  ;;  %v13990_v57 = vcombine.high %v13988_v62, %v13988_v62  ;;  %v14004_v34 = vrot.slane %v13988_v62, %v19228_v27  ;;  %v14217_v26 = vcombine.low %v13924_v19, %v13949_v2  ;;  %v14224_v7 = vrot.slane %v14214_v0, %v19228_v27 }
 0x3cd   : > { %v14011_v15 = vrot.slane %v13989_v30, %v19228_v27  ;;  %v14231_v55 = vrot.slane %v17693_v11, %v19228_v27  ;;  %v14238_v56 = vrot.slane %v14216_v12, %v19228_v27  ;;  %v14263_v43 = vcombine.low %v13963_v20, %v13971_v50  ;;  %18440 = vmatpush3.bf16.msra.mxu1 %v18745_v6  ;;  %v13868_v20 = vld [vmem:[#allocation2 + $0xe9] sm:$0x7f] }
 0x3ce   : > { %v14245_v31 = vrot.slane %v14217_v26, %v19228_v27  ;;  %v14264_v8 = vcombine.low %v13973_v9, %v13956_v23  ;;  %v14265_v52 = vcombine.low %v13970_v47, %v13972_v4  ;;  %v21447_v58 = vadd.f32 %v21105_v63, %v20997_v25  ;;  %v13867_v23 = vld [vmem:[#allocation2 + $0xe1] sm:$0x7f] }
 0x3cf   : > { %v14246_v35 = vcombine.low %v14224_v7, %v14231_v55  ;;  %v14266_v53 = vcombine.low %v13997_v41, %v14011_v15  ;;  %v14273_v19 = vrot.slane %v14263_v43, %v19228_v27  ;;  %v17694_v2 = vcombine.high %v13997_v41, %v14011_v15 }
 0x3d0   : > { %v14247_v13 = vcombine.low %v14238_v56, %v14245_v31  ;;  %v14280_v59 = vrot.slane %v14264_v8, %v19228_v27  ;;  %v14287_v37 = vrot.slane %v14265_v52, %v19228_v27  ;;  %v21454_v6 = vadd.f32 %v21109_v21, %v21000_v38 }
 0x3d1   : > { %v14254_v50 = vrot.slane %v14246_v35, %v19228_v27  ;;  %v14294_v25 = vrot.slane %v14266_v53, %v19228_v27  ;;  %v14322_v63 = vrot.slane %v17694_v2, %v19228_v27  ;;  %v21461_v10 = vadd.f32 %v21114_v40, %v21006_v28 }
 0x3d2   : > { %v14261_v0 = vrot.slane %v14247_v13, %v19228_v27  ;;  %v14295_v47 = vcombine.low %v14273_v19, %v14280_v59  ;;  %v14018_v4 = vrot.slane %v13990_v57, %v19228_v27  ;;  %v14020_v9 = vcombine.high %v14004_v34, %v14004_v34 }
 0x3d3   : > { %v14296_v38 = vcombine.low %v14287_v37, %v14294_v25  ;;  %v14022_v21 = vcombine.high %v13867_v23, %v13867_v23  ;;  %v14029_v62 = vrot.slane %v13867_v23, %v19228_v27  ;;  %v14077_v30 = vrot.slane %v13868_v20, %v19228_v27 }
 0x3d4   : > { %v14262_v41 = vcombine.low %v14254_v50, %v14261_v0  ;;  %v14303_v11 = vrot.slane %v14295_v47, %v19228_v27  ;;  %v14313_v12 = vcombine.low %v14004_v34, %v14018_v4  ;;  %v14070_v26 = vcombine.high %v13868_v20, %v13868_v20  ;;  %v13869_v50 = vld [vmem:[#allocation2 + $0xf1] sm:$0x7f] }
 0x3d5   : > { %v14310_v28 = vrot.slane %v14296_v38, %v19228_v27  ;;  %v14036_v40 = vrot.slane %v14022_v21, %v19228_v27  ;;  %v14037_v7 = vcombine.high %v14029_v62, %v14029_v62  ;;  %v14045_v15 = vrot.slane %v14029_v62, %v19228_v27 }
 0x3d6   : > { %v14085_v57 = vcombine.high %v14077_v30, %v14077_v30  ;;  %v14093_v55 = vrot.slane %v14077_v30, %v19228_v27  ;;  %v14329_v56 = vrot.slane %v14313_v12, %v19228_v27  ;;  %v14084_v43 = vrot.slane %v14070_v26, %v19228_v27  ;;  %v13870_v26 = vld [vmem:[#allocation2 + $0xf9] sm:$0x7f] }
 0x3d7   : > { %v14311_v31 = vcombine.low %v14303_v11, %v14310_v28  ;;  %v14038_v8 = vcombine.high %v14036_v40, %v14036_v40  ;;  %v14052_v52 = vrot.slane %v14036_v40, %v19228_v27  ;;  %v14059_v34 = vrot.slane %v14037_v7, %v19228_v27 }
 0x3d8   : > { %v14067_v35 = vcombine.high %v14045_v15, %v14045_v15  ;;  %v14107_v53 = vrot.slane %v14085_v57, %v19228_v27  ;;  %v14314_v19 = vcombine.low %v14020_v9, %v14045_v15  ;;  %v14344_v2 = vcombine.low %v14322_v63, %v14329_v56  ;;  %v21477_v13 = vpop.f32.mrb[68].mxu1 }
 0x3d9   : > { %v14529_v59 = vpack.c.bf16 %v14311_v31, %v14262_v41  ;;  %v14066_v37 = vrot.slane %v14038_v8, %v19228_v27  ;;  %v14068_v23 = vcombine.high %v14052_v52, %v14052_v52  ;;  %v14069_v20 = vcombine.high %v14059_v34, %v14059_v34  ;;  %v21480_v25 = vpop.f32.mrb[69].mxu1 }
 0x3da   : > { %v14315_v0 = vcombine.low %v14059_v34, %v14067_v35  ;;  %v14336_v47 = vrot.slane %v14314_v19, %v19228_v27  ;;  %v14352_v4 = vrot.slane %v14344_v2, %v19228_v27  ;;  %v14363_v38 = vcombine.low %v14093_v55, %v14107_v53  ;;  %v18352_v21 = vpop.f32.mrb[70].mxu1 }
 0x3db   : > { %18441 = vmatprep.mubr.msk.bf16.mxu1 %vm606_vm2, %v14529_v59  ;;  %v14361_v63 = vcombine.low %v14069_v20, %v14052_v52  ;;  %v14362_v9 = vcombine.low %v14066_v37, %v14068_v23  ;;  %v17695_v62 = vcombine.high %v14093_v55, %v14107_v53  ;;  %v14086_v30 = vcombine.high %v14084_v43, %v14084_v43  ;;  %v21485_v41 = vpop.f32.mrb[71].mxu1 }
 0x3dc   : > { %v14343_v11 = vrot.slane %v14315_v0, %v19228_v27  ;;  %v14385_v12 = vrot.slane %v14363_v38, %v19228_v27  ;;  %v14100_v28 = vrot.slane %v14084_v43, %v19228_v27  ;;  %v14118_v40 = vcombine.high %v13869_v50, %v13869_v50 }
 0x3dd   : > { %v14371_v7 = vrot.slane %v14361_v63, %v19228_v27  ;;  %v14378_v15 = vrot.slane %v14362_v9, %v19228_v27  ;;  %v14392_v57 = vrot.slane %v17695_v62, %v19228_v27  ;;  %v14114_v56 = vrot.slane %v14086_v30, %v19228_v27 }
 0x3de   : > { %v14345_v55 = vcombine.low %v14336_v47, %v14343_v11  ;;  %v14116_v31 = vcombine.high %v14100_v28, %v14100_v28  ;;  %v14125_v8 = vrot.slane %v13869_v50, %v19228_v27  ;;  %v14132_v52 = vrot.slane %v14118_v40, %v19228_v27 }
 0x3df   : > { %v14393_v34 = vcombine.low %v14371_v7, %v14378_v15  ;;  %v14394_v35 = vcombine.low %v14385_v12, %v14392_v57  ;;  %v14166_v53 = vcombine.high %v13870_v26, %v13870_v26  ;;  %v14173_v43 = vrot.slane %v13870_v26, %v19228_v27 }
 0x3e0   : > { %v14359_v19 = vrot.slane %v14345_v55, %v19228_v27  ;;  %v14133_v2 = vcombine.high %v14125_v8, %v14125_v8  ;;  %v14134_v59 = vcombine.high %v14132_v52, %v14132_v52  ;;  %v14141_v37 = vrot.slane %v14125_v8, %v19228_v27 }
 0x3e1   : > { %v14401_v23 = vrot.slane %v14393_v34, %v19228_v27  ;;  %v14408_v20 = vrot.slane %v14394_v35, %v19228_v27  ;;  %v14148_v0 = vrot.slane %v14132_v52, %v19228_v27  ;;  %v14180_v50 = vrot.slane %v14166_v53, %v19228_v27 }
 0x3e2   : > { %v14360_v47 = vcombine.low %v14352_v4, %v14359_v19  ;;  %v14155_v38 = vrot.slane %v14133_v2, %v19228_v27  ;;  %v14162_v21 = vrot.slane %v14134_v59, %v19228_v27  ;;  %v14163_v63 = vcombine.high %v14141_v37, %v14141_v37 }
 0x3e3   : > { %v14409_v9 = vcombine.low %v14401_v23, %v14408_v20  ;;  %v14164_v62 = vcombine.high %v14148_v0, %v14148_v0  ;;  %v14181_v30 = vcombine.high %v14173_v43, %v14173_v43  ;;  %v14182_v11 = vcombine.high %v14180_v50, %v14180_v50 }
 0x3e4   : > { %v14165_v12 = vcombine.high %v14155_v38, %v14155_v38  ;;  %v14189_v26 = vrot.slane %v14173_v43, %v19228_v27  ;;  %v14196_v40 = vrot.slane %v14180_v50, %v19228_v27  ;;  %v14410_v7 = vcombine.low %v14100_v28, %v14114_v56 }
 0x3e5   : > { %v14530_v15 = vpack.c.bf16 %v14409_v9, %v14360_v47  ;;  %v14203_v57 = vrot.slane %v14181_v30, %v19228_v27  ;;  %v14210_v4 = vrot.slane %v14182_v11, %v19228_v27  ;;  %v14411_v55 = vcombine.low %v14116_v31, %v14141_v37 }
 0x3e6   : > { %v14412_v8 = vcombine.low %v14155_v38, %v14163_v63  ;;  %v14413_v52 = vcombine.low %v14165_v12, %v14148_v0  ;;  %v14420_v34 = vrot.slane %v14410_v7, %v19228_v27  ;;  %v14459_v35 = vcombine.low %v14162_v21, %v14164_v62 }
 0x3e7   : > { %18442 = vmatmul.mubr.msk.bf16.vlgmr.msra.gmra.mrb[28].mxu1 %vm606_vm2, %v14530_v15  ;;  %v14427_v53 = vrot.slane %v14411_v55, %v19228_v27  ;;  %v14460_v19 = vcombine.low %v14189_v26, %v14203_v57  ;;  %v17696_v43 = vcombine.high %v14189_v26, %v14203_v57  ;;  %v14462_v2 = vcombine.low %v14196_v40, %v14210_v4 }
 0x3e8   : > { %v14434_v28 = vrot.slane %v14412_v8, %v19228_v27  ;;  %v14441_v56 = vrot.slane %v14413_v52, %v19228_v27  ;;  %v14469_v59 = vrot.slane %v14459_v35, %v19228_v27  ;;  %v14212_v23 = vcombine.high %v14196_v40, %v14196_v40 }
 0x3e9   : > { %v14442_v31 = vcombine.low %v14420_v34, %v14427_v53  ;;  %v14476_v37 = vrot.slane %v14460_v19, %v19228_v27  ;;  %v14483_v20 = vrot.slane %v17696_v43, %v19228_v27  ;;  %v14490_v0 = vrot.slane %v14462_v2, %v19228_v27 }
 0x3ea   : > { %v14443_v50 = vcombine.low %v14434_v28, %v14441_v56  ;;  %v14514_v47 = vrot.slane %v14212_v23, %v19228_v27  ;;  %v4441_v38 = vadd.f32 %v21173_v18, %v21447_v58  ;;  %v4439_v21 = vadd.f32 %v21176_v17, %v21454_v6 }
 0x3eb   : > { %v14450_v63 = vrot.slane %v14442_v31, %v19228_v27  ;;  %v14491_v9 = vcombine.low %v14469_v59, %v14476_v37  ;;  %v14492_v62 = vcombine.low %v14483_v20, %v14490_v0  ;;  %v4440_v30 = vadd.f32 %v21183_v49, %v21461_v10 }
 0x3ec   : > { %v14457_v11 = vrot.slane %v14443_v50, %v19228_v27  ;;  %v14521_v12 = vrot.slane %v14514_v47, %v19228_v27  ;;  %v5226_v26 = vadd.f32 %v21187_v29, %v4441_v38  ;;  %v5224_v40 = vadd.f32 %v21191_v61, %v4439_v21 }
 0x3ed   : > { %v14499_v18 = vrot.slane %v14491_v9, %v19228_v27  ;;  %v14506_v58 = vrot.slane %v14492_v62, %v19228_v27  ;;  %v5225_v17 = vadd.f32 %v21203_v16, %v4440_v30  ;;  %v18757_v9 = vld [vmem:[%s22370_s4 + $0x80] ss:$8 sps:$4 sm:$0xff]   ;;  %v18759_v62 = vld [vmem:[%s22370_s4 + $0x84] ss:$8 sps:$4 sm:$0xff]   ;;  %v18762_v30 = vld [vmem:[%s22370_s4 + $0x94] ss:$8 sps:$4 sm:$0xff]  }
 0x3ee   : > { %v14458_v6 = vcombine.low %v14450_v63, %v14457_v11  ;;  %v6011_v7 = vadd.f32 %v21207_v45, %v5226_v26  ;;  %v6009_v15 = vadd.f32 %v21211_v51, %v5224_v40  ;;  %v14532_v57 = vpack.c.bf16 %v14521_v12, %v14521_v12  ;;  %16002 = vmatprep.subr.bf16.mxu0 %v18759_v62  ;;  %v18760_v11 = vld [vmem:[%s22370_s4 + $0x90] ss:$8 sps:$4 sm:$0xff]   ;;  %v18765_v12 = vld [vmem:[%s22370_s4 + $0xa4] ss:$8 sps:$4 sm:$0xff]   ;;  %v18763_v40 = vld [vmem:[%s22370_s4 + $0xa0] ss:$8 sps:$4 sm:$0xff]  }
 0x3ef   : > { %v14507_v49 = vcombine.low %v14499_v18, %v14506_v58  ;;  %v6010_v10 = vadd.f32 %v21223_v5, %v5225_v17  ;;  %16003 = vmatpush1.bf16.msra.mxu0 %v18757_v9  ;;  %v19009_v26 = vmov 0   ;;  %v18768_v18 = vld [vmem:[%s22370_s4 + $0xb4] ss:$8 sps:$4 sm:$0xff]   ;;  %v18766_v58 = vld [vmem:[%s22370_s4 + $0xb0] ss:$8 sps:$4 sm:$0xff]  }
 0x3f0   : > { %v6796_v4 = vadd.f32 %v21227_v3, %v6011_v7  ;;  %v6794_v29 = vadd.f32 %v21231_v24, %v6009_v15  ;;  %16004 = vmatprep.subr.bf16.mxu0 %v18762_v30  ;;  %16034 = vmatprep.mubr.bf16.mxu0 %v19009_v26  ;;  %v18771_v17 = vld [vmem:[%s22370_s4 + $0xc4] ss:$8 sps:$4 sm:$0xff]   ;;  %v18774_v7 = vld [vmem:[%s22370_s4 + $0xd4] ss:$8 sps:$4 sm:$0xff]   ;;  %v18772_v15 = vld [vmem:[%s22370_s4 + $0xd0] ss:$8 sps:$4 sm:$0xff]  }
 0x3f1   : > { %v14531_v61 = vpack.c.bf16 %v14507_v49, %v14458_v6  ;;  %v6795_v55 = vadd.f32 %v21240_v1, %v6010_v10  ;;  %v18769_v6 = vld [vmem:[%s22370_s4 + $0xc0] ss:$8 sps:$4 sm:$0xff]   ;;  %v18777_v49 = vld [vmem:[%s22370_s4 + $0xe4] ss:$8 sps:$4 sm:$0xff]  }
 0x3f2   : > { %v7581_v8 = vadd.f32 %v21244_v46, %v6796_v4  ;;  %v7579_v16 = vadd.f32 %v21249_v42, %v6794_v29  ;;  %v18775_v10 = vld [vmem:[%s22370_s4 + $0xe0] ss:$8 sps:$4 sm:$0xff]   ;;  %v18778_v4 = vld [vmem:[%s22370_s4 + $0xf0] ss:$8 sps:$4 sm:$0xff]   ;;  %v18783_v29 = vld [vmem:[%s22370_s4 + $0x4] ss:$8 sps:$4 sm:$0xff]  }
 0x3f3   : > { %18445 = vmatprep.mubr.msk.bf16.mxu1 %vm606_vm2, %v14531_v61  ;;  %v7580_v45 = vadd.f32 %v21254_v22, %v6795_v55  ;;  %16005 = vmatpush1.bf16.msra.mxu0 %v18760_v11 }
 0x3f4   : > { %18446 = vmatmul.mubr.msk.bf16.gmra.mrb[92].mxu1 %vm606_vm2, %v14532_v57  ;;  %v8366_v51 = vadd.f32 %v21258_v44, %v7581_v8  ;;  %v8364_v5 = vadd.f32 %v21260_v14, %v7579_v16  ;;  %16006 = vmatprep.subr.bf16.mxu0 %v18765_v12  ;;  %v18780_v57 = vld [vmem:[%s22370_s4 + $0xf4] ss:$8 sps:$4 sm:$0xff]  }
 0x3f5   : > { %v8365_v3 = vadd.f32 %v21270_v48, %v7580_v45 }
 0x3f6   : > { %v9151_v24 = vadd.f32 %v21365_v39, %v8366_v51  ;;  %v9149_v1 = vadd.f32 %v21367_v60, %v8364_v5 }
 0x3f7   : > { %v9150_v46 = vadd.f32 %v21377_v54, %v8365_v3  ;;  %16007 = vmatpush1.bf16.msra.mxu0 %v18763_v40  ;;  %v21614_v3 = vld [vmem:[%s22369_s3] ss:$0 sm:$0xff] }
 0x3f8   : > { %v9936_v42 = vadd.f32 %v21477_v13, %v9151_v24  ;;  %v9934_v52 = vadd.f32 %v21480_v25, %v9149_v1  ;;  %16008 = vmatprep.subr.bf16.mxu0 %v18768_v18 }
 0x3f9   : > { %v9935_v22 = vadd.f32 %v21485_v41, %v9150_v46 }
 0x3fb   : > { %16009 = vmatpush1.bf16.msra.mxu0 %v18766_v58 }
 0x3fc   : > { %16010 = vmatprep.subr.bf16.mxu0 %v18771_v17 }
 0x3ff   : > { %v18367_v34 = vpop.f32.mrb[72].mxu1  ;;  %16011 = vmatpush1.bf16.msra.mxu0 %v18769_v6 }
 0x400   : > { %v10721_v35 = vadd.f32 %v18367_v34, %v9936_v42  ;;  %v10701_v53 = vpop.f32.mrb[73].mxu1  ;;  %16012 = vmatprep.subr.bf16.mxu0 %v18774_v7 }
 0x401   : > { %v10719_v44 = vadd.f32 %v10701_v53, %v9934_v52  ;;  %v18368_v19 = vpop.f32.mrb[74].mxu1 }
 0x402   : > { %v10704_v14 = vpop.f32.mrb[75].mxu1 }
 0x403   : > { %v10720_v43 = vadd.f32 %v10704_v14, %v9935_v22  ;;  %16013 = vmatpush1.bf16.msra.mxu0 %v18772_v15 }
 0x404   : > { %16014 = vmatprep.subr.bf16.mxu0 %v18777_v49 }
 0x407   : > { %16015 = vmatpush1.bf16.msra.mxu0 %v18775_v10 }
 0x408   : > { %16016 = vmatprep.subr.bf16.mxu0 %v18780_v57 }
 0x40b   : > { %16017 = vmatpush1.bf16.msra.mxu0 %v18778_v4 }
 0x40c   : > { %16125 = vmatprep.subr.bf16.mxu0 %v18783_v29 }
 0x427   : > { %v18383_v48 = vpop.f32.mrb[76].mxu1 }
 0x428   : > { %v11506_v2 = vadd.f32 %v18383_v48, %v10721_v35  ;;  %v11486_v39 = vpop.f32.mrb[77].mxu1 }
 0x429   : > { %v11504_v28 = vadd.f32 %v11486_v39, %v10719_v44  ;;  %v18384_v60 = vpop.f32.mrb[78].mxu1 }
 0x42a   : > { %v11489_v56 = vpop.f32.mrb[79].mxu1 }
 0x42b   : > { %v11505_v54 = vadd.f32 %v11489_v56, %v10720_v43 }
 0x450   : > { %v18399_v59 = vpop.f32.mrb[80].mxu1 }
 0x451   : > { %v12292_v13 = vadd.f32 %v18399_v59, %v11506_v2  ;;  %v12272_v23 = vpop.f32.mrb[81].mxu1 }
 0x452   : > { %v12290_v25 = vadd.f32 %v12272_v23, %v11504_v28  ;;  %v18400_v31 = vpop.f32.mrb[82].mxu1 }
 0x453   : > { %v12275_v41 = vpop.f32.mrb[83].mxu1 }
 0x454   : > { %v12291_v37 = vadd.f32 %v12275_v41, %v11505_v54 }
 0x478   : > { %v18415_v20 = vpop.f32.mrb[84].mxu1 }
 0x479   : > { %v13078_v0 = vadd.f32 %v18415_v20, %v12292_v13  ;;  %v13058_v50 = vpop.f32.mrb[85].mxu1 }
 0x47a   : > { %v13076_v47 = vadd.f32 %v13058_v50, %v12290_v25  ;;  %v18416_v38 = vpop.f32.mrb[86].mxu1 }
 0x47b   : > { %v13061_v21 = vpop.f32.mrb[87].mxu1 }
 0x47c   : > { %v13077_v63 = vadd.f32 %v13061_v21, %v12291_v37 }
 0x49f   : > { %v18431_v61 = vpop.f32.mrb[88].mxu1 }
 0x4a0   : > { %v21605_v55 = vadd.f32 %v18431_v61, %v13078_v0  ;;  %v13843_v8 = vpop.f32.mrb[89].mxu1 }
 0x4a1   : > { %v21607_v16 = vadd.f32 %v13843_v8, %v13076_v47  ;;  %v18432_v45 = vpop.f32.mrb[90].mxu1 }
 0x4a2   : > { %v13846_v51 = vpop.f32.mrb[91].mxu1 }
 0x4a3   : > { %v21609_v5 = vadd.f32 %v13846_v51, %v13077_v63 }
 0x4ba   : > { %v18443_v24 = vpop.f32.mrb[28].mxu1 }
 0x4bb   : > { %v14658_v1 = vadd.f32 %v18443_v24, %v21614_v3  ;;  %v14612_v46 = vpop.f32.mrb[29].mxu1 }
 0x4bc   : > { %v14656_v42 = vadd.f32 %v21614_v3, %v14612_v46  ;;  %v18444_v52 = vpop.f32.mrb[30].mxu1 }
 0x4bd   : > { %v14665_v22 = vmul.f32 0.2, %v14658_v1  ;;  %v14659_v34 = vadd.f32 %v18444_v52, %v21614_v3  ;;  %v14615_v35 = vpop.f32.mrb[31].mxu1 }
 0x4be   : > { %v14663_v53 = vmul.f32 0.2, %v14656_v42  ;;  %v14657_v43 = vadd.f32 %v21614_v3, %v14615_v35 }
 0x4bf   : > { %v14672_v44 = vmax.f32 %v14658_v1, %v14665_v22  ;;  %v14666_v19 = vmul.f32 0.2, %v14659_v34 }
 0x4c0   : > { %v14670_v14 = vmax.f32 %v14656_v42, %v14663_v53  ;;  %v14664_v31 = vmul.f32 0.2, %v14657_v43 }
 0x4c1   : > { %v14790_v48 = vcombine.high %v14672_v44, %v14672_v44  ;;  %v14797_v2 = vrot.slane %v14672_v44, %v19228_v27  ;;  %v14673_v39 = vmax.f32 %v14659_v34, %v14666_v19 }
 0x4c2   : > { %v14692_v28 = vcombine.high %v14670_v14, %v14670_v14  ;;  %v14699_v60 = vrot.slane %v14670_v14, %v19228_v27  ;;  %v14671_v15 = vmax.f32 %v14657_v43, %v14664_v31 }
 0x4c3   : > { %v14804_v56 = vrot.slane %v14790_v48, %v19228_v27  ;;  %v14805_v54 = vcombine.high %v14797_v2, %v14797_v2  ;;  %v14839_v59 = vcombine.high %v14673_v39, %v14673_v39  ;;  %v14846_v25 = vrot.slane %v14673_v39, %v19228_v27 }
 0x4c4   : > { %v14706_v13 = vrot.slane %v14692_v28, %v19228_v27  ;;  %v14707_v23 = vcombine.high %v14699_v60, %v14699_v60  ;;  %v14813_v37 = vrot.slane %v14797_v2, %v19228_v27  ;;  %v14715_v47 = vrot.slane %v14699_v60, %v19228_v27 }
 0x4c5   : > { %v14806_v41 = vcombine.high %v14804_v56, %v14804_v56  ;;  %v21627_v20 = vrot.slane %v14804_v56, %v19228_v27  ;;  %v14827_v0 = vrot.slane %v14805_v54, %v19228_v27  ;;  %v14853_v62 = vrot.slane %v14839_v59, %v19228_v27 }
 0x4c6   : > { %v14708_v50 = vcombine.high %v14706_v13, %v14706_v13  ;;  %v14722_v38 = vrot.slane %v14706_v13, %v19228_v27  ;;  %v14729_v21 = vrot.slane %v14707_v23, %v19228_v27  ;;  %v14854_v30 = vcombine.high %v14846_v25, %v14846_v25 }
 0x4c7   : > { %v14834_v63 = vrot.slane %v14806_v41, %v19228_v27  ;;  %v14836_v9 = vcombine.high %v21627_v20, %v21627_v20  ;;  %v18447_v11 = vpop.f32.mrb[92].mxu1  ;;  %v15097_v12 = vcombine.low %v14813_v37, %v14827_v0  ;;  %v17716_v6 = vcombine.high %v14813_v37, %v14827_v0 }
 0x4c8   : > { %v14736_v40 = vrot.slane %v14708_v50, %v19228_v27  ;;  %v14738_v18 = vcombine.high %v14722_v38, %v14722_v38  ;;  %v15000_v58 = vcombine.low %v14715_v47, %v14729_v21  ;;  %v14628_v17 = vpop.f32.mrb[93].mxu1  ;;  %v17714_v7 = vcombine.high %v14715_v47, %v14729_v21 }
 0x4c9   : > { %v18448_v49 = vpop.f32.mrb[94].mxu1  ;;  %v15144_v10 = vcombine.low %v14834_v63, %v14836_v9  ;;  %v14838_v29 = vcombine.high %v14834_v63, %v14834_v63  ;;  %v15126_v8 = vrot.slane %v21627_v20, %v19228_v27  ;;  %v14855_v51 = vcombine.high %v14853_v62, %v14853_v62 }
 0x4ca   : > { %v15002_v57 = vcombine.low %v14722_v38, %v14736_v40  ;;  %v15009_v4 = vrot.slane %v15000_v58, %v19228_v27  ;;  %v14631_v61 = vpop.f32.mrb[95].mxu1  ;;  %v15016_v45 = vrot.slane %v17714_v7, %v19228_v27  ;;  %v14862_v24 = vrot.slane %v14846_v25, %v19228_v27 }
 0x4cb   : > { %v21644_v1 = vrot.slane %v15097_v12, %v19228_v27  ;;  %v15030_v42 = vrot.slane %v14738_v18, %v19228_v27  ;;  %v14876_v52 = vrot.slane %v14854_v30, %v19228_v27  ;;  %v14869_v34 = vrot.slane %v14853_v62, %v19228_v27 }
 0x4cc   : > { %v15023_v46 = vrot.slane %v15002_v57, %v19228_v27  ;;  %v15031_v22 = vcombine.low %v15009_v4, %v15016_v45  ;;  %v14883_v35 = vrot.slane %v14855_v51, %v19228_v27  ;;  %v14884_v53 = vcombine.high %v14862_v24, %v14862_v24 }
 0x4cd   : > { %v14886_v19 = vcombine.high %v14876_v52, %v14876_v52  ;;  %v15145_v14 = vcombine.low %v14838_v29, %v14862_v24  ;;  %v15153_v43 = vrot.slane %v15144_v10, %v19228_v27  ;;  %v14741_v59 = vcombine.high %v14671_v15, %v14671_v15 }
 0x4ce   : > { %v15032_v44 = vcombine.low %v15023_v46, %v15030_v42  ;;  %v15039_v48 = vrot.slane %v15031_v22, %v19228_v27  ;;  %v15146_v2 = vcombine.low %v14876_v52, %v14884_v53  ;;  %v15192_v39 = vcombine.low %v14869_v34, %v14883_v35 }
 0x4cf   : > { %v17717_v28 = vcombine.high %v14869_v34, %v14883_v35  ;;  %v15160_v56 = vrot.slane %v15145_v14, %v19228_v27  ;;  %v15174_v54 = vrot.slane %v14886_v19, %v19228_v27  ;;  %v15119_v13 = vrot.slane %v17716_v6, %v19228_v27 }
 0x4d0   : > { %v15046_v60 = vrot.slane %v15032_v44, %v19228_v27  ;;  %v15167_v23 = vrot.slane %v15146_v2, %v19228_v27  ;;  %v14740_v25 = vcombine.high %v14736_v40, %v14736_v40  ;;  %v14748_v31 = vrot.slane %v14671_v15, %v19228_v27 }
 0x4d1   : > { %v15175_v37 = vcombine.low %v15153_v43, %v15160_v56  ;;  %v14755_v20 = vrot.slane %v14741_v59, %v19228_v27  ;;  %v14648_v0 = vadd.f32 %v18447_v11, %v21605_v55  ;;  %v15201_v47 = vrot.slane %v15192_v39, %v19228_v27 }
 0x4d2   : > { %v15047_v41 = vcombine.low %v15039_v48, %v15046_v60  ;;  %v15176_v50 = vcombine.low %v15167_v23, %v15174_v54  ;;  %v14756_v38 = vcombine.high %v14748_v31, %v14748_v31  ;;  %v14764_v21 = vrot.slane %v14748_v31, %v19228_v27 }
 0x4d3   : > { %v15183_v63 = vrot.slane %v15175_v37, %v19228_v27  ;;  %v15208_v9 = vrot.slane %v17717_v28, %v19228_v27  ;;  %v14757_v62 = vcombine.high %v14755_v20, %v14755_v20  ;;  %v14662_v30 = vadd.f32 %v21614_v3, %v14648_v0 }
 0x4d4   : > { %15343 = vst [vmem:[#allocation3] sm:$0x7f] %v15047_v41  ;;  %v15190_v12 = vrot.slane %v15176_v50, %v19228_v27  ;;  %v14771_v40 = vrot.slane %v14755_v20, %v19228_v27  ;;  %v14778_v55 = vrot.slane %v14756_v38, %v19228_v27  ;;  %v14786_v11 = vcombine.high %v14764_v21, %v14764_v21 }
 0x4d5   : > { %v14785_v18 = vrot.slane %v14757_v62, %v19228_v27  ;;  %v15048_v58 = vcombine.low %v14740_v25, %v14764_v21  ;;  %v14669_v6 = vmul.f32 0.2, %v14662_v30  ;;  %v14646_v7 = vadd.f32 %v14628_v17, %v21607_v16 }
 0x4d6   : > { %v15191_v15 = vcombine.low %v15183_v63, %v15190_v12  ;;  %v14788_v49 = vcombine.high %v14778_v55, %v14778_v55  ;;  %v15049_v10 = vcombine.low %v14778_v55, %v14786_v11  ;;  %v14647_v57 = vadd.f32 %v14631_v61, %v21609_v5 }
 0x4d7   : > { %v15128_v4 = vcombine.low %v15119_v13, %v15126_v8  ;;  %v15057_v29 = vrot.slane %v15048_v58, %v19228_v27  ;;  %v17715_v45 = vcombine.high %v14771_v40, %v14785_v18  ;;  %v14676_v51 = vmax.f32 %v14662_v30, %v14669_v6 }
 0x4d8   : > { %15346 = vst [vmem:[#allocation3 + $0x18] sm:$0x7f] %v15191_v15  ;;  %v15050_v24 = vcombine.low %v14788_v49, %v14771_v40  ;;  %v15064_v46 = vrot.slane %v15049_v10, %v19228_v27  ;;  %v14660_v42 = vadd.f32 %v21614_v3, %v14646_v7  ;;  %v14661_v52 = vadd.f32 %v21614_v3, %v14647_v57 }
 0x4d9   : > { %v15223_v22 = vcombine.low %v15201_v47, %v15208_v9  ;;  %v15078_v16 = vrot.slane %v14785_v18, %v19228_v27  ;;  %v15105_v17 = vrot.slane %v17715_v45, %v19228_v27  ;;  %v14992_v5 = vrot.slane %v14676_v51, %v19228_v27 }
 0x4da   : > { %v15071_v8 = vrot.slane %v15050_v24, %v19228_v27  ;;  %v15079_v34 = vcombine.low %v15057_v29, %v15064_v46  ;;  %v14667_v35 = vmul.f32 0.2, %v14660_v42  ;;  %v14668_v53 = vmul.f32 0.2, %v14661_v52 }
 0x4db   : > { %v15350_v61 = vld [vmem:[#allocation3] sm:$0xff]  ;;  %v15127_v19 = vcombine.low %v15105_v17, %v21644_v1  ;;  %v14999_v14 = vrot.slane %v14992_v5, %v19228_v27  ;;  %v15142_v39 = vrot.slane %v15128_v4, %v19228_v27  ;;  %v21688_v60 = vrot.slane %v15223_v22, %v19228_v27 }
 0x4dc   : > { %v15624_v44 = vcombine.high %v15350_v61, %v15350_v61  ;;  %v15080_v43 = vcombine.low %v15071_v8, %v15078_v16  ;;  %v15087_v3 = vrot.slane %v15079_v34, %v19228_v27  ;;  %v14674_v48 = vmax.f32 %v14660_v42, %v14667_v35 }
 0x4dd   : > { %v14675_v2 = vmax.f32 %v14661_v52, %v14668_v53  ;;  %v21685_v28 = vrot.slane %v15350_v61, %v19232_v32  ;;  %v15135_v56 = vrot.slane %v15127_v19, %v19228_v27  ;;  %v21697_v41 = vrot.slane %v14999_v14, %v19228_v27 }
 0x4de   : > { %v15094_v54 = vrot.slane %v15080_v43, %v19228_v27  ;;  %v14888_v1 = vcombine.high %v14674_v48, %v14674_v48  ;;  %v14895_v59 = vrot.slane %v14674_v48, %v19228_v27  ;;  %v21694_v23 = vrot.slane %v15624_v44, %v19232_v32 }
 0x4df   : > { %v14937_v13 = vcombine.high %v14675_v2, %v14675_v2  ;;  %v15353_v25 = vld [vmem:[#allocation3 + $0x18] sm:$0xff]  ;;  %v15143_v31 = vcombine.low %v15135_v56, %v15142_v39  ;;  %v14944_v37 = vrot.slane %v14675_v2, %v19228_v27 }
 0x4e0   : > { %v15399_v20 = vcombine.high %v15353_v25, %v15353_v25  ;;  %v21701_v0 = vrot.slane %v15353_v25, %v19232_v32  ;;  %v15095_v50 = vcombine.low %v15087_v3, %v15094_v54  ;;  %v14902_v47 = vrot.slane %v14888_v1, %v19228_v27 }
 0x4e1   : > { %15345 = vst [vmem:[#allocation3 + $0x10] sm:$0x7f] %v15143_v31  ;;  %v14903_v38 = vcombine.high %v14895_v59, %v14895_v59  ;;  %v14911_v21 = vrot.slane %v14895_v59, %v19228_v27  ;;  %v14951_v63 = vrot.slane %v14937_v13, %v19228_v27  ;;  %v14952_v9 = vcombine.high %v14944_v37, %v14944_v37 }
 0x4e2   : > { %v21707_v62 = vrot.slane %v15399_v20, %v19232_v32  ;;  %v21711_v30 = vcombine.high %v21701_v0, %v21701_v0  ;;  %v15554_v12 = vrot.slane %v21701_v0, %v19236_v36  ;;  %15344 = vst [vmem:[#allocation3 + $0x8] sm:$0x7f] %v15095_v50  ;;  %v14904_v40 = vcombine.high %v14902_v47, %v14902_v47 }
 0x4e3   : > { %v14918_v55 = vrot.slane %v14902_v47, %v19228_v27  ;;  %v14925_v11 = vrot.slane %v14903_v38, %v19228_v27  ;;  %v14933_v18 = vcombine.high %v14911_v21, %v14911_v21  ;;  %v14953_v58 = vcombine.high %v14951_v63, %v14951_v63 }
 0x4e4   : > { %v14932_v6 = vrot.slane %v14904_v40, %v19228_v27  ;;  %v14960_v7 = vrot.slane %v14944_v37, %v19228_v27  ;;  %v14967_v15 = vrot.slane %v14951_v63, %v19228_v27  ;;  %v14974_v49 = vrot.slane %v14952_v9, %v19228_v27 }
 0x4e5   : > { %v14934_v10 = vcombine.high %v14918_v55, %v14918_v55  ;;  %v14935_v57 = vcombine.high %v14925_v11, %v14925_v11  ;;  %v15194_v4 = vcombine.low %v14911_v21, %v14925_v11  ;;  %v15222_v29 = vrot.slane %v14933_v18, %v19228_v27 }
 0x4e6   : > { %v14936_v45 = vcombine.high %v14932_v6, %v14932_v6  ;;  %v14981_v51 = vrot.slane %v14953_v58, %v19228_v27  ;;  %v15270_v24 = vrot.slane %v14974_v49, %v19228_v27  ;;  %v17718_v46 = vcombine.high %v14960_v7, %v14974_v49 }
 0x4e7   : > { %v15215_v42 = vrot.slane %v15194_v4, %v19228_v27  ;;  %v15240_v52 = vcombine.low %v14935_v57, %v14918_v55  ;;  %v15241_v22 = vcombine.low %v14932_v6, %v14934_v10  ;;  %v21727_v16 = vcombine.high %v21707_v62, %v21707_v62 }
 0x4e8   : > { %v21729_v17 = vld [vmem:[#allocation3 + $0x10] sm:$0xff]  ;;  %v15242_v5 = vcombine.low %v14936_v45, %v14960_v7  ;;  %v15289_v61 = vcombine.low %v14967_v15, %v14981_v51  ;;  %v17719_v8 = vcombine.high %v14967_v15, %v14981_v51  ;;  %v15297_v34 = vrot.slane %v17718_v46, %v19228_v27 }
 0x4e9   : > { %v15351_v35 = vld [vmem:[#allocation3 + $0x8] sm:$0xff]  ;;  %v15641_v53 = vcombine.high %v21729_v17, %v21729_v17  ;;  %v21736_v44 = vrot.slane %v21729_v17, %v19232_v32  ;;  %v15224_v19 = vcombine.low %v15215_v42, %v15222_v29  ;;  %v15249_v14 = vrot.slane %v15240_v52, %v19228_v27 }
 0x4ea   : > { %v15382_v43 = vcombine.high %v15351_v35, %v15351_v35  ;;  %v15389_v3 = vrot.slane %v15351_v35, %v19232_v32  ;;  %v15256_v48 = vrot.slane %v15241_v22, %v19228_v27  ;;  %v15263_v2 = vrot.slane %v15242_v5, %v19228_v27 }
 0x4eb   : > { %v15238_v39 = vrot.slane %v15224_v19, %v19228_v27  ;;  %v15304_v56 = vrot.slane %v15289_v61, %v19228_v27  ;;  %v15311_v54 = vrot.slane %v17719_v8, %v19228_v27  ;;  %v15558_v1 = vrot.slane %v21711_v30, %v19236_v36 }
 0x4ec   : > { %v15396_v59 = vrot.slane %v15382_v43, %v19232_v32  ;;  %v15397_v13 = vcombine.high %v15389_v3, %v15389_v3  ;;  %v15538_v25 = vrot.slane %v15389_v3, %v19236_v36  ;;  %v15271_v31 = vcombine.low %v15249_v14, %v15256_v48 }
 0x4ed   : > { %v15239_v37 = vcombine.low %v21688_v60, %v15238_v39  ;;  %v15272_v20 = vcombine.low %v15263_v2, %v15270_v24  ;;  %v15319_v50 = vcombine.low %v15297_v34, %v15304_v56  ;;  %v15320_v47 = vcombine.low %v15311_v54, %v21697_v41 }
 0x4ee   : > { %v15279_v38 = vrot.slane %v15271_v31, %v19228_v27  ;;  %v15398_v21 = vcombine.high %v15396_v59, %v15396_v59  ;;  %v15542_v63 = vrot.slane %v15397_v13, %v19236_v36  ;;  %v15546_v9 = vrot.slane %v15396_v59, %v19236_v36 }
 0x4ef   : > { %15347 = vst [vmem:[#allocation3 + $0x20] sm:$0x7f] %v15239_v37  ;;  %v15286_v40 = vrot.slane %v15272_v20, %v19228_v27  ;;  %v15327_v55 = vrot.slane %v15319_v50, %v19228_v27  ;;  %v15334_v11 = vrot.slane %v15320_v47, %v19228_v27  ;;  %v15562_v60 = vrot.slane %v21707_v62, %v19236_v36 }
 0x4f0   : > { %v15550_v18 = vrot.slane %v15398_v21, %v19236_v36  ;;  %v15566_v41 = vrot.slane %v21727_v16, %v19236_v36  ;;  %v15599_v58 = vsel %vm1536_vm5, %v15542_v63, %v15538_v25  ;;  %v15602_v6 = vsel %vm1536_vm5, %v15558_v1, %v15554_v12 }
 0x4f1   : > { %v15287_v7 = vcombine.low %v15279_v38, %v15286_v40  ;;  %v15335_v15 = vcombine.low %v15327_v55, %v15334_v11  ;;  %v15600_v49 = vsel %vm1276_vm3, %v15546_v9, %v15599_v58  ;;  %v15603_v10 = vsel %vm1276_vm3, %v15562_v60, %v15602_v6 }
 0x4f2   : > { %v15601_v27 = vsel %vm1278_vm4, %v15550_v18, %v15600_v49  ;;  %v15604_v57 = vsel %vm1278_vm4, %v15566_v41, %v15603_v10  ;;  %v15453_v4 = vrot.slane %v15389_v3, %v19234_v33  ;;  %v15457_v29 = vrot.slane %v15397_v13, %v19234_v33 }
 0x4f3   : > { %15348 = vst [vmem:[#allocation3 + $0x28] sm:$0x7f] %v15287_v7  ;;  %15349 = vst [vmem:[#allocation3 + $0x30] sm:$0x7f] %v15335_v15  ;;  %v15461_v12 = vrot.slane %v15396_v59, %v19234_v33  ;;  %v15465_v45 = vrot.slane %v15398_v21, %v19234_v33  ;;  %v15469_v51 = vrot.slane %v21701_v0, %v19234_v33 }
 0x4f4   : > { %15616 = vst [vmem:[#allocation4 + $0x30] sm:$0xf] %v15601_v27  ;;  %15617 = vst [vmem:[#allocation4 + $0x38] sm:$0xf] %v15604_v57  ;;  %v15473_v24 = vrot.slane %v21711_v30, %v19234_v33  ;;  %v15477_v46 = vrot.slane %v21707_v62, %v19234_v33  ;;  %v15481_v42 = vrot.slane %v21727_v16, %v19234_v33 }
 0x4f5   : > { %v15514_v52 = vsel %vm1276_vm3, %v15457_v29, %v15453_v4  ;;  %v21783_v22 = vcombine.high %v21685_v28, %v21685_v28  ;;  %v21789_v0 = vcombine.high %v21694_v23, %v21694_v23  ;;  %v21792_v30 = vrot.slane %v15641_v53, %v19232_v32 }
 0x4f6   : > { %v15515_v17 = vsel %vm1278_vm4, %v15461_v12, %v15514_v52  ;;  %v15517_v5 = vsel %vm1276_vm3, %v15473_v24, %v15469_v51  ;;  %v15354_v62 = vld [vmem:[#allocation3 + $0x20] sm:$0xff]  ;;  %v21798_v8 = vcombine.high %v21736_v44, %v21736_v44  ;;  %v15695_v14 = vrot.slane %v21685_v28, %v19234_v33 }
 0x4f7   : > { %v15516_v16 = vsel %vm1280_vm6, %v15465_v45, %v15515_v17  ;;  %v15518_v61 = vsel %vm1278_vm4, %v15477_v46, %v15517_v5  ;;  %v15658_v34 = vcombine.high %v15354_v62, %v15354_v62  ;;  %v21801_v35 = vrot.slane %v15354_v62, %v19232_v32 }
 0x4f8   : > { %v15519_v19 = vsel %vm1280_vm6, %v15481_v42, %v15518_v61  ;;  %15531 = vst [vmem:[#allocation4 + $0x8] sm:$0x1e] %v15516_v16  ;;  %v21806_v53 = vcombine.high %v21792_v30, %v21792_v30  ;;  %v15699_v43 = vrot.slane %v21783_v22, %v19234_v33  ;;  %v15703_v3 = vrot.slane %v21694_v23, %v19234_v33 }
 0x4f9   : > { %15532 = vst [vmem:[#allocation4 + $0x10] sm:$0x1e] %v15519_v19  ;;  %v15707_v48 = vrot.slane %v21789_v0, %v19234_v33  ;;  %v21817_v2 = vrot.slane %v15658_v34, %v19232_v32  ;;  %v21821_v39 = vcombine.high %v21801_v35, %v21801_v35  ;;  %v15711_v56 = vrot.slane %v21736_v44, %v19234_v33 }
 0x4fa   : > { %v15715_v54 = vrot.slane %v21798_v8, %v19234_v33  ;;  %v15355_v1 = vld [vmem:[#allocation3 + $0x28] sm:$0xff]  ;;  %v15356_v59 = vld [vmem:[#allocation3 + $0x30] sm:$0xff]  ;;  %v15719_v13 = vrot.slane %v21792_v30, %v19234_v33  ;;  %v15723_v25 = vrot.slane %v21806_v53, %v19234_v33  ;;  %v15727_v31 = vrot.slane %v21801_v35, %v19234_v33 }
 0x4fb   : > { %v15756_v37 = vsel %vm1276_vm3, %v15699_v43, %v15695_v14  ;;  %v15416_v20 = vcombine.high %v15355_v1, %v15355_v1  ;;  %v15423_v50 = vrot.slane %v15355_v1, %v19232_v32  ;;  %v15675_v47 = vcombine.high %v15356_v59, %v15356_v59 }
 0x4fc   : > { %v21836_v38 = vrot.slane %v15356_v59, %v19232_v32  ;;  %v21840_v21 = vcombine.high %v21817_v2, %v21817_v2  ;;  %v15731_v63 = vrot.slane %v21821_v39, %v19234_v33  ;;  %v15735_v9 = vrot.slane %v21817_v2, %v19234_v33 }
 0x4fd   : > { %v15757_v40 = vsel %vm1278_vm4, %v15703_v3, %v15756_v37  ;;  %v15430_v55 = vrot.slane %v15416_v20, %v19232_v32  ;;  %v15431_v11 = vcombine.high %v15423_v50, %v15423_v50  ;;  %v15570_v60 = vrot.slane %v15423_v50, %v19236_v36 }
 0x4fe   : > { %v15485_v18 = vrot.slane %v15423_v50, %v19234_v33  ;;  %v21851_v41 = vrot.slane %v15675_v47, %v19232_v32  ;;  %v21855_v58 = vcombine.high %v21836_v38, %v21836_v38  ;;  %v15739_v6 = vrot.slane %v21840_v21, %v19234_v33 }
 0x4ff   : > { %v15743_v7 = vrot.slane %v21836_v38, %v19234_v33  ;;  %v15432_v15 = vcombine.high %v15430_v55, %v15430_v55  ;;  %v15574_v49 = vrot.slane %v15431_v11, %v19236_v36  ;;  %v15578_v10 = vrot.slane %v15430_v55, %v19236_v36 }
 0x500   : > { %v15489_v27 = vrot.slane %v15431_v11, %v19234_v33  ;;  %v15493_v57 = vrot.slane %v15430_v55, %v19234_v33  ;;  %v21867_v4 = vcombine.high %v21851_v41, %v21851_v41  ;;  %v15747_v29 = vrot.slane %v21855_v58, %v19234_v33 }
 0x501   : > { %v15751_v12 = vrot.slane %v21851_v41, %v19234_v33  ;;  %v15582_v45 = vrot.slane %v15432_v15, %v19236_v36  ;;  %v15605_v51 = vsel %vm1536_vm5, %v15574_v49, %v15570_v60  ;;  %v15497_v24 = vrot.slane %v15432_v15, %v19234_v33  ;;  %v18789_v49 = vld [vmem:[%s22370_s4 + $0x20] ss:$8 sps:$4 sm:$0xff]  }
 0x502   : > { %v15520_v46 = vsel %vm1276_vm3, %v15489_v27, %v15485_v18  ;;  %v15606_v42 = vsel %vm1276_vm3, %v15578_v10, %v15605_v51  ;;  %v15755_v17 = vrot.slane %v21867_v4, %v19234_v33  ;;  %v15758_v5 = vsel %vm1280_vm6, %v15707_v48, %v15757_v40  ;;  %v18794_v27 = vld [vmem:[%s22370_s4 + $0x34] ss:$8 sps:$4 sm:$0xff]   ;;  %v18803_v51 = vld [vmem:[%s22370_s4 + $0x64] ss:$8 sps:$4 sm:$0xff]  }
 0x503   : > { %v15521_v52 = vsel %vm1278_vm4, %v15493_v57, %v15520_v46  ;;  %v15607_v62 = vsel %vm1278_vm4, %v15582_v45, %v15606_v42  ;;  %v15759_v61 = vsel %vm1276_vm3, %v15715_v54, %v15711_v56  ;;  %v15762_v34 = vsel %vm1276_vm3, %v15731_v63, %v15727_v31  ;;  %15773 = vst [vmem:[#allocation4 + $0x50] sm:$0x1e] %v15758_v5  ;;  %v18784_v56 = vld [vmem:[#allocation4 + $0x28] ss:$8 sps:$4 sm:$0xff]   ;;  %v18806_v46 = vld [vmem:[%s22370_s4 + $0x74] ss:$8 sps:$4 sm:$0xff]  }
 0x504   : > { %v15522_v16 = vsel %vm1280_vm6, %v15497_v24, %v15521_v52  ;;  %15618 = vst [vmem:[#allocation4 + $0x40] sm:$0xf] %v15607_v62  ;;  %v15760_v19 = vsel %vm1278_vm4, %v15719_v13, %v15759_v61  ;;  %v15763_v14 = vsel %vm1278_vm4, %v15735_v9, %v15762_v34  ;;  %v15765_v43 = vsel %vm1276_vm3, %v15747_v29, %v15743_v7  ;;  %v18781_v13 = vld [vmem:[%s22370_s4] ss:$8 sps:$4 sm:$0xff]   ;;  %v18792_v57 = vld [vmem:[%s22370_s4 + $0x30] ss:$8 sps:$4 sm:$0xff]  }
 0x505   : > { %15533 = vst [vmem:[#allocation4 + $0x18] sm:$0x1e] %v15522_v16  ;;  %v15761_v3 = vsel %vm1280_vm6, %v15723_v25, %v15760_v19  ;;  %v15764_v48 = vsel %vm1280_vm6, %v15739_v6, %v15763_v14  ;;  %v15766_v1 = vsel %vm1278_vm4, %v15751_v12, %v15765_v43  ;;  %v15780_v31 = vrot.slane %v21685_v28, %v19236_v36  ;;  %v18788_v25 = vld [vmem:[%s22370_s4 + $0x14] ss:$8 sps:$4 sm:$0xff]   ;;  %v18795_v29 = vld [vmem:[%s22370_s4 + $0x40] ss:$8 sps:$4 sm:$0xff]  }
 0x506   : > { %v15767_v59 = vsel %vm1280_vm6, %v15755_v17, %v15766_v1  ;;  %15774 = vst [vmem:[#allocation4 + $0x58] sm:$0x1e] %v15761_v3  ;;  %15775 = vst [vmem:[#allocation4 + $0x60] sm:$0x1e] %v15764_v48  ;;  %v15784_v20 = vrot.slane %v21783_v22, %v19236_v36  ;;  %v15788_v50 = vrot.slane %v21694_v23, %v19236_v36  ;;  %v18800_v12 = vld [vmem:[%s22370_s4 + $0x54] ss:$8 sps:$4 sm:$0xff]  }
 0x507   : > { %15776 = vst [vmem:[#allocation4 + $0x68] sm:$0x1e] %v15767_v59  ;;  %v15800_v47 = vrot.slane %v21798_v8, %v19236_v36  ;;  %v15792_v63 = vrot.slane %v21789_v0, %v19236_v36  ;;  %v15796_v28 = vrot.slane %v21736_v44, %v19236_v36  ;;  %v15804_v9 = vrot.slane %v21792_v30, %v19236_v36  ;;  %v18786_v44 = vld [vmem:[%s22370_s4 + $0x10] ss:$8 sps:$4 sm:$0xff]   ;;  %v18791_v30 = vld [vmem:[%s22370_s4 + $0x24] ss:$8 sps:$4 sm:$0xff]  }
 0x508   : > { %v15808_v40 = vrot.slane %v21806_v53, %v19236_v36  ;;  %v15812_v22 = vrot.slane %v21801_v35, %v19236_v36  ;;  %v15816_v23 = vrot.slane %v21821_v39, %v19236_v36  ;;  %v15820_v8 = vrot.slane %v21817_v2, %v19236_v36  ;;  %v18798_v45 = vld [vmem:[%s22370_s4 + $0x50] ss:$8 sps:$4 sm:$0xff]   ;;  %v18801_v24 = vld [vmem:[%s22370_s4 + $0x60] ss:$8 sps:$4 sm:$0xff]   ;;  %v18811_v17 = vld [vmem:[%s22370_s4 + $0x104] ss:$8 sps:$4 sm:$0xff]  }
 0x509   : > { %v15824_v0 = vrot.slane %v21840_v21, %v19236_v36  ;;  %v15828_v35 = vrot.slane %v21836_v38, %v19236_v36  ;;  %v15832_v53 = vrot.slane %v21855_v58, %v19236_v36  ;;  %v15836_v2 = vrot.slane %v21851_v41, %v19236_v36  ;;  %v18804_v42 = vld [vmem:[%s22370_s4 + $0x70] ss:$8 sps:$4 sm:$0xff]   ;;  %v18807_v5 = vld [vmem:[#allocation4] ss:$8 sps:$4 sm:$0xff]   ;;  %v18814_v61 = vld [vmem:[%s22370_s4 + $0x114] ss:$8 sps:$4 sm:$0xff]  }
 0x50a   : > { %v15840_v39 = vrot.slane %v21867_v4, %v19236_v36  ;;  %v15841_v21 = vsel %vm1536_vm5, %v15784_v20, %v15780_v31  ;;  %v15844_v55 = vsel %vm1536_vm5, %v15800_v47, %v15796_v28  ;;  %v15847_v11 = vsel %vm1536_vm5, %v15816_v23, %v15812_v22  ;;  %v18797_v4 = vld [vmem:[%s22370_s4 + $0x44] ss:$8 sps:$4 sm:$0xff]   ;;  %v18809_v62 = vld [vmem:[%s22370_s4 + $0x100] ss:$8 sps:$4 sm:$0xff]   ;;  %v18812_v34 = vld [vmem:[%s22370_s4 + $0x110] ss:$8 sps:$4 sm:$0xff]  }
 0x50b   : > { %v18785_v54 = vld [vmem:[#allocation4 + $0x38] ss:$8 sps:$4 sm:$0xff]   ;;  %v15842_v60 = vsel %vm1276_vm3, %v15788_v50, %v15841_v21  ;;  %v15845_v38 = vsel %vm1276_vm3, %v15804_v9, %v15844_v55  ;;  %v15848_v18 = vsel %vm1276_vm3, %v15820_v8, %v15847_v11  ;;  %v15850_v58 = vsel %vm1536_vm5, %v15832_v53, %v15828_v35  ;;  %v18817_v19 = vld [vmem:[%s22370_s4 + $0x124] ss:$8 sps:$4 sm:$0xff]   ;;  %v18820_v43 = vld [vmem:[%s22370_s4 + $0x134] ss:$8 sps:$4 sm:$0xff]  }
 0x50c   : > { %v15904_v37 = vpack.c.bf16 %v18785_v54, %v18784_v56  ;;  %v15843_v41 = vsel %vm1278_vm4, %v15792_v63, %v15842_v60  ;;  %v15846_v6 = vsel %vm1278_vm4, %v15808_v40, %v15845_v38  ;;  %v15849_v7 = vsel %vm1278_vm4, %v15824_v0, %v15848_v18  ;;  %v18808_v52 = vld [vmem:[#allocation4 + $0x10] ss:$8 sps:$4 sm:$0xff]   ;;  %v18815_v14 = vld [vmem:[%s22370_s4 + $0x120] ss:$8 sps:$4 sm:$0xff]   ;;  %v18823_v48 = vld [vmem:[%s22370_s4 + $0x144] ss:$8 sps:$4 sm:$0xff]  }
 0x50d   : > { %v15851_v15 = vsel %vm1276_vm3, %v15836_v2, %v15850_v58  ;;  %15858 = vst [vmem:[#allocation4 + $0x78] sm:$0xf] %v15843_v41  ;;  %15859 = vst [vmem:[#allocation4 + $0x80] sm:$0xf] %v15846_v6  ;;  %v15874_v16 = vpack.c.bf16 %v18808_v52, %v18807_v5  ;;  %v18818_v3 = vld [vmem:[%s22370_s4 + $0x130] ss:$8 sps:$4 sm:$0xff]  }
 0x50e   : > { %16035 = vmatmul.mubr.bf16.vlgmr.msra.gmra.mrb[24].mxu0 %v15904_v37  ;;  %v15852_v10 = vsel %vm1278_vm4, %v15840_v39, %v15851_v15  ;;  %15860 = vst [vmem:[#allocation4 + $0x88] sm:$0xf] %v15849_v7  ;;  %v18821_v1 = vld [vmem:[%s22370_s4 + $0x140] ss:$8 sps:$4 sm:$0xff]   ;;  %v18826_v59 = vld [vmem:[%s22370_s4 + $0x154] ss:$8 sps:$4 sm:$0xff]  }
 0x50f   : > { %16126 = vmatpush1.bf16.msra.mxu0 %v18781_v13  ;;  %16157 = vmatprep.mubr.bf16.mxu0 %v19009_v26  ;;  %15861 = vst [vmem:[#allocation4 + $0x90] sm:$0xf] %v15852_v10  ;;  %v18824_v56 = vld [vmem:[%s22370_s4 + $0x150] ss:$8 sps:$4 sm:$0xff]   ;;  %v18829_v54 = vld [vmem:[%s22370_s4 + $0x164] ss:$8 sps:$4 sm:$0xff]  }
 0x510   : > { %16127 = vmatprep.subr.bf16.mxu0 %v18788_v25  ;;  %v18827_v13 = vld [vmem:[%s22370_s4 + $0x160] ss:$8 sps:$4 sm:$0xff]   ;;  %v18832_v31 = vld [vmem:[%s22370_s4 + $0x174] ss:$8 sps:$4 sm:$0xff]   ;;  %v18830_v37 = vld [vmem:[%s22370_s4 + $0x170] ss:$8 sps:$4 sm:$0xff]  }
 0x511   : > { %v18834_v25 = vld [vmem:[#allocation4 + $0x11] ss:$8 sps:$4 sm:$0xff]   ;;  %v18837_v20 = vld [vmem:[%s22370_s4 + $0x184] ss:$8 sps:$4 sm:$0xff]   ;;  %v18835_v47 = vld [vmem:[%s22370_s4 + $0x180] ss:$8 sps:$4 sm:$0xff]  }
 0x512   : > { %v18833_v50 = vld [vmem:[#allocation4 + $0x1] ss:$8 sps:$4 sm:$0xff]   ;;  %v18996_v63 = vld [vmem:[#allocation3 + $0x38] sm:$0xff] }
 0x513   : > { %16128 = vmatpush1.bf16.msra.mxu0 %v18786_v44  ;;  %v15433_v28 = vcombine.high %v18996_v63, %v18996_v63  ;;  %v15440_v9 = vrot.slane %v18996_v63, %v19232_v32  ;;  %v16180_v40 = vpack.c.bf16 %v18834_v25, %v18833_v50  ;;  %v18840_v22 = vld [vmem:[%s22370_s4 + $0x194] ss:$8 sps:$4 sm:$0xff]   ;;  %v18838_v44 = vld [vmem:[%s22370_s4 + $0x190] ss:$8 sps:$4 sm:$0xff]   ;;  %v18841_v55 = vld [vmem:[%s22370_s4 + $0x1a0] ss:$8 sps:$4 sm:$0xff]  }
 0x514   : > { %16129 = vmatprep.subr.bf16.mxu0 %v18791_v30  ;;  %v18846_v60 = vld [vmem:[%s22370_s4 + $0x1b4] ss:$8 sps:$4 sm:$0xff]   ;;  %v18844_v38 = vld [vmem:[%s22370_s4 + $0x1b0] ss:$8 sps:$4 sm:$0xff]   ;;  %v18849_v18 = vld [vmem:[%s22370_s4 + $0x1c4] ss:$8 sps:$4 sm:$0xff]  }
 0x515   : > { %v15447_v23 = vrot.slane %v15433_v28, %v19232_v32  ;;  %v15448_v8 = vcombine.high %v15440_v9, %v15440_v9  ;;  %v15501_v0 = vrot.slane %v15440_v9, %v19234_v33  ;;  %v18843_v32 = vld [vmem:[%s22370_s4 + $0x1a4] ss:$8 sps:$4 sm:$0xff]   ;;  %v18847_v58 = vld [vmem:[%s22370_s4 + $0x1c0] ss:$8 sps:$4 sm:$0xff]   ;;  %v18852_v41 = vld [vmem:[%s22370_s4 + $0x1d4] ss:$8 sps:$4 sm:$0xff]  }
 0x516   : > { %v18850_v6 = vld [vmem:[%s22370_s4 + $0x1d0] ss:$8 sps:$4 sm:$0xff]   ;;  %v18855_v7 = vld [vmem:[%s22370_s4 + $0x1e4] ss:$8 sps:$4 sm:$0xff]   ;;  %v18853_v15 = vld [vmem:[%s22370_s4 + $0x1e0] ss:$8 sps:$4 sm:$0xff]  }
 0x517   : > { %16130 = vmatpush1.bf16.msra.mxu0 %v18789_v49  ;;  %v15449_v30 = vcombine.high %v15447_v23, %v15447_v23  ;;  %v15505_v35 = vrot.slane %v15448_v8, %v19234_v33  ;;  %v15509_v53 = vrot.slane %v15447_v23, %v19234_v33  ;;  %v18858_v49 = vld [vmem:[%s22370_s4 + $0x1f4] ss:$8 sps:$4 sm:$0xff]   ;;  %v18856_v10 = vld [vmem:[%s22370_s4 + $0x1f0] ss:$8 sps:$4 sm:$0xff]   ;;  %v18887_v25 = vld [vmem:[%s22370_s4 + $0x280] ss:$8 sps:$4 sm:$0xff]  }
 0x518   : > { %16131 = vmatprep.subr.bf16.mxu0 %v18794_v27  ;;  %v18860_v27 = vld [vmem:[#allocation4 + $0x60] ss:$8 sps:$4 sm:$0xff]   ;;  %v18864_v5 = vld [vmem:[%s22370_s4 + $0x210] ss:$8 sps:$4 sm:$0xff]   ;;  %v18892_v50 = vld [vmem:[%s22370_s4 + $0x294] ss:$8 sps:$4 sm:$0xff]  }
 0x519   : > { %v15513_v2 = vrot.slane %v15449_v30, %v19234_v33  ;;  %v15523_v39 = vsel %vm1276_vm3, %v15505_v35, %v15501_v0  ;;  %v18895_v63 = vld [vmem:[%s22370_s4 + $0x2a4] ss:$8 sps:$4 sm:$0xff]   ;;  %v18893_v28 = vld [vmem:[%s22370_s4 + $0x2a0] ss:$8 sps:$4 sm:$0xff]   ;;  %v18902_v0 = vld [vmem:[%s22370_s4 + $0x2d0] ss:$8 sps:$4 sm:$0xff]  }
 0x51a   : > { %v15524_v21 = vsel %vm1278_vm4, %v15509_v53, %v15523_v39  ;;  %v18910_v35 = vld [vmem:[%s22370_s4 + $0x2f4] ss:$8 sps:$4 sm:$0xff]   ;;  %v18908_v53 = vld [vmem:[%s22370_s4 + $0x2f0] ss:$8 sps:$4 sm:$0xff]  }
 0x51b   : > { %16132 = vmatpush1.bf16.msra.mxu0 %v18792_v57  ;;  %v15525_v11 = vsel %vm1280_vm6, %v15513_v2, %v15524_v21  ;;  %v18863_v57 = vld [vmem:[%s22370_s4 + $0x204] ss:$8 sps:$4 sm:$0xff]   ;;  %v18911_v39 = vld [vmem:[#allocation4 + $0x51] ss:$8 sps:$4 sm:$0xff]   ;;  %v18913_v21 = vld [vmem:[%s22370_s4 + $0x300] ss:$8 sps:$4 sm:$0xff]  }
 0x51c   : > { %16133 = vmatprep.subr.bf16.mxu0 %v18797_v4  ;;  %15534 = vst [vmem:[#allocation4 + $0x20] sm:$0x1e] %v15525_v11  ;;  %v18859_v4 = vld [vmem:[#allocation4 + $0x50] ss:$8 sps:$4 sm:$0xff]   ;;  %v18915_v2 = vld [vmem:[%s22370_s4 + $0x304] ss:$8 sps:$4 sm:$0xff]  }
 0x51d   : > { %v18918_v11 = vld [vmem:[%s22370_s4 + $0x314] ss:$8 sps:$4 sm:$0xff]  }
 0x51f   : > { %16134 = vmatpush1.bf16.msra.mxu0 %v18795_v29  ;;  %v18861_v29 = vld [vmem:[%s22370_s4 + $0x200] ss:$8 sps:$4 sm:$0xff]  }
 0x520   : > { %16135 = vmatprep.subr.bf16.mxu0 %v18800_v12  ;;  %v15586_v12 = vrot.slane %v15440_v9, %v19236_v36  ;;  %v18898_v9 = vld [vmem:[%s22370_s4 + $0x2b4] ss:$8 sps:$4 sm:$0xff]  }
 0x523   : > { %16136 = vmatpush1.bf16.msra.mxu0 %v18798_v45  ;;  %v15590_v45 = vrot.slane %v15448_v8, %v19236_v36  ;;  %v18904_v8 = vld [vmem:[%s22370_s4 + $0x2d4] ss:$8 sps:$4 sm:$0xff]  }
 0x524   : > { %16137 = vmatprep.subr.bf16.mxu0 %v18803_v51  ;;  %v15594_v51 = vrot.slane %v15447_v23, %v19236_v36  ;;  %v18899_v23 = vld [vmem:[%s22370_s4 + $0x2c0] ss:$8 sps:$4 sm:$0xff]  }
 0x525   : > { %v15608_v52 = vsel %vm1536_vm5, %v15590_v45, %v15586_v12  ;;  %v18941_v12 = vld [vmem:[%s22370_s4 + $0x384] ss:$8 sps:$4 sm:$0xff]   ;;  %v18937_v45 = vld [vmem:[#allocation4 + $0x8] ss:$8 sps:$4 sm:$0xff]  }
 0x527   : > { %16138 = vmatpush1.bf16.msra.mxu0 %v18801_v24  ;;  %v15598_v24 = vrot.slane %v15449_v30, %v19236_v36  ;;  %v18905_v30 = vld [vmem:[%s22370_s4 + $0x2e0] ss:$8 sps:$4 sm:$0xff]  }
 0x528   : > { %16139 = vmatprep.subr.bf16.mxu0 %v18806_v46  ;;  %v16337_v46 = vpack.c.bf16 %v18860_v27, %v18859_v4  ;;  %v18931_v27 = vld [vmem:[%s22370_s4 + $0x360] ss:$8 sps:$4 sm:$0xff]   ;;  %v18934_v4 = vld [vmem:[%s22370_s4 + $0x370] ss:$8 sps:$4 sm:$0xff]  }
 0x52b   : > { %16140 = vmatpush1.bf16.msra.mxu0 %v18804_v42  ;;  %v18866_v42 = vld [vmem:[%s22370_s4 + $0x214] ss:$8 sps:$4 sm:$0xff]  }
 0x52c   : > { %16278 = vmatprep.subr.bf16.mxu0 %v18811_v17  ;;  %v15609_v17 = vsel %vm1276_vm3, %v15594_v51, %v15608_v52  ;;  %v18939_v51 = vld [vmem:[%s22370_s4 + $0x380] ss:$8 sps:$4 sm:$0xff]   ;;  %v18947_v52 = vld [vmem:[%s22370_s4 + $0x3a4] ss:$8 sps:$4 sm:$0xff]  }
 0x52e   : > { %16158 = vmatmul.mubr.bf16.vlgmr.msra.gmra.mrb[24].mxu0 %v15874_v16  ;;  %v18869_v16 = vld [vmem:[%s22370_s4 + $0x224] ss:$8 sps:$4 sm:$0xff]  }
 0x52f   : > { %16279 = vmatpush1.bf16.msra.mxu0 %v18809_v62  ;;  %16310 = vmatprep.mubr.bf16.mxu0 %v19009_v26  ;;  %v15610_v62 = vsel %vm1278_vm4, %v15598_v24, %v15609_v17  ;;  %v18945_v17 = vld [vmem:[%s22370_s4 + $0x3a0] ss:$8 sps:$4 sm:$0xff]  }
 0x530   : > { %16280 = vmatprep.subr.bf16.mxu0 %v18814_v61  ;;  %15619 = vst [vmem:[#allocation4 + $0x48] sm:$0xf] %v15610_v62  ;;  %v18867_v61 = vld [vmem:[%s22370_s4 + $0x220] ss:$8 sps:$4 sm:$0xff]   ;;  %v18948_v62 = vld [vmem:[%s22370_s4 + $0x3b0] ss:$8 sps:$4 sm:$0xff]  }
 0x533   : > { %16281 = vmatpush1.bf16.msra.mxu0 %v18812_v34  ;;  %v18872_v34 = vld [vmem:[%s22370_s4 + $0x234] ss:$8 sps:$4 sm:$0xff]  }
 0x534   : > { %16282 = vmatprep.subr.bf16.mxu0 %v18817_v19  ;;  %v18870_v19 = vld [vmem:[%s22370_s4 + $0x230] ss:$8 sps:$4 sm:$0xff]  }
 0x537   : > { %16283 = vmatpush1.bf16.msra.mxu0 %v18815_v14  ;;  %v18875_v14 = vld [vmem:[%s22370_s4 + $0x244] ss:$8 sps:$4 sm:$0xff]  }
 0x538   : > { %16284 = vmatprep.subr.bf16.mxu0 %v18820_v43  ;;  %v18873_v43 = vld [vmem:[%s22370_s4 + $0x240] ss:$8 sps:$4 sm:$0xff]  }
 0x53b   : > { %16285 = vmatpush1.bf16.msra.mxu0 %v18818_v3  ;;  %v18878_v3 = vld [vmem:[%s22370_s4 + $0x254] ss:$8 sps:$4 sm:$0xff]  }
 0x53c   : > { %16286 = vmatprep.subr.bf16.mxu0 %v18823_v48  ;;  %v18876_v48 = vld [vmem:[%s22370_s4 + $0x250] ss:$8 sps:$4 sm:$0xff]  }
 0x53f   : > { %16287 = vmatpush1.bf16.msra.mxu0 %v18821_v1  ;;  %v18881_v1 = vld [vmem:[%s22370_s4 + $0x264] ss:$8 sps:$4 sm:$0xff]  }
 0x540   : > { %16288 = vmatprep.subr.bf16.mxu0 %v18826_v59  ;;  %v18879_v59 = vld [vmem:[%s22370_s4 + $0x260] ss:$8 sps:$4 sm:$0xff]  }
 0x543   : > { %16289 = vmatpush1.bf16.msra.mxu0 %v18824_v56  ;;  %v18884_v56 = vld [vmem:[%s22370_s4 + $0x274] ss:$8 sps:$4 sm:$0xff]  }
 0x544   : > { %16290 = vmatprep.subr.bf16.mxu0 %v18829_v54  ;;  %v18882_v54 = vld [vmem:[%s22370_s4 + $0x270] ss:$8 sps:$4 sm:$0xff]  }
 0x547   : > { %16291 = vmatpush1.bf16.msra.mxu0 %v18827_v13  ;;  %v18886_v13 = vld [vmem:[#allocation4 + $0x88] ss:$8 sps:$4 sm:$0xff]  }
 0x548   : > { %16292 = vmatprep.subr.bf16.mxu0 %v18832_v31  ;;  %v18889_v31 = vld [vmem:[%s22370_s4 + $0x284] ss:$8 sps:$4 sm:$0xff]  }
 0x54b   : > { %16293 = vmatpush1.bf16.msra.mxu0 %v18830_v37  ;;  %v18885_v37 = vld [vmem:[#allocation4 + $0x78] ss:$8 sps:$4 sm:$0xff]  }
 0x54c   : > { %16435 = vmatprep.subr.bf16.mxu0 %v18837_v20  ;;  %v16494_v20 = vpack.c.bf16 %v18886_v13, %v18885_v37  ;;  %v18968_v37 = vld [vmem:[%s22370_s4 + $0x410] ss:$8 sps:$4 sm:$0xff]  }
 0x54e   : > { %16311 = vmatmul.mubr.bf16.vlgmr.msra.gmra.mrb[24].mxu0 %v16180_v40  ;;  %v18896_v40 = vld [vmem:[%s22370_s4 + $0x2b0] ss:$8 sps:$4 sm:$0xff]  }
 0x54f   : > { %16436 = vmatpush1.bf16.msra.mxu0 %v18835_v47  ;;  %16467 = vmatprep.mubr.bf16.mxu0 %v19009_v26  ;;  %v18890_v47 = vld [vmem:[%s22370_s4 + $0x290] ss:$8 sps:$4 sm:$0xff]  }
 0x550   : > { %16437 = vmatprep.subr.bf16.mxu0 %v18840_v22  ;;  %v18901_v22 = vld [vmem:[%s22370_s4 + $0x2c4] ss:$8 sps:$4 sm:$0xff]  }
 0x553   : > { %16438 = vmatpush1.bf16.msra.mxu0 %v18838_v44  ;;  %v18907_v44 = vld [vmem:[%s22370_s4 + $0x2e4] ss:$8 sps:$4 sm:$0xff]  }
 0x554   : > { %16439 = vmatprep.subr.bf16.mxu0 %v18843_v32  ;;  %v18912_v32 = vld [vmem:[#allocation4 + $0x61] ss:$8 sps:$4 sm:$0xff]  }
 0x557   : > { %16440 = vmatpush1.bf16.msra.mxu0 %v18841_v55  ;;  %v16651_v55 = vpack.c.bf16 %v18912_v32, %v18911_v39 }
 0x558   : > { %16441 = vmatprep.subr.bf16.mxu0 %v18846_v60  ;;  %v18916_v60 = vld [vmem:[%s22370_s4 + $0x310] ss:$8 sps:$4 sm:$0xff]  }
 0x55b   : > { %16442 = vmatpush1.bf16.msra.mxu0 %v18844_v38  ;;  %v18921_v38 = vld [vmem:[%s22370_s4 + $0x324] ss:$8 sps:$4 sm:$0xff]  }
 0x55c   : > { %16443 = vmatprep.subr.bf16.mxu0 %v18849_v18  ;;  %v18919_v18 = vld [vmem:[%s22370_s4 + $0x320] ss:$8 sps:$4 sm:$0xff]  }
 0x55f   : > { %16444 = vmatpush1.bf16.msra.mxu0 %v18847_v58  ;;  %v18924_v58 = vld [vmem:[%s22370_s4 + $0x334] ss:$8 sps:$4 sm:$0xff]  }
 0x560   : > { %16445 = vmatprep.subr.bf16.mxu0 %v18852_v41  ;;  %v18922_v41 = vld [vmem:[%s22370_s4 + $0x330] ss:$8 sps:$4 sm:$0xff]  }
 0x563   : > { %16446 = vmatpush1.bf16.msra.mxu0 %v18850_v6  ;;  %v18927_v6 = vld [vmem:[%s22370_s4 + $0x344] ss:$8 sps:$4 sm:$0xff]  }
 0x564   : > { %16447 = vmatprep.subr.bf16.mxu0 %v18855_v7  ;;  %v18925_v7 = vld [vmem:[%s22370_s4 + $0x340] ss:$8 sps:$4 sm:$0xff]  }
 0x567   : > { %16448 = vmatpush1.bf16.msra.mxu0 %v18853_v15  ;;  %v18930_v15 = vld [vmem:[%s22370_s4 + $0x354] ss:$8 sps:$4 sm:$0xff]  }
 0x568   : > { %16449 = vmatprep.subr.bf16.mxu0 %v18858_v49  ;;  %v18928_v49 = vld [vmem:[%s22370_s4 + $0x350] ss:$8 sps:$4 sm:$0xff]  }
 0x56b   : > { %16450 = vmatpush1.bf16.msra.mxu0 %v18856_v10  ;;  %v18933_v10 = vld [vmem:[%s22370_s4 + $0x364] ss:$8 sps:$4 sm:$0xff]  }
 0x56c   : > { %16592 = vmatprep.subr.bf16.mxu0 %v18863_v57  ;;  %v18936_v57 = vld [vmem:[%s22370_s4 + $0x374] ss:$8 sps:$4 sm:$0xff]  }
 0x56e   : > { %16468 = vmatmul.mubr.bf16.vlgmr.msra.gmra.mrb[24].mxu0 %v16337_v46  ;;  %v18944_v46 = vld [vmem:[%s22370_s4 + $0x394] ss:$8 sps:$4 sm:$0xff]  }
 0x56f   : > { %16593 = vmatpush1.bf16.msra.mxu0 %v18861_v29  ;;  %16624 = vmatprep.mubr.bf16.mxu0 %v19009_v26  ;;  %v18938_v29 = vld [vmem:[#allocation4 + $0x18] ss:$8 sps:$4 sm:$0xff]  }
 0x570   : > { %16594 = vmatprep.subr.bf16.mxu0 %v18866_v42  ;;  %v16808_v24 = vpack.c.bf16 %v18938_v29, %v18937_v45  ;;  %v18942_v42 = vld [vmem:[%s22370_s4 + $0x390] ss:$8 sps:$4 sm:$0xff]  }
 0x573   : > { %16595 = vmatpush1.bf16.msra.mxu0 %v18864_v5  ;;  %v18950_v5 = vld [vmem:[%s22370_s4 + $0x3b4] ss:$8 sps:$4 sm:$0xff]  }
 0x574   : > { %16596 = vmatprep.subr.bf16.mxu0 %v18869_v16  ;;  %v18953_v16 = vld [vmem:[%s22370_s4 + $0x3c4] ss:$8 sps:$4 sm:$0xff]  }
 0x577   : > { %16597 = vmatpush1.bf16.msra.mxu0 %v18867_v61  ;;  %v18951_v61 = vld [vmem:[%s22370_s4 + $0x3c0] ss:$8 sps:$4 sm:$0xff]  }
 0x578   : > { %16598 = vmatprep.subr.bf16.mxu0 %v18872_v34  ;;  %v18956_v34 = vld [vmem:[%s22370_s4 + $0x3d4] ss:$8 sps:$4 sm:$0xff]  }
 0x57b   : > { %16599 = vmatpush1.bf16.msra.mxu0 %v18870_v19  ;;  %v18954_v19 = vld [vmem:[%s22370_s4 + $0x3d0] ss:$8 sps:$4 sm:$0xff]  }
 0x57c   : > { %16600 = vmatprep.subr.bf16.mxu0 %v18875_v14  ;;  %v18959_v14 = vld [vmem:[%s22370_s4 + $0x3e4] ss:$8 sps:$4 sm:$0xff]  }
 0x57f   : > { %16601 = vmatpush1.bf16.msra.mxu0 %v18873_v43  ;;  %v18957_v43 = vld [vmem:[%s22370_s4 + $0x3e0] ss:$8 sps:$4 sm:$0xff]  }
 0x580   : > { %16602 = vmatprep.subr.bf16.mxu0 %v18878_v3  ;;  %v18962_v3 = vld [vmem:[%s22370_s4 + $0x3f4] ss:$8 sps:$4 sm:$0xff]  }
 0x583   : > { %16603 = vmatpush1.bf16.msra.mxu0 %v18876_v48  ;;  %v18960_v48 = vld [vmem:[%s22370_s4 + $0x3f0] ss:$8 sps:$4 sm:$0xff]  }
 0x584   : > { %16604 = vmatprep.subr.bf16.mxu0 %v18881_v1  ;;  %v18964_v1 = vld [vmem:[#allocation4 + $0x40] ss:$8 sps:$4 sm:$0xff]  }
 0x587   : > { %16605 = vmatpush1.bf16.msra.mxu0 %v18879_v59  ;;  %v18967_v59 = vld [vmem:[%s22370_s4 + $0x404] ss:$8 sps:$4 sm:$0xff]  }
 0x588   : > { %16606 = vmatprep.subr.bf16.mxu0 %v18884_v56  ;;  %v18963_v56 = vld [vmem:[#allocation4 + $0x30] ss:$8 sps:$4 sm:$0xff]  }
 0x589   : > { %v16965_v13 = vpack.c.bf16 %v18964_v1, %v18963_v56 }
 0x58b   : > { %16607 = vmatpush1.bf16.msra.mxu0 %v18882_v54  ;;  %v18965_v54 = vld [vmem:[%s22370_s4 + $0x400] ss:$8 sps:$4 sm:$0xff]  }
 0x58c   : > { %16749 = vmatprep.subr.bf16.mxu0 %v18889_v31  ;;  %v18970_v31 = vld [vmem:[%s22370_s4 + $0x414] ss:$8 sps:$4 sm:$0xff]  }
 0x58e   : > { %16625 = vmatmul.mubr.bf16.vlgmr.msra.gmra.mrb[24].mxu0 %v16494_v20  ;;  %v18971_v20 = vld [vmem:[%s22370_s4 + $0x420] ss:$8 sps:$4 sm:$0xff]  }
 0x58f   : > { %16750 = vmatpush1.bf16.msra.mxu0 %v18887_v25  ;;  %16781 = vmatprep.mubr.bf16.mxu0 %v19009_v26  ;;  %v18973_v25 = vld [vmem:[%s22370_s4 + $0x424] ss:$8 sps:$4 sm:$0xff]  }
 0x590   : > { %16751 = vmatprep.subr.bf16.mxu0 %v18892_v50  ;;  %v18976_v50 = vld [vmem:[%s22370_s4 + $0x434] ss:$8 sps:$4 sm:$0xff]  }
 0x593   : > { %16752 = vmatpush1.bf16.msra.mxu0 %v18890_v47  ;;  %v18979_v47 = vld [vmem:[%s22370_s4 + $0x444] ss:$8 sps:$4 sm:$0xff]  }
 0x594   : > { %16753 = vmatprep.subr.bf16.mxu0 %v18895_v63  ;;  %v18977_v63 = vld [vmem:[%s22370_s4 + $0x440] ss:$8 sps:$4 sm:$0xff]  }
 0x597   : > { %16754 = vmatpush1.bf16.msra.mxu0 %v18893_v28  ;;  %v18982_v28 = vld [vmem:[%s22370_s4 + $0x454] ss:$8 sps:$4 sm:$0xff]  }
 0x598   : > { %16755 = vmatprep.subr.bf16.mxu0 %v18898_v9  ;;  %v18980_v9 = vld [vmem:[%s22370_s4 + $0x450] ss:$8 sps:$4 sm:$0xff]  }
 0x59b   : > { %16756 = vmatpush1.bf16.msra.mxu0 %v18896_v40  ;;  %v18985_v40 = vld [vmem:[%s22370_s4 + $0x464] ss:$8 sps:$4 sm:$0xff]  }
 0x59c   : > { %16757 = vmatprep.subr.bf16.mxu0 %v18901_v22  ;;  %v18983_v22 = vld [vmem:[%s22370_s4 + $0x460] ss:$8 sps:$4 sm:$0xff]  }
 0x59f   : > { %16758 = vmatpush1.bf16.msra.mxu0 %v18899_v23  ;;  %v18988_v23 = vld [vmem:[%s22370_s4 + $0x474] ss:$8 sps:$4 sm:$0xff]  }
 0x5a0   : > { %16759 = vmatprep.subr.bf16.mxu0 %v18904_v8  ;;  %v18986_v8 = vld [vmem:[%s22370_s4 + $0x470] ss:$8 sps:$4 sm:$0xff]  }
 0x5a3   : > { %16760 = vmatpush1.bf16.msra.mxu0 %v18902_v0  ;;  %v18990_v0 = vld [vmem:[#allocation4 + $0x19] ss:$8 sps:$4 sm:$0xff]  }
 0x5a4   : > { %16761 = vmatprep.subr.bf16.mxu0 %v18907_v44  ;;  %v18989_v44 = vld [vmem:[#allocation4 + $0x9] ss:$8 sps:$4 sm:$0xff]  }
 0x5a7   : > { %16762 = vmatpush1.bf16.msra.mxu0 %v18905_v30  ;;  %v17122_v30 = vpack.c.bf16 %v18990_v0, %v18989_v44 }
 0x5a8   : > { %16763 = vmatprep.subr.bf16.mxu0 %v18910_v35  ;;  %v17267_v35 = vld [vmem:[%s22371_s5] sm:$0x3] }
 0x5a9   : > { %v17276_v32 = vrot.slane %v17267_v35, %v19234_v33  ;;  %v17292_v33 = vld [vmem:[%s22372_s6 + $0x8] sm:$0xff] }
 0x5ab   : > { %16764 = vmatpush1.bf16.msra.mxu0 %v18908_v53  ;;  %v17272_v53 = vrot.slane %v17267_v35, %v19236_v36 }
 0x5ac   : > { %16906 = vmatprep.subr.bf16.mxu0 %v18915_v2 }
 0x5ae   : > { %16782 = vmatmul.mubr.bf16.vlgmr.msra.gmra.mrb[24].mxu0 %v16651_v55 }
 0x5af   : > { %16907 = vmatpush1.bf16.msra.mxu0 %v18913_v21  ;;  %16938 = vmatprep.mubr.bf16.mxu0 %v19009_v26 }
 0x5b0   : > { %16908 = vmatprep.subr.bf16.mxu0 %v18918_v11 }
 0x5b3   : > { %16909 = vmatpush1.bf16.msra.mxu0 %v18916_v60 }
 0x5b4   : > { %16910 = vmatprep.subr.bf16.mxu0 %v18921_v38 }
 0x5b7   : > { %16911 = vmatpush1.bf16.msra.mxu0 %v18919_v18 }
 0x5b8   : > { %16912 = vmatprep.subr.bf16.mxu0 %v18924_v58 }
 0x5bb   : > { %16913 = vmatpush1.bf16.msra.mxu0 %v18922_v41 }
 0x5bc   : > { %16914 = vmatprep.subr.bf16.mxu0 %v18927_v6  ;;  %v17291_v6 = vld [vmem:[%s22372_s6] sm:$0xff] }
 0x5bf   : > { %16915 = vmatpush1.bf16.msra.mxu0 %v18925_v7 }
 0x5c0   : > { %16916 = vmatprep.subr.bf16.mxu0 %v18930_v15 }
 0x5c3   : > { %16917 = vmatpush1.bf16.msra.mxu0 %v18928_v49 }
 0x5c4   : > { %16918 = vmatprep.subr.bf16.mxu0 %v18933_v10  ;;  %v17293_v10 = vld [vmem:[%s22372_s6 + $0x10] sm:$0xff] }
 0x5c7   : > { %16919 = vmatpush1.bf16.msra.mxu0 %v18931_v27 }
 0x5c8   : > { %16920 = vmatprep.subr.bf16.mxu0 %v18936_v57 }
 0x5cb   : > { %16921 = vmatpush1.bf16.msra.mxu0 %v18934_v4  ;;  %v17294_v4 = vld [vmem:[%s22372_s6 + $0x18] sm:$0xff] }
 0x5cc   : > { %17063 = vmatprep.subr.bf16.mxu0 %v18941_v12 }
 0x5ce   : > { %16939 = vmatmul.mubr.bf16.vlgmr.msra.gmra.mrb[24].mxu0 %v16808_v24 }
 0x5cf   : > { %17064 = vmatpush1.bf16.msra.mxu0 %v18939_v51  ;;  %17095 = vmatprep.mubr.bf16.mxu0 %v19009_v26 }
 0x5d0   : > { %17065 = vmatprep.subr.bf16.mxu0 %v18944_v46 }
 0x5d3   : > { %17066 = vmatpush1.bf16.msra.mxu0 %v18942_v42 }
 0x5d4   : > { %17067 = vmatprep.subr.bf16.mxu0 %v18947_v52 }
 0x5d7   : > { %17068 = vmatpush1.bf16.msra.mxu0 %v18945_v17 }
 0x5d8   : > { %17069 = vmatprep.subr.bf16.mxu0 %v18950_v5 }
 0x5db   : > { %17070 = vmatpush1.bf16.msra.mxu0 %v18948_v62 }
 0x5dc   : > { %17071 = vmatprep.subr.bf16.mxu0 %v18953_v16 }
 0x5df   : > { %17072 = vmatpush1.bf16.msra.mxu0 %v18951_v61 }
 0x5e0   : > { %17073 = vmatprep.subr.bf16.mxu0 %v18956_v34 }
 0x5e3   : > { %17074 = vmatpush1.bf16.msra.mxu0 %v18954_v19 }
 0x5e4   : > { %17075 = vmatprep.subr.bf16.mxu0 %v18959_v14 }
 0x5e7   : > { %17076 = vmatpush1.bf16.msra.mxu0 %v18957_v43 }
 0x5e8   : > { %17077 = vmatprep.subr.bf16.mxu0 %v18962_v3 }
 0x5eb   : > { %17078 = vmatpush1.bf16.msra.mxu0 %v18960_v48 }
 0x5ec   : > { %17220 = vmatprep.subr.bf16.mxu0 %v18967_v59 }
 0x5ee   : > { %17096 = vmatmul.mubr.bf16.vlgmr.msra.gmra.mrb[24].mxu0 %v16965_v13 }
 0x5ef   : > { %17221 = vmatpush1.bf16.msra.mxu0 %v18965_v54  ;;  %17252 = vmatprep.mubr.bf16.mxu0 %v19009_v26  ;;  %v18974_v26 = vld [vmem:[%s22370_s4 + $0x430] ss:$8 sps:$4 sm:$0xff]  }
 0x5f0   : > { %17222 = vmatprep.subr.bf16.mxu0 %v18970_v31 }
 0x5f3   : > { %17223 = vmatpush1.bf16.msra.mxu0 %v18968_v37 }
 0x5f4   : > { %17224 = vmatprep.subr.bf16.mxu0 %v18973_v25 }
 0x5f7   : > { %17225 = vmatpush1.bf16.msra.mxu0 %v18971_v20 }
 0x5f8   : > { %17226 = vmatprep.subr.bf16.mxu0 %v18976_v50 }
 0x5fb   : > { %17227 = vmatpush1.bf16.msra.mxu0 %v18974_v26 }
 0x5fc   : > { %17228 = vmatprep.subr.bf16.mxu0 %v18979_v47 }
 0x5ff   : > { %17229 = vmatpush1.bf16.msra.mxu0 %v18977_v63 }
 0x600   : > { %17230 = vmatprep.subr.bf16.mxu0 %v18982_v28 }
 0x603   : > { %17231 = vmatpush1.bf16.msra.mxu0 %v18980_v9 }
 0x604   : > { %17232 = vmatprep.subr.bf16.mxu0 %v18985_v40 }
 0x607   : > { %17233 = vmatpush1.bf16.msra.mxu0 %v18983_v22 }
 0x608   : > { %17234 = vmatprep.subr.bf16.mxu0 %v18988_v23 }
 0x60b   : > { %17235 = vmatpush1.bf16.msra.mxu0 %v18986_v8 }
 0x60e   : > { %17253 = vmatmul.mubr.bf16.vlgmr.msra.gmra.mrb[24].mxu0 %v17122_v30 }
 0x6e1   : > { %v17254_v2 = vpop.f32.mrb[24].mxu0 }
 0x6e2   : > { %v17279_v39 = vadd.f32 %v17272_v53, %v17254_v2  ;;  %v17256_v21 = vpop.f32.mrb[25].mxu0 }
 0x6e3   : > { %v17280_v55 = vadd.f32 %v17276_v32, %v17256_v21  ;;  %v17258_v11 = vpop.f32.mrb[26].mxu0 }
 0x6e4   : > { %v17283_v60 = vmul.f32 0.2, %v17279_v39  ;;  %v17281_v38 = vadd.f32 %v17272_v53, %v17258_v11  ;;  %v17260_v18 = vpop.f32.mrb[27].mxu0 }
 0x6e5   : > { %v17284_v58 = vmul.f32 0.2, %v17280_v55  ;;  %v17282_v41 = vadd.f32 %v17276_v32, %v17260_v18 }
 0x6e6   : > { %v17287_v7 = vmax.f32 %v17279_v39, %v17283_v60  ;;  %v17285_v15 = vmul.f32 0.2, %v17281_v38 }
 0x6e7   : > { %v17288_v36 = vmax.f32 %v17280_v55, %v17284_v58  ;;  %v17286_v49 = vmul.f32 0.2, %v17282_v41 }
 0x6e8   : > { %v17289_v27 = vmax.f32 %v17281_v38, %v17285_v15  ;;  %v17295_v57 = vmul.f32 %v17291_v6, %v17287_v7 }
 0x6e9   : > { %v17290_v29 = vmax.f32 %v17282_v41, %v17286_v49  ;;  %v17296_v12 = vmul.f32 %v17292_v33, %v17288_v36 }
 0x6ea   : > { %v17297_v45 = vmul.f32 %v17293_v10, %v17289_v27 }
 0x6eb   : > { %v17299_v51 = vadd.f32 %v17296_v12, %v17295_v57  ;;  %v17298_v24 = vmul.f32 %v17294_v4, %v17290_v29 }
 0x6ed   : > { %17300 = vadd.xlane.f32.xlu0 %v17299_v51  ;;  %v17302_v46 = vadd.f32 %v17298_v24, %v17297_v45 }
 0x6f1   : > { %17303 = vadd.xlane.f32.xlu0 %v17302_v46 }
 0x77a   : > { %v17301_v42 = vpop.xlane.xlu0 %17300 }
 0x77e   : > { %v17304_v52 = vpop.xlane.xlu0 %17303 }
 0x77f   : > { %v17305_v17 = vadd.f32 %v17304_v52, %v17301_v42 }
 0x781   : > { %v17306_v5 = vrot.slane %v17305_v17, 4 }
 0x783   : > { %v17307_v62 = vadd.f32 %v17306_v5, %v17305_v17 }
 0x785   : > { %v17308_v16 = vrot.slane %v17307_v62, 2 }
 0x787   : > { %v17309_v61 = vadd.f32 %v17308_v16, %v17307_v62 }
 0x789   : > { %v17310_v34 = vrot.slane %v17309_v61, 1 }
 0x78b   : > { %v17311_v19 = vadd.f32 %v17310_v34, %v17309_v61 }
 0x78d   : > { %v17312_v14 = vsub.f32 0.0, %v17311_v19 }
 0x78f   : > { %v17313_v43 = vmul.f32 1.442695, %v17312_v14 }
 0x791   : > { %18991 = vpow2.f32 %v17313_v43 }
 0x79b   : > { %v18992_v3 = vpop.eup %18991 }
 0x79c   : > { %v17315_v48 = vadd.f32 1.0, %v18992_v3 }
 0x79e   : > { %18993 = vrcp.f32 %v17315_v48 }
 0x7a8   : > { %v18994_v1 = vpop.eup %18993 }
 0x7a9   : > { %17319 = vst.msk [vmem:[%s274_s23] sm:$0x1] %vm17318_vm12, %v18994_v1 }
 0x7aa PF: > { %s17_s24 = sadd.s32 1, %s19003_s24  }
 0x7ab   : > { %p14_p4 = scmp.ge.s32.totalorder %s17_s24, 4  }
 0x7ad   :  { %16 = sbr.rel (!%p14_p4) target bundleno = 1 (0x1), region = 113 }

</bundles_post_ra>
